<compile_context>
chip_gen: v7x
topology: tpu7x:2x2x1
jax: 0.10.0
libtpu: 0.0.40
codegen_flags: <defaults>
</compile_context>

<pallas_src>
import jax
import jax.numpy as jnp
from jax import lax
from jax.experimental import pallas as pl
from jax.experimental.pallas import tpu as pltpu

PREC = lax.Precision.HIGHEST   # only for the tiny GN group-aggregation matmul + reference
EPS = 1e-5
BF16 = jnp.bfloat16


def _round_up(x, m):
    return (x + m - 1) // m * m


def make_resblock_kernel(H, W, Cin, Cout, groups, has_res_conv):
    Hp, Wp = H + 2, W + 2
    L = H * Wp                                            # output-layout rows (keep W+2 cols/row)
    Lp = _round_up(max(Hp * Wp, L + 2 * Wp + 2), 8)       # padded-flat-layout rows
    Rx = _round_up(Lp + 2 * Wp + 2, 8)                    # physical rows of lead-padded input
    lead = Wp + 1                                         # lead zero-rows of the input buffer
    cnt = float(H * W * (Cout // groups))                 # elements per (sample, group)
    im2col_conv2 = Cout < 128                             # wide-K only pays off for small Cout

    def kernel(*refs):
        if has_res_conv:
            (xp_ref, eo_ref, mp_ref,
             w1_ref, b1_ref, g1_ref, be1_ref,
             w2_ref, b2_ref, g2_ref, be2_ref,
             gmat_ref, wres_ref, bres_ref, out_ref) = refs
        else:
            (xp_ref, eo_ref, mp_ref,
             w1_ref, b1_ref, g1_ref, be1_ref,
             w2_ref, b2_ref, g2_ref, be2_ref,
             gmat_ref, out_ref) = refs

        def silu(v):
            return v * jax.nn.sigmoid(v)

        def group_norm(h, mask, gamma, beta):
            # two-pass, f32: per-channel masked sums aggregated to per-group with a
            # tiny 0/1 matmul (M=1, kept f32 @ HIGHEST -- negligible cost).
            s = jnp.sum(h * mask, axis=0, keepdims=True)                  # (1, Cout)
            gs = jnp.dot(s, gmat_ref[...],
                         preferred_element_type=jnp.float32, precision=PREC)
            mean = gs * (1.0 / cnt)
            d = (h - mean) * mask
            s2 = jnp.sum(d * d, axis=0, keepdims=True)                    # (1, Cout)
            gs2 = jnp.dot(s2, gmat_ref[...],
                          preferred_element_type=jnp.float32, precision=PREC)
            inv = lax.rsqrt(gs2 * (1.0 / cnt) + EPS)
            return (h - mean) * inv * gamma + beta

        mp = mp_ref[...]                        # (Lp, 1) interior mask, padded-flat layout
        mo = mp_ref[lead:lead + L, :]           # (L, 1)  derived output-layout mask

        # ---- conv1: 3x3 "same" as ONE im2col matmul, K = 9*Cin, bf16 in / f32 acc ----
        patches = []
        for k in range(9):
            off = (k // 3) * Wp + (k % 3)
            patches.append(xp_ref[0, off:off + Lp, :].astype(BF16))       # (Lp, Cin)
        h = jnp.dot(jnp.concatenate(patches, axis=1), w1_ref[...],
                    preferred_element_type=jnp.float32)                   # (Lp, Cout) f32
        h = h + b1_ref[...]
        h = group_norm(h, mp, g1_ref[...], be1_ref[...])
        h = silu(h)

        # time-embedding projection was hoisted to the wrapper: just add the row.
        h = h + eo_ref[0]                                                 # (1, Cout) broadcast

        # ---- conv2: masked h in padded-flat layout IS the zero-padded input ----
        hm = h * mp                                                       # (Lp, Cout) f32
        if im2col_conv2:
            taps = []
            for k in range(9):
                off = (k // 3) * Wp + (k % 3)
                taps.append(hm[off:off + L, :].astype(BF16))              # (L, Cout)
            h2 = jnp.dot(jnp.concatenate(taps, axis=1), w2_ref[...],
                         preferred_element_type=jnp.float32)              # (L, Cout) f32
        else:
            h2 = jnp.zeros((L, Cout), jnp.float32)
            for k in range(9):
                off = (k // 3) * Wp + (k % 3)
                h2 = h2 + jnp.dot(hm[off:off + L, :].astype(BF16),
                                  w2_ref[k * Cout:(k + 1) * Cout, :],
                                  preferred_element_type=jnp.float32)
        h2 = h2 + b2_ref[...]
        h2 = group_norm(h2, mo, g2_ref[...], be2_ref[...])
        h2 = silu(h2)

        # ---- residual path ----
        xin = xp_ref[0, 2 * lead:2 * lead + L, :]                         # (L, Cin) f32
        if has_res_conv:
            res = jnp.dot(xin.astype(BF16), wres_ref[...],
                          preferred_element_type=jnp.float32) + bres_ref[...]
        else:
            res = xin                                   # nn.Identity: skip the matmul entirely

        # zero the Wp-W dead columns so the raw kernel output holds no junk.
        out_ref[0] = ((h2 + res) * mo).astype(out_ref.dtype)

    return kernel, L, Lp, Rx, lead


def resblock_pallas(x_nchw, emb, params, groups=8):
    N, Cin, H, W = x_nchw.shape
    Cout = params["b1"].shape[0]
    Hp, Wp = H + 2, W + 2
    has_res_conv = "wres" in params

    kernel, L, Lp, Rx, lead = make_resblock_kernel(H, W, Cin, Cout, groups, has_res_conv)

    # ---- glue: NCHW -> NHWC, zero-pad spatially, flatten, lead-pad rows ----
    x = jnp.transpose(x_nchw, (0, 2, 3, 1)).astype(jnp.float32)           # NHWC
    xpad = jnp.pad(x, ((0, 0), (1, 1), (1, 1), (0, 0)))                   # (N, Hp, Wp, Cin)
    xflat = xpad.reshape(N, Hp * Wp, Cin)
    xp = jnp.pad(xflat, ((0, 0), (lead, Rx - lead - Hp * Wp), (0, 0)))    # (N, Rx, Cin)

    # hoisted (batched) time-embedding projection
    eo = (jnp.dot(jax.nn.silu(emb.astype(jnp.float32)),
                  params["wemb"].astype(jnp.float32), precision=PREC)
          + params["bemb"].astype(jnp.float32)).reshape(N, 1, Cout)

    # single interior mask (padded-flat layout); kernel derives the output mask from it.
    ip = jnp.arange(Lp)
    ypi, xpi = ip // Wp, ip % Wp
    mask_p = ((ypi >= 1) & (ypi <= H) & (xpi >= 1) & (xpi <= W)
              ).astype(jnp.float32)[:, None]                              # (Lp, 1)

    # same-group indicator matrix for GroupNorm statistics aggregation
    Cg = Cout // groups
    cidx = jnp.arange(Cout)
    gmat = (cidx[:, None] // Cg == cidx[None, :] // Cg).astype(jnp.float32)

    row = lambda v: v.astype(jnp.float32).reshape(1, Cout)
    w1f = params["w1"].reshape(9 * Cin, Cout).astype(BF16)    # rows ordered (dy, dx, cin)
    w2f = params["w2"].reshape(9 * Cout, Cout).astype(BF16)

    args = [xp, eo, mask_p,
            w1f, row(params["b1"]), row(params["g1"]), row(params["be1"]),
            w2f, row(params["b2"]), row(params["g2"]), row(params["be2"]),
            gmat]
    if has_res_conv:
        args += [params["wres"].astype(BF16), row(params["bres"])]

    in_specs = [
        pl.BlockSpec((1, Rx, Cin), lambda n: (n, 0, 0)),      # per-sample input
        pl.BlockSpec((1, 1, Cout), lambda n: (n, 0, 0)),      # per-sample emb row
    ] + [pl.BlockSpec(a.shape, lambda n: (0, 0)) for a in args[2:]]   # constants (fetched once)

    out = pl.pallas_call(
        kernel,
        out_shape=jax.ShapeDtypeStruct((N, L, Cout), jnp.float32),
        grid_spec=pltpu.PrefetchScalarGridSpec(
            num_scalar_prefetch=0,
            grid=(N,),
            in_specs=in_specs,
            out_specs=pl.BlockSpec((1, L, Cout), lambda n: (n, 0, 0)),
        ),
        compiler_params=pltpu.CompilerParams(
            # batch steps are independent -> shard across both TCs on v7x
            dimension_semantics=("parallel",),
            vmem_limit_bytes=32 * 1024 * 1024,
        ),
    )(*args)

    # glue: drop the (zeroed) padded-width columns, back to NCHW
    out = out.reshape(N, H, Wp, Cout)[:, :, :W, :]
    return jnp.transpose(out, (0, 3, 1, 2))


# ----------------------------- pure-JAX reference -----------------------------
def _group_norm_ref(h, groups, gamma, beta, eps=EPS):
    N, H, W, C = h.shape
    Cg = C // groups
    hr = h.reshape(N, H, W, groups, Cg)
    mean = hr.mean(axis=(1, 2, 4), keepdims=True)
    var = hr.var(axis=(1, 2, 4), keepdims=True)
    hn = ((hr - mean) / jnp.sqrt(var + eps)).reshape(N, H, W, C)
    return hn * gamma + beta


def resblock_reference(x_nchw, emb, p, groups=8):
    x = jnp.transpose(x_nchw, (0, 2, 3, 1)).astype(jnp.float32)
    dn = ("NHWC", "HWIO", "NHWC")
    conv = lambda v, w: lax.conv_general_dilated(
        v, w, (1, 1), ((1, 1), (1, 1)), dimension_numbers=dn, precision=PREC)

    h = conv(x, p["w1"]) + p["b1"]
    h = _group_norm_ref(h, groups, p["g1"], p["be1"])
    h = jax.nn.silu(h)
    eo = jnp.dot(jax.nn.silu(emb), p["wemb"], precision=PREC) + p["bemb"]
    h = h + eo[:, None, None, :]
    h = conv(h, p["w2"]) + p["b2"]
    h = _group_norm_ref(h, groups, p["g2"], p["be2"])
    h = jax.nn.silu(h)
    if "wres" in p:
        res = jnp.tensordot(x, p["wres"], axes=[[3], [0]], precision=PREC) + p["bres"]
    else:
        res = x
    return jnp.transpose(h + res, (0, 3, 1, 2))


# ------------------------- deterministic parameter init -----------------------
def init_params(key, in_ch, out_ch, emb_dim):
    ks = jax.random.split(key, 12)
    nrm = lambda k, s, sc: sc * jax.random.normal(k, s, jnp.float32)
    p = {
        "w1": nrm(ks[0], (3, 3, in_ch, out_ch), 1.0 / (3.0 * in_ch ** 0.5)),
        "b1": nrm(ks[1], (out_ch,), 0.1),
        "w2": nrm(ks[2], (3, 3, out_ch, out_ch), 1.0 / (3.0 * out_ch ** 0.5)),
        "b2": nrm(ks[3], (out_ch,), 0.1),
        "g1": 1.0 + 0.1 * jax.random.normal(ks[4], (out_ch,), jnp.float32),
        "be1": 0.1 * jax.random.normal(ks[5], (out_ch,), jnp.float32),
        "g2": 1.0 + 0.1 * jax.random.normal(ks[6], (out_ch,), jnp.float32),
        "be2": 0.1 * jax.random.normal(ks[7], (out_ch,), jnp.float32),
        "wemb": nrm(ks[8], (emb_dim, out_ch), 1.0 / emb_dim ** 0.5),
        "bemb": 0.1 * jax.random.normal(ks[9], (out_ch,), jnp.float32),
    }
    if in_ch != out_ch:
        p["wres"] = nrm(ks[10], (in_ch, out_ch), 1.0 / in_ch ** 0.5)
        p["bres"] = 0.1 * jax.random.normal(ks[11], (out_ch,), jnp.float32)
    # else: nn.Identity -> no wres/bres, kernel skips the residual matmul
    return p


def _run_case(key, N, in_ch, out_ch, emb_dim, H, W, tol):
    kx, ke, kp = jax.random.split(key, 3)
    x = jax.random.normal(kx, (N, in_ch, H, W), jnp.float32)    # NCHW, matching PyTorch
    emb = jax.random.normal(ke, (N, emb_dim), jnp.float32)
    params = init_params(kp, in_ch, out_ch, emb_dim)

    out = jax.block_until_ready(resblock_pallas(x, emb, params))
    ref = resblock_reference(x, emb, params)
    assert out.shape == ref.shape == (N, out_ch, H, W), (out.shape, ref.shape)
    max_err = float(jnp.max(jnp.abs(out - ref)))
    assert jnp.allclose(out, ref, atol=tol, rtol=tol), f"max abs err {max_err}"
    return out


if __name__ == "__main__":
    key = jax.random.PRNGKey(0)
    k1, k2 = jax.random.split(key)

    # case 1: channel-changing block (exercises the 1x1 residual conv path)
    _run_case(k1, N=2, in_ch=8, out_ch=16, emb_dim=32, H=16, W=16, tol=2e-2)

    # case 2: same-channel block (exercises the identity-residual fast path)
    _run_case(k2, N=2, in_ch=16, out_ch=16, emb_dim=32, H=8, W=8, tol=2e-2)

    print("KERNEL_OK")
</pallas_src>

<mosaic_0001>
module attributes {stable_mosaic.version = 11 : i64} {
  func.func @kernel(%arg0: i32, %arg1: memref<1x368x8xf32, #tpu.memory_space<vmem>>, %arg2: memref<1x1x16xf32, #tpu.memory_space<vmem>>, %arg3: memref<328x1xf32, #tpu.memory_space<vmem>>, %arg4: memref<72x16xbf16, #tpu.memory_space<vmem>>, %arg5: memref<1x16xf32, #tpu.memory_space<vmem>>, %arg6: memref<1x16xf32, #tpu.memory_space<vmem>>, %arg7: memref<1x16xf32, #tpu.memory_space<vmem>>, %arg8: memref<144x16xbf16, #tpu.memory_space<vmem>>, %arg9: memref<1x16xf32, #tpu.memory_space<vmem>>, %arg10: memref<1x16xf32, #tpu.memory_space<vmem>>, %arg11: memref<1x16xf32, #tpu.memory_space<vmem>>, %arg12: memref<16x16xf32, #tpu.memory_space<vmem>>, %arg13: memref<8x16xbf16, #tpu.memory_space<vmem>>, %arg14: memref<1x16xf32, #tpu.memory_space<vmem>>, %arg15: memref<1x288x16xf32, #tpu.memory_space<vmem>>) attributes {dimension_semantics = [#tpu.dimension_semantics<parallel>], iteration_bounds = array<i64: 2>, scalar_prefetch = 0 : i64, scratch_operands = 0 : i64, tpu.core_type = #tpu.core_type<tc>, window_params = [{transform_indices = @transform_0, window_bounds = array<i64: 1, 368, 8>}, {transform_indices = @transform_1, window_bounds = array<i64: 1, 1, 16>}, {pipeline_mode = #tpu.pipeline_mode<synchronous>, transform_indices = @transform_2, window_bounds = array<i64: 328, 1>}, {pipeline_mode = #tpu.pipeline_mode<synchronous>, transform_indices = @transform_3, window_bounds = array<i64: 72, 16>}, {pipeline_mode = #tpu.pipeline_mode<synchronous>, transform_indices = @transform_4, window_bounds = array<i64: 1, 16>}, {pipeline_mode = #tpu.pipeline_mode<synchronous>, transform_indices = @transform_5, window_bounds = array<i64: 1, 16>}, {pipeline_mode = #tpu.pipeline_mode<synchronous>, transform_indices = @transform_6, window_bounds = array<i64: 1, 16>}, {pipeline_mode = #tpu.pipeline_mode<synchronous>, transform_indices = @transform_7, window_bounds = array<i64: 144, 16>}, {pipeline_mode = #tpu.pipeline_mode<synchronous>, transform_indices = @transform_8, window_bounds = array<i64: 1, 16>}, {pipeline_mode = #tpu.pipeline_mode<synchronous>, transform_indices = @transform_9, window_bounds = array<i64: 1, 16>}, {pipeline_mode = #tpu.pipeline_mode<synchronous>, transform_indices = @transform_10, window_bounds = array<i64: 1, 16>}, {pipeline_mode = #tpu.pipeline_mode<synchronous>, transform_indices = @transform_11, window_bounds = array<i64: 16, 16>}, {pipeline_mode = #tpu.pipeline_mode<synchronous>, transform_indices = @transform_12, window_bounds = array<i64: 8, 16>}, {pipeline_mode = #tpu.pipeline_mode<synchronous>, transform_indices = @transform_13, window_bounds = array<i64: 1, 16>}, {transform_indices = @transform_14, window_bounds = array<i64: 1, 288, 16>}]} {
    %c0 = arith.constant 0 : index
    %c0_0 = arith.constant 0 : index
    %0 = vector.load %arg3[%c0, %c0_0] : memref<328x1xf32, #tpu.memory_space<vmem>>, vector<328x1xf32>
    %c19 = arith.constant 19 : index
    %c0_1 = arith.constant 0 : index
    %1 = vector.load %arg3[%c19, %c0_1] : memref<328x1xf32, #tpu.memory_space<vmem>>, vector<288x1xf32>
    %c0_2 = arith.constant 0 : index
    %c0_3 = arith.constant 0 : index
    %c0_4 = arith.constant 0 : index
    %2 = vector.load %arg1[%c0_2, %c0_3, %c0_4] : memref<1x368x8xf32, #tpu.memory_space<vmem>>, vector<1x328x8xf32>
    %3 = vector.shape_cast %2 : vector<1x328x8xf32> to vector<328x8xf32>
    %4 = arith.truncf %3 : vector<328x8xf32> to vector<328x8xbf16>
    %c0_5 = arith.constant 0 : index
    %c1 = arith.constant 1 : index
    %c0_6 = arith.constant 0 : index
    %5 = vector.load %arg1[%c0_5, %c1, %c0_6] : memref<1x368x8xf32, #tpu.memory_space<vmem>>, vector<1x328x8xf32>
    %6 = vector.shape_cast %5 : vector<1x328x8xf32> to vector<328x8xf32>
    %7 = arith.truncf %6 : vector<328x8xf32> to vector<328x8xbf16>
    %c0_7 = arith.constant 0 : index
    %c2 = arith.constant 2 : index
    %c0_8 = arith.constant 0 : index
    %8 = vector.load %arg1[%c0_7, %c2, %c0_8] : memref<1x368x8xf32, #tpu.memory_space<vmem>>, vector<1x328x8xf32>
    %9 = vector.shape_cast %8 : vector<1x328x8xf32> to vector<328x8xf32>
    %10 = arith.truncf %9 : vector<328x8xf32> to vector<328x8xbf16>
    %c0_9 = arith.constant 0 : index
    %c18 = arith.constant 18 : index
    %c0_10 = arith.constant 0 : index
    %11 = vector.load %arg1[%c0_9, %c18, %c0_10] : memref<1x368x8xf32, #tpu.memory_space<vmem>>, vector<1x328x8xf32>
    %12 = vector.shape_cast %11 : vector<1x328x8xf32> to vector<328x8xf32>
    %13 = arith.truncf %12 : vector<328x8xf32> to vector<328x8xbf16>
    %c0_11 = arith.constant 0 : index
    %c19_12 = arith.constant 19 : index
    %c0_13 = arith.constant 0 : index
    %14 = vector.load %arg1[%c0_11, %c19_12, %c0_13] : memref<1x368x8xf32, #tpu.memory_space<vmem>>, vector<1x328x8xf32>
    %15 = vector.shape_cast %14 : vector<1x328x8xf32> to vector<328x8xf32>
    %16 = arith.truncf %15 : vector<328x8xf32> to vector<328x8xbf16>
    %c0_14 = arith.constant 0 : index
    %c20 = arith.constant 20 : index
    %c0_15 = arith.constant 0 : index
    %17 = vector.load %arg1[%c0_14, %c20, %c0_15] : memref<1x368x8xf32, #tpu.memory_space<vmem>>, vector<1x328x8xf32>
    %18 = vector.shape_cast %17 : vector<1x328x8xf32> to vector<328x8xf32>
    %19 = arith.truncf %18 : vector<328x8xf32> to vector<328x8xbf16>
    %c0_16 = arith.constant 0 : index
    %c36 = arith.constant 36 : index
    %c0_17 = arith.constant 0 : index
    %20 = vector.load %arg1[%c0_16, %c36, %c0_17] : memref<1x368x8xf32, #tpu.memory_space<vmem>>, vector<1x328x8xf32>
    %21 = vector.shape_cast %20 : vector<1x328x8xf32> to vector<328x8xf32>
    %22 = arith.truncf %21 : vector<328x8xf32> to vector<328x8xbf16>
    %c0_18 = arith.constant 0 : index
    %c37 = arith.constant 37 : index
    %c0_19 = arith.constant 0 : index
    %23 = vector.load %arg1[%c0_18, %c37, %c0_19] : memref<1x368x8xf32, #tpu.memory_space<vmem>>, vector<1x328x8xf32>
    %24 = vector.shape_cast %23 : vector<1x328x8xf32> to vector<328x8xf32>
    %25 = arith.truncf %24 : vector<328x8xf32> to vector<328x8xbf16>
    %c0_20 = arith.constant 0 : index
    %c38 = arith.constant 38 : index
    %c0_21 = arith.constant 0 : index
    %26 = vector.load %arg1[%c0_20, %c38, %c0_21] : memref<1x368x8xf32, #tpu.memory_space<vmem>>, vector<1x328x8xf32>
    %27 = vector.shape_cast %26 : vector<1x328x8xf32> to vector<328x8xf32>
    %28 = arith.truncf %27 : vector<328x8xf32> to vector<328x8xbf16>
    %29 = tpu.concatenate %4, %7, %10, %13, %16, %19, %22, %25, %28 in 1 : vector<328x8xbf16>, vector<328x8xbf16>, vector<328x8xbf16>, vector<328x8xbf16>, vector<328x8xbf16>, vector<328x8xbf16>, vector<328x8xbf16>, vector<328x8xbf16>, vector<328x8xbf16> -> vector<328x72xbf16>
    %c0_22 = arith.constant 0 : index
    %c0_23 = arith.constant 0 : index
    %30 = vector.load %arg4[%c0_22, %c0_23] : memref<72x16xbf16, #tpu.memory_space<vmem>>, vector<72x16xbf16>
    %cst = arith.constant dense<0.000000e+00> : vector<328x16xf32>
    %31 = tpu.matmul %29, %30, %cst {dimension_numbers = #tpu.dot_dimension_numbers<[1], [0], [0], [1], [0, 0, 1, 1], [], []>} : vector<328x72xbf16>, vector<72x16xbf16>, vector<328x16xf32> -> vector<328x16xf32>
    %c0_24 = arith.constant 0 : index
    %c0_25 = arith.constant 0 : index
    %32 = vector.load %arg5[%c0_24, %c0_25] : memref<1x16xf32, #tpu.memory_space<vmem>>, vector<1x16xf32>
    %33 = vector.broadcast %32 : vector<1x16xf32> to vector<328x16xf32>
    %34 = arith.addf %31, %33 : vector<328x16xf32>
    %c0_26 = arith.constant 0 : index
    %c0_27 = arith.constant 0 : index
    %35 = vector.load %arg6[%c0_26, %c0_27] : memref<1x16xf32, #tpu.memory_space<vmem>>, vector<1x16xf32>
    %c0_28 = arith.constant 0 : index
    %c0_29 = arith.constant 0 : index
    %36 = vector.load %arg7[%c0_28, %c0_29] : memref<1x16xf32, #tpu.memory_space<vmem>>, vector<1x16xf32>
    %37 = vector.broadcast %0 : vector<328x1xf32> to vector<328x16xf32>
    %38 = arith.mulf %34, %37 : vector<328x16xf32>
    %cst_30 = arith.constant dense<0.000000e+00> : vector<16xf32>
    %39 = vector.multi_reduction <add>, %38, %cst_30 [0] : vector<328x16xf32> to vector<16xf32>
    %40 = vector.shape_cast %39 : vector<16xf32> to vector<1x16xf32>
    %c0_31 = arith.constant 0 : index
    %c0_32 = arith.constant 0 : index
    %41 = vector.load %arg12[%c0_31, %c0_32] : memref<16x16xf32, #tpu.memory_space<vmem>>, vector<16x16xf32>
    %cst_33 = arith.constant dense<0.000000e+00> : vector<1x16xf32>
    %42 = tpu.matmul %40, %41, %cst_33 {dimension_numbers = #tpu.dot_dimension_numbers<[1], [0], [0], [1], [0, 0, 1, 1], [], []>, precision = #tpu.contract_precision<fp32>} : vector<1x16xf32>, vector<16x16xf32>, vector<1x16xf32> -> vector<1x16xf32>
    %cst_34 = arith.constant 0.001953125 : f32
    %43 = vector.broadcast %cst_34 : f32 to vector<1x16xf32>
    %44 = arith.mulf %42, %43 : vector<1x16xf32>
    %45 = vector.broadcast %44 : vector<1x16xf32> to vector<328x16xf32>
    %46 = arith.subf %34, %45 : vector<328x16xf32>
    %47 = vector.broadcast %0 : vector<328x1xf32> to vector<328x16xf32>
    %48 = arith.mulf %46, %47 : vector<328x16xf32>
    %49 = arith.mulf %48, %48 : vector<328x16xf32>
    %cst_35 = arith.constant dense<0.000000e+00> : vector<16xf32>
    %50 = vector.multi_reduction <add>, %49, %cst_35 [0] : vector<328x16xf32> to vector<16xf32>
    %51 = vector.shape_cast %50 : vector<16xf32> to vector<1x16xf32>
    %c0_36 = arith.constant 0 : index
    %c0_37 = arith.constant 0 : index
    %52 = vector.load %arg12[%c0_36, %c0_37] : memref<16x16xf32, #tpu.memory_space<vmem>>, vector<16x16xf32>
    %cst_38 = arith.constant dense<0.000000e+00> : vector<1x16xf32>
    %53 = tpu.matmul %51, %52, %cst_38 {dimension_numbers = #tpu.dot_dimension_numbers<[1], [0], [0], [1], [0, 0, 1, 1], [], []>, precision = #tpu.contract_precision<fp32>} : vector<1x16xf32>, vector<16x16xf32>, vector<1x16xf32> -> vector<1x16xf32>
    %cst_39 = arith.constant 0.001953125 : f32
    %54 = vector.broadcast %cst_39 : f32 to vector<1x16xf32>
    %55 = arith.mulf %53, %54 : vector<1x16xf32>
    %cst_40 = arith.constant 9.99999974E-6 : f32
    %56 = vector.broadcast %cst_40 : f32 to vector<1x16xf32>
    %57 = arith.addf %55, %56 : vector<1x16xf32>
    %58 = math.rsqrt %57 : vector<1x16xf32>
    %59 = vector.broadcast %44 : vector<1x16xf32> to vector<328x16xf32>
    %60 = arith.subf %34, %59 : vector<328x16xf32>
    %61 = vector.broadcast %58 : vector<1x16xf32> to vector<328x16xf32>
    %62 = arith.mulf %60, %61 : vector<328x16xf32>
    %63 = vector.broadcast %35 : vector<1x16xf32> to vector<328x16xf32>
    %64 = arith.mulf %62, %63 : vector<328x16xf32>
    %65 = vector.broadcast %36 : vector<1x16xf32> to vector<328x16xf32>
    %66 = arith.addf %64, %65 : vector<328x16xf32>
    %67 = arith.negf %66 : vector<328x16xf32>
    %68 = math.exp %67 : vector<328x16xf32>
    %cst_41 = arith.constant 1.000000e+00 : f32
    %69 = vector.broadcast %cst_41 : f32 to vector<328x16xf32>
    %70 = arith.addf %69, %68 : vector<328x16xf32>
    %71 = arith.divf %69, %70 : vector<328x16xf32>
    %72 = arith.mulf %66, %71 : vector<328x16xf32>
    %c0_42 = arith.constant 0 : index
    %c0_43 = arith.constant 0 : index
    %c0_44 = arith.constant 0 : index
    %73 = vector.load %arg2[%c0_42, %c0_43, %c0_44] : memref<1x1x16xf32, #tpu.memory_space<vmem>>, vector<1x1x16xf32>
    %74 = vector.shape_cast %73 : vector<1x1x16xf32> to vector<1x16xf32>
    %75 = vector.broadcast %74 : vector<1x16xf32> to vector<328x16xf32>
    %76 = arith.addf %72, %75 : vector<328x16xf32>
    %77 = vector.broadcast %0 : vector<328x1xf32> to vector<328x16xf32>
    %78 = arith.mulf %76, %77 : vector<328x16xf32>
    %79 = vector.extract_strided_slice %78 {offsets = [0, 0], sizes = [288, 16], strides = [1, 1]} : vector<328x16xf32> to vector<288x16xf32>
    %80 = arith.truncf %79 : vector<288x16xf32> to vector<288x16xbf16>
    %81 = vector.extract_strided_slice %78 {offsets = [1, 0], sizes = [288, 16], strides = [1, 1]} : vector<328x16xf32> to vector<288x16xf32>
    %82 = arith.truncf %81 : vector<288x16xf32> to vector<288x16xbf16>
    %83 = vector.extract_strided_slice %78 {offsets = [2, 0], sizes = [288, 16], strides = [1, 1]} : vector<328x16xf32> to vector<288x16xf32>
    %84 = arith.truncf %83 : vector<288x16xf32> to vector<288x16xbf16>
    %85 = vector.extract_strided_slice %78 {offsets = [18, 0], sizes = [288, 16], strides = [1, 1]} : vector<328x16xf32> to vector<288x16xf32>
    %86 = arith.truncf %85 : vector<288x16xf32> to vector<288x16xbf16>
    %87 = vector.extract_strided_slice %78 {offsets = [19, 0], sizes = [288, 16], strides = [1, 1]} : vector<328x16xf32> to vector<288x16xf32>
    %88 = arith.truncf %87 : vector<288x16xf32> to vector<288x16xbf16>
    %89 = vector.extract_strided_slice %78 {offsets = [20, 0], sizes = [288, 16], strides = [1, 1]} : vector<328x16xf32> to vector<288x16xf32>
    %90 = arith.truncf %89 : vector<288x16xf32> to vector<288x16xbf16>
    %91 = vector.extract_strided_slice %78 {offsets = [36, 0], sizes = [288, 16], strides = [1, 1]} : vector<328x16xf32> to vector<288x16xf32>
    %92 = arith.truncf %91 : vector<288x16xf32> to vector<288x16xbf16>
    %93 = vector.extract_strided_slice %78 {offsets = [37, 0], sizes = [288, 16], strides = [1, 1]} : vector<328x16xf32> to vector<288x16xf32>
    %94 = arith.truncf %93 : vector<288x16xf32> to vector<288x16xbf16>
    %95 = vector.extract_strided_slice %78 {offsets = [38, 0], sizes = [288, 16], strides = [1, 1]} : vector<328x16xf32> to vector<288x16xf32>
    %96 = arith.truncf %95 : vector<288x16xf32> to vector<288x16xbf16>
    %97 = tpu.concatenate %80, %82, %84, %86, %88, %90, %92, %94, %96 in 1 : vector<288x16xbf16>, vector<288x16xbf16>, vector<288x16xbf16>, vector<288x16xbf16>, vector<288x16xbf16>, vector<288x16xbf16>, vector<288x16xbf16>, vector<288x16xbf16>, vector<288x16xbf16> -> vector<288x144xbf16>
    %c0_45 = arith.constant 0 : index
    %c0_46 = arith.constant 0 : index
    %98 = vector.load %arg8[%c0_45, %c0_46] : memref<144x16xbf16, #tpu.memory_space<vmem>>, vector<144x16xbf16>
    %cst_47 = arith.constant dense<0.000000e+00> : vector<288x16xf32>
    %99 = tpu.matmul %97, %98, %cst_47 {dimension_numbers = #tpu.dot_dimension_numbers<[1], [0], [0], [1], [0, 0, 1, 1], [], []>} : vector<288x144xbf16>, vector<144x16xbf16>, vector<288x16xf32> -> vector<288x16xf32>
    %c0_48 = arith.constant 0 : index
    %c0_49 = arith.constant 0 : index
    %100 = vector.load %arg9[%c0_48, %c0_49] : memref<1x16xf32, #tpu.memory_space<vmem>>, vector<1x16xf32>
    %101 = vector.broadcast %100 : vector<1x16xf32> to vector<288x16xf32>
    %102 = arith.addf %99, %101 : vector<288x16xf32>
    %c0_50 = arith.constant 0 : index
    %c0_51 = arith.constant 0 : index
    %103 = vector.load %arg10[%c0_50, %c0_51] : memref<1x16xf32, #tpu.memory_space<vmem>>, vector<1x16xf32>
    %c0_52 = arith.constant 0 : index
    %c0_53 = arith.constant 0 : index
    %104 = vector.load %arg11[%c0_52, %c0_53] : memref<1x16xf32, #tpu.memory_space<vmem>>, vector<1x16xf32>
    %105 = vector.broadcast %1 : vector<288x1xf32> to vector<288x16xf32>
    %106 = arith.mulf %102, %105 : vector<288x16xf32>
    %cst_54 = arith.constant dense<0.000000e+00> : vector<16xf32>
    %107 = vector.multi_reduction <add>, %106, %cst_54 [0] : vector<288x16xf32> to vector<16xf32>
    %108 = vector.shape_cast %107 : vector<16xf32> to vector<1x16xf32>
    %c0_55 = arith.constant 0 : index
    %c0_56 = arith.constant 0 : index
    %109 = vector.load %arg12[%c0_55, %c0_56] : memref<16x16xf32, #tpu.memory_space<vmem>>, vector<16x16xf32>
    %cst_57 = arith.constant dense<0.000000e+00> : vector<1x16xf32>
    %110 = tpu.matmul %108, %109, %cst_57 {dimension_numbers = #tpu.dot_dimension_numbers<[1], [0], [0], [1], [0, 0, 1, 1], [], []>, precision = #tpu.contract_precision<fp32>} : vector<1x16xf32>, vector<16x16xf32>, vector<1x16xf32> -> vector<1x16xf32>
    %cst_58 = arith.constant 0.001953125 : f32
    %111 = vector.broadcast %cst_58 : f32 to vector<1x16xf32>
    %112 = arith.mulf %110, %111 : vector<1x16xf32>
    %113 = vector.broadcast %112 : vector<1x16xf32> to vector<288x16xf32>
    %114 = arith.subf %102, %113 : vector<288x16xf32>
    %115 = vector.broadcast %1 : vector<288x1xf32> to vector<288x16xf32>
    %116 = arith.mulf %114, %115 : vector<288x16xf32>
    %117 = arith.mulf %116, %116 : vector<288x16xf32>
    %cst_59 = arith.constant dense<0.000000e+00> : vector<16xf32>
    %118 = vector.multi_reduction <add>, %117, %cst_59 [0] : vector<288x16xf32> to vector<16xf32>
    %119 = vector.shape_cast %118 : vector<16xf32> to vector<1x16xf32>
    %c0_60 = arith.constant 0 : index
    %c0_61 = arith.constant 0 : index
    %120 = vector.load %arg12[%c0_60, %c0_61] : memref<16x16xf32, #tpu.memory_space<vmem>>, vector<16x16xf32>
    %cst_62 = arith.constant dense<0.000000e+00> : vector<1x16xf32>
    %121 = tpu.matmul %119, %120, %cst_62 {dimension_numbers = #tpu.dot_dimension_numbers<[1], [0], [0], [1], [0, 0, 1, 1], [], []>, precision = #tpu.contract_precision<fp32>} : vector<1x16xf32>, vector<16x16xf32>, vector<1x16xf32> -> vector<1x16xf32>
    %cst_63 = arith.constant 0.001953125 : f32
    %122 = vector.broadcast %cst_63 : f32 to vector<1x16xf32>
    %123 = arith.mulf %121, %122 : vector<1x16xf32>
    %cst_64 = arith.constant 9.99999974E-6 : f32
    %124 = vector.broadcast %cst_64 : f32 to vector<1x16xf32>
    %125 = arith.addf %123, %124 : vector<1x16xf32>
    %126 = math.rsqrt %125 : vector<1x16xf32>
    %127 = vector.broadcast %112 : vector<1x16xf32> to vector<288x16xf32>
    %128 = arith.subf %102, %127 : vector<288x16xf32>
    %129 = vector.broadcast %126 : vector<1x16xf32> to vector<288x16xf32>
    %130 = arith.mulf %128, %129 : vector<288x16xf32>
    %131 = vector.broadcast %103 : vector<1x16xf32> to vector<288x16xf32>
    %132 = arith.mulf %130, %131 : vector<288x16xf32>
    %133 = vector.broadcast %104 : vector<1x16xf32> to vector<288x16xf32>
    %134 = arith.addf %132, %133 : vector<288x16xf32>
    %135 = arith.negf %134 : vector<288x16xf32>
    %136 = math.exp %135 : vector<288x16xf32>
    %cst_65 = arith.constant 1.000000e+00 : f32
    %137 = vector.broadcast %cst_65 : f32 to vector<288x16xf32>
    %138 = arith.addf %137, %136 : vector<288x16xf32>
    %139 = arith.divf %137, %138 : vector<288x16xf32>
    %140 = arith.mulf %134, %139 : vector<288x16xf32>
    %c0_66 = arith.constant 0 : index
    %c38_67 = arith.constant 38 : index
    %c0_68 = arith.constant 0 : index
    %141 = vector.load %arg1[%c0_66, %c38_67, %c0_68] : memref<1x368x8xf32, #tpu.memory_space<vmem>>, vector<1x288x8xf32>
    %142 = vector.shape_cast %141 : vector<1x288x8xf32> to vector<288x8xf32>
    %143 = arith.truncf %142 : vector<288x8xf32> to vector<288x8xbf16>
    %c0_69 = arith.constant 0 : index
    %c0_70 = arith.constant 0 : index
    %144 = vector.load %arg13[%c0_69, %c0_70] : memref<8x16xbf16, #tpu.memory_space<vmem>>, vector<8x16xbf16>
    %cst_71 = arith.constant dense<0.000000e+00> : vector<288x16xf32>
    %145 = tpu.matmul %143, %144, %cst_71 {dimension_numbers = #tpu.dot_dimension_numbers<[1], [0], [0], [1], [0, 0, 1, 1], [], []>} : vector<288x8xbf16>, vector<8x16xbf16>, vector<288x16xf32> -> vector<288x16xf32>
    %c0_72 = arith.constant 0 : index
    %c0_73 = arith.constant 0 : index
    %146 = vector.load %arg14[%c0_72, %c0_73] : memref<1x16xf32, #tpu.memory_space<vmem>>, vector<1x16xf32>
    %147 = vector.broadcast %146 : vector<1x16xf32> to vector<288x16xf32>
    %148 = arith.addf %145, %147 : vector<288x16xf32>
    %149 = arith.addf %140, %148 : vector<288x16xf32>
    %150 = vector.broadcast %1 : vector<288x1xf32> to vector<288x16xf32>
    %151 = arith.mulf %149, %150 : vector<288x16xf32>
    %c0_74 = arith.constant 0 : index
    %c0_75 = arith.constant 0 : index
    %c0_76 = arith.constant 0 : index
    %152 = vector.load %arg15[%c0_74, %c0_75, %c0_76] : memref<1x288x16xf32, #tpu.memory_space<vmem>>, vector<1x288x16xf32>
    %153 = vector.shape_cast %152 : vector<1x288x16xf32> to vector<288x16xf32>
    %154 = vector.shape_cast %151 : vector<288x16xf32> to vector<1x288x16xf32>
    tpu.vector_store %arg15[%c0_74, %c0_75, %c0_76], %154 {strides = array<i32>} : memref<1x288x16xf32, #tpu.memory_space<vmem>>, vector<1x288x16xf32>,
    return
  }
  func.func @transform_0(%arg0: i32) -> (i32, i32, i32) {
    %c0_i32 = arith.constant 0 : i32
    %c0_i32_0 = arith.constant 0 : i32
    %c0_i32_1 = arith.constant 0 : i32
    return %arg0, %c0_i32, %c0_i32_0 : i32, i32, i32
  }
  func.func @transform_1(%arg0: i32) -> (i32, i32, i32) {
    %c0_i32 = arith.constant 0 : i32
    %c0_i32_0 = arith.constant 0 : i32
    %c0_i32_1 = arith.constant 0 : i32
    return %arg0, %c0_i32, %c0_i32_0 : i32, i32, i32
  }
  func.func @transform_2(%arg0: i32) -> (i32, i32) {
    %c0_i32 = arith.constant 0 : i32
    %c0_i32_0 = arith.constant 0 : i32
    %c0_i32_1 = arith.constant 0 : i32
    return %c0_i32, %c0_i32_0 : i32, i32
  }
  func.func @transform_3(%arg0: i32) -> (i32, i32) {
    %c0_i32 = arith.constant 0 : i32
    %c0_i32_0 = arith.constant 0 : i32
    %c0_i32_1 = arith.constant 0 : i32
    return %c0_i32, %c0_i32_0 : i32, i32
  }
  func.func @transform_4(%arg0: i32) -> (i32, i32) {
    %c0_i32 = arith.constant 0 : i32
    %c0_i32_0 = arith.constant 0 : i32
    %c0_i32_1 = arith.constant 0 : i32
    return %c0_i32, %c0_i32_0 : i32, i32
  }
  func.func @transform_5(%arg0: i32) -> (i32, i32) {
    %c0_i32 = arith.constant 0 : i32
    %c0_i32_0 = arith.constant 0 : i32
    %c0_i32_1 = arith.constant 0 : i32
    return %c0_i32, %c0_i32_0 : i32, i32
  }
  func.func @transform_6(%arg0: i32) -> (i32, i32) {
    %c0_i32 = arith.constant 0 : i32
    %c0_i32_0 = arith.constant 0 : i32
    %c0_i32_1 = arith.constant 0 : i32
    return %c0_i32, %c0_i32_0 : i32, i32
  }
  func.func @transform_7(%arg0: i32) -> (i32, i32) {
    %c0_i32 = arith.constant 0 : i32
    %c0_i32_0 = arith.constant 0 : i32
    %c0_i32_1 = arith.constant 0 : i32
    return %c0_i32, %c0_i32_0 : i32, i32
  }
  func.func @transform_8(%arg0: i32) -> (i32, i32) {
    %c0_i32 = arith.constant 0 : i32
    %c0_i32_0 = arith.constant 0 : i32
    %c0_i32_1 = arith.constant 0 : i32
    return %c0_i32, %c0_i32_0 : i32, i32
  }
  func.func @transform_9(%arg0: i32) -> (i32, i32) {
    %c0_i32 = arith.constant 0 : i32
    %c0_i32_0 = arith.constant 0 : i32
    %c0_i32_1 = arith.constant 0 : i32
    return %c0_i32, %c0_i32_0 : i32, i32
  }
  func.func @transform_10(%arg0: i32) -> (i32, i32) {
    %c0_i32 = arith.constant 0 : i32
    %c0_i32_0 = arith.constant 0 : i32
    %c0_i32_1 = arith.constant 0 : i32
    return %c0_i32, %c0_i32_0 : i32, i32
  }
  func.func @transform_11(%arg0: i32) -> (i32, i32) {
    %c0_i32 = arith.constant 0 : i32
    %c0_i32_0 = arith.constant 0 : i32
    %c0_i32_1 = arith.constant 0 : i32
    return %c0_i32, %c0_i32_0 : i32, i32
  }
  func.func @transform_12(%arg0: i32) -> (i32, i32) {
    %c0_i32 = arith.constant 0 : i32
    %c0_i32_0 = arith.constant 0 : i32
    %c0_i32_1 = arith.constant 0 : i32
    return %c0_i32, %c0_i32_0 : i32, i32
  }
  func.func @transform_13(%arg0: i32) -> (i32, i32) {
    %c0_i32 = arith.constant 0 : i32
    %c0_i32_0 = arith.constant 0 : i32
    %c0_i32_1 = arith.constant 0 : i32
    return %c0_i32, %c0_i32_0 : i32, i32
  }
  func.func @transform_14(%arg0: i32) -> (i32, i32, i32) {
    %c0_i32 = arith.constant 0 : i32
    %c0_i32_0 = arith.constant 0 : i32
    %c0_i32_1 = arith.constant 0 : i32
    return %arg0, %c0_i32, %c0_i32_0 : i32, i32, i32
  }
}

</mosaic_0001>

<bundles_post_ra>
// kernel: tpu_custom_call.1
= control target key start
LH: loop header
LB: loop body
LE: loop exit
PB: predicated region body
PF: predicated region fallthrough
CT: control target
= control target key end

     0   :  { %s8861_s29 = smov 0   ;;  %s13449_s0 = inlined_call_operand.vmem [shape: f32[2,368,8], index: 0, kind: input, shape index: {}]   ;;  %s13450_s1 = inlined_call_operand.vmem [shape: f32[2,1,16], index: 1, kind: input, shape index: {}]   ;;  %s13451_s2 = inlined_call_operand.vmem [shape: f32[328,1], index: 2, kind: input, shape index: {}]   ;;  %s13452_s3 = inlined_call_operand.vmem [shape: bf16[72,16], index: 3, kind: input, shape index: {}]   ;;  %s13453_s4 = inlined_call_operand.vmem [shape: f32[1,16], index: 4, kind: input, shape index: {}]   ;;  %s13454_s5 = inlined_call_operand.vmem [shape: f32[1,16], index: 5, kind: input, shape index: {}]   ;;  %s13455_s6 = inlined_call_operand.vmem [shape: f32[1,16], index: 6, kind: input, shape index: {}]   ;;  %s13456_s7 = inlined_call_operand.vmem [shape: bf16[144,16], index: 7, kind: input, shape index: {}]   ;;  %s13457_s8 = inlined_call_operand.vmem [shape: f32[1,16], index: 8, kind: input, shape index: {}]   ;;  %s13458_s9 = inlined_call_operand.vmem [shape: f32[1,16], index: 9, kind: input, shape index: {}]   ;;  %s13459_s10 = inlined_call_operand.vmem [shape: f32[1,16], index: 10, kind: input, shape index: {}]   ;;  %s13460_s11 = inlined_call_operand.vmem [shape: f32[16,16], index: 11, kind: input, shape index: {}]   ;;  %s13461_s12 = inlined_call_operand.vmem [shape: bf16[8,16], index: 12, kind: input, shape index: {}]   ;;  %s13462_s13 = inlined_call_operand.vmem [shape: f32[1,16], index: 13, kind: input, shape index: {}]   ;;  %s13463_s14 = inlined_call_operand.vmem [shape: f32[2,288,16], index: 14, kind: output, shape index: {}]  }
   0x1 LB: > { %s7697_s30 = sadd.s32 4294967295, %s8769_s29   ;;  %p7701_p0 = scmp.ge.s32.totalorder %s8769_s29, 1  ;;  %s8769_s29 = sphi %s8861_s29, %s24_s29  }
   0x2   : > { %p420_p1 = scmp.lt.s32.totalorder %s8769_s29, 3 }
   0x4   : > { %p421_p2 = pnand %p7701_p0, %p420_p1 }
   0x6   : > { %424 = sbr.rel (%p421_p2) target bundleno = 2806 (0xaf6), region = 76 }
   0xd   : > { %p469_p3 = scmp.lt.s32.totalorder %s7697_s30, 1  ;;  %v8437_v0 = vld [vmem:[%s13452_s3] sm:$0xff]   ;;  %v13468_v1 = vmov 0.0   ;;  %v8438_v2 = vld [vmem:[%s13452_s3 + $0x8] sm:$0xff]   ;;  %v8439_v3 = vld [vmem:[%s13452_s3 + $0x10] sm:$0xff]   ;;  %s8772_s25 = smov 24  }
   0xe   : > { %7979 = vmatprep.subr.bf16.mxu0 %v13468_v1  ;;  %v8440_v15 = vld [vmem:[%s13452_s3 + $0x18] sm:$0xff]   ;;  %s8773_s28 = smov 8   ;;  %v8441_v19 = vld [vmem:[%s13452_s3 + $0x20] ss:$0 sps:$4 sm:$0xff]   ;;  %vm1919_vm0 = vcmask 1043456   ;;  %vm8774_vm1 = vmmov 0  }
   0xf   : > { %s14184_s30 = smov (!%p469_p3, %s7697_s30), 1  ;;  %7980 = vmatpush3.bf16.msra.mxu0 %v8437_v0  ;;  %7989 = vmatprep.mubr.msk.bf16.mxu0 %vm8774_vm1, %v13468_v1  ;;  %s8775_s17 = smov 32   ;;  %v1921_v26 = vsel %vm1919_vm0, %v8441_v19, 0  ;;  %vm1468_vm2 = vcmask 64512   ;;  %vm1532_vm3 = vcmask 130048   ;;  %vm1575_vm4 = vcmask 195584  }
  0x10   : > { %7981 = vmatprep.subr.bf16.mxu0 %v13468_v1  ;;  %s8410_s19 = smul.u32 368, %s14184_s30  ;;  %8077 = vmatprep.mubr.msk.f32.mxu1 %vm8774_vm1, %v13468_v1  ;;  %s8776_s18 = smov 16   ;;  %vm1618_vm5 = vcmask 261120   ;;  %vm1661_vm6 = vcmask 326656   ;;  %vm1704_vm7 = vcmask 392192   ;;  %vm1747_vm8 = vcmask 457728  }
  0x11   : > { %s8778_s20 = smov 40   ;;  %s8779_s21 = smov 64   ;;  %vm1790_vm9 = vcmask 523264   ;;  %vm1876_vm10 = vcmask 588800   ;;  %vm4820_vm11 = vcmask 1044480   ;;  %vm4344_vm12 = vcmask 1046528  }
  0x12   : > { %s8883_s22 = scalar_lea.vmem %s13449_s0, %s8410_s19  ;;  %s8777_s19 = smov 48   ;;  %vm4582_vm13 = vcmask 1045504   ;;  %vm4460_vm14 = vsmask.f32 6400  ;;  %vm4698_vm15 = vsmask.f32 5376 }
  0x13   : > { %7982 = vmatpush3.bf16.msra.mxu0 %v8438_v2  ;;  %v686_v4 = vld [vmem:[%s8883_s22 + $0x12] sm:$0xff]  ;;  %v687_v5 = vld [vmem:[%s8883_s22 + $0x1a] sm:$0xff]  ;;  %v623_v8 = vld [vmem:[%s8883_s22 + $0x9] sm:$0xff]  ;;  %s8780_s23 = smov 56   ;;  %s8783_s15 = smov 80  }
  0x14   : > { %v622_v6 = vld [vmem:[%s8883_s22 + $0x1] sm:$0xff]  ;;  %7983 = vmatprep.subr.bf16.mxu0 %v13468_v1  ;;  %v726_v7 = vpack.c.bf16 %v687_v5, %v686_v4  ;;  %v750_v9 = vld [vmem:[%s8883_s22 + $0x13] sm:$0xff]  ;;  %v685_v13 = vld [vmem:[%s8883_s22 + $0xa] sm:$0xff]  ;;  %s8784_s16 = smov 96   ;;  %s8785_s26 = smov 112  }
  0x15   : > { %v751_v10 = vld [vmem:[%s8883_s22 + $0x1b] sm:$0xff]  ;;  %v663_v11 = vpack.c.bf16 %v623_v8, %v622_v6  ;;  %v814_v17 = vld [vmem:[%s8883_s22 + $0x24] sm:$0xff]  ;;  %v815_v18 = vld [vmem:[%s8883_s22 + $0x2c] sm:$0xff] }
  0x16   : > { %v684_v12 = vld [vmem:[%s8883_s22 + $0x2] sm:$0xff]  ;;  %1130 = vrot.lane.b32.xlu1 %v726_v7, %s8772_s25  ;;  %v791_v14 = vpack.c.bf16 %v751_v10, %v750_v9  ;;  %v812_v20 = vld [vmem:[%s8883_s22 + $0x14] sm:$0xff]  ;;  %v854_v22 = vpack.c.bf16 %v815_v18, %v814_v17  ;;  %v753_v35 = vld [vmem:[%s8883_s22 + $0x2b] sm:$0xff] }
  0x17   : > { %7984 = vmatpush3.bf16.msra.mxu0 %v8439_v3  ;;  %1023 = vrot.lane.b32.xlu0 %v663_v11, %s8773_s28  ;;  %v725_v16 = vpack.c.bf16 %v685_v13, %v684_v12  ;;  %v813_v21 = vld [vmem:[%s8883_s22 + $0x1c] sm:$0xff]  ;;  %v940_v24 = vld [vmem:[%s8883_s22 + $0x26] sm:$0xff]  ;;  %v941_v25 = vld [vmem:[%s8883_s22 + $0x2e] sm:$0xff] }
  0x18   : > { %7985 = vmatprep.subr.bf16.mxu0 %v13468_v1  ;;  %v853_v23 = vpack.c.bf16 %v813_v21, %v812_v20  ;;  %v878_v27 = vld [vmem:[%s8883_s22 + $0x25] sm:$0xff]  ;;  %v879_v28 = vld [vmem:[%s8883_s22 + $0x2d] sm:$0xff]  ;;  %v981_v29 = vpack.c.bf16 %v941_v25, %v940_v24  ;;  %v625_v32 = vld [vmem:[%s8883_s22 + $0x19] sm:$0xff] }
  0x19   : > { %v919_v30 = vpack.c.bf16 %v879_v28, %v878_v27  ;;  %v624_v31 = vld [vmem:[%s8883_s22 + $0x11] sm:$0xff]  ;;  %v752_v34 = vld [vmem:[%s8883_s22 + $0x23] sm:$0xff]  ;;  %v755_v53 = vld [vmem:[%s8883_s22 + $0x3b] sm:$0xff] }
  0x1a   : > { %1193 = vrot.lane.b32.xlu1 %v791_v14, %s8775_s17  ;;  %v664_v33 = vpack.c.bf16 %v625_v32, %v624_v31  ;;  %v688_v36 = vld [vmem:[%s8883_s22 + $0x22] sm:$0xff]  ;;  %v689_v37 = vld [vmem:[%s8883_s22 + $0x2a] sm:$0xff]  ;;  %v792_v38 = vpack.c.bf16 %v753_v35, %v752_v34  ;;  %v816_v40 = vld [vmem:[%s8883_s22 + $0x34] sm:$0xff] }
  0x1b   : > { %7986 = vmatpush3.bf16.msra.mxu0 %v8440_v15  ;;  %1086 = vrot.lane.b32.xlu0 %v725_v16, %s8776_s18  ;;  %v727_v39 = vpack.c.bf16 %v689_v37, %v688_v36  ;;  %v817_v41 = vld [vmem:[%s8883_s22 + $0x3c] sm:$0xff]  ;;  %v627_v50 = vld [vmem:[%s8883_s22 + $0x29] sm:$0xff]  ;;  %v754_v52 = vld [vmem:[%s8883_s22 + $0x33] sm:$0xff] }
  0x1c   : > { %7987 = vmatprep.subr.bf16.mxu0 %v13468_v1  ;;  %v855_v42 = vpack.c.bf16 %v817_v41, %v816_v40  ;;  %v942_v43 = vld [vmem:[%s8883_s22 + $0x36] sm:$0xff]  ;;  %v943_v44 = vld [vmem:[%s8883_s22 + $0x3e] sm:$0xff]  ;;  %v793_v56 = vpack.c.bf16 %v755_v53, %v754_v52  ;;  %v819_v59 = vld [vmem:[%s8883_s22 + $0x4c] sm:$0xff] }
  0x1d   : > { %v880_v45 = vld [vmem:[%s8883_s22 + $0x35] sm:$0xff]  ;;  %v881_v46 = vld [vmem:[%s8883_s22 + $0x3d] sm:$0xff]  ;;  %v982_v47 = vpack.c.bf16 %v943_v44, %v942_v43  ;;  %v944_v61 = vld [vmem:[%s8883_s22 + $0x46] sm:$0xff] }
  0x1e   : > { %1300 = vrot.lane.b32.xlu1 %v854_v22, %s8777_s19  ;;  %v920_v48 = vpack.c.bf16 %v881_v46, %v880_v45  ;;  %v626_v49 = vld [vmem:[%s8883_s22 + $0x21] sm:$0xff]  ;;  %v690_v54 = vld [vmem:[%s8883_s22 + $0x32] sm:$0xff]  ;;  %v693_v10 = vld [vmem:[%s8883_s22 + $0x4a] sm:$0xff] }
  0x1f   : > { %7988 = vmatpush3.bf16.msra.mxu0 %v1921_v26  ;;  %1256 = vrot.lane.b32.xlu0 %v853_v23, %s8778_s20  ;;  %v665_v51 = vpack.c.bf16 %v627_v50, %v626_v49  ;;  %v691_v55 = vld [vmem:[%s8883_s22 + $0x3a] sm:$0xff]  ;;  %v818_v58 = vld [vmem:[%s8883_s22 + $0x44] sm:$0xff]  ;;  %v945_v62 = vld [vmem:[%s8883_s22 + $0x4e] sm:$0xff] }
  0x20   : > { %v728_v57 = vpack.c.bf16 %v691_v55, %v690_v54  ;;  %v856_v60 = vpack.c.bf16 %v819_v59, %v818_v58  ;;  %v882_v63 = vld [vmem:[%s8883_s22 + $0x45] sm:$0xff]  ;;  %v883_v0 = vld [vmem:[%s8883_s22 + $0x4d] sm:$0xff]  ;;  %v983_v2 = vpack.c.bf16 %v945_v62, %v944_v61  ;;  %v629_v5 = vld [vmem:[%s8883_s22 + $0x39] sm:$0xff] }
  0x21   : > { %v921_v3 = vpack.c.bf16 %v883_v0, %v882_v63  ;;  %v628_v4 = vld [vmem:[%s8883_s22 + $0x31] sm:$0xff]  ;;  %v756_v6 = vld [vmem:[%s8883_s22 + $0x43] sm:$0xff]  ;;  %v759_v26 = vld [vmem:[%s8883_s22 + $0x5b] sm:$0xff] }
  0x22   : > { %1426 = vrot.lane.b32.xlu1 %v981_v29, %s8779_s21  ;;  %v666_v8 = vpack.c.bf16 %v629_v5, %v628_v4  ;;  %v692_v9 = vld [vmem:[%s8883_s22 + $0x42] sm:$0xff]  ;;  %v820_v13 = vld [vmem:[%s8883_s22 + $0x54] sm:$0xff]  ;;  %v823_v32 = vld [vmem:[%s8883_s22 + $0x6c] sm:$0xff] }
  0x23   : > { %1363 = vrot.lane.b32.xlu0 %v919_v30, %s8780_s23  ;;  %v729_v12 = vpack.c.bf16 %v693_v10, %v692_v9  ;;  %v821_v14 = vld [vmem:[%s8883_s22 + $0x5c] sm:$0xff]  ;;  %v631_v23 = vld [vmem:[%s8883_s22 + $0x49] sm:$0xff]  ;;  %v758_v25 = vld [vmem:[%s8883_s22 + $0x53] sm:$0xff] }
  0x24   : > { %v946_v15 = vld [vmem:[%s8883_s22 + $0x56] sm:$0xff]  ;;  %v857_v16 = vpack.c.bf16 %v821_v14, %v820_v13  ;;  %v947_v17 = vld [vmem:[%s8883_s22 + $0x5e] sm:$0xff]  ;;  %v795_v29 = vpack.c.bf16 %v759_v26, %v758_v25  ;;  %v948_v34 = vld [vmem:[%s8883_s22 + $0x66] sm:$0xff] }
  0x25   : > { %v884_v18 = vld [vmem:[%s8883_s22 + $0x55] sm:$0xff]  ;;  %v885_v19 = vld [vmem:[%s8883_s22 + $0x5d] sm:$0xff]  ;;  %v984_v20 = vpack.c.bf16 %v947_v17, %v946_v15  ;;  %v886_v36 = vld [vmem:[%s8883_s22 + $0x65] sm:$0xff] }
  0x26   : > { %1088 = vrot.lane.b32.xlu1 %v726_v7, %s8776_s18  ;;  %v757_v7 = vld [vmem:[%s8883_s22 + $0x4b] sm:$0xff]  ;;  %v922_v21 = vpack.c.bf16 %v885_v19, %v884_v18  ;;  %v695_v28 = vld [vmem:[%s8883_s22 + $0x5a] sm:$0xff]  ;;  %v760_v43 = vld [vmem:[%s8883_s22 + $0x63] sm:$0xff] }
  0x27   : > { %1025 = vrot.lane.b32.xlu0 %v664_v33, %s8773_s28  ;;  %v794_v11 = vpack.c.bf16 %v757_v7, %v756_v6  ;;  %v694_v27 = vld [vmem:[%s8883_s22 + $0x52] sm:$0xff]  ;;  %v822_v31 = vld [vmem:[%s8883_s22 + $0x64] sm:$0xff]  ;;  %v825_v50 = vld [vmem:[%s8883_s22 + $0x7c] sm:$0xff] }
  0x28   : > { %v730_v30 = vpack.c.bf16 %v695_v28, %v694_v27  ;;  %v858_v33 = vpack.c.bf16 %v823_v32, %v822_v31  ;;  %v949_v35 = vld [vmem:[%s8883_s22 + $0x6e] sm:$0xff]  ;;  %v633_v41 = vld [vmem:[%s8883_s22 + $0x59] sm:$0xff]  ;;  %v696_v45 = vld [vmem:[%s8883_s22 + $0x62] sm:$0xff] }
  0x29   : > { %v887_v37 = vld [vmem:[%s8883_s22 + $0x6d] sm:$0xff]  ;;  %v950_v52 = vld [vmem:[%s8883_s22 + $0x76] sm:$0xff]  ;;  %v951_v53 = vld [vmem:[%s8883_s22 + $0x7e] sm:$0xff] }
  0x2a   : > { %1195 = vrot.lane.b32.xlu1 %v792_v38, %s8775_s17  ;;  %v985_v38 = vpack.c.bf16 %v949_v35, %v948_v34  ;;  %v632_v40 = vld [vmem:[%s8883_s22 + $0x51] sm:$0xff]  ;;  %v889_v55 = vld [vmem:[%s8883_s22 + $0x7d] sm:$0xff]  ;;  %v635_v59 = vld [vmem:[%s8883_s22 + $0x69] sm:$0xff] }
  0x2b   : > { %1132 = vrot.lane.b32.xlu0 %v727_v39, %s8772_s25  ;;  %v761_v44 = vld [vmem:[%s8883_s22 + $0x6b] sm:$0xff]  ;;  %v824_v49 = vld [vmem:[%s8883_s22 + $0x74] sm:$0xff]  ;;  %v634_v58 = vld [vmem:[%s8883_s22 + $0x61] sm:$0xff] }
  0x2c   : > { %v697_v46 = vld [vmem:[%s8883_s22 + $0x6a] sm:$0xff]  ;;  %v888_v54 = vld [vmem:[%s8883_s22 + $0x75] sm:$0xff]  ;;  %v700_v18 = vld [vmem:[%s8883_s22 + $0x82] sm:$0xff] }
  0x2d   : > { %v762_v61 = vld [vmem:[%s8883_s22 + $0x73] sm:$0xff]  ;;  %v763_v62 = vld [vmem:[%s8883_s22 + $0x7b] sm:$0xff]  ;;  %v826_v4 = vld [vmem:[%s8883_s22 + $0x84] sm:$0xff] }
  0x2e   : > { %1302 = vrot.lane.b32.xlu1 %v855_v42, %s8777_s19  ;;  %v698_v63 = vld [vmem:[%s8883_s22 + $0x72] sm:$0xff]  ;;  %v699_v0 = vld [vmem:[%s8883_s22 + $0x7a] sm:$0xff]  ;;  %v952_v7 = vld [vmem:[%s8883_s22 + $0x86] sm:$0xff] }
  0x2f   : > { %1258 = vrot.lane.b32.xlu0 %v854_v22, %s8778_s20  ;;  %v630_v22 = vld [vmem:[%s8883_s22 + $0x41] sm:$0xff]  ;;  %v827_v5 = vld [vmem:[%s8883_s22 + $0x8c] sm:$0xff]  ;;  %v637_v14 = vld [vmem:[%s8883_s22 + $0x79] sm:$0xff] }
  0x30   : > { %v667_v24 = vpack.c.bf16 %v631_v23, %v630_v22  ;;  %v860_v6 = vpack.c.bf16 %v827_v5, %v826_v4  ;;  %v890_v9 = vld [vmem:[%s8883_s22 + $0x85] sm:$0xff]  ;;  %v891_v10 = vld [vmem:[%s8883_s22 + $0x8d] sm:$0xff]  ;;  %v829_v25 = vld [vmem:[%s8883_s22 + $0x9c] sm:$0xff] }
  0x31   : > { %v636_v13 = vld [vmem:[%s8883_s22 + $0x71] sm:$0xff]  ;;  %v955_v31 = vld [vmem:[%s8883_s22 + $0x9e] sm:$0xff]  ;;  %v956_v5 = vld [vmem:[%s8883_s22 + $0xa6] sm:$0xff] }
  0x32   : > { %1428 = vrot.lane.b32.xlu1 %v982_v47, %s8779_s21  ;;  %v796_v47 = vpack.c.bf16 %v761_v44, %v760_v43  ;;  %v670_v15 = vpack.c.bf16 %v637_v14, %v636_v13  ;;  %v765_v17 = vld [vmem:[%s8883_s22 + $0x8b] sm:$0xff]  ;;  %v893_v34 = vld [vmem:[%s8883_s22 + $0x9d] sm:$0xff] }
  0x33   : > { %1365 = vrot.lane.b32.xlu0 %v920_v48, %s8780_s23  ;;  %v731_v48 = vpack.c.bf16 %v697_v46, %v696_v45  ;;  %v701_v19 = vld [vmem:[%s8883_s22 + $0x8a] sm:$0xff]  ;;  %v638_v43 = vld [vmem:[%s8883_s22 + $0x81] sm:$0xff] }
  0x34   : > { %v733_v23 = vpack.c.bf16 %v701_v19, %v700_v18  ;;  %v639_v44 = vld [vmem:[%s8883_s22 + $0x89] sm:$0xff] }
  0x36   : > { %1090 = vrot.lane.b32.xlu1 %v727_v39, %s8776_s18  ;;  %v923_v39 = vpack.c.bf16 %v887_v37, %v886_v36 }
  0x37   : > { %1027 = vrot.lane.b32.xlu0 %v665_v51, %s8773_s28  ;;  %v859_v51 = vpack.c.bf16 %v825_v50, %v824_v49  ;;  %v563_v49 = vld [vmem:[%s8883_s22 + $0x18] sm:$0xff] }
  0x38   : > { %v766_v50 = vld [vmem:[%s8883_s22 + $0x93] sm:$0xff] }
  0x3a   : > { %1197 = vrot.lane.b32.xlu1 %v793_v56, %s8775_s17  ;;  %v986_v56 = vpack.c.bf16 %v951_v53, %v950_v52  ;;  %v702_v53 = vld [vmem:[%s8883_s22 + $0x92] sm:$0xff] }
  0x3b   : > { %1134 = vrot.lane.b32.xlu0 %v728_v57, %s8772_s25 }
  0x3e   : > { %1304 = vrot.lane.b32.xlu1 %v856_v60, %s8777_s19 }
  0x3f   : > { %1260 = vrot.lane.b32.xlu0 %v855_v42, %s8778_s20  ;;  %v668_v42 = vpack.c.bf16 %v633_v41, %v632_v40 }
  0x42   : > { %1430 = vrot.lane.b32.xlu1 %v983_v2, %s8779_s21  ;;  %v797_v2 = vpack.c.bf16 %v763_v62, %v762_v61  ;;  %v830_v62 = vld [vmem:[%s8883_s22 + $0xa4] sm:$0xff] }
  0x43   : > { %1367 = vrot.lane.b32.xlu0 %v921_v3, %s8780_s23  ;;  %v732_v3 = vpack.c.bf16 %v699_v0, %v698_v63  ;;  %v831_v63 = vld [vmem:[%s8883_s22 + $0xac] sm:$0xff] }
  0x44   : > { %v862_v4 = vpack.c.bf16 %v831_v63, %v830_v62  ;;  %v771_v62 = vld [vmem:[%s8883_s22 + $0xbb] sm:$0xff] }
  0x46   : > { %1092 = vrot.lane.b32.xlu1 %v728_v57, %s8776_s18  ;;  %v924_v57 = vpack.c.bf16 %v889_v55, %v888_v54  ;;  %v703_v54 = vld [vmem:[%s8883_s22 + $0x9a] sm:$0xff] }
  0x47   : > { %1029 = vrot.lane.b32.xlu0 %v666_v8, %s8773_s28  ;;  %v953_v8 = vld [vmem:[%s8883_s22 + $0x8e] sm:$0xff]  ;;  %v734_v61 = vpack.c.bf16 %v703_v54, %v702_v53  ;;  %v642_v53 = vld [vmem:[%s8883_s22 + $0xa1] sm:$0xff] }
  0x48   : > { %v643_v54 = vld [vmem:[%s8883_s22 + $0xa9] sm:$0xff] }
  0x4a   : > { %1199 = vrot.lane.b32.xlu1 %v794_v11, %s8775_s17  ;;  %v987_v11 = vpack.c.bf16 %v953_v8, %v952_v7  ;;  %v894_v8 = vld [vmem:[%s8883_s22 + $0xa5] sm:$0xff] }
  0x4b   : > { %1136 = vrot.lane.b32.xlu0 %v729_v12, %s8772_s25 }
  0x4e   : > { %1306 = vrot.lane.b32.xlu1 %v857_v16, %s8777_s19 }
  0x4f   : > { %1262 = vrot.lane.b32.xlu0 %v856_v60, %s8778_s20  ;;  %v669_v60 = vpack.c.bf16 %v635_v59, %v634_v58 }
  0x52   : > { %1432 = vrot.lane.b32.xlu1 %v984_v20, %s8779_s21  ;;  %v560_v20 = vld [vmem:[%s8883_s22] sm:$0xff] }
  0x53   : > { %1369 = vrot.lane.b32.xlu0 %v922_v21, %s8780_s23  ;;  %v561_v21 = vld [vmem:[%s8883_s22 + $0x8] sm:$0xff] }
  0x54   : > { %v601_v28 = vpack.c.bf16 %v561_v21, %v560_v20  ;;  %v564_v21 = vld [vmem:[%s8883_s22 + $0x20] sm:$0xff] }
  0x56   : > { %1094 = vrot.lane.b32.xlu1 %v729_v12, %s8776_s18  ;;  %v925_v12 = vpack.c.bf16 %v891_v10, %v890_v9  ;;  %v895_v9 = vld [vmem:[%s8883_s22 + $0xad] sm:$0xff] }
  0x57   : > { %1031 = vrot.lane.b32.xlu0 %v667_v24, %s8773_s28  ;;  %v828_v24 = vld [vmem:[%s8883_s22 + $0x94] sm:$0xff]  ;;  %v927_v14 = vpack.c.bf16 %v895_v9, %v894_v8 }
  0x5a   : > { %1201 = vrot.lane.b32.xlu1 %v795_v29, %s8775_s17  ;;  %v9059_v29 = vpack.c.bf16 %v829_v25, %v828_v24  ;;  %v768_v24 = vld [vmem:[%s8883_s22 + $0xa3] sm:$0xff]  ;;  %v769_v25 = vld [vmem:[%s8883_s22 + $0xab] sm:$0xff] }
  0x5b   : > { %1138 = vrot.lane.b32.xlu0 %v730_v30, %s8772_s25 }
  0x5e   : > { %1308 = vrot.lane.b32.xlu1 %v858_v33, %s8777_s19 }
  0x5f   : > { %1264 = vrot.lane.b32.xlu0 %v857_v16, %s8778_s20  ;;  %v764_v16 = vld [vmem:[%s8883_s22 + $0x83] sm:$0xff] }
  0x60   : > { %v798_v22 = vpack.c.bf16 %v765_v17, %v764_v16  ;;  %v640_v16 = vld [vmem:[%s8883_s22 + $0x91] sm:$0xff]  ;;  %v641_v17 = vld [vmem:[%s8883_s22 + $0x99] sm:$0xff] }
  0x62   : > { %1434 = vrot.lane.b32.xlu1 %v985_v38, %s8779_s21 }
  0x63   : > { %1371 = vrot.lane.b32.xlu0 %v923_v39, %s8780_s23 }
  0x66   : > { %1096 = vrot.lane.b32.xlu1 %v730_v30, %s8776_s18  ;;  %v954_v30 = vld [vmem:[%s8883_s22 + $0x96] sm:$0xff] }
  0x67   : > { %1033 = vrot.lane.b32.xlu0 %v668_v42, %s8773_s28  ;;  %v988_v38 = vpack.c.bf16 %v955_v31, %v954_v30 }
  0x6a   : > { %1203 = vrot.lane.b32.xlu1 %v796_v47, %s8775_s17  ;;  %v562_v47 = vld [vmem:[%s8883_s22 + $0x10] sm:$0xff] }
  0x6b   : > { %1140 = vrot.lane.b32.xlu0 %v731_v48, %s8772_s25  ;;  %v602_v58 = vpack.c.bf16 %v563_v49, %v562_v47 }
  0x6e   : > { %1310 = vrot.lane.b32.xlu1 %v859_v51, %s8777_s19 }
  0x6f   : > { %1266 = vrot.lane.b32.xlu0 %v858_v33, %s8778_s20  ;;  %v892_v33 = vld [vmem:[%s8883_s22 + $0x95] sm:$0xff] }
  0x70   : > { %v926_v40 = vpack.c.bf16 %v893_v34, %v892_v33  ;;  %v800_v33 = vpack.c.bf16 %v769_v25, %v768_v24 }
  0x72   : > { %1436 = vrot.lane.b32.xlu1 %v986_v56, %s8779_s21 }
  0x73   : > { %1373 = vrot.lane.b32.xlu0 %v924_v57, %s8780_s23 }
  0x76   : > { %1098 = vrot.lane.b32.xlu1 %v731_v48, %s8776_s18  ;;  %v671_v48 = vpack.c.bf16 %v639_v44, %v638_v43  ;;  %v959_v43 = vld [vmem:[%s8883_s22 + $0xbe] sm:$0xff] }
  0x77   : > { %1035 = vrot.lane.b32.xlu0 %v669_v60, %s8773_s28 }
  0x7a   : > { %1205 = vrot.lane.b32.xlu1 %v797_v2, %s8775_s17 }
  0x7b   : > { %1142 = vrot.lane.b32.xlu0 %v732_v3, %s8772_s25 }
  0x7e   : > { %1312 = vrot.lane.b32.xlu1 %v860_v6, %s8777_s19 }
  0x7f   : > { %1268 = vrot.lane.b32.xlu0 %v859_v51, %s8778_s20  ;;  %v767_v51 = vld [vmem:[%s8883_s22 + $0x9b] sm:$0xff] }
  0x80   : > { %v799_v59 = vpack.c.bf16 %v767_v51, %v766_v50 }
  0x82   : > { %1438 = vrot.lane.b32.xlu1 %v987_v11, %s8779_s21 }
  0x83   : > { %1375 = vrot.lane.b32.xlu0 %v925_v12, %s8780_s23 }
  0x86   : > { %1100 = vrot.lane.b32.xlu1 %v732_v3, %s8776_s18 }
  0x87   : > { %1037 = vrot.lane.b32.xlu0 %v670_v15, %s8773_s28 }
  0x88   : > { %v1131_v26 = vpop.permute.xlu1 %1130 }
  0x89   : > { %v1024_v27 = vpop.permute.xlu0 %1023 }
  0x8a   : > { %1207 = vrot.lane.b32.xlu1 %v798_v22, %s8775_s17  ;;  %v1471_v35 = vsel %vm1468_vm2, %v601_v28, %v1024_v27  ;;  %v672_v22 = vpack.c.bf16 %v641_v17, %v640_v16  ;;  %v704_v27 = vld [vmem:[%s8883_s22 + $0xa2] sm:$0xff]  ;;  %v705_v28 = vld [vmem:[%s8883_s22 + $0xaa] sm:$0xff] }
  0x8b   : > { %1144 = vrot.lane.b32.xlu0 %v733_v23, %s8772_s25  ;;  %v960_v16 = vld [vmem:[%s8883_s22 + $0xc6] sm:$0xff]  ;;  %v961_v17 = vld [vmem:[%s8883_s22 + $0xce] sm:$0xff] }
  0x8c   : > { %v1194_v32 = vpop.permute.xlu1 %1193  ;;  %v991_v24 = vpack.c.bf16 %v961_v17, %v960_v16 }
  0x8d   : > { %v1087_v36 = vpop.permute.xlu0 %1086 }
  0x8e   : > { %v1534_v37 = vsel %vm1532_vm3, %v1471_v35, %v1087_v36  ;;  %1314 = vrot.lane.b32.xlu1 %v9059_v29, %s8777_s19  ;;  %v735_v35 = vpack.c.bf16 %v705_v28, %v704_v27  ;;  %v832_v36 = vld [vmem:[%s8883_s22 + $0xb4] sm:$0xff] }
  0x8f   : > { %v1577_v39 = vsel %vm1575_vm4, %v1534_v37, %v1131_v26  ;;  %1270 = vrot.lane.b32.xlu0 %v860_v6, %s8778_s20  ;;  %v957_v6 = vld [vmem:[%s8883_s22 + $0xae] sm:$0xff]  ;;  %v833_v37 = vld [vmem:[%s8883_s22 + $0xbc] sm:$0xff] }
  0x90   : > { %v1620_v41 = vsel %vm1618_vm5, %v1577_v39, %v1194_v32  ;;  %v1301_v42 = vpop.permute.xlu1 %1300  ;;  %v989_v13 = vpack.c.bf16 %v957_v6, %v956_v5  ;;  %v644_v27 = vld [vmem:[%s8883_s22 + $0xb1] sm:$0xff]  ;;  %v645_v28 = vld [vmem:[%s8883_s22 + $0xb9] sm:$0xff] }
  0x91   : > { %v1257_v45 = vpop.permute.xlu0 %1256 }
  0x92   : > { %v1663_v46 = vsel %vm1661_vm6, %v1620_v41, %v1257_v45  ;;  %1440 = vrot.lane.b32.xlu1 %v988_v38, %s8779_s21  ;;  %v863_v41 = vpack.c.bf16 %v833_v37, %v832_v36  ;;  %v896_v45 = vld [vmem:[%s8883_s22 + $0xb5] sm:$0xff]  ;;  %v773_v36 = vld [vmem:[%s8883_s22 + $0xcb] sm:$0xff] }
  0x93   : > { %1377 = vrot.lane.b32.xlu0 %v926_v40, %s8780_s23  ;;  %v1706_v55 = vsel %vm1704_vm7, %v1663_v46, %v1301_v42  ;;  %v958_v42 = vld [vmem:[%s8883_s22 + $0xb6] sm:$0xff] }
  0x94   : > { %v1427_v52 = vpop.permute.xlu1 %1426  ;;  %v897_v46 = vld [vmem:[%s8883_s22 + $0xbd] sm:$0xff]  ;;  %v990_v50 = vpack.c.bf16 %v959_v43, %v958_v42 }
  0x95   : > { %v1364_v56 = vpop.permute.xlu0 %1363  ;;  %v928_v51 = vpack.c.bf16 %v897_v46, %v896_v45 }
  0x96   : > { %v1749_v57 = vsel %vm1747_vm8, %v1706_v55, %v1364_v56  ;;  %1102 = vrot.lane.b32.xlu1 %v733_v23, %s8776_s18  ;;  %v565_v23 = vld [vmem:[%s8883_s22 + $0x28] sm:$0xff] }
  0x97   : > { %v1792_v60 = vsel %vm1790_vm9, %v1749_v57, %v1427_v52  ;;  %1039 = vrot.lane.b32.xlu0 %v671_v48, %s8773_s28  ;;  %v603_v32 = vpack.c.bf16 %v565_v23, %v564_v21 }
  0x98   : > { %7990 = vmatmul.mubr.msk.bf16.vlgmr.msra.gmra.mrb[0].mxu0 %vm1876_vm10, %v1792_v60  ;;  %v1089_v0 = vpop.permute.xlu1 %1088  ;;  %v567_v60 = vld [vmem:[%s8883_s22 + $0x38] sm:$0xff] }
  0x99   : > { %v1026_v2 = vpop.permute.xlu0 %1025  ;;  %7993 = vmatprep.mubr.msk.bf16.mxu0 %vm8774_vm1, %v13468_v1 }
  0x9a   : > { %v1474_v3 = vsel %vm1468_vm2, %v602_v58, %v1026_v2  ;;  %1209 = vrot.lane.b32.xlu1 %v799_v59, %s8775_s17  ;;  %v566_v58 = vld [vmem:[%s8883_s22 + $0x30] sm:$0xff]  ;;  %v673_v59 = vpack.c.bf16 %v643_v54, %v642_v53  ;;  %v707_v2 = vld [vmem:[%s8883_s22 + $0xba] sm:$0xff] }
  0x9b   : > { %1146 = vrot.lane.b32.xlu0 %v734_v61, %s8772_s25  ;;  %v1536_v10 = vsel %vm1532_vm3, %v1474_v3, %v1089_v0  ;;  %v706_v0 = vld [vmem:[%s8883_s22 + $0xb2] sm:$0xff]  ;;  %v604_v6 = vpack.c.bf16 %v567_v60, %v566_v58  ;;  %v963_v54 = vld [vmem:[%s8883_s22 + $0xde] sm:$0xff] }
  0x9c   : > { %v1196_v7 = vpop.permute.xlu1 %1195  ;;  %v736_v9 = vpack.c.bf16 %v707_v2, %v706_v0  ;;  %v962_v53 = vld [vmem:[%s8883_s22 + $0xd6] sm:$0xff]  ;;  %v646_v0 = vld [vmem:[%s8883_s22 + $0xc1] sm:$0xff]  ;;  %v647_v2 = vld [vmem:[%s8883_s22 + $0xc9] sm:$0xff] }
  0x9d   : > { %v1133_v11 = vpop.permute.xlu0 %1132 }
  0x9e   : > { %v1579_v12 = vsel %vm1575_vm4, %v1536_v10, %v1133_v11  ;;  %1316 = vrot.lane.b32.xlu1 %v862_v4, %s8777_s19  ;;  %v834_v10 = vld [vmem:[%s8883_s22 + $0xc4] sm:$0xff]  ;;  %v835_v11 = vld [vmem:[%s8883_s22 + $0xcc] sm:$0xff] }
  0x9f   : > { %1272 = vrot.lane.b32.xlu0 %v9059_v29, %s8778_s20  ;;  %v1622_v18 = vsel %vm1618_vm5, %v1579_v12, %v1196_v7 }
  0xa0   : > { %v1303_v15 = vpop.permute.xlu1 %1302 }
  0xa1   : > { %v1259_v19 = vpop.permute.xlu0 %1258 }
  0xa2   : > { %v1665_v20 = vsel %vm1661_vm6, %v1622_v18, %v1259_v19  ;;  %1442 = vrot.lane.b32.xlu1 %v989_v13, %s8779_s21  ;;  %v898_v19 = vld [vmem:[%s8883_s22 + $0xc5] sm:$0xff] }
  0xa3   : > { %1379 = vrot.lane.b32.xlu0 %v927_v14, %s8780_s23  ;;  %v1708_v29 = vsel %vm1704_vm7, %v1665_v20, %v1303_v15  ;;  %v864_v15 = vpack.c.bf16 %v835_v11, %v834_v10  ;;  %v899_v20 = vld [vmem:[%s8883_s22 + $0xcd] sm:$0xff]  ;;  %v775_v10 = vld [vmem:[%s8883_s22 + $0xdb] sm:$0xff] }
  0xa4   : > { %v1429_v26 = vpop.permute.xlu1 %1428  ;;  %v929_v25 = vpack.c.bf16 %v899_v20, %v898_v19 }
  0xa5   : > { %v1366_v30 = vpop.permute.xlu0 %1365 }
  0xa6   : > { %v1751_v31 = vsel %vm1747_vm8, %v1708_v29, %v1366_v30  ;;  %1104 = vrot.lane.b32.xlu1 %v734_v61, %s8776_s18  ;;  %v770_v61 = vld [vmem:[%s8883_s22 + $0xb3] sm:$0xff] }
  0xa7   : > { %v1794_v34 = vsel %vm1790_vm9, %v1751_v31, %v1429_v26  ;;  %1041 = vrot.lane.b32.xlu0 %v672_v22, %s8773_s28  ;;  %v801_v7 = vpack.c.bf16 %v771_v62, %v770_v61  ;;  %v992_v61 = vpack.c.bf16 %v963_v54, %v962_v53 }
  0xa8   : > { %7994 = vmatmul.mubr.msk.bf16.gmra.mrb[4].mxu0 %vm1876_vm10, %v1794_v34  ;;  %v1091_v38 = vpop.permute.xlu1 %1090  ;;  %v569_v34 = vld [vmem:[%s8883_s22 + $0x48] sm:$0xff] }
  0xa9   : > { %v1028_v39 = vpop.permute.xlu0 %1027  ;;  %7997 = vmatprep.mubr.msk.bf16.mxu0 %vm8774_vm1, %v13468_v1 }
  0xaa   : > { %v1477_v40 = vsel %vm1468_vm2, %v603_v32, %v1028_v39  ;;  %1211 = vrot.lane.b32.xlu1 %v800_v33, %s8775_s17  ;;  %v568_v32 = vld [vmem:[%s8883_s22 + $0x40] sm:$0xff]  ;;  %v674_v33 = vpack.c.bf16 %v645_v28, %v644_v27  ;;  %v709_v39 = vld [vmem:[%s8883_s22 + $0xca] sm:$0xff] }
  0xab   : > { %1148 = vrot.lane.b32.xlu0 %v735_v35, %s8772_s25  ;;  %v1538_v47 = vsel %vm1532_vm3, %v1477_v40, %v1091_v38  ;;  %v708_v38 = vld [vmem:[%s8883_s22 + $0xc2] sm:$0xff]  ;;  %v605_v43 = vpack.c.bf16 %v569_v34, %v568_v32  ;;  %v965_v28 = vld [vmem:[%s8883_s22 + $0xee] sm:$0xff] }
  0xac   : > { %v1198_v44 = vpop.permute.xlu1 %1197  ;;  %v737_v46 = vpack.c.bf16 %v709_v39, %v708_v38  ;;  %v964_v27 = vld [vmem:[%s8883_s22 + $0xe6] sm:$0xff]  ;;  %v648_v38 = vld [vmem:[%s8883_s22 + $0xd1] sm:$0xff]  ;;  %v649_v39 = vld [vmem:[%s8883_s22 + $0xd9] sm:$0xff] }
  0xad   : > { %v1135_v48 = vpop.permute.xlu0 %1134 }
  0xae   : > { %v1581_v49 = vsel %vm1575_vm4, %v1538_v47, %v1135_v48  ;;  %1318 = vrot.lane.b32.xlu1 %v863_v41, %s8777_s19  ;;  %v836_v47 = vld [vmem:[%s8883_s22 + $0xd4] sm:$0xff]  ;;  %v837_v48 = vld [vmem:[%s8883_s22 + $0xdc] sm:$0xff] }
  0xaf   : > { %1274 = vrot.lane.b32.xlu0 %v862_v4, %s8778_s20  ;;  %v1624_v55 = vsel %vm1618_vm5, %v1581_v49, %v1198_v44 }
  0xb0   : > { %v1305_v52 = vpop.permute.xlu1 %1304 }
  0xb1   : > { %v1261_v56 = vpop.permute.xlu0 %1260 }
  0xb2   : > { %v1667_v57 = vsel %vm1661_vm6, %v1624_v55, %v1261_v56  ;;  %1444 = vrot.lane.b32.xlu1 %v990_v50, %s8779_s21  ;;  %v900_v56 = vld [vmem:[%s8883_s22 + $0xd5] sm:$0xff] }
  0xb3   : > { %1381 = vrot.lane.b32.xlu0 %v928_v51, %s8780_s23  ;;  %v1710_v3 = vsel %vm1704_vm7, %v1667_v57, %v1305_v52  ;;  %v865_v52 = vpack.c.bf16 %v837_v48, %v836_v47  ;;  %v901_v57 = vld [vmem:[%s8883_s22 + $0xdd] sm:$0xff]  ;;  %v777_v47 = vld [vmem:[%s8883_s22 + $0xeb] sm:$0xff] }
  0xb4   : > { %v1431_v63 = vpop.permute.xlu1 %1430  ;;  %v930_v62 = vpack.c.bf16 %v901_v57, %v900_v56  ;;  %v13464_v56 = vmov 0  }
  0xb5   : > { %v1368_v4 = vpop.permute.xlu0 %1367  ;;  %8435 = vset.pattern.permute.xlu0 %v13464_v56  ;;  %8436 = vset.pattern.permute.xlu1 %v13464_v56 }
  0xb6   : > { %v1753_v5 = vsel %vm1747_vm8, %v1710_v3, %v1368_v4  ;;  %1106 = vrot.lane.b32.xlu1 %v735_v35, %s8776_s18  ;;  %v772_v35 = vld [vmem:[%s8883_s22 + $0xc3] sm:$0xff]  ;;  %5264 = vmatprep.subr.bf16.mxu0 %v13464_v56 }
  0xb7   : > { %v1796_v8 = vsel %vm1790_vm9, %v1753_v5, %v1431_v63  ;;  %1043 = vrot.lane.b32.xlu0 %v673_v59, %s8773_s28  ;;  %v802_v44 = vpack.c.bf16 %v773_v36, %v772_v35  ;;  %v993_v35 = vpack.c.bf16 %v965_v28, %v964_v27 }
  0xb8   : > { %7998 = vmatmul.mubr.msk.bf16.gmra.mrb[8].mxu0 %vm1876_vm10, %v1796_v8  ;;  %v1093_v12 = vpop.permute.xlu1 %1092  ;;  %v571_v8 = vld [vmem:[%s8883_s22 + $0x58] sm:$0xff] }
  0xb9   : > { %v1030_v13 = vpop.permute.xlu0 %1029  ;;  %8001 = vmatprep.mubr.msk.bf16.mxu0 %vm8774_vm1, %v13468_v1 }
  0xba   : > { %v1480_v14 = vsel %vm1468_vm2, %v604_v6, %v1030_v13  ;;  %1213 = vrot.lane.b32.xlu1 %v801_v7, %s8775_s17  ;;  %v570_v6 = vld [vmem:[%s8883_s22 + $0x50] sm:$0xff]  ;;  %v675_v7 = vpack.c.bf16 %v647_v2, %v646_v0  ;;  %v711_v13 = vld [vmem:[%s8883_s22 + $0xda] sm:$0xff] }
  0xbb   : > { %1150 = vrot.lane.b32.xlu0 %v736_v9, %s8772_s25  ;;  %v1540_v21 = vsel %vm1532_vm3, %v1480_v14, %v1093_v12  ;;  %v710_v12 = vld [vmem:[%s8883_s22 + $0xd2] sm:$0xff]  ;;  %v606_v17 = vpack.c.bf16 %v571_v8, %v570_v6  ;;  %v905_v6 = vld [vmem:[%s8883_s22 + $0xfd] sm:$0xff] }
  0xbc   : > { %v1200_v18 = vpop.permute.xlu1 %1199  ;;  %v738_v20 = vpack.c.bf16 %v711_v13, %v710_v12  ;;  %v966_v2 = vld [vmem:[%s8883_s22 + $0xf6] sm:$0xff]  ;;  %v650_v13 = vld [vmem:[%s8883_s22 + $0xe1] sm:$0xff] }
  0xbd   : > { %v1137_v22 = vpop.permute.xlu0 %1136 }
  0xbe   : > { %v1583_v23 = vsel %vm1575_vm4, %v1540_v21, %v1137_v22  ;;  %1320 = vrot.lane.b32.xlu1 %v864_v15, %s8777_s19  ;;  %v838_v21 = vld [vmem:[%s8883_s22 + $0xe4] sm:$0xff]  ;;  %v839_v22 = vld [vmem:[%s8883_s22 + $0xec] sm:$0xff] }
  0xbf   : > { %1276 = vrot.lane.b32.xlu0 %v863_v41, %s8778_s20  ;;  %v1626_v29 = vsel %vm1618_vm5, %v1583_v23, %v1200_v18 }
  0xc0   : > { %v1307_v26 = vpop.permute.xlu1 %1306 }
  0xc1   : > { %v1263_v30 = vpop.permute.xlu0 %1262 }
  0xc2   : > { %v1669_v31 = vsel %vm1661_vm6, %v1626_v29, %v1263_v30  ;;  %1446 = vrot.lane.b32.xlu1 %v991_v24, %s8779_s21  ;;  %v902_v30 = vld [vmem:[%s8883_s22 + $0xe5] sm:$0xff] }
  0xc3   : > { %1383 = vrot.lane.b32.xlu0 %v929_v25, %s8780_s23  ;;  %v1712_v40 = vsel %vm1704_vm7, %v1669_v31, %v1307_v26  ;;  %v9229_v26 = vpack.c.bf16 %v839_v22, %v838_v21  ;;  %v903_v31 = vld [vmem:[%s8883_s22 + $0xed] sm:$0xff]  ;;  %v779_v22 = vld [vmem:[%s8883_s22 + $0xfb] sm:$0xff] }
  0xc4   : > { %v1433_v37 = vpop.permute.xlu1 %1432  ;;  %v931_v36 = vpack.c.bf16 %v903_v31, %v902_v30  ;;  %v778_v21 = vld [vmem:[%s8883_s22 + $0xf3] sm:$0xff] }
  0xc5   : > { %v1370_v41 = vpop.permute.xlu0 %1369  ;;  %v805_v30 = vpack.c.bf16 %v779_v22, %v778_v21 }
  0xc6   : > { %v1755_v42 = vsel %vm1747_vm8, %v1712_v40, %v1370_v41  ;;  %1108 = vrot.lane.b32.xlu1 %v736_v9, %s8776_s18  ;;  %v774_v9 = vld [vmem:[%s8883_s22 + $0xd3] sm:$0xff] }
  0xc7   : > { %v1798_v45 = vsel %vm1790_vm9, %v1755_v42, %v1433_v37  ;;  %1045 = vrot.lane.b32.xlu0 %v674_v33, %s8773_s28  ;;  %v803_v18 = vpack.c.bf16 %v775_v10, %v774_v9 }
  0xc8   : > { %8002 = vmatmul.mubr.msk.bf16.gmra.mrb[12].mxu0 %vm1876_vm10, %v1798_v45  ;;  %v1095_v49 = vpop.permute.xlu1 %1094  ;;  %v573_v45 = vld [vmem:[%s8883_s22 + $0x68] sm:$0xff] }
  0xc9   : > { %v1032_v50 = vpop.permute.xlu0 %1031  ;;  %8005 = vmatprep.mubr.msk.bf16.mxu0 %vm8774_vm1, %v13468_v1 }
  0xca   : > { %v1483_v51 = vsel %vm1468_vm2, %v605_v43, %v1032_v50  ;;  %1215 = vrot.lane.b32.xlu1 %v802_v44, %s8775_s17  ;;  %v572_v43 = vld [vmem:[%s8883_s22 + $0x60] sm:$0xff]  ;;  %v676_v44 = vpack.c.bf16 %v649_v39, %v648_v38  ;;  %v713_v50 = vld [vmem:[%s8883_s22 + $0xea] sm:$0xff] }
  0xcb   : > { %1152 = vrot.lane.b32.xlu0 %v737_v46, %s8772_s25  ;;  %v1542_v58 = vsel %vm1532_vm3, %v1483_v51, %v1095_v49  ;;  %v712_v49 = vld [vmem:[%s8883_s22 + $0xe2] sm:$0xff]  ;;  %v607_v54 = vpack.c.bf16 %v573_v45, %v572_v43  ;;  %v907_v43 = vld [vmem:[%s8883_s22 + $0x10d] sm:$0xff] }
  0xcc   : > { %v1202_v55 = vpop.permute.xlu1 %1201  ;;  %v968_v39 = vld [vmem:[%s8883_s22 + $0x106] sm:$0xff] }
  0xcd   : > { %v1139_v59 = vpop.permute.xlu0 %1138 }
  0xce   : > { %v1585_v60 = vsel %vm1575_vm4, %v1542_v58, %v1139_v59  ;;  %1322 = vrot.lane.b32.xlu1 %v865_v52, %s8777_s19  ;;  %v739_v58 = vpack.c.bf16 %v713_v50, %v712_v49  ;;  %v840_v59 = vld [vmem:[%s8883_s22 + $0xf4] sm:$0xff] }
  0xcf   : > { %1278 = vrot.lane.b32.xlu0 %v864_v15, %s8778_s20  ;;  %v1628_v3 = vsel %vm1618_vm5, %v1585_v60, %v1202_v55  ;;  %v841_v60 = vld [vmem:[%s8883_s22 + $0xfc] sm:$0xff]  ;;  %v652_v50 = vld [vmem:[%s8883_s22 + $0xf1] sm:$0xff] }
  0xd0   : > { %v1309_v63 = vpop.permute.xlu1 %1308  ;;  %v867_v0 = vpack.c.bf16 %v841_v60, %v840_v59  ;;  %v780_v59 = vld [vmem:[%s8883_s22 + $0x103] sm:$0xff]  ;;  %v781_v60 = vld [vmem:[%s8883_s22 + $0x10b] sm:$0xff] }
  0xd1   : > { %v1265_v4 = vpop.permute.xlu0 %1264 }
  0xd2   : > { %v1671_v5 = vsel %vm1661_vm6, %v1628_v3, %v1265_v4  ;;  %1448 = vrot.lane.b32.xlu1 %v992_v61, %s8779_s21  ;;  %v967_v3 = vld [vmem:[%s8883_s22 + $0xfe] sm:$0xff] }
  0xd3   : > { %1385 = vrot.lane.b32.xlu0 %v930_v62, %s8780_s23  ;;  %v1714_v14 = vsel %vm1704_vm7, %v1671_v5, %v1309_v63  ;;  %v904_v5 = vld [vmem:[%s8883_s22 + $0xf5] sm:$0xff]  ;;  %v994_v10 = vpack.c.bf16 %v967_v3, %v966_v2 }
  0xd4   : > { %v1435_v11 = vpop.permute.xlu1 %1434 }
  0xd5   : > { %v1372_v15 = vpop.permute.xlu0 %1371 }
  0xd6   : > { %v1757_v16 = vsel %vm1747_vm8, %v1714_v14, %v1372_v15  ;;  %1110 = vrot.lane.b32.xlu1 %v737_v46, %s8776_s18  ;;  %v776_v46 = vld [vmem:[%s8883_s22 + $0xe3] sm:$0xff] }
  0xd7   : > { %v1800_v19 = vsel %vm1790_vm9, %v1757_v16, %v1435_v11  ;;  %1047 = vrot.lane.b32.xlu0 %v675_v7, %s8773_s28  ;;  %v804_v55 = vpack.c.bf16 %v777_v47, %v776_v46  ;;  %v932_v11 = vpack.c.bf16 %v905_v6, %v904_v5  ;;  %v651_v14 = vld [vmem:[%s8883_s22 + $0xe9] sm:$0xff]  ;;  %v806_v5 = vpack.c.bf16 %v781_v60, %v780_v59 }
  0xd8   : > { %8006 = vmatmul.mubr.msk.bf16.gmra.mrb[16].mxu0 %vm1876_vm10, %v1800_v19  ;;  %v1097_v23 = vpop.permute.xlu1 %1096  ;;  %v677_v19 = vpack.c.bf16 %v651_v14, %v650_v13  ;;  %v970_v14 = vld [vmem:[%s8883_s22 + $0x116] sm:$0xff] }
  0xd9   : > { %v1034_v24 = vpop.permute.xlu0 %1033  ;;  %8009 = vmatprep.mubr.msk.bf16.mxu0 %vm8774_vm1, %v13468_v1 }
  0xda   : > { %v1486_v25 = vsel %vm1468_vm2, %v606_v17, %v1034_v24  ;;  %1217 = vrot.lane.b32.xlu1 %v803_v18, %s8775_s17  ;;  %v574_v18 = vld [vmem:[%s8883_s22 + $0x70] sm:$0xff] }
  0xdb   : > { %1154 = vrot.lane.b32.xlu0 %v738_v20, %s8772_s25  ;;  %v1544_v32 = vsel %vm1532_vm3, %v1486_v25, %v1097_v23  ;;  %v714_v24 = vld [vmem:[%s8883_s22 + $0xf2] sm:$0xff]  ;;  %v715_v25 = vld [vmem:[%s8883_s22 + $0xfa] sm:$0xff] }
  0xdc   : > { %v1204_v29 = vpop.permute.xlu1 %1203 }
  0xdd   : > { %v1141_v33 = vpop.permute.xlu0 %1140 }
  0xde   : > { %v1587_v34 = vsel %vm1575_vm4, %v1544_v32, %v1141_v33  ;;  %1324 = vrot.lane.b32.xlu1 %v9229_v26, %s8777_s19  ;;  %v740_v32 = vpack.c.bf16 %v715_v25, %v714_v24  ;;  %v842_v33 = vld [vmem:[%s8883_s22 + $0x104] sm:$0xff] }
  0xdf   : > { %1280 = vrot.lane.b32.xlu0 %v865_v52, %s8778_s20  ;;  %v1630_v40 = vsel %vm1618_vm5, %v1587_v34, %v1204_v29  ;;  %v843_v34 = vld [vmem:[%s8883_s22 + $0x10c] sm:$0xff]  ;;  %v654_v25 = vld [vmem:[%s8883_s22 + $0x101] sm:$0xff] }
  0xe0   : > { %v1311_v37 = vpop.permute.xlu1 %1310  ;;  %v868_v38 = vpack.c.bf16 %v843_v34, %v842_v33  ;;  %v782_v33 = vld [vmem:[%s8883_s22 + $0x113] sm:$0xff]  ;;  %v783_v34 = vld [vmem:[%s8883_s22 + $0x11b] sm:$0xff] }
  0xe1   : > { %v1267_v41 = vpop.permute.xlu0 %1266 }
  0xe2   : > { %v1673_v42 = vsel %vm1661_vm6, %v1630_v40, %v1267_v41  ;;  %1450 = vrot.lane.b32.xlu1 %v993_v35, %s8779_s21  ;;  %v969_v40 = vld [vmem:[%s8883_s22 + $0x10e] sm:$0xff] }
  0xe3   : > { %1387 = vrot.lane.b32.xlu0 %v931_v36, %s8780_s23  ;;  %v1716_v51 = vsel %vm1704_vm7, %v1673_v42, %v1311_v37  ;;  %v906_v42 = vld [vmem:[%s8883_s22 + $0x105] sm:$0xff]  ;;  %v995_v47 = vpack.c.bf16 %v969_v40, %v968_v39 }
  0xe4   : > { %v1437_v48 = vpop.permute.xlu1 %1436 }
  0xe5   : > { %v1374_v52 = vpop.permute.xlu0 %1373 }
  0xe6   : > { %v1759_v53 = vsel %vm1747_vm8, %v1716_v51, %v1374_v52  ;;  %1112 = vrot.lane.b32.xlu1 %v738_v20, %s8776_s18  ;;  %v575_v20 = vld [vmem:[%s8883_s22 + $0x78] sm:$0xff] }
  0xe7   : > { %v1802_v57 = vsel %vm1790_vm9, %v1759_v53, %v1437_v48  ;;  %1049 = vrot.lane.b32.xlu0 %v676_v44, %s8773_s28  ;;  %v608_v29 = vpack.c.bf16 %v575_v20, %v574_v18  ;;  %v933_v48 = vpack.c.bf16 %v907_v43, %v906_v42  ;;  %v653_v51 = vld [vmem:[%s8883_s22 + $0xf9] sm:$0xff]  ;;  %v807_v42 = vpack.c.bf16 %v783_v34, %v782_v33 }
  0xe8   : > { %8010 = vmatmul.mubr.msk.bf16.gmra.mrb[20].mxu0 %vm1876_vm10, %v1802_v57  ;;  %v1099_v61 = vpop.permute.xlu1 %1098  ;;  %v678_v57 = vpack.c.bf16 %v653_v51, %v652_v50  ;;  %v909_v18 = vld [vmem:[%s8883_s22 + $0x11d] sm:$0xff]  ;;  %v972_v51 = vld [vmem:[%s8883_s22 + $0x126] sm:$0xff] }
  0xe9   : > { %v1036_v62 = vpop.permute.xlu0 %1035  ;;  %8013 = vmatprep.mubr.msk.bf16.mxu0 %vm8774_vm1, %v13468_v1 }
  0xea   : > { %v1489_v63 = vsel %vm1468_vm2, %v607_v54, %v1036_v62  ;;  %1219 = vrot.lane.b32.xlu1 %v804_v55, %s8775_s17  ;;  %v576_v55 = vld [vmem:[%s8883_s22 + $0x80] sm:$0xff] }
  0xeb   : > { %1156 = vrot.lane.b32.xlu0 %v739_v58, %s8772_s25  ;;  %v1546_v7 = vsel %vm1532_vm3, %v1489_v63, %v1099_v61  ;;  %v716_v62 = vld [vmem:[%s8883_s22 + $0x102] sm:$0xff]  ;;  %v717_v63 = vld [vmem:[%s8883_s22 + $0x10a] sm:$0xff] }
  0xec   : > { %v1206_v4 = vpop.permute.xlu1 %1205 }
  0xed   : > { %v1143_v8 = vpop.permute.xlu0 %1142 }
  0xee   : > { %v1589_v9 = vsel %vm1575_vm4, %v1546_v7, %v1143_v8  ;;  %1326 = vrot.lane.b32.xlu1 %v867_v0, %s8777_s19  ;;  %v741_v7 = vpack.c.bf16 %v717_v63, %v716_v62  ;;  %v844_v8 = vld [vmem:[%s8883_s22 + $0x114] sm:$0xff] }
  0xef   : > { %1282 = vrot.lane.b32.xlu0 %v9229_v26, %s8778_s20  ;;  %v1632_v15 = vsel %vm1618_vm5, %v1589_v9, %v1206_v4  ;;  %v845_v9 = vld [vmem:[%s8883_s22 + $0x11c] sm:$0xff]  ;;  %v656_v63 = vld [vmem:[%s8883_s22 + $0x111] sm:$0xff] }
  0xf0   : > { %v1313_v12 = vpop.permute.xlu1 %1312  ;;  %v869_v13 = vpack.c.bf16 %v845_v9, %v844_v8  ;;  %v784_v8 = vld [vmem:[%s8883_s22 + $0x123] sm:$0xff]  ;;  %v785_v9 = vld [vmem:[%s8883_s22 + $0x12b] sm:$0xff] }
  0xf1   : > { %v1269_v16 = vpop.permute.xlu0 %1268 }
  0xf2   : > { %v1675_v17 = vsel %vm1661_vm6, %v1632_v15, %v1269_v16  ;;  %1452 = vrot.lane.b32.xlu1 %v994_v10, %s8779_s21  ;;  %v971_v15 = vld [vmem:[%s8883_s22 + $0x11e] sm:$0xff] }
  0xf3   : > { %1389 = vrot.lane.b32.xlu0 %v932_v11, %s8780_s23  ;;  %v1718_v26 = vsel %vm1704_vm7, %v1675_v17, %v1313_v12  ;;  %v908_v17 = vld [vmem:[%s8883_s22 + $0x115] sm:$0xff]  ;;  %v996_v22 = vpack.c.bf16 %v971_v15, %v970_v14 }
  0xf4   : > { %v1439_v23 = vpop.permute.xlu1 %1438 }
  0xf5   : > { %v1376_v27 = vpop.permute.xlu0 %1375 }
  0xf6   : > { %v1761_v28 = vsel %vm1747_vm8, %v1718_v26, %v1376_v27  ;;  %1114 = vrot.lane.b32.xlu1 %v739_v58, %s8776_s18  ;;  %v577_v58 = vld [vmem:[%s8883_s22 + $0x88] sm:$0xff] }
  0xf7   : > { %v1804_v31 = vsel %vm1790_vm9, %v1761_v28, %v1439_v23  ;;  %1051 = vrot.lane.b32.xlu0 %v677_v19, %s8773_s28  ;;  %v609_v4 = vpack.c.bf16 %v577_v58, %v576_v55  ;;  %v934_v23 = vpack.c.bf16 %v909_v18, %v908_v17  ;;  %v655_v26 = vld [vmem:[%s8883_s22 + $0x109] sm:$0xff]  ;;  %v808_v17 = vpack.c.bf16 %v785_v9, %v784_v8 }
  0xf8   : > { %8014 = vmatmul.mubr.msk.bf16.gmra.mrb[24].mxu0 %vm1876_vm10, %v1804_v31  ;;  %v1101_v35 = vpop.permute.xlu1 %1100  ;;  %v679_v31 = vpack.c.bf16 %v655_v26, %v654_v25  ;;  %v911_v55 = vld [vmem:[%s8883_s22 + $0x12d] sm:$0xff]  ;;  %v974_v26 = vld [vmem:[%s8883_s22 + $0x136] sm:$0xff] }
  0xf9   : > { %v1038_v36 = vpop.permute.xlu0 %1037  ;;  %8017 = vmatprep.mubr.msk.bf16.mxu0 %vm8774_vm1, %v13468_v1 }
  0xfa   : > { %v1492_v37 = vsel %vm1468_vm2, %v608_v29, %v1038_v36  ;;  %1221 = vrot.lane.b32.xlu1 %v805_v30, %s8775_s17  ;;  %v578_v30 = vld [vmem:[%s8883_s22 + $0x90] sm:$0xff] }
  0xfb   : > { %1158 = vrot.lane.b32.xlu0 %v740_v32, %s8772_s25  ;;  %v1548_v44 = vsel %vm1532_vm3, %v1492_v37, %v1101_v35  ;;  %v718_v36 = vld [vmem:[%s8883_s22 + $0x112] sm:$0xff]  ;;  %v719_v37 = vld [vmem:[%s8883_s22 + $0x11a] sm:$0xff] }
  0xfc   : > { %v1208_v41 = vpop.permute.xlu1 %1207 }
  0xfd   : > { %v1145_v45 = vpop.permute.xlu0 %1144 }
  0xfe   : > { %v1591_v46 = vsel %vm1575_vm4, %v1548_v44, %v1145_v45  ;;  %1328 = vrot.lane.b32.xlu1 %v868_v38, %s8777_s19  ;;  %v742_v44 = vpack.c.bf16 %v719_v37, %v718_v36  ;;  %v846_v45 = vld [vmem:[%s8883_s22 + $0x124] sm:$0xff] }
  0xff   : > { %1284 = vrot.lane.b32.xlu0 %v867_v0, %s8778_s20  ;;  %v1634_v52 = vsel %vm1618_vm5, %v1591_v46, %v1208_v41  ;;  %v847_v46 = vld [vmem:[%s8883_s22 + $0x12c] sm:$0xff]  ;;  %v658_v37 = vld [vmem:[%s8883_s22 + $0x121] sm:$0xff] }
 0x100   : > { %v1315_v49 = vpop.permute.xlu1 %1314  ;;  %v870_v50 = vpack.c.bf16 %v847_v46, %v846_v45  ;;  %v786_v45 = vld [vmem:[%s8883_s22 + $0x133] sm:$0xff]  ;;  %v787_v46 = vld [vmem:[%s8883_s22 + $0x13b] sm:$0xff] }
 0x101   : > { %v1271_v53 = vpop.permute.xlu0 %1270 }
 0x102   : > { %v1677_v54 = vsel %vm1661_vm6, %v1634_v52, %v1271_v53  ;;  %1454 = vrot.lane.b32.xlu1 %v995_v47, %s8779_s21  ;;  %v973_v52 = vld [vmem:[%s8883_s22 + $0x12e] sm:$0xff] }
 0x103   : > { %1391 = vrot.lane.b32.xlu0 %v933_v48, %s8780_s23  ;;  %v1720_v0 = vsel %vm1704_vm7, %v1677_v54, %v1315_v49  ;;  %v910_v54 = vld [vmem:[%s8883_s22 + $0x125] sm:$0xff]  ;;  %v997_v60 = vpack.c.bf16 %v973_v52, %v972_v51 }
 0x104   : > { %v1441_v61 = vpop.permute.xlu1 %1440 }
 0x105   : > { %v1378_v2 = vpop.permute.xlu0 %1377 }
 0x106   : > { %v1763_v3 = vsel %vm1747_vm8, %v1720_v0, %v1378_v2  ;;  %1116 = vrot.lane.b32.xlu1 %v740_v32, %s8776_s18  ;;  %v579_v32 = vld [vmem:[%s8883_s22 + $0x98] sm:$0xff] }
 0x107   : > { %v1806_v6 = vsel %vm1790_vm9, %v1763_v3, %v1441_v61  ;;  %1053 = vrot.lane.b32.xlu0 %v678_v57, %s8773_s28  ;;  %v610_v41 = vpack.c.bf16 %v579_v32, %v578_v30  ;;  %v935_v61 = vpack.c.bf16 %v911_v55, %v910_v54  ;;  %v657_v0 = vld [vmem:[%s8883_s22 + $0x119] sm:$0xff]  ;;  %v809_v54 = vpack.c.bf16 %v787_v46, %v786_v45 }
 0x108   : > { %8018 = vmatmul.mubr.msk.bf16.gmra.mrb[28].mxu0 %vm1876_vm10, %v1806_v6  ;;  %v1103_v10 = vpop.permute.xlu1 %1102  ;;  %v680_v6 = vpack.c.bf16 %v657_v0, %v656_v63  ;;  %v913_v30 = vld [vmem:[%s8883_s22 + $0x13d] sm:$0xff]  ;;  %v976_v0 = vld [vmem:[%s8883_s22 + $0x146] sm:$0xff] }
 0x109   : > { %v1040_v11 = vpop.permute.xlu0 %1039  ;;  %8021 = vmatprep.mubr.msk.bf16.mxu0 %vm8774_vm1, %v13468_v1 }
 0x10a   : > { %v1495_v12 = vsel %vm1468_vm2, %v609_v4, %v1040_v11  ;;  %1223 = vrot.lane.b32.xlu1 %v806_v5, %s8775_s17  ;;  %v580_v5 = vld [vmem:[%s8883_s22 + $0xa0] sm:$0xff] }
 0x10b   : > { %1160 = vrot.lane.b32.xlu0 %v741_v7, %s8772_s25  ;;  %v1550_v19 = vsel %vm1532_vm3, %v1495_v12, %v1103_v10  ;;  %v720_v11 = vld [vmem:[%s8883_s22 + $0x122] sm:$0xff]  ;;  %v721_v12 = vld [vmem:[%s8883_s22 + $0x12a] sm:$0xff] }
 0x10c   : > { %v1210_v16 = vpop.permute.xlu1 %1209 }
 0x10d   : > { %v1147_v20 = vpop.permute.xlu0 %1146 }
 0x10e   : > { %v1593_v21 = vsel %vm1575_vm4, %v1550_v19, %v1147_v20  ;;  %1330 = vrot.lane.b32.xlu1 %v869_v13, %s8777_s19  ;;  %v743_v19 = vpack.c.bf16 %v721_v12, %v720_v11  ;;  %v848_v20 = vld [vmem:[%s8883_s22 + $0x134] sm:$0xff] }
 0x10f   : > { %1286 = vrot.lane.b32.xlu0 %v868_v38, %s8778_s20  ;;  %v1636_v27 = vsel %vm1618_vm5, %v1593_v21, %v1210_v16  ;;  %v849_v21 = vld [vmem:[%s8883_s22 + $0x13c] sm:$0xff]  ;;  %v660_v12 = vld [vmem:[%s8883_s22 + $0x131] sm:$0xff] }
 0x110   : > { %v1317_v24 = vpop.permute.xlu1 %1316  ;;  %v871_v25 = vpack.c.bf16 %v849_v21, %v848_v20  ;;  %v788_v20 = vld [vmem:[%s8883_s22 + $0x143] sm:$0xff]  ;;  %v789_v21 = vld [vmem:[%s8883_s22 + $0x14b] sm:$0xff] }
 0x111   : > { %v1273_v28 = vpop.permute.xlu0 %1272 }
 0x112   : > { %v1679_v29 = vsel %vm1661_vm6, %v1636_v27, %v1273_v28  ;;  %1456 = vrot.lane.b32.xlu1 %v996_v22, %s8779_s21  ;;  %v975_v27 = vld [vmem:[%s8883_s22 + $0x13e] sm:$0xff] }
 0x113   : > { %1393 = vrot.lane.b32.xlu0 %v934_v23, %s8780_s23  ;;  %v1722_v38 = vsel %vm1704_vm7, %v1679_v29, %v1317_v24  ;;  %v912_v29 = vld [vmem:[%s8883_s22 + $0x135] sm:$0xff]  ;;  %v998_v34 = vpack.c.bf16 %v975_v27, %v974_v26 }
 0x114   : > { %v1443_v35 = vpop.permute.xlu1 %1442 }
 0x115   : > { %v1380_v39 = vpop.permute.xlu0 %1379 }
 0x116   : > { %v1765_v40 = vsel %vm1747_vm8, %v1722_v38, %v1380_v39  ;;  %1118 = vrot.lane.b32.xlu1 %v741_v7, %s8776_s18  ;;  %v581_v7 = vld [vmem:[%s8883_s22 + $0xa8] sm:$0xff] }
 0x117   : > { %v1808_v43 = vsel %vm1790_vm9, %v1765_v40, %v1443_v35  ;;  %1055 = vrot.lane.b32.xlu0 %v679_v31, %s8773_s28  ;;  %v611_v16 = vpack.c.bf16 %v581_v7, %v580_v5  ;;  %v936_v35 = vpack.c.bf16 %v913_v30, %v912_v29  ;;  %v659_v38 = vld [vmem:[%s8883_s22 + $0x129] sm:$0xff]  ;;  %v810_v29 = vpack.c.bf16 %v789_v21, %v788_v20 }
 0x118   : > { %8022 = vmatmul.mubr.msk.bf16.gmra.mrb[32].mxu0 %vm1876_vm10, %v1808_v43  ;;  %v1105_v47 = vpop.permute.xlu1 %1104  ;;  %v681_v43 = vpack.c.bf16 %v659_v38, %v658_v37  ;;  %v915_v5 = vld [vmem:[%s8883_s22 + $0x14d] sm:$0xff]  ;;  %v978_v38 = vld [vmem:[%s8883_s22 + $0x156] sm:$0xff] }
 0x119   : > { %v1042_v48 = vpop.permute.xlu0 %1041  ;;  %8025 = vmatprep.mubr.msk.bf16.mxu0 %vm8774_vm1, %v13468_v1 }
 0x11a   : > { %v1498_v49 = vsel %vm1468_vm2, %v610_v41, %v1042_v48  ;;  %1225 = vrot.lane.b32.xlu1 %v807_v42, %s8775_s17  ;;  %v582_v42 = vld [vmem:[%s8883_s22 + $0xb0] sm:$0xff] }
 0x11b   : > { %1162 = vrot.lane.b32.xlu0 %v742_v44, %s8772_s25  ;;  %v1552_v57 = vsel %vm1532_vm3, %v1498_v49, %v1105_v47  ;;  %v722_v48 = vld [vmem:[%s8883_s22 + $0x132] sm:$0xff]  ;;  %v723_v49 = vld [vmem:[%s8883_s22 + $0x13a] sm:$0xff] }
 0x11c   : > { %v1212_v53 = vpop.permute.xlu1 %1211 }
 0x11d   : > { %v1149_v58 = vpop.permute.xlu0 %1148 }
 0x11e   : > { %v1595_v59 = vsel %vm1575_vm4, %v1552_v57, %v1149_v58  ;;  %1332 = vrot.lane.b32.xlu1 %v870_v50, %s8777_s19  ;;  %v744_v57 = vpack.c.bf16 %v723_v49, %v722_v48  ;;  %v850_v58 = vld [vmem:[%s8883_s22 + $0x144] sm:$0xff] }
 0x11f   : > { %1288 = vrot.lane.b32.xlu0 %v869_v13, %s8778_s20  ;;  %v1638_v2 = vsel %vm1618_vm5, %v1595_v59, %v1212_v53  ;;  %v851_v59 = vld [vmem:[%s8883_s22 + $0x14c] sm:$0xff]  ;;  %v662_v49 = vld [vmem:[%s8883_s22 + $0x141] sm:$0xff] }
 0x120   : > { %v1319_v62 = vpop.permute.xlu1 %1318  ;;  %v872_v63 = vpack.c.bf16 %v851_v59, %v850_v58  ;;  %v790_v58 = vld [vmem:[%s8883_s22 + $0x153] sm:$0xff] }
 0x121   : > { %v1275_v3 = vpop.permute.xlu0 %1274 }
 0x122   : > { %v1681_v4 = vsel %vm1661_vm6, %v1638_v2, %v1275_v3  ;;  %1458 = vrot.lane.b32.xlu1 %v997_v60, %s8779_s21  ;;  %v977_v2 = vld [vmem:[%s8883_s22 + $0x14e] sm:$0xff] }
 0x123   : > { %1395 = vrot.lane.b32.xlu0 %v935_v61, %s8780_s23  ;;  %v1724_v13 = vsel %vm1704_vm7, %v1681_v4, %v1319_v62  ;;  %v914_v4 = vld [vmem:[%s8883_s22 + $0x145] sm:$0xff]  ;;  %v999_v9 = vpack.c.bf16 %v977_v2, %v976_v0  ;;  %v811_v2 = vpack.c.bf16 %v790_v58, %v790_v58 }
 0x124   : > { %v1445_v10 = vpop.permute.xlu1 %1444 }
 0x125   : > { %v1382_v14 = vpop.permute.xlu0 %1381 }
 0x126   : > { %v1767_v15 = vsel %vm1747_vm8, %v1724_v13, %v1382_v14  ;;  %1120 = vrot.lane.b32.xlu1 %v742_v44, %s8776_s18  ;;  %v583_v44 = vld [vmem:[%s8883_s22 + $0xb8] sm:$0xff] }
 0x127   : > { %v1810_v18 = vsel %vm1790_vm9, %v1767_v15, %v1445_v10  ;;  %1057 = vrot.lane.b32.xlu0 %v680_v6, %s8773_s28  ;;  %v612_v53 = vpack.c.bf16 %v583_v44, %v582_v42  ;;  %v937_v10 = vpack.c.bf16 %v915_v5, %v914_v4  ;;  %v661_v13 = vld [vmem:[%s8883_s22 + $0x139] sm:$0xff]  ;;  %v875_v5 = vld [vmem:[%s8883_s22 + $0x164] sm:$0xff] }
 0x128   : > { %8026 = vmatmul.mubr.msk.bf16.gmra.mrb[36].mxu0 %vm1876_vm10, %v1810_v18  ;;  %v1107_v22 = vpop.permute.xlu1 %1106  ;;  %v682_v18 = vpack.c.bf16 %v661_v13, %v660_v12  ;;  %v917_v42 = vld [vmem:[%s8883_s22 + $0x15d] sm:$0xff]  ;;  %v918_v13 = vld [vmem:[%s8883_s22 + $0x165] sm:$0xff] }
 0x129   : > { %v1044_v23 = vpop.permute.xlu0 %1043  ;;  %8029 = vmatprep.mubr.msk.bf16.mxu0 %vm8774_vm1, %v13468_v1 }
 0x12a   : > { %v1501_v24 = vsel %vm1468_vm2, %v611_v16, %v1044_v23  ;;  %1227 = vrot.lane.b32.xlu1 %v808_v17, %s8775_s17  ;;  %v584_v17 = vld [vmem:[%s8883_s22 + $0xc0] sm:$0xff] }
 0x12b   : > { %1164 = vrot.lane.b32.xlu0 %v743_v19, %s8772_s25  ;;  %v1554_v31 = vsel %vm1532_vm3, %v1501_v24, %v1107_v22  ;;  %v724_v23 = vld [vmem:[%s8883_s22 + $0x142] sm:$0xff]  ;;  %v746_v24 = vld [vmem:[%s8883_s22 + $0x14a] sm:$0xff] }
 0x12c   : > { %v1214_v28 = vpop.permute.xlu1 %1213 }
 0x12d   : > { %v1151_v32 = vpop.permute.xlu0 %1150 }
 0x12e   : > { %v1597_v33 = vsel %vm1575_vm4, %v1554_v31, %v1151_v32  ;;  %1334 = vrot.lane.b32.xlu1 %v871_v25, %s8777_s19  ;;  %v748_v31 = vpack.c.bf16 %v746_v24, %v724_v23  ;;  %v9461_v32 = vld [vmem:[%s8883_s22 + $0x154] sm:$0xff]  ;;  %v588_v24 = vld [vmem:[%s8883_s22 + $0xe0] sm:$0xff] }
 0x12f   : > { %1290 = vrot.lane.b32.xlu0 %v870_v50, %s8778_s20  ;;  %v1640_v39 = vsel %vm1618_vm5, %v1597_v33, %v1214_v28  ;;  %v874_v33 = vld [vmem:[%s8883_s22 + $0x15c] sm:$0xff] }
 0x130   : > { %v1321_v36 = vpop.permute.xlu1 %1320  ;;  %v876_v37 = vpack.c.bf16 %v874_v33, %v9461_v32  ;;  %v485_v33 = vld [vmem:[%s13451_s2 + $0x10] sm:$0xff] }
 0x131   : > { %v1277_v40 = vpop.permute.xlu0 %1276 }
 0x132   : > { %v1683_v41 = vsel %vm1661_vm6, %v1640_v39, %v1277_v40  ;;  %1460 = vrot.lane.b32.xlu1 %v998_v34, %s8779_s21  ;;  %v979_v39 = vld [vmem:[%s8883_s22 + $0x15e] sm:$0xff] }
 0x133   : > { %1397 = vrot.lane.b32.xlu0 %v936_v35, %s8780_s23  ;;  %v1726_v50 = vsel %vm1704_vm7, %v1683_v41, %v1321_v36  ;;  %v916_v41 = vld [vmem:[%s8883_s22 + $0x155] sm:$0xff]  ;;  %v1000_v46 = vpack.c.bf16 %v979_v39, %v978_v38  ;;  %v487_v39 = vld [vmem:[%s13451_s2 + $0x20] sm:$0xff] }
 0x134   : > { %v1447_v47 = vpop.permute.xlu1 %1446 }
 0x135   : > { %v1384_v51 = vpop.permute.xlu0 %1383 }
 0x136   : > { %v1769_v52 = vsel %vm1747_vm8, %v1726_v50, %v1384_v51  ;;  %1122 = vrot.lane.b32.xlu1 %v743_v19, %s8776_s18  ;;  %v585_v19 = vld [vmem:[%s8883_s22 + $0xc8] sm:$0xff] }
 0x137   : > { %v1812_v55 = vsel %vm1790_vm9, %v1769_v52, %v1447_v47  ;;  %1059 = vrot.lane.b32.xlu0 %v681_v43, %s8773_s28  ;;  %v613_v28 = vpack.c.bf16 %v585_v19, %v584_v17  ;;  %v938_v47 = vpack.c.bf16 %v917_v42, %v916_v41  ;;  %v488_v42 = vld [vmem:[%s13451_s2 + $0x28] sm:$0xff] }
 0x138   : > { %8030 = vmatmul.mubr.msk.bf16.gmra.mrb[40].mxu0 %vm1876_vm10, %v1812_v55  ;;  %v1109_v60 = vpop.permute.xlu1 %1108  ;;  %v586_v55 = vld [vmem:[%s8883_s22 + $0xd0] sm:$0xff] }
 0x139   : > { %v1046_v61 = vpop.permute.xlu0 %1045  ;;  %8033 = vmatprep.mubr.msk.bf16.mxu0 %vm8774_vm1, %v13468_v1 }
 0x13a   : > { %v1504_v62 = vsel %vm1468_vm2, %v612_v53, %v1046_v61  ;;  %1229 = vrot.lane.b32.xlu1 %v809_v54, %s8775_s17  ;;  %v745_v53 = vpack.c.bf16 %v724_v23, %v724_v23  ;;  %v683_v54 = vpack.c.bf16 %v662_v49, %v662_v49  ;;  %v484_v23 = vld [vmem:[%s13451_s2 + $0x8] sm:$0xff] }
 0x13b   : > { %1166 = vrot.lane.b32.xlu0 %v744_v57, %s8772_s25  ;;  %v1556_v6 = vsel %vm1532_vm3, %v1504_v62, %v1109_v60  ;;  %v747_v60 = vld [vmem:[%s8883_s22 + $0x152] sm:$0xff] }
 0x13c   : > { %v1216_v3 = vpop.permute.xlu1 %1215  ;;  %v749_v4 = vpack.c.bf16 %v747_v60, %v747_v60 }
 0x13d   : > { %v1153_v7 = vpop.permute.xlu0 %1152 }
 0x13e   : > { %v1599_v8 = vsel %vm1575_vm4, %v1556_v6, %v1153_v7  ;;  %1336 = vrot.lane.b32.xlu1 %v872_v63, %s8777_s19 }
 0x13f   : > { %1292 = vrot.lane.b32.xlu0 %v871_v25, %s8778_s20  ;;  %v1642_v14 = vsel %vm1618_vm5, %v1599_v8, %v1216_v3 }
 0x140   : > { %v1323_v11 = vpop.permute.xlu1 %1322 }
 0x141   : > { %v1279_v15 = vpop.permute.xlu0 %1278 }
 0x142   : > { %v1685_v16 = vsel %vm1661_vm6, %v1642_v14, %v1279_v15  ;;  %1462 = vrot.lane.b32.xlu1 %v999_v9, %s8779_s21  ;;  %v877_v9 = vpack.c.bf16 %v875_v5, %v875_v5 }
 0x143   : > { %1399 = vrot.lane.b32.xlu0 %v937_v10, %s8780_s23  ;;  %v1728_v25 = vsel %vm1704_vm7, %v1685_v16, %v1323_v11  ;;  %v873_v10 = vpack.c.bf16 %v9461_v32, %v9461_v32  ;;  %v980_v11 = vld [vmem:[%s8883_s22 + $0x166] sm:$0xff] }
 0x144   : > { %v1449_v22 = vpop.permute.xlu1 %1448  ;;  %v1001_v17 = vpack.c.bf16 %v980_v11, %v980_v11  ;;  %v496_v11 = vld [vmem:[%s13451_s2 + $0x68] sm:$0xff] }
 0x145   : > { %v1386_v26 = vpop.permute.xlu0 %1385 }
 0x146   : > { %v1771_v27 = vsel %vm1747_vm8, %v1728_v25, %v1386_v26  ;;  %1124 = vrot.lane.b32.xlu1 %v744_v57, %s8776_s18  ;;  %v587_v57 = vld [vmem:[%s8883_s22 + $0xd8] sm:$0xff]  ;;  %v589_v25 = vld [vmem:[%s8883_s22 + $0xe8] sm:$0xff] }
 0x147   : > { %v1814_v30 = vsel %vm1790_vm9, %v1771_v27, %v1449_v22  ;;  %1061 = vrot.lane.b32.xlu0 %v682_v18, %s8773_s28  ;;  %v614_v0 = vpack.c.bf16 %v587_v57, %v586_v55  ;;  %v939_v18 = vpack.c.bf16 %v918_v13, %v918_v13  ;;  %v483_v27 = vld [vmem:[%s13451_s2] sm:$0xff]  ;;  %v590_v55 = vld [vmem:[%s8883_s22 + $0xf0] sm:$0xff]  ;;  %v591_v57 = vld [vmem:[%s8883_s22 + $0xf8] sm:$0xff] }
 0x148   : > { %8034 = vmatmul.mubr.msk.bf16.gmra.mrb[44].mxu0 %vm1876_vm10, %v1814_v30  ;;  %v1111_v34 = vpop.permute.xlu1 %1110 }
 0x149   : > { %v1048_v35 = vpop.permute.xlu0 %1047  ;;  %8037 = vmatprep.mubr.msk.bf16.mxu0 %vm8774_vm1, %v13468_v1 }
 0x14a   : > { %v1507_v36 = vsel %vm1468_vm2, %v613_v28, %v1048_v35  ;;  %1231 = vrot.lane.b32.xlu1 %v810_v29, %s8775_s17  ;;  %v486_v35 = vld [vmem:[%s13451_s2 + $0x18] sm:$0xff] }
 0x14b   : > { %1168 = vrot.lane.b32.xlu0 %v748_v31, %s8772_s25  ;;  %v1558_v43 = vsel %vm1532_vm3, %v1507_v36, %v1111_v34  ;;  %v615_v31 = vpack.c.bf16 %v589_v25, %v588_v24  ;;  %v592_v24 = vld [vmem:[%s8883_s22 + $0x100] sm:$0xff]  ;;  %v593_v25 = vld [vmem:[%s8883_s22 + $0x108] sm:$0xff] }
 0x14c   : > { %v1218_v40 = vpop.permute.xlu1 %1217 }
 0x14d   : > { %v1155_v44 = vpop.permute.xlu0 %1154 }
 0x14e   : > { %v1601_v45 = vsel %vm1575_vm4, %v1558_v43, %v1155_v44  ;;  %1338 = vrot.lane.b32.xlu1 %v876_v37, %s8777_s19 }
 0x14f   : > { %1294 = vrot.lane.b32.xlu0 %v872_v63, %s8778_s20  ;;  %v1644_v50 = vsel %vm1618_vm5, %v1601_v45, %v1218_v40 }
 0x150   : > { %v1325_v48 = vpop.permute.xlu1 %1324 }
 0x151   : > { %v1281_v51 = vpop.permute.xlu0 %1280 }
 0x152   : > { %v1687_v52 = vsel %vm1661_vm6, %v1644_v50, %v1281_v51  ;;  %1464 = vrot.lane.b32.xlu1 %v1000_v46, %s8779_s21  ;;  %v490_v50 = vld [vmem:[%s13451_s2 + $0x38] sm:$0xff] }
 0x153   : > { %1401 = vrot.lane.b32.xlu0 %v938_v47, %s8780_s23  ;;  %v1730_v61 = vsel %vm1704_vm7, %v1687_v52, %v1325_v48  ;;  %v489_v48 = vld [vmem:[%s13451_s2 + $0x30] sm:$0xff] }
 0x154   : > { %v1451_v59 = vpop.permute.xlu1 %1450 }
 0x155   : > { %v1388_v62 = vpop.permute.xlu0 %1387 }
 0x156   : > { %v1773_v63 = vsel %vm1747_vm8, %v1730_v61, %v1388_v62  ;;  %1126 = vrot.lane.b32.xlu1 %v745_v53, %s8776_s18 }
 0x157   : > { %v1816_v3 = vsel %vm1790_vm9, %v1773_v63, %v1451_v59  ;;  %1063 = vrot.lane.b32.xlu0 %v683_v54, %s8773_s28  ;;  %v491_v54 = vld [vmem:[%s13451_s2 + $0x40] sm:$0xff]  ;;  %v492_v59 = vld [vmem:[%s13451_s2 + $0x48] sm:$0xff]  ;;  %v616_v63 = vpack.c.bf16 %v591_v57, %v590_v55  ;;  %v594_v57 = vld [vmem:[%s8883_s22 + $0x110] sm:$0xff]  ;;  %s476_s28 = scalar_lea.vmem %s13450_s1, %s14184_s30 }
 0x158   : > { %8038 = vmatmul.mubr.msk.bf16.gmra.mrb[48].mxu0 %vm1876_vm10, %v1816_v3  ;;  %v1113_v6 = vpop.permute.xlu1 %1112 }
 0x159   : > { %v1050_v7 = vpop.permute.xlu0 %1049  ;;  %8041 = vmatprep.mubr.msk.bf16.mxu0 %vm8774_vm1, %v13468_v1 }
 0x15a   : > { %v1510_v8 = vsel %vm1468_vm2, %v614_v0, %v1050_v7  ;;  %1233 = vrot.lane.b32.xlu1 %v811_v2, %s8775_s17  ;;  %v493_v2 = vld [vmem:[%s13451_s2 + $0x50] sm:$0xff] }
 0x15b   : > { %1170 = vrot.lane.b32.xlu0 %v749_v4, %s8772_s25  ;;  %v1560_v14 = vsel %vm1532_vm3, %v1510_v8, %v1113_v6  ;;  %v494_v4 = vld [vmem:[%s13451_s2 + $0x58] sm:$0xff]  ;;  %v495_v8 = vld [vmem:[%s13451_s2 + $0x60] sm:$0xff] }
 0x15c   : > { %v1220_v12 = vpop.permute.xlu1 %1219 }
 0x15d   : > { %v1157_v15 = vpop.permute.xlu0 %1156 }
 0x15e   : > { %v1603_v16 = vsel %vm1575_vm4, %v1560_v14, %v1157_v15  ;;  %1340 = vrot.lane.b32.xlu1 %v877_v9, %s8777_s19 }
 0x15f   : > { %1296 = vrot.lane.b32.xlu0 %v873_v10, %s8778_s20  ;;  %v1646_v20 = vsel %vm1618_vm5, %v1603_v16, %v1220_v12 }
 0x160   : > { %v1327_v19 = vpop.permute.xlu1 %1326 }
 0x161   : > { %v1283_v21 = vpop.permute.xlu0 %1282 }
 0x162   : > { %v1689_v22 = vsel %vm1661_vm6, %v1646_v20, %v1283_v21  ;;  %1466 = vrot.lane.b32.xlu1 %v1001_v17, %s8779_s21  ;;  %v497_v17 = vld [vmem:[%s13451_s2 + $0x70] sm:$0xff] }
 0x163   : > { %1403 = vrot.lane.b32.xlu0 %v939_v18, %s8780_s23  ;;  %v1732_v28 = vsel %vm1704_vm7, %v1689_v22, %v1327_v19  ;;  %v498_v19 = vld [vmem:[%s13451_s2 + $0x78] sm:$0xff] }
 0x164   : > { %v1453_v26 = vpop.permute.xlu1 %1452 }
 0x165   : > { %v1390_v29 = vpop.permute.xlu0 %1389 }
 0x166   : > { %v1775_v30 = vsel %vm1747_vm8, %v1732_v28, %v1390_v29  ;;  %2132 = vperm.xlu1 %8436, %v484_v23   ;;  %v499_v23 = vld [vmem:[%s13451_s2 + $0x80] sm:$0xff] }
 0x167   : > { %v1818_v32 = vsel %vm1790_vm9, %v1775_v30, %v1453_v26  ;;  %2127 = vperm.xlu0 %8435, %v483_v27   ;;  %v500_v27 = vld [vmem:[%s13451_s2 + $0x88] sm:$0xff] }
 0x168   : > { %8042 = vmatmul.mubr.msk.bf16.gmra.mrb[52].mxu0 %vm1876_vm10, %v1818_v32  ;;  %v1115_v34 = vpop.permute.xlu1 %1114 }
 0x169   : > { %v1052_v36 = vpop.permute.xlu0 %1051  ;;  %8045 = vmatprep.mubr.msk.bf16.mxu0 %vm8774_vm1, %v13468_v1 }
 0x16a   : > { %v1513_v37 = vsel %vm1468_vm2, %v615_v31, %v1052_v36  ;;  %2137 = vperm.xlu1 %8436, %v485_v33   ;;  %v617_v31 = vpack.c.bf16 %v593_v25, %v592_v24  ;;  %v501_v33 = vld [vmem:[%s13451_s2 + $0x90] sm:$0xff] }
 0x16b   : > { %2142 = vperm.xlu0 %8435, %v486_v35   ;;  %v9533_v38 = vpop.f32.mrb[0].mxu0  ;;  %v1562_v43 = vsel %vm1532_vm3, %v1513_v37, %v1115_v34  ;;  %v502_v35 = vld [vmem:[%s13451_s2 + $0x98] sm:$0xff] }
 0x16c   : > { %v7991_v40 = vpop.f32.mrb[1].mxu0  ;;  %v1222_v41 = vpop.permute.xlu1 %1221 }
 0x16d   : > { %v1159_v44 = vpop.permute.xlu0 %1158  ;;  %v9542_v45 = vpop.f32.mrb[2].mxu0  ;;  %v503_v40 = vld [vmem:[%s13451_s2 + $0xa0] sm:$0xff] }
 0x16e   : > { %v1605_v46 = vsel %vm1575_vm4, %v1562_v43, %v1159_v44  ;;  %v7992_v47 = vpop.f32.mrb[3].mxu0  ;;  %2147 = vperm.xlu1 %8436, %v487_v39   ;;  %v504_v43 = vld [vmem:[%s13451_s2 + $0xa8] sm:$0xff] }
 0x16f   : > { %2152 = vperm.xlu0 %8435, %v488_v42   ;;  %v1648_v51 = vsel %vm1618_vm5, %v1605_v46, %v1222_v41 }
 0x170   : > { %v1329_v49 = vpop.permute.xlu1 %1328 }
 0x171   : > { %v1285_v52 = vpop.permute.xlu0 %1284 }
 0x172   : > { %v1691_v53 = vsel %vm1661_vm6, %v1648_v51, %v1285_v52  ;;  %2157 = vperm.xlu1 %8436, %v489_v48   ;;  %v506_v52 = vld [vmem:[%s13451_s2 + $0xb8] sm:$0xff] }
 0x173   : > { %2162 = vperm.xlu0 %8435, %v490_v50   ;;  %v1734_v60 = vsel %vm1704_vm7, %v1691_v53, %v1329_v49  ;;  %v505_v50 = vld [vmem:[%s13451_s2 + $0xb0] sm:$0xff] }
 0x174   : > { %v1455_v58 = vpop.permute.xlu1 %1454 }
 0x175   : > { %v1392_v61 = vpop.permute.xlu0 %1391 }
 0x176   : > { %v1777_v62 = vsel %vm1747_vm8, %v1734_v60, %v1392_v61  ;;  %2167 = vperm.xlu1 %8436, %v491_v54   ;;  %v508_v61 = vld [vmem:[%s13451_s2 + $0xc8] sm:$0xff] }
 0x177   : > { %v1820_v0 = vsel %vm1790_vm9, %v1777_v62, %v1455_v58  ;;  %2172 = vperm.xlu0 %8435, %v492_v59   ;;  %v595_v58 = vld [vmem:[%s8883_s22 + $0x118] sm:$0xff]  ;;  %v507_v59 = vld [vmem:[%s13451_s2 + $0xc0] sm:$0xff] }
 0x178   : > { %8046 = vmatmul.mubr.msk.bf16.gmra.mrb[56].mxu0 %vm1876_vm10, %v1820_v0  ;;  %v1117_v3 = vpop.permute.xlu1 %1116 }
 0x179   : > { %v1054_v5 = vpop.permute.xlu0 %1053  ;;  %8049 = vmatprep.mubr.msk.bf16.mxu0 %vm8774_vm1, %v13468_v1 }
 0x17a   : > { %v1516_v6 = vsel %vm1468_vm2, %v616_v63, %v1054_v5  ;;  %2177 = vperm.xlu1 %8436, %v493_v2   ;;  %v618_v2 = vpack.c.bf16 %v595_v58, %v594_v57  ;;  %v521_v57 = vld [vmem:[%s13451_s2 + $0x130] sm:$0xff] }
 0x17b   : > { %2182 = vperm.xlu0 %8435, %v494_v4   ;;  %v9574_v7 = vpop.f32.mrb[4].mxu0  ;;  %v1564_v12 = vsel %vm1532_vm3, %v1516_v6, %v1117_v3  ;;  %v509_v4 = vld [vmem:[%s13451_s2 + $0xd0] sm:$0xff]  ;;  %v510_v6 = vld [vmem:[%s13451_s2 + $0xd8] sm:$0xff] }
 0x17c   : > { %v7995_v9 = vpop.f32.mrb[5].mxu0  ;;  %v1224_v10 = vpop.permute.xlu1 %1223 }
 0x17d   : > { %v1161_v13 = vpop.permute.xlu0 %1160  ;;  %v9583_v14 = vpop.f32.mrb[6].mxu0 }
 0x17e   : > { %v1607_v15 = vsel %vm1575_vm4, %v1564_v12, %v1161_v13  ;;  %v7996_v16 = vpop.f32.mrb[7].mxu0  ;;  %2187 = vperm.xlu1 %8436, %v495_v8  }
 0x17f   : > { %2192 = vperm.xlu0 %8435, %v496_v11   ;;  %v1650_v20 = vsel %vm1618_vm5, %v1607_v15, %v1224_v10  ;;  %v511_v11 = vld [vmem:[%s13451_s2 + $0xe0] sm:$0xff]  ;;  %v512_v15 = vld [vmem:[%s13451_s2 + $0xe8] sm:$0xff] }
 0x180   : > { %v1331_v18 = vpop.permute.xlu1 %1330 }
 0x181   : > { %v1287_v21 = vpop.permute.xlu0 %1286 }
 0x182   : > { %v1693_v22 = vsel %vm1661_vm6, %v1650_v20, %v1287_v21  ;;  %2197 = vperm.xlu1 %8436, %v497_v17   ;;  %v513_v21 = vld [vmem:[%s13451_s2 + $0xf0] sm:$0xff] }
 0x183   : > { %2202 = vperm.xlu0 %8435, %v498_v19   ;;  %v1736_v28 = vsel %vm1704_vm7, %v1693_v22, %v1331_v18 }
 0x184   : > { %v1457_v26 = vpop.permute.xlu1 %1456 }
 0x185   : > { %v1394_v29 = vpop.permute.xlu0 %1393 }
 0x186   : > { %v1779_v30 = vsel %vm1747_vm8, %v1736_v28, %v1394_v29  ;;  %2207 = vperm.xlu1 %8436, %v499_v23   ;;  %v514_v23 = vld [vmem:[%s13451_s2 + $0xf8] sm:$0xff]  ;;  %v597_v28 = vld [vmem:[%s8883_s22 + $0x128] sm:$0xff]  ;;  %v515_v29 = vld [vmem:[%s13451_s2 + $0x100] sm:$0xff] }
 0x187   : > { %v1822_v32 = vsel %vm1790_vm9, %v1779_v30, %v1457_v26  ;;  %2212 = vperm.xlu0 %8435, %v500_v27   ;;  %v596_v27 = vld [vmem:[%s8883_s22 + $0x120] sm:$0xff] }
 0x188   : > { %8050 = vmatmul.mubr.msk.bf16.gmra.mrb[60].mxu0 %vm1876_vm10, %v1822_v32  ;;  %v1119_v34 = vpop.permute.xlu1 %1118 }
 0x189   : > { %v1056_v36 = vpop.permute.xlu0 %1055  ;;  %8053 = vmatprep.mubr.msk.bf16.mxu0 %vm8774_vm1, %v13468_v1 }
 0x18a   : > { %v1519_v37 = vsel %vm1468_vm2, %v617_v31, %v1056_v36  ;;  %2217 = vperm.xlu1 %8436, %v501_v33   ;;  %v516_v31 = vld [vmem:[%s13451_s2 + $0x108] sm:$0xff] }
 0x18b   : > { %2222 = vperm.xlu0 %8435, %v502_v35   ;;  %v9615_v39 = vpop.f32.mrb[8].mxu0  ;;  %v1566_v44 = vsel %vm1532_vm3, %v1519_v37, %v1119_v34  ;;  %v619_v35 = vpack.c.bf16 %v597_v28, %v596_v27  ;;  %v517_v37 = vld [vmem:[%s13451_s2 + $0x110] sm:$0xff]  ;;  %v600_v28 = vld [vmem:[%s8883_s22 + $0x140] sm:$0xff] }
 0x18c   : > { %v7999_v41 = vpop.f32.mrb[9].mxu0  ;;  %v1226_v42 = vpop.permute.xlu1 %1225 }
 0x18d   : > { %v1163_v46 = vpop.permute.xlu0 %1162  ;;  %v9624_v47 = vpop.f32.mrb[10].mxu0  ;;  %v518_v41 = vld [vmem:[%s13451_s2 + $0x118] sm:$0xff] }
 0x18e   : > { %v1609_v48 = vsel %vm1575_vm4, %v1566_v44, %v1163_v46  ;;  %v8000_v49 = vpop.f32.mrb[11].mxu0  ;;  %2227 = vperm.xlu1 %8436, %v503_v40   ;;  %v519_v46 = vld [vmem:[%s13451_s2 + $0x120] sm:$0xff] }
 0x18f   : > { %2232 = vperm.xlu0 %8435, %v504_v43   ;;  %v1652_v53 = vsel %vm1618_vm5, %v1609_v48, %v1226_v42 }
 0x190   : > { %v1333_v51 = vpop.permute.xlu1 %1332 }
 0x191   : > { %v1289_v54 = vpop.permute.xlu0 %1288 }
 0x192   : > { %v1695_v55 = vsel %vm1661_vm6, %v1652_v53, %v1289_v54  ;;  %2237 = vperm.xlu1 %8436, %v505_v50   ;;  %v520_v50 = vld [vmem:[%s13451_s2 + $0x128] sm:$0xff] }
 0x193   : > { %2242 = vperm.xlu0 %8435, %v506_v52   ;;  %v1738_v62 = vsel %vm1704_vm7, %v1695_v55, %v1333_v51 }
 0x194   : > { %v1459_v60 = vpop.permute.xlu1 %1458 }
 0x195   : > { %v1396_v63 = vpop.permute.xlu0 %1395 }
 0x196   : > { %v1781_v0 = vsel %vm1747_vm8, %v1738_v62, %v1396_v63  ;;  %2247 = vperm.xlu1 %8436, %v507_v59   ;;  %v522_v59 = vld [vmem:[%s13451_s2 + $0x138] sm:$0xff]  ;;  %v598_v63 = vld [vmem:[%s8883_s22 + $0x130] sm:$0xff] }
 0x197   : > { %v1824_v3 = vsel %vm1790_vm9, %v1781_v0, %v1459_v60  ;;  %2252 = vperm.xlu0 %8435, %v508_v61   ;;  %v599_v0 = vld [vmem:[%s8883_s22 + $0x138] sm:$0xff] }
 0x198   : > { %8054 = vmatmul.mubr.msk.bf16.gmra.mrb[64].mxu0 %vm1876_vm10, %v1824_v3  ;;  %v1121_v5 = vpop.permute.xlu1 %1120 }
 0x199   : > { %v1058_v8 = vpop.permute.xlu0 %1057  ;;  %8057 = vmatprep.mubr.msk.bf16.mxu0 %vm8774_vm1, %v13468_v1 }
 0x19a   : > { %v1522_v9 = vsel %vm1468_vm2, %v618_v2, %v1058_v8  ;;  %2257 = vperm.xlu1 %8436, %v509_v4   ;;  %v523_v2 = vld [vmem:[%s13451_s2 + $0x140] sm:$0xff]  ;;  %v620_v8 = vpack.c.bf16 %v599_v0, %v598_v63 }
 0x19b   : > { %v9656_v10 = vpop.f32.mrb[12].mxu0  ;;  %2262 = vperm.xlu0 %8435, %v510_v6   ;;  %v1568_v16 = vsel %vm1532_vm3, %v1522_v9, %v1121_v5 }
 0x19c   : > { %v8003_v12 = vpop.f32.mrb[13].mxu0  ;;  %v1228_v13 = vpop.permute.xlu1 %1227 }
 0x19d   : > { %v1165_v17 = vpop.permute.xlu0 %1164  ;;  %v9665_v18 = vpop.f32.mrb[14].mxu0 }
 0x19e   : > { %v1611_v19 = vsel %vm1575_vm4, %v1568_v16, %v1165_v17  ;;  %v8004_v20 = vpop.f32.mrb[15].mxu0  ;;  %2267 = vperm.xlu1 %8436, %v511_v11  }
 0x19f   : > { %2272 = vperm.xlu0 %8435, %v512_v15   ;;  %v1654_v24 = vsel %vm1618_vm5, %v1611_v19, %v1228_v13 }
 0x1a0   : > { %v1335_v22 = vpop.permute.xlu1 %1334 }
 0x1a1   : > { %v1291_v25 = vpop.permute.xlu0 %1290 }
 0x1a2   : > { %v1697_v26 = vsel %vm1661_vm6, %v1654_v24, %v1291_v25  ;;  %2277 = vperm.xlu1 %8436, %v513_v21  }
 0x1a3   : > { %2282 = vperm.xlu0 %8435, %v514_v23   ;;  %v1740_v32 = vsel %vm1704_vm7, %v1697_v26, %v1335_v22 }
 0x1a4   : > { %v1461_v30 = vpop.permute.xlu1 %1460 }
 0x1a5   : > { %v1398_v33 = vpop.permute.xlu0 %1397 }
 0x1a6   : > { %v1783_v34 = vsel %vm1747_vm8, %v1740_v32, %v1398_v33  ;;  %2287 = vperm.xlu1 %8436, %v515_v29   ;;  %v621_v33 = vpack.c.bf16 %v600_v28, %v600_v28 }
 0x1a7   : > { %v1826_v36 = vsel %vm1790_vm9, %v1783_v34, %v1461_v30  ;;  %2292 = vperm.xlu0 %8435, %v516_v31  }
 0x1a8   : > { %8058 = vmatmul.mubr.msk.bf16.gmra.mrb[68].mxu0 %vm1876_vm10, %v1826_v36  ;;  %v1123_v40 = vpop.permute.xlu1 %1122 }
 0x1a9   : > { %v1060_v42 = vpop.permute.xlu0 %1059  ;;  %8061 = vmatprep.mubr.msk.bf16.mxu0 %vm8774_vm1, %v13468_v1 }
 0x1aa   : > { %v1525_v43 = vsel %vm1468_vm2, %v619_v35, %v1060_v42  ;;  %2297 = vperm.xlu1 %8436, %v517_v37  }
 0x1ab   : > { %v9697_v44 = vpop.f32.mrb[16].mxu0  ;;  %2302 = vperm.xlu0 %8435, %v518_v41   ;;  %v1570_v51 = vsel %vm1532_vm3, %v1525_v43, %v1123_v40 }
 0x1ac   : > { %v8007_v48 = vpop.f32.mrb[17].mxu0  ;;  %v1230_v49 = vpop.permute.xlu1 %1229 }
 0x1ad   : > { %v1167_v52 = vpop.permute.xlu0 %1166  ;;  %v9706_v53 = vpop.f32.mrb[18].mxu0 }
 0x1ae   : > { %v1613_v54 = vsel %vm1575_vm4, %v1570_v51, %v1167_v52  ;;  %v8008_v55 = vpop.f32.mrb[19].mxu0  ;;  %2307 = vperm.xlu1 %8436, %v519_v46  }
 0x1af   : > { %2312 = vperm.xlu0 %8435, %v520_v50   ;;  %v1656_v60 = vsel %vm1618_vm5, %v1613_v54, %v1230_v49 }
 0x1b0   : > { %v1337_v58 = vpop.permute.xlu1 %1336 }
 0x1b1   : > { %v1293_v61 = vpop.permute.xlu0 %1292 }
 0x1b2   : > { %v1699_v62 = vsel %vm1661_vm6, %v1656_v60, %v1293_v61  ;;  %2317 = vperm.xlu1 %8436, %v521_v57  }
 0x1b3   : > { %2322 = vperm.xlu0 %8435, %v522_v59   ;;  %v1742_v4 = vsel %vm1704_vm7, %v1699_v62, %v1337_v58 }
 0x1b4   : > { %v1463_v3 = vpop.permute.xlu1 %1462 }
 0x1b5   : > { %v1400_v5 = vpop.permute.xlu0 %1399 }
 0x1b6   : > { %v1785_v6 = vsel %vm1747_vm8, %v1742_v4, %v1400_v5  ;;  %2327 = vperm.xlu1 %8436, %v523_v2  }
 0x1b7   : > { %v1828_v9 = vsel %vm1790_vm9, %v1785_v6, %v1463_v3 }
 0x1b8   : > { %8062 = vmatmul.mubr.msk.bf16.gmra.mrb[72].mxu0 %vm1876_vm10, %v1828_v9  ;;  %v1125_v11 = vpop.permute.xlu1 %1124 }
 0x1b9   : > { %v1062_v12 = vpop.permute.xlu0 %1061  ;;  %8065 = vmatprep.mubr.msk.bf16.mxu0 %vm8774_vm1, %v13468_v1 }
 0x1ba   : > { %v1528_v13 = vsel %vm1468_vm2, %v620_v8, %v1062_v12 }
 0x1bb   : > { %v9729_v15 = vpop.f32.mrb[20].mxu0  ;;  %v1572_v19 = vsel %vm1532_vm3, %v1528_v13, %v1125_v11 }
 0x1bc   : > { %v8011_v16 = vpop.f32.mrb[21].mxu0  ;;  %v1232_v17 = vpop.permute.xlu1 %1231 }
 0x1bd   : > { %v1169_v20 = vpop.permute.xlu0 %1168  ;;  %v9732_v21 = vpop.f32.mrb[22].mxu0 }
 0x1be   : > { %v1615_v22 = vsel %vm1575_vm4, %v1572_v19, %v1169_v20  ;;  %v8012_v23 = vpop.f32.mrb[23].mxu0 }
 0x1bf   : > { %v1658_v25 = vsel %vm1618_vm5, %v1615_v22, %v1232_v17 }
 0x1c0   : > { %v1339_v24 = vpop.permute.xlu1 %1338 }
 0x1c1   : > { %v1295_v26 = vpop.permute.xlu0 %1294 }
 0x1c2   : > { %v1701_v27 = vsel %vm1661_vm6, %v1658_v25, %v1295_v26  ;;  %v9782_v26 = vld [vmem:[%s13453_s4] ss:$0 sm:$0xff] }
 0x1c3   : > { %v1744_v30 = vsel %vm1704_vm7, %v1701_v27, %v1339_v24  ;;  %v9788_v28 = vadd.f32 %v9782_v26, %v9533_v38 }
 0x1c4   : > { %v1465_v29 = vpop.permute.xlu1 %1464 }
 0x1c5   : > { %v1402_v31 = vpop.permute.xlu0 %1401 }
 0x1c6   : > { %v1787_v32 = vsel %vm1747_vm8, %v1744_v30, %v1402_v31  ;;  %v9798_v31 = vadd.f32 %v9782_v26, %v9574_v7 }
 0x1c7   : > { %v1830_v34 = vsel %vm1790_vm9, %v1787_v32, %v1465_v29  ;;  %v9792_v29 = vadd.f32 %v9782_v26, %v9542_v45 }
 0x1c8   : > { %8066 = vmatmul.mubr.msk.bf16.gmra.mrb[76].mxu0 %vm1876_vm10, %v1830_v34  ;;  %v1127_v35 = vpop.permute.xlu1 %1126 }
 0x1c9   : > { %v1064_v36 = vpop.permute.xlu0 %1063  ;;  %8069 = vmatprep.mubr.msk.bf16.mxu0 %vm8774_vm1, %v13468_v1 }
 0x1ca   : > { %v1531_v37 = vsel %vm1468_vm2, %v621_v33, %v1064_v36  ;;  %v9812_v36 = vadd.f32 %v9782_v26, %v9583_v14 }
 0x1cb   : > { %v9745_v40 = vpop.f32.mrb[24].mxu0  ;;  %v1574_v43 = vsel %vm1532_vm3, %v1531_v37, %v1127_v35 }
 0x1cc   : > { %v8015_v41 = vpop.f32.mrb[25].mxu0  ;;  %v1234_v42 = vpop.permute.xlu1 %1233 }
 0x1cd   : > { %v1171_v46 = vpop.permute.xlu0 %1170  ;;  %v9748_v48 = vpop.f32.mrb[26].mxu0 }
 0x1ce   : > { %v1617_v49 = vsel %vm1575_vm4, %v1574_v43, %v1171_v46  ;;  %v8016_v50 = vpop.f32.mrb[27].mxu0  ;;  %v9821_v43 = vadd.f32 %v9782_v26, %v9615_v39  ;;  %v9834_v39 = vadd.f32 %v9782_v26, %v9624_v47  ;;  %vm4140_vm4 = vsmask.f32 7424 }
 0x1cf   : > { %v1660_v52 = vsel %vm1618_vm5, %v1617_v49, %v1234_v42 }
 0x1d0   : > { %v1341_v51 = vpop.permute.xlu1 %1340 }
 0x1d1   : > { %v1297_v54 = vpop.permute.xlu0 %1296 }
 0x1d2   : > { %v1703_v55 = vsel %vm1661_vm6, %v1660_v52, %v1297_v54  ;;  %vm5002_vm6 = vcmask 654336  }
 0x1d3   : > { %v1746_v58 = vsel %vm1704_vm7, %v1703_v55, %v1341_v51 }
 0x1d4   : > { %v1467_v57 = vpop.permute.xlu1 %1466 }
 0x1d5   : > { %v1404_v59 = vpop.permute.xlu0 %1403 }
 0x1d6   : > { %v1789_v60 = vsel %vm1747_vm8, %v1746_v58, %v1404_v59  ;;  %vm5039_vm8 = vcmask 785408  }
 0x1d7   : > { %v1832_v61 = vsel %vm1790_vm9, %v1789_v60, %v1467_v57  ;;  %v9841_v60 = vadd.f32 %v9782_v26, %v9656_v10 }
 0x1d8   : > { %8070 = vmatmul.mubr.msk.bf16.gmra.mrb[80].mxu0 %vm1876_vm10, %v1832_v61  ;;  %vm5076_vm10 = vcmask 916480  }
 0x1db   : > { %v9757_v62 = vpop.f32.mrb[28].mxu0 }
 0x1dc   : > { %v8019_v63 = vpop.f32.mrb[29].mxu0 }
 0x1dd   : > { %v9759_v0 = vpop.f32.mrb[30].mxu0 }
 0x1de   : > { %v8020_v2 = vpop.f32.mrb[31].mxu0 }
 0x1e5   : > { %v9775_v23 = vpop.permute.xlu1 %2132 }
 0x1e6   : > { %13703 = vst [vmem:[#allocation2_spill] sm:$0xff] %v9775_v23  ;;  %v9784_v27 = vpop.permute.xlu0 %2127  ;;  %v2331_v32 = vmul.f32 %v9775_v23, %v9792_v29 }
 0x1e7   : > { %13704 = vst [vmem:[#allocation3_spill] sm:$0xff] %v9784_v27  ;;  %v2330_v33 = vmul.f32 %v9784_v27, %v9788_v28 }
 0x1e8   : > { %v2372_v34 = vsel %vm1532_vm3, %v2331_v32, 0.0 }
 0x1e9   : > { %v9794_v30 = vpop.permute.xlu1 %2137  ;;  %v2371_v45 = vsel %vm1532_vm3, %v2330_v33, 0.0 }
 0x1ea   : > { %13705 = vst [vmem:[#allocation4_spill] sm:$0xff] %v9794_v30  ;;  %v2332_v38 = vmul.f32 %v9794_v30, %v9798_v31  ;;  %v9808_v35 = vpop.permute.xlu0 %2142  ;;  %v2373_v37 = vadd.f32 %v2372_v34, %v2371_v45  ;;  %v13466_v45 = vmov 0.0|0.0  }
 0x1eb   : > { %v9761_v3 = vpop.f32.mrb[32].mxu0  ;;  %13706 = vst [vmem:[#allocation5_spill] sm:$0xff] %v9808_v35  ;;  %v2333_v46 = vmul.f32 %v9808_v35, %v9812_v36  ;;  %8279 = vmatprep.subr.bf16.mxu1 %v13466_v45 }
 0x1ec   : > { %v8023_v4 = vpop.f32.mrb[33].mxu0  ;;  %v2374_v7 = vsel %vm1532_vm3, %v2332_v38, 0.0  ;;  %v2459_v38 = vld [vmem:[%s13460_s11 + $0x8] sm:$0xff] }
 0x1ed   : > { %v9763_v5 = vpop.f32.mrb[34].mxu0  ;;  %v9815_v41 = vpop.permute.xlu1 %2147  ;;  %v2375_v50 = vadd.f32 %v2374_v7, %v2373_v37  ;;  %v2376_v54 = vsel %vm1532_vm3, %v2333_v46, 0.0  ;;  %v2467_v37 = vand.u32 4294901760, %v2459_v38 }
 0x1ee   : > { %v8024_v6 = vpop.f32.mrb[35].mxu0  ;;  %13707 = vst [vmem:[#allocation6_spill] sm:$0xff] %v9815_v41  ;;  %v2334_v14 = vmul.f32 %v9815_v41, %v9821_v43  ;;  %v9830_v57 = vpop.permute.xlu0 %2152 }
 0x1ef   : > { %v2377_v55 = vadd.f32 %v2376_v54, %v2375_v50  ;;  %13708 = vst [vmem:[#allocation7_spill] sm:$0xff] %v9830_v57  ;;  %v2335_v61 = vmul.f32 %v9830_v57, %v9834_v39 }
 0x1f0   : > { %v2378_v58 = vsel %vm1532_vm3, %v2334_v14, 0.0 }
 0x1f1   : > { %v9837_v59 = vpop.permute.xlu1 %2157  ;;  %v2379_v63 = vadd.f32 %v2378_v58, %v2377_v55  ;;  %v2380_v4 = vsel %vm1532_vm3, %v2335_v61, 0.0  ;;  %v9892_v58 = vadd.f32 %v9782_v26, %v9729_v15  ;;  %v9903_v15 = vadd.f32 %v9782_v26, %v9732_v21 }
 0x1f2   : > { %13709 = vst [vmem:[#allocation8_spill] sm:$0xff] %v9837_v59  ;;  %v2336_v2 = vmul.f32 %v9837_v59, %v9841_v60  ;;  %v9848_v47 = vpop.permute.xlu0 %2162 }
 0x1f3   : > { %v2381_v6 = vadd.f32 %v2380_v4, %v2379_v63  ;;  %13710 = vst [vmem:[#allocation9_spill] sm:$0xff] %v9848_v47  ;;  %v2549_v4 = vsub.f32 %v2459_v38, %v2467_v37 }
 0x1f5   : > { %v9855_v10 = vpop.permute.xlu1 %2167 }
 0x1f6   : > { %13711 = vst [vmem:[#allocation10_spill] sm:$0xff] %v9855_v10  ;;  %v9879_v14 = vpop.permute.xlu0 %2172 }
 0x1f7   : > { %13713 = vst [vmem:[#allocation12_spill] sm:$0xff] %v9879_v14 }
 0x1f9   : > { %v9887_v55 = vpop.permute.xlu1 %2177 }
 0x1fa   : > { %13714 = vst [vmem:[#allocation13_spill] sm:$0xff] %v9887_v55 }
 0x1fb   : > { %v9765_v8 = vpop.f32.mrb[36].mxu0 }
 0x1fc   : > { %v8027_v9 = vpop.f32.mrb[37].mxu0 }
 0x1fd   : > { %v9767_v11 = vpop.f32.mrb[38].mxu0  ;;  %v9852_v9 = vadd.f32 %v9782_v26, %v9665_v18  ;;  %v2458_v18 = vld [vmem:[%s13460_s11] sm:$0xff] }
 0x1fe   : > { %v8028_v12 = vpop.f32.mrb[39].mxu0  ;;  %v2464_v7 = vand.u32 4294901760, %v2458_v18 }
 0x1ff   : > { %v2382_v12 = vsel %vm1532_vm3, %v2336_v2, 0.0 }
 0x200   : > { %v2383_v32 = vadd.f32 %v2382_v12, %v2381_v6  ;;  %v2542_v2 = vsub.f32 %v2458_v18, %v2464_v7  ;;  %v2550_v12 = vand.u32 4294901760, %v2549_v4  ;;  %v9906_v18 = vpop.permute.xlu1 %2187 }
 0x201   : > { %13716 = vst [vmem:[#allocation15_spill] sm:$0xff] %v9906_v18 }
 0x202   : > { %v2543_v6 = vand.u32 4294901760, %v2542_v2 }
 0x20b   : > { %v9769_v13 = vpop.f32.mrb[40].mxu0 }
 0x20c   : > { %v8031_v16 = vpop.f32.mrb[41].mxu0 }
 0x20d   : > { %v9771_v17 = vpop.f32.mrb[42].mxu0 }
 0x20e   : > { %v8032_v19 = vpop.f32.mrb[43].mxu0 }
 0x20f   : > { %v9861_v19 = vadd.f32 %v9782_v26, %v9697_v44 }
 0x211   : > { %v2338_v34 = vmul.f32 %v9855_v10, %v9861_v19 }
 0x213   : > { %v2386_v54 = vsel %vm1532_vm3, %v2338_v34, 0.0  ;;  %v2544_v34 = vsub.f32 %v2542_v2, %v2543_v6 }
 0x21b   : > { %v9773_v20 = vpop.f32.mrb[44].mxu0 }
 0x21c   : > { %v8035_v22 = vpop.f32.mrb[45].mxu0 }
 0x21d   : > { %v9777_v24 = vpop.f32.mrb[46].mxu0  ;;  %v2337_v22 = vmul.f32 %v9848_v47, %v9852_v9 }
 0x21e   : > { %v8036_v25 = vpop.f32.mrb[47].mxu0 }
 0x21f   : > { %v2384_v46 = vsel %vm1532_vm3, %v2337_v22, 0.0 }
 0x220   : > { %v2385_v50 = vadd.f32 %v2384_v46, %v2383_v32  ;;  %v9899_v32 = vpop.permute.xlu0 %2182 }
 0x221   : > { %13715 = vst [vmem:[#allocation14_spill] sm:$0xff] %v9899_v32 }
 0x222   : > { %v2387_v63 = vadd.f32 %v2386_v54, %v2385_v50  ;;  %v9912_v50 = vadd.f32 %v9782_v26, %v9745_v40  ;;  %v2341_v54 = vmul.f32 %v9899_v32, %v9903_v15  ;;  %v9927_v40 = vadd.f32 %v9782_v26, %v9748_v48 }
 0x22b   : > { %v9817_v42 = vpop.f32.mrb[48].mxu0 }
 0x22c   : > { %v8039_v49 = vpop.f32.mrb[49].mxu0 }
 0x22d   : > { %v9825_v51 = vpop.f32.mrb[50].mxu0  ;;  %v9877_v49 = vpack.c.bf16 %v2467_v37, %v2464_v7  ;;  %v2545_v7 = vand.u32 4294901760, %v2544_v34  ;;  %v2392_v34 = vsel %vm1532_vm3, %v2341_v54, 0.0 }
 0x22e   : > { %v8040_v52 = vpop.f32.mrb[51].mxu0 }
 0x22f   : > { %13712 = vst [vmem:[#allocation11_spill] sm:$0xff] %v9877_v49  ;;  %v9883_v52 = vadd.f32 %v9782_v26, %v9706_v53  ;;  %8281 = vmatpush3.bf16.msra.mxu1 %v9877_v49  ;;  %v2340_v53 = vmul.f32 %v9887_v55, %v9892_v58 }
 0x230   : > { %8282 = vmatprep.subr.bf16.mxu1 %v13466_v45  ;;  %v9923_v45 = vpop.permute.xlu0 %2192 }
 0x231   : > { %v2339_v61 = vmul.f32 %v9879_v14, %v9883_v52  ;;  %v2390_v46 = vsel %vm1532_vm3, %v2340_v53, 0.0  ;;  %v2342_v53 = vmul.f32 %v9906_v18, %v9912_v50  ;;  %13718 = vst [vmem:[#allocation17_spill] sm:$0xff] %v9923_v45 }
 0x233   : > { %v2388_v22 = vsel %vm1532_vm3, %v2339_v61, 0.0 }
 0x23b   : > { %v9857_v16 = vpop.f32.mrb[52].mxu0 }
 0x23c   : > { %v8043_v25 = vpop.f32.mrb[53].mxu0 }
 0x23d   : > { %v9865_v33 = vpop.f32.mrb[54].mxu0  ;;  %v2389_v25 = vadd.f32 %v2388_v22, %v2387_v63 }
 0x23e   : > { %v8044_v44 = vpop.f32.mrb[55].mxu0 }
 0x23f   : > { %v2551_v44 = vsub.f32 %v2549_v4, %v2550_v12  ;;  %v2391_v63 = vadd.f32 %v2390_v46, %v2389_v25  ;;  %v9930_v25 = vpack.c.bf16 %v2549_v4, %v2542_v2  ;;  %v9932_v46 = vpop.permute.xlu1 %2197  ;;  %v9947_v2 = vadd.f32 %v9782_v26, %v9759_v0 }
 0x240   : > { %13720 = vst [vmem:[#allocation19_spill] sm:$0xff] %v9932_v46 }
 0x241   : > { %v2552_v37 = vand.u32 4294901760, %v2551_v44  ;;  %v2393_v44 = vadd.f32 %v2392_v34, %v2391_v63  ;;  %13719 = vst [vmem:[#allocation18_spill] sm:$0xff] %v9930_v25  ;;  %v9943_v34 = vpop.permute.xlu0 %2202 }
 0x242   : > { %13721 = vst [vmem:[#allocation20_spill] sm:$0xff] %v9943_v34 }
 0x243   : > { %v9918_v21 = vpack.c.bf16 %v2552_v37, %v2545_v7  ;;  %v9936_v7 = vadd.f32 %v9782_v26, %v9757_v62  ;;  %v9950_v62 = vpop.permute.xlu1 %2207 }
 0x244   : > { %13722 = vst [vmem:[#allocation21_spill] sm:$0xff] %v9950_v62 }
 0x245   : > { %13717 = vst [vmem:[#allocation16_spill] sm:$0xff] %v9918_v21  ;;  %v2344_v54 = vmul.f32 %v9932_v46, %v9936_v7 }
 0x247   : > { %v2398_v4 = vsel %vm1532_vm3, %v2344_v54, 0.0 }
 0x24b   : > { %v9908_v38 = vpop.f32.mrb[56].mxu0 }
 0x24c   : > { %v8047_v61 = vpop.f32.mrb[57].mxu0 }
 0x24d   : > { %v9916_v22 = vpop.f32.mrb[58].mxu0  ;;  %v2394_v61 = vsel %vm1532_vm3, %v2342_v53, 0.0 }
 0x24e   : > { %v8048_v56 = vpop.f32.mrb[59].mxu0  ;;  %v2395_v37 = vadd.f32 %v2394_v61, %v2393_v44  ;;  %v9956_v44 = vadd.f32 %v9782_v26, %v9761_v3  ;;  %v2345_v61 = vmul.f32 %v9943_v34, %v9947_v2  ;;  %v9969_v3 = vadd.f32 %v9782_v26, %v9763_v5 }
 0x24f   : > { %v2343_v56 = vmul.f32 %v9923_v45, %v9927_v40  ;;  %v9965_v45 = vpop.permute.xlu0 %2212  ;;  %v9972_v34 = vpack.c.bf16 %v2550_v12, %v2543_v6  ;;  %v9989_v6 = vadd.f32 %v9782_v26, %v9767_v11  ;;  %v10006_v11 = vadd.f32 %v9782_v26, %v9771_v17 }
 0x250   : > { %v2346_v0 = vmul.f32 %v9950_v62, %v9956_v44  ;;  %v2400_v54 = vsel %vm1532_vm3, %v2345_v61, 0.0  ;;  %13723 = vst [vmem:[#allocation22_spill] sm:$0xff] %v9965_v45  ;;  %v10015_v62 = vadd.f32 %v9782_v26, %v9773_v20 }
 0x251   : > { %v2396_v48 = vsel %vm1532_vm3, %v2343_v56, 0.0  ;;  %13724 = vst [vmem:[#allocation23_spill] sm:$0xff] %v9972_v34  ;;  %13728 = vst [vmem:[#allocation27_spill] sm:$0xff] %v10006_v11 }
 0x252   : > { %v2397_v63 = vadd.f32 %v2396_v48, %v2395_v37  ;;  %v2402_v18 = vsel %vm1532_vm3, %v2346_v0, 0.0  ;;  %13730 = vst [vmem:[#allocation29_spill] sm:$0xff] %v10015_v62 }
 0x254   : > { %v2399_v37 = vadd.f32 %v2398_v4, %v2397_v63  ;;  %v9974_v63 = vpop.permute.xlu1 %2217  ;;  %v9978_v4 = vadd.f32 %v9782_v26, %v9765_v8  ;;  %v9994_v8 = vadd.f32 %v9782_v26, %v9769_v13 }
 0x255   : > { %13725 = vst [vmem:[#allocation24_spill] sm:$0xff] %v9974_v63 }
 0x256   : > { %v2401_v46 = vadd.f32 %v2400_v54, %v2399_v37  ;;  %v9985_v54 = vpop.permute.xlu0 %2222 }
 0x257   : > { %13726 = vst [vmem:[#allocation25_spill] sm:$0xff] %v9985_v54 }
 0x258   : > { %v2403_v61 = vadd.f32 %v2402_v18, %v2401_v46  ;;  %v9996_v0 = vpop.permute.xlu1 %2227  ;;  %v2349_v46 = vmul.f32 %v9985_v54, %v9989_v6 }
 0x259   : > { %13727 = vst [vmem:[#allocation26_spill] sm:$0xff] %v9996_v0 }
 0x25b   : > { %v9952_v53 = vpop.f32.mrb[60].mxu0 }
 0x25c   : > { %v8051_v56 = vpop.f32.mrb[61].mxu0 }
 0x25d   : > { %v9960_v48 = vpop.f32.mrb[62].mxu0  ;;  %v2348_v56 = vmul.f32 %v9974_v63, %v9978_v4  ;;  %v10010_v63 = vpop.permute.xlu0 %2232 }
 0x25e   : > { %v8052_v1 = vpop.f32.mrb[63].mxu0  ;;  %13729 = vst [vmem:[#allocation28_spill] sm:$0xff] %v10010_v63  ;;  %v2351_v17 = vmul.f32 %v10010_v63, %v10006_v11 }
 0x25f   : > { %v2347_v1 = vmul.f32 %v9965_v45, %v9969_v3  ;;  %v2406_v12 = vsel %vm1532_vm3, %v2348_v56, 0.0  ;;  %v2350_v56 = vmul.f32 %v9996_v0, %v9994_v8  ;;  %v2408_v45 = vsel %vm1532_vm3, %v2349_v46, 0.0 }
 0x260   : > { %v2412_v20 = vsel %vm1532_vm3, %v2351_v17, 0.0 }
 0x261   : > { %v2404_v5 = vsel %vm1532_vm3, %v2347_v1, 0.0  ;;  %v10028_v54 = vpop.permute.xlu0 %2242 }
 0x262   : > { %v2405_v37 = vadd.f32 %v2404_v5, %v2403_v61  ;;  %13732 = vst [vmem:[#allocation31_spill] sm:$0xff] %v10028_v54 }
 0x264   : > { %v2407_v61 = vadd.f32 %v2406_v12, %v2405_v37  ;;  %v10017_v37 = vpop.permute.xlu1 %2237  ;;  %v2410_v12 = vsel %vm1532_vm3, %v2350_v56, 0.0 }
 0x265   : > { %13731 = vst [vmem:[#allocation30_spill] sm:$0xff] %v10017_v37  ;;  %v2352_v0 = vmul.f32 %v10017_v37, %v10015_v62  ;;  %v10046_v17 = vpop.permute.xlu0 %2252 }
 0x266   : > { %13735 = vst [vmem:[#allocation34_spill] sm:$0xff] %v10046_v17 }
 0x267   : > { %v2414_v56 = vsel %vm1532_vm3, %v2352_v0, 0.0  ;;  %v10051_v0 = vadd.f32 %v9782_v26, %v9857_v16 }
 0x26b   : > { %v9998_v18 = vpop.f32.mrb[64].mxu0 }
 0x26c   : > { %v8055_v1 = vpop.f32.mrb[65].mxu0 }
 0x26d   : > { %v10002_v5 = vpop.f32.mrb[66].mxu0  ;;  %v2409_v1 = vadd.f32 %v2408_v45, %v2407_v61  ;;  %v10033_v45 = vadd.f32 %v9782_v26, %v9817_v42  ;;  %v10035_v61 = vpop.permute.xlu1 %2247 }
 0x26e   : > { %v8056_v13 = vpop.f32.mrb[67].mxu0  ;;  %13734 = vst [vmem:[#allocation33_spill] sm:$0xff] %v10035_v61 }
 0x26f   : > { %v10026_v13 = vadd.f32 %v9782_v26, %v9777_v24  ;;  %v2411_v46 = vadd.f32 %v2410_v12, %v2409_v1  ;;  %13733 = vst [vmem:[#allocation32_spill] sm:$0xff] %v10033_v45  ;;  %v2354_v24 = vmul.f32 %v10035_v61, %v10033_v45  ;;  %v10044_v1 = vadd.f32 %v9782_v26, %v9825_v51  ;;  %v10064_v45 = vpop.permute.xlu0 %2262 }
 0x270   : > { %13737 = vst [vmem:[#allocation36_spill] sm:$0xff] %v10064_v45 }
 0x271   : > { %v2353_v37 = vmul.f32 %v10028_v54, %v10026_v13  ;;  %v2413_v63 = vadd.f32 %v2412_v20, %v2411_v46  ;;  %v10053_v54 = vpop.permute.xlu1 %2257  ;;  %v2418_v20 = vsel %vm1532_vm3, %v2354_v24, 0.0  ;;  %v2355_v51 = vmul.f32 %v10046_v17, %v10044_v1 }
 0x272   : > { %13736 = vst [vmem:[#allocation35_spill] sm:$0xff] %v10053_v54  ;;  %v10069_v24 = vadd.f32 %v9782_v26, %v9908_v38  ;;  %v10085_v38 = vadd.f32 %v9782_v26, %v9952_v53 }
 0x273   : > { %v2415_v12 = vadd.f32 %v2414_v56, %v2413_v63  ;;  %v2416_v62 = vsel %vm1532_vm3, %v2353_v37, 0.0  ;;  %v2356_v56 = vmul.f32 %v10053_v54, %v10051_v0  ;;  %v10062_v37 = vadd.f32 %v9782_v26, %v9865_v33 }
 0x274   : > { %13738 = vst [vmem:[#allocation37_spill] sm:$0xff] %v10069_v24 }
 0x275   : > { %v2417_v63 = vadd.f32 %v2416_v62, %v2415_v12  ;;  %v2422_v17 = vsel %vm1532_vm3, %v2356_v56, 0.0  ;;  %v2357_v62 = vmul.f32 %v10064_v45, %v10062_v37  ;;  %v10074_v12 = vpop.permute.xlu1 %2267  ;;  %v10087_v56 = vpop.permute.xlu0 %2272 }
 0x276   : > { %13739 = vst [vmem:[#allocation38_spill] sm:$0xff] %v10074_v12  ;;  %v2358_v33 = vmul.f32 %v10074_v12, %v10069_v24  ;;  %13741 = vst [vmem:[#allocation40_spill] sm:$0xff] %v10087_v56 }
 0x277   : > { %v2419_v16 = vadd.f32 %v2418_v20, %v2417_v63  ;;  %v10080_v20 = vadd.f32 %v9782_v26, %v9916_v22  ;;  %v2424_v63 = vsel %vm1532_vm3, %v2357_v62, 0.0 }
 0x279   : > { %13740 = vst [vmem:[#allocation39_spill] sm:$0xff] %v10080_v20  ;;  %v10092_v45 = vpop.permute.xlu1 %2277 }
 0x27a   : > { %13742 = vst [vmem:[#allocation41_spill] sm:$0xff] %v10092_v45  ;;  %v2360_v22 = vmul.f32 %v10092_v45, %v10085_v38 }
 0x27b   : > { %v2093_v42 = vpop.f32.mrb[68].mxu0 }
 0x27c   : > { %v8059_v11 = vpop.f32.mrb[69].mxu0 }
 0x27d   : > { %v2096_v46 = vpop.f32.mrb[70].mxu0  ;;  %v2420_v11 = vsel %vm1532_vm3, %v2355_v51, 0.0  ;;  %v10110_v45 = vpop.permute.xlu1 %2287 }
 0x27e   : > { %v8060_v61 = vpop.f32.mrb[71].mxu0  ;;  %13745 = vst [vmem:[#allocation44_spill] sm:$0xff] %v10110_v45 }
 0x27f   : > { %v2421_v61 = vadd.f32 %v2420_v11, %v2419_v16  ;;  %v2426_v16 = vsel %vm1532_vm3, %v2358_v33, 0.0  ;;  %v2359_v11 = vmul.f32 %v10087_v56, %v10080_v20  ;;  %v10103_v33 = vadd.f32 %v9782_v26, %v9998_v18  ;;  %v10105_v20 = vpop.permute.xlu0 %2282 }
 0x280   : > { %13744 = vst [vmem:[#allocation43_spill] sm:$0xff] %v10105_v20 }
 0x281   : > { %v2423_v51 = vadd.f32 %v2422_v17, %v2421_v61  ;;  %v10098_v17 = vadd.f32 %v9782_v26, %v9960_v48  ;;  %v2428_v24 = vsel %vm1532_vm3, %v2359_v11, 0.0  ;;  %13743 = vst [vmem:[#allocation42_spill] sm:$0xff] %v10103_v33  ;;  %v10120_v11 = vadd.f32 %v9782_v26, %v2093_v42 }
 0x283   : > { %v2425_v12 = vadd.f32 %v2424_v63, %v2423_v51  ;;  %v2430_v51 = vsel %vm1532_vm3, %v2360_v22, 0.0  ;;  %v2361_v63 = vmul.f32 %v10105_v20, %v10098_v17  ;;  %13747 = vst [vmem:[#allocation46_spill] sm:$0xff] %v10120_v11  ;;  %v10122_v22 = vpop.permute.xlu0 %2292 }
 0x284   : > { %13748 = vst [vmem:[#allocation47_spill] sm:$0xff] %v10122_v22 }
 0x285   : > { %v2427_v62 = vadd.f32 %v2426_v16, %v2425_v12  ;;  %v2362_v12 = vmul.f32 %v10110_v45, %v10103_v33  ;;  %v10116_v16 = vadd.f32 %v9782_v26, %v10002_v5 }
 0x287   : > { %v2429_v48 = vadd.f32 %v2428_v24, %v2427_v62  ;;  %13746 = vst [vmem:[#allocation45_spill] sm:$0xff] %v10116_v16  ;;  %v2363_v24 = vmul.f32 %v10122_v22, %v10116_v16  ;;  %v10127_v62 = vpop.permute.xlu1 %2297  ;;  %v10138_v20 = vpop.permute.xlu0 %2302 }
 0x288   : > { %13749 = vst [vmem:[#allocation48_spill] sm:$0xff] %v10127_v62  ;;  %v2364_v5 = vmul.f32 %v10127_v62, %v10120_v11  ;;  %13752 = vst [vmem:[#allocation51_spill] sm:$0xff] %v10138_v20 }
 0x289   : > { %v2431_v18 = vadd.f32 %v2430_v51, %v2429_v48  ;;  %v10132_v51 = vadd.f32 %v9782_v26, %v2096_v46  ;;  %v2436_v42 = vsel %vm1532_vm3, %v2363_v24, 0.0 }
 0x28a   : > { %v2438_v22 = vsel %vm1532_vm3, %v2364_v5, 0.0 }
 0x28b   : > { %v2101_v54 = vpop.f32.mrb[72].mxu0  ;;  %13750 = vst [vmem:[#allocation49_spill] sm:$0xff] %v10132_v51  ;;  %v10143_v16 = vpop.permute.xlu1 %2307 }
 0x28c   : > { %v8063_v53 = vpop.f32.mrb[73].mxu0  ;;  %v10136_v48 = vadd.f32 %v9782_v26, %v2101_v54  ;;  %13753 = vst [vmem:[#allocation52_spill] sm:$0xff] %v10143_v16  ;;  %v10154_v33 = vpop.permute.xlu0 %2312 }
 0x28d   : > { %v2104_v61 = vpop.f32.mrb[74].mxu0  ;;  %v2434_v53 = vsel %vm1532_vm3, %v2362_v12, 0.0  ;;  %13756 = vst [vmem:[#allocation55_spill] sm:$0xff] %v10154_v33 }
 0x28e   : > { %v8064_v56 = vpop.f32.mrb[75].mxu0  ;;  %13751 = vst [vmem:[#allocation50_spill] sm:$0xff] %v10136_v48 }
 0x28f   : > { %v2432_v56 = vsel %vm1532_vm3, %v2361_v63, 0.0 }
 0x290   : > { %v2433_v45 = vadd.f32 %v2432_v56, %v2431_v18  ;;  %v2365_v18 = vmul.f32 %v10138_v20, %v10132_v51 }
 0x292   : > { %v2435_v63 = vadd.f32 %v2434_v53, %v2433_v45  ;;  %v2366_v45 = vmul.f32 %v10143_v16, %v10136_v48  ;;  %v10148_v53 = vadd.f32 %v9782_v26, %v2104_v61  ;;  %v2440_v11 = vsel %vm1532_vm3, %v2365_v18, 0.0  ;;  %v10167_v18 = vpop.permute.xlu0 %2322 }
 0x293   : > { %13759 = vst [vmem:[#allocation58_spill] sm:$0xff] %v10167_v18 }
 0x294   : > { %v2437_v62 = vadd.f32 %v2436_v42, %v2435_v63  ;;  %13754 = vst [vmem:[#allocation53_spill] sm:$0xff] %v10148_v53  ;;  %v2367_v63 = vmul.f32 %v10154_v33, %v10148_v53  ;;  %v10159_v42 = vpop.permute.xlu1 %2317 }
 0x295   : > { %13757 = vst [vmem:[#allocation56_spill] sm:$0xff] %v10159_v42 }
 0x296   : > { %v2439_v24 = vadd.f32 %v2438_v22, %v2437_v62 }
 0x298   : > { %v2441_v16 = vadd.f32 %v2440_v11, %v2439_v24 }
 0x29b   : > { %v2109_v12 = vpop.f32.mrb[76].mxu0 }
 0x29c   : > { %v8067_v56 = vpop.f32.mrb[77].mxu0  ;;  %v10152_v5 = vadd.f32 %v9782_v26, %v2109_v12  ;;  %v2444_v12 = vsel %vm1532_vm3, %v2367_v63, 0.0 }
 0x29d   : > { %v2112_v46 = vpop.f32.mrb[78].mxu0  ;;  %v2442_v56 = vsel %vm1532_vm3, %v2366_v45, 0.0 }
 0x29e   : > { %v8068_v54 = vpop.f32.mrb[79].mxu0  ;;  %13755 = vst [vmem:[#allocation54_spill] sm:$0xff] %v10152_v5  ;;  %v2368_v61 = vmul.f32 %v10159_v42, %v10152_v5  ;;  %v10164_v22 = vadd.f32 %v9782_v26, %v2112_v46  ;;  %v2443_v62 = vadd.f32 %v2442_v56, %v2441_v16  ;;  %v10176_v42 = vpop.permute.xlu1 %2327 }
 0x29f   : > { %13760 = vst [vmem:[#allocation59_spill] sm:$0xff] %v10176_v42 }
 0x2a0   : > { %13758 = vst [vmem:[#allocation57_spill] sm:$0xff] %v10164_v22  ;;  %v2446_v54 = vsel %vm1532_vm3, %v2368_v61, 0.0  ;;  %v2369_v45 = vmul.f32 %v10167_v18, %v10164_v22  ;;  %v2445_v33 = vadd.f32 %v2444_v12, %v2443_v62 }
 0x2a2   : > { %v2447_v20 = vadd.f32 %v2446_v54, %v2445_v33  ;;  %v2448_v11 = vsel %vm1532_vm3, %v2369_v45, 0.0 }
 0x2a4   : > { %v2449_v61 = vadd.f32 %v2448_v11, %v2447_v20  ;;  %v13761_v20 = vmov 0.0  }
 0x2ab   : > { %v2117_v53 = vpop.f32.mrb[80].mxu0 }
 0x2ac   : > { %v10174_v24 = vadd.f32 %v9782_v26, %v2117_v53  ;;  %v8071_v46 = vpop.f32.mrb[81].mxu0 }
 0x2ad   : > { %v2120_v16 = vpop.f32.mrb[82].mxu0 }
 0x2ae   : > { %v2370_v56 = vmul.f32 %v10176_v42, %v10174_v24  ;;  %v8072_v63 = vpop.f32.mrb[83].mxu0 }
 0x2b0   : > { %v2450_v5 = vsel %vm1532_vm3, %v2370_v56, 0.0 }
 0x2b1   : > { %v2451_v18 = vadd.f32 %v2450_v5, %v2449_v61  ;;  %v13762_v5 = vmov 0.0|0.0  }
 0x2b3   : > { %v2452_v62 = vrot.slane %v2451_v18, 4 }
 0x2b5   : > { %v2453_v33 = vadd.f32 %v2452_v62, %v2451_v18 }
 0x2b7   : > { %v2454_v12 = vrot.slane %v2453_v33, 2 }
 0x2b9   : > { %v2455_v54 = vadd.f32 %v2454_v12, %v2453_v33 }
 0x2bb   : > { %v2456_v45 = vrot.slane %v2455_v54, 1 }
 0x2bd   : > { %v2457_v22 = vadd.f32 %v2456_v45, %v2455_v54 }
 0x2bf   : > { %v2461_v26 = vsel %vm1532_vm3, %v2457_v22, 0  ;;  %v2923_v22 = vlaneseq }
 0x2c0   : > { %v2530_v53 = vand.u32 4294901760, %v2461_v26 }
 0x2c1   : > { %v2924_v18 = vshrl.u32 %v2923_v22, 7 }
 0x2c2   : > { %v2531_v46 = vsub.f32 %v2461_v26, %v2530_v53 }
 0x2c3   : > { %v10206_v56 = vsub.s32 0, %v2924_v18 }
 0x2c4   : > { %v2532_v48 = vand.u32 4294901760, %v2531_v46 }
 0x2c5   : > { %13763 = vst [vmem:[#allocation60_spill] sm:$0xff] %v10206_v56 }
 0x2c6   : > { %v2533_v16 = vsub.f32 %v2531_v46, %v2532_v48 }
 0x2c8   : > { %v2534_v51 = vand.u32 4294901760, %v2533_v16 }
 0x2ca   : > { %8078 = vmatmul.mubr.f32.vlgmr.msra.gmra.mrb[0].mxu1 %v2534_v51 }
 0x2cb   : > { %8284 = vmatpush3.bf16.msra.mxu1 %v9918_v21  ;;  %8084 = vmatprep.mubr.msk.f32.mxu1 %vm8774_vm1, %v13761_v20 }
 0x2cc   : > { %8285 = vmatprep.subr.bf16.mxu1 %v13762_v5 }
 0x2d2   : > { %8085 = vmatmul.mubr.f32.vlgmr.msra.gmra.mrb[0].mxu1 %v2530_v53 }
 0x2d3   : > { %8287 = vmatpush3.bf16.msra.mxu1 %v9930_v25  ;;  %8091 = vmatprep.mubr.msk.f32.mxu1 %vm8774_vm1, %v13761_v20 }
 0x2d4   : > { %8288 = vmatprep.subr.bf16.mxu1 %v13762_v5 }
 0x2da   : > { %8092 = vmatmul.mubr.f32.vlgmr.msra.gmra.mrb[0].mxu1 %v2531_v46 }
 0x2db   : > { %8290 = vmatpush3.bf16.msra.mxu1 %v9877_v49  ;;  %8098 = vmatprep.mubr.msk.f32.mxu1 %vm8774_vm1, %v13761_v20 }
 0x2dc   : > { %8291 = vmatprep.subr.bf16.mxu1 %v13762_v5 }
 0x2e2   : > { %8099 = vmatmul.mubr.f32.vlgmr.msra.gmra.mrb[0].mxu1 %v2532_v48 }
 0x2e3   : > { %8293 = vmatpush3.bf16.msra.mxu1 %v9972_v34  ;;  %8105 = vmatprep.mubr.msk.f32.mxu1 %vm8774_vm1, %v13761_v20 }
 0x2e4   : > { %8294 = vmatprep.subr.bf16.mxu1 %v13762_v5 }
 0x2ea   : > { %8106 = vmatmul.mubr.f32.vlgmr.msra.gmra.mrb[0].mxu1 %v2530_v53 }
 0x2eb   : > { %8296 = vmatpush3.bf16.msra.mxu1 %v9877_v49  ;;  %8112 = vmatprep.mubr.msk.f32.mxu1 %vm8774_vm1, %v13761_v20 }
 0x2ec   : > { %8297 = vmatprep.subr.bf16.mxu1 %v13762_v5 }
 0x2f2   : > { %8113 = vmatmul.mubr.f32.vlgmr.msra.gmra.mrb[0].mxu1 %v2530_v53 }
 0x2f3   : > { %8299 = vmatpush3.bf16.msra.mxu1 %v9877_v49  ;;  %8119 = vmatprep.mubr.msk.f32.mxu1 %vm8774_vm1, %v13761_v20 }
 0x2f4   : > { %8300 = vmatprep.subr.bf16.mxu1 %v13762_v5 }
 0x3c5   : > { %v2918_v51 = vpop.f32.mrb[0].mxu1 }
 0x3c6   : > { %v8114_v48 = vpop.f32.mrb[1].mxu1  ;;  %v2922_v11 = vmul.f32 0.001953125, %v2918_v51 }
 0x3c8   : > { %v10209_v63 = vrot.slane %v2922_v11, %v10206_v56 }
 0x3ca   : > { %v10213_v61 = vsub.f32 %v9788_v28, %v10209_v63  ;;  %v10217_v62 = vsub.f32 %v9792_v29, %v10209_v63  ;;  %v10221_v33 = vsub.f32 %v9798_v31, %v10209_v63  ;;  %v10227_v54 = vsub.f32 %v9812_v36, %v10209_v63 }
 0x3cb   : > { %v10233_v28 = vsub.f32 %v9821_v43, %v10209_v63  ;;  %v10239_v31 = vsub.f32 %v9834_v39, %v10209_v63  ;;  %v10245_v46 = vsub.f32 %v9841_v60, %v10209_v63  ;;  %v10252_v48 = vsub.f32 %v9852_v9, %v10209_v63 }
 0x3cc   : > { %v2968_v12 = vmul.f32 %v10213_v61, %v9784_v27  ;;  %v2969_v45 = vmul.f32 %v10217_v62, %v9775_v23  ;;  %v2970_v29 = vmul.f32 %v10221_v33, %v9794_v30  ;;  %v2971_v53 = vmul.f32 %v10227_v54, %v9808_v35  ;;  %v13768_v35 = vld [vmem:[#allocation15_spill] sm:$0xff]  ;;  %v13769_v30 = vld [vmem:[#allocation17_spill] sm:$0xff]  ;;  %v13773_v27 = vld [vmem:[#allocation20_spill] sm:$0xff] }
 0x3cd   : > { %13764 = vst [vmem:[#allocation61_spill] sm:$0xff] %v10233_v28  ;;  %13765 = vst [vmem:[#allocation62_spill] sm:$0xff] %v10239_v31  ;;  %v2972_v43 = vmul.f32 %v10233_v28, %v9815_v41  ;;  %v2973_v39 = vmul.f32 %v10239_v31, %v9830_v57  ;;  %v10259_v60 = vsub.f32 %v9861_v19, %v10209_v63  ;;  %v13771_v23 = vld [vmem:[#allocation19_spill] sm:$0xff] }
 0x3ce   : > { %v3009_v26 = vmul.f32 %v2968_v12, %v2968_v12  ;;  %v3010_v36 = vmul.f32 %v2969_v45, %v2969_v45  ;;  %13766 = vst [vmem:[#allocation63_spill] sm:$0xff] %v10245_v46  ;;  %v3011_v16 = vmul.f32 %v2970_v29, %v2970_v29  ;;  %13767 = vst [vmem:[#allocation64_spill] sm:$0xff] %v10252_v48 }
 0x3cf   : > { %v3012_v22 = vmul.f32 %v2971_v53, %v2971_v53  ;;  %v2974_v12 = vmul.f32 %v10245_v46, %v9837_v59  ;;  %v3013_v45 = vmul.f32 %v2972_v43, %v2972_v43  ;;  %v10266_v9 = vsub.f32 %v9883_v52, %v10209_v63  ;;  %v13775_v59 = vld [vmem:[#allocation22_spill] sm:$0xff] }
 0x3d0   : > { %v3050_v51 = vsel %vm1532_vm3, %v3009_v26, 0.0  ;;  %v3051_v18 = vsel %vm1532_vm3, %v3010_v36, 0.0  ;;  %v3053_v29 = vsel %vm1532_vm3, %v3011_v16, 0.0  ;;  %v2975_v53 = vmul.f32 %v10252_v48, %v9848_v47  ;;  %v13774_v47 = vld [vmem:[#allocation21_spill] sm:$0xff] }
 0x3d1   : > { %v3052_v11 = vadd.f32 %v3051_v18, %v3050_v51  ;;  %v3014_v36 = vmul.f32 %v2973_v39, %v2973_v39  ;;  %v3055_v51 = vsel %vm1532_vm3, %v3012_v22, 0.0  ;;  %v10273_v19 = vsub.f32 %v9892_v58, %v10209_v63 }
 0x3d2   : > { %v2976_v43 = vmul.f32 %v10259_v60, %v9855_v10  ;;  %v3015_v16 = vmul.f32 %v2974_v12, %v2974_v12  ;;  %v10280_v52 = vsub.f32 %v9903_v15, %v10209_v63  ;;  %v2977_v39 = vmul.f32 %v10266_v9, %v9879_v14 }
 0x3d3   : > { %v3054_v26 = vadd.f32 %v3053_v29, %v3052_v11  ;;  %v3057_v11 = vsel %vm1532_vm3, %v3013_v45, 0.0  ;;  %v3016_v22 = vmul.f32 %v2975_v53, %v2975_v53  ;;  %v10287_v58 = vsub.f32 %v9912_v50, %v10209_v63 }
 0x3d4   : > { %v2978_v12 = vmul.f32 %v10273_v19, %v9887_v55  ;;  %v3017_v45 = vmul.f32 %v2976_v43, %v2976_v43  ;;  %v10294_v15 = vsub.f32 %v9927_v40, %v10209_v63  ;;  %v2979_v53 = vmul.f32 %v10280_v52, %v9899_v32 }
 0x3d5   : > { %v3056_v18 = vadd.f32 %v3055_v51, %v3054_v26  ;;  %v3059_v26 = vsel %vm1532_vm3, %v3014_v36, 0.0  ;;  %v3018_v36 = vmul.f32 %v2977_v39, %v2977_v39  ;;  %v10301_v50 = vsub.f32 %v9936_v7, %v10209_v63 }
 0x3d6   : > { %v2980_v43 = vmul.f32 %v10287_v58, %v13768_v35  ;;  %v10308_v40 = vsub.f32 %v9947_v2, %v10209_v63  ;;  %v2981_v39 = vmul.f32 %v10294_v15, %v13769_v30  ;;  %v10315_v7 = vsub.f32 %v9956_v44, %v10209_v63 }
 0x3d7   : > { %v3058_v29 = vadd.f32 %v3057_v11, %v3056_v18  ;;  %v3061_v18 = vsel %vm1532_vm3, %v3015_v16, 0.0  ;;  %v3019_v16 = vmul.f32 %v2978_v12, %v2978_v12  ;;  %v2982_v12 = vmul.f32 %v10301_v50, %v13771_v23 }
 0x3d8   : > { %13770 = vst [vmem:[#allocation65_spill] sm:$0xff] %v10315_v7  ;;  %v10322_v2 = vsub.f32 %v9969_v3, %v10209_v63  ;;  %v10329_v44 = vsub.f32 %v9978_v4, %v10209_v63  ;;  %v10336_v3 = vsub.f32 %v9989_v6, %v10209_v63  ;;  %v10343_v4 = vsub.f32 %v9994_v8, %v10209_v63  ;;  %v13777_v6 = vld [vmem:[#allocation27_spill] sm:$0xff]  ;;  %v13779_v8 = vld [vmem:[#allocation29_spill] sm:$0xff] }
 0x3d9   : > { %v3060_v51 = vadd.f32 %v3059_v26, %v3058_v29  ;;  %v3063_v29 = vsel %vm1532_vm3, %v3016_v22, 0.0  ;;  %v3020_v22 = vmul.f32 %v2979_v53, %v2979_v53  ;;  %v2983_v53 = vmul.f32 %v10308_v40, %v13773_v27 }
 0x3da   : > { %13772 = vst [vmem:[#allocation66_spill] sm:$0xff] %v10322_v2  ;;  %v10350_v57 = vsub.f32 %v13777_v6, %v10209_v63  ;;  %v10357_v41 = vsub.f32 %v13779_v8, %v10209_v63  ;;  %v10364_v6 = vsub.f32 %v10026_v13, %v10209_v63  ;;  %v13782_v8 = vld [vmem:[#allocation32_spill] sm:$0xff]  ;;  %v10378_v13 = vsub.f32 %v10044_v1, %v10209_v63 }
 0x3db   : > { %v3062_v11 = vadd.f32 %v3061_v18, %v3060_v51  ;;  %v3065_v51 = vsel %vm1532_vm3, %v3017_v45, 0.0  ;;  %v3021_v45 = vmul.f32 %v2980_v43, %v2980_v43  ;;  %v2984_v43 = vmul.f32 %v10315_v7, %v13774_v47  ;;  %v13776_v47 = vld [vmem:[#allocation24_spill] sm:$0xff] }
 0x3dc   : > { %v10371_v14 = vsub.f32 %v13782_v8, %v10209_v63  ;;  %v10385_v8 = vsub.f32 %v10051_v0, %v10209_v63  ;;  %v10392_v1 = vsub.f32 %v10062_v37, %v10209_v63  ;;  %v13787_v0 = vld [vmem:[#allocation37_spill] sm:$0xff]  ;;  %v13789_v37 = vld [vmem:[#allocation39_spill] sm:$0xff] }
 0x3dd   : > { %v3064_v26 = vadd.f32 %v3063_v29, %v3062_v11  ;;  %v3067_v11 = vsel %vm1532_vm3, %v3018_v36, 0.0  ;;  %v3022_v36 = vmul.f32 %v2981_v39, %v2981_v39  ;;  %v2985_v39 = vmul.f32 %v10322_v2, %v13775_v59  ;;  %v13778_v59 = vld [vmem:[#allocation25_spill] sm:$0xff] }
 0x3de   : > { %v10399_v10 = vsub.f32 %v13787_v0, %v10209_v63  ;;  %v10406_v32 = vsub.f32 %v13789_v37, %v10209_v63  ;;  %v10413_v0 = vsub.f32 %v10085_v38, %v10209_v63  ;;  %v10420_v37 = vsub.f32 %v10098_v17, %v10209_v63  ;;  %v13793_v38 = vld [vmem:[#allocation42_spill] sm:$0xff]  ;;  %v13795_v17 = vld [vmem:[#allocation45_spill] sm:$0xff] }
 0x3df   : > { %v3066_v18 = vadd.f32 %v3065_v51, %v3064_v26  ;;  %v3069_v26 = vsel %vm1532_vm3, %v3019_v16, 0.0  ;;  %v3023_v16 = vmul.f32 %v2982_v12, %v2982_v12  ;;  %v2986_v12 = vmul.f32 %v10329_v44, %v13776_v47  ;;  %v13780_v47 = vld [vmem:[#allocation26_spill] sm:$0xff] }
 0x3e0   : > { %v10427_v55 = vsub.f32 %v13793_v38, %v10209_v63  ;;  %v10434_v27 = vsub.f32 %v13795_v17, %v10209_v63  ;;  %v13797_v38 = vld [vmem:[#allocation46_spill] sm:$0xff]  ;;  %v13799_v17 = vld [vmem:[#allocation49_spill] sm:$0xff] }
 0x3e1   : > { %v3068_v29 = vadd.f32 %v3067_v11, %v3066_v18  ;;  %v3071_v18 = vsel %vm1532_vm3, %v3020_v22, 0.0  ;;  %v3024_v22 = vmul.f32 %v2983_v53, %v2983_v53  ;;  %v2987_v53 = vmul.f32 %v10336_v3, %v13778_v59  ;;  %v13781_v59 = vld [vmem:[#allocation28_spill] sm:$0xff] }
 0x3e2   : > { %v10441_v23 = vsub.f32 %v13797_v38, %v10209_v63  ;;  %v10448_v30 = vsub.f32 %v13799_v17, %v10209_v63  ;;  %v13801_v38 = vld [vmem:[#allocation50_spill] sm:$0xff]  ;;  %v13803_v17 = vld [vmem:[#allocation53_spill] sm:$0xff] }
 0x3e3   : > { %v3070_v51 = vadd.f32 %v3069_v26, %v3068_v29  ;;  %v3073_v29 = vsel %vm1532_vm3, %v3021_v45, 0.0  ;;  %v3025_v45 = vmul.f32 %v2984_v43, %v2984_v43  ;;  %v2988_v43 = vmul.f32 %v10343_v4, %v13780_v47  ;;  %v13783_v47 = vld [vmem:[#allocation30_spill] sm:$0xff] }
 0x3e4   : > { %v10455_v35 = vsub.f32 %v13801_v38, %v10209_v63  ;;  %v10462_v2 = vsub.f32 %v13803_v17, %v10209_v63  ;;  %v13805_v38 = vld [vmem:[#allocation54_spill] sm:$0xff]  ;;  %v13807_v17 = vld [vmem:[#allocation57_spill] sm:$0xff] }
 0x3e5   : > { %v3072_v11 = vadd.f32 %v3071_v18, %v3070_v51  ;;  %v3075_v51 = vsel %vm1532_vm3, %v3022_v36, 0.0  ;;  %v3026_v36 = vmul.f32 %v2985_v39, %v2985_v39  ;;  %v2989_v39 = vmul.f32 %v10350_v57, %v13781_v59  ;;  %v13784_v59 = vld [vmem:[#allocation31_spill] sm:$0xff] }
 0x3e6   : > { %v10469_v7 = vsub.f32 %v13805_v38, %v10209_v63  ;;  %v10476_v48 = vsub.f32 %v13807_v17, %v10209_v63  ;;  %v10483_v38 = vsub.f32 %v10174_v24, %v10209_v63  ;;  %v13810_v17 = vld [vmem:[#allocation58_spill] sm:$0xff] }
 0x3e7   : > { %v3074_v26 = vadd.f32 %v3073_v29, %v3072_v11  ;;  %v3077_v11 = vsel %vm1532_vm3, %v3023_v16, 0.0  ;;  %v3027_v16 = vmul.f32 %v2986_v12, %v2986_v12  ;;  %v2990_v12 = vmul.f32 %v10357_v41, %v13783_v47  ;;  %v13785_v47 = vld [vmem:[#allocation33_spill] sm:$0xff] }
 0x3e8   : > { %v3007_v46 = vmul.f32 %v10476_v48, %v13810_v17 }
 0x3e9   : > { %v3076_v18 = vadd.f32 %v3075_v51, %v3074_v26  ;;  %v3079_v26 = vsel %vm1532_vm3, %v3024_v22, 0.0  ;;  %v3028_v22 = vmul.f32 %v2987_v53, %v2987_v53  ;;  %v2991_v53 = vmul.f32 %v10364_v6, %v13784_v59  ;;  %v13786_v59 = vld [vmem:[#allocation34_spill] sm:$0xff] }
 0x3eb   : > { %v3078_v29 = vadd.f32 %v3077_v11, %v3076_v18  ;;  %v3081_v18 = vsel %vm1532_vm3, %v3025_v45, 0.0  ;;  %v3029_v45 = vmul.f32 %v2988_v43, %v2988_v43  ;;  %v2992_v43 = vmul.f32 %v10371_v14, %v13785_v47  ;;  %v13788_v47 = vld [vmem:[#allocation35_spill] sm:$0xff] }
 0x3ed   : > { %v3080_v51 = vadd.f32 %v3079_v26, %v3078_v29  ;;  %v3083_v29 = vsel %vm1532_vm3, %v3026_v36, 0.0  ;;  %v3030_v36 = vmul.f32 %v2989_v39, %v2989_v39  ;;  %v2993_v39 = vmul.f32 %v10378_v13, %v13786_v59  ;;  %v13790_v59 = vld [vmem:[#allocation36_spill] sm:$0xff] }
 0x3ef   : > { %v3082_v11 = vadd.f32 %v3081_v18, %v3080_v51  ;;  %v3085_v51 = vsel %vm1532_vm3, %v3027_v16, 0.0  ;;  %v3031_v16 = vmul.f32 %v2990_v12, %v2990_v12  ;;  %v2994_v12 = vmul.f32 %v10385_v8, %v13788_v47  ;;  %v13791_v47 = vld [vmem:[#allocation38_spill] sm:$0xff] }
 0x3f1   : > { %v3084_v26 = vadd.f32 %v3083_v29, %v3082_v11  ;;  %v3087_v11 = vsel %vm1532_vm3, %v3028_v22, 0.0  ;;  %v3032_v22 = vmul.f32 %v2991_v53, %v2991_v53  ;;  %v2995_v53 = vmul.f32 %v10392_v1, %v13790_v59  ;;  %v13792_v59 = vld [vmem:[#allocation40_spill] sm:$0xff] }
 0x3f3   : > { %v3086_v18 = vadd.f32 %v3085_v51, %v3084_v26  ;;  %v3089_v26 = vsel %vm1532_vm3, %v3029_v45, 0.0  ;;  %v3033_v45 = vmul.f32 %v2992_v43, %v2992_v43  ;;  %v2996_v43 = vmul.f32 %v10399_v10, %v13791_v47  ;;  %v13794_v47 = vld [vmem:[#allocation41_spill] sm:$0xff] }
 0x3f5   : > { %v3088_v29 = vadd.f32 %v3087_v11, %v3086_v18  ;;  %v3091_v18 = vsel %vm1532_vm3, %v3030_v36, 0.0  ;;  %v3034_v36 = vmul.f32 %v2993_v39, %v2993_v39  ;;  %v2997_v39 = vmul.f32 %v10406_v32, %v13792_v59  ;;  %v13796_v59 = vld [vmem:[#allocation43_spill] sm:$0xff] }
 0x3f7   : > { %v3090_v51 = vadd.f32 %v3089_v26, %v3088_v29  ;;  %v3093_v29 = vsel %vm1532_vm3, %v3031_v16, 0.0  ;;  %v3035_v16 = vmul.f32 %v2994_v12, %v2994_v12  ;;  %v2998_v12 = vmul.f32 %v10413_v0, %v13794_v47  ;;  %v13798_v47 = vld [vmem:[#allocation44_spill] sm:$0xff] }
 0x3f9   : > { %v3092_v11 = vadd.f32 %v3091_v18, %v3090_v51  ;;  %v3095_v51 = vsel %vm1532_vm3, %v3032_v22, 0.0  ;;  %v3036_v22 = vmul.f32 %v2995_v53, %v2995_v53  ;;  %v2999_v53 = vmul.f32 %v10420_v37, %v13796_v59  ;;  %v13800_v59 = vld [vmem:[#allocation47_spill] sm:$0xff] }
 0x3fb   : > { %v3094_v26 = vadd.f32 %v3093_v29, %v3092_v11  ;;  %v3097_v11 = vsel %vm1532_vm3, %v3033_v45, 0.0  ;;  %v3037_v45 = vmul.f32 %v2996_v43, %v2996_v43  ;;  %v3000_v43 = vmul.f32 %v10427_v55, %v13798_v47  ;;  %v13802_v47 = vld [vmem:[#allocation48_spill] sm:$0xff] }
 0x3fd   : > { %v3096_v18 = vadd.f32 %v3095_v51, %v3094_v26  ;;  %v3099_v26 = vsel %vm1532_vm3, %v3034_v36, 0.0  ;;  %v3038_v36 = vmul.f32 %v2997_v39, %v2997_v39  ;;  %v3001_v39 = vmul.f32 %v10434_v27, %v13800_v59  ;;  %v13804_v59 = vld [vmem:[#allocation51_spill] sm:$0xff] }
 0x3ff   : > { %v3098_v29 = vadd.f32 %v3097_v11, %v3096_v18  ;;  %v3101_v18 = vsel %vm1532_vm3, %v3035_v16, 0.0  ;;  %v3039_v16 = vmul.f32 %v2998_v12, %v2998_v12  ;;  %v3002_v12 = vmul.f32 %v10441_v23, %v13802_v47  ;;  %v13806_v47 = vld [vmem:[#allocation52_spill] sm:$0xff] }
 0x401   : > { %v3100_v51 = vadd.f32 %v3099_v26, %v3098_v29  ;;  %v3103_v29 = vsel %vm1532_vm3, %v3036_v22, 0.0  ;;  %v3040_v22 = vmul.f32 %v2999_v53, %v2999_v53  ;;  %v3003_v53 = vmul.f32 %v10448_v30, %v13804_v59  ;;  %v13808_v59 = vld [vmem:[#allocation55_spill] sm:$0xff] }
 0x403   : > { %v3102_v11 = vadd.f32 %v3101_v18, %v3100_v51  ;;  %v3105_v51 = vsel %vm1532_vm3, %v3037_v45, 0.0  ;;  %v3041_v45 = vmul.f32 %v3000_v43, %v3000_v43  ;;  %v3004_v43 = vmul.f32 %v10455_v35, %v13806_v47  ;;  %v13809_v47 = vld [vmem:[#allocation56_spill] sm:$0xff] }
 0x405   : > { %v3104_v26 = vadd.f32 %v3103_v29, %v3102_v11  ;;  %v3107_v11 = vsel %vm1532_vm3, %v3038_v36, 0.0  ;;  %v3042_v36 = vmul.f32 %v3001_v39, %v3001_v39  ;;  %v3005_v39 = vmul.f32 %v10462_v2, %v13808_v59 }
 0x407   : > { %v3106_v18 = vadd.f32 %v3105_v51, %v3104_v26  ;;  %v3109_v26 = vsel %vm1532_vm3, %v3039_v16, 0.0  ;;  %v3043_v16 = vmul.f32 %v3002_v12, %v3002_v12  ;;  %v3006_v12 = vmul.f32 %v10469_v7, %v13809_v47 }
 0x408   : > { %v3046_v31 = vmul.f32 %v3005_v39, %v3005_v39 }
 0x409   : > { %v3108_v29 = vadd.f32 %v3107_v11, %v3106_v18  ;;  %v3111_v18 = vsel %vm1532_vm3, %v3040_v22, 0.0  ;;  %v3044_v22 = vmul.f32 %v3003_v53, %v3003_v53 }
 0x40b   : > { %v3110_v51 = vadd.f32 %v3109_v26, %v3108_v29  ;;  %v3113_v29 = vsel %vm1532_vm3, %v3041_v45, 0.0  ;;  %v3045_v45 = vmul.f32 %v3004_v43, %v3004_v43  ;;  %v3119_v53 = vsel %vm1532_vm3, %v3044_v22, 0.0 }
 0x40c   : > { %v3123_v43 = vsel %vm1532_vm3, %v3046_v31, 0.0 }
 0x40d   : > { %v3112_v11 = vadd.f32 %v3111_v18, %v3110_v51  ;;  %v3115_v51 = vsel %vm1532_vm3, %v3042_v36, 0.0  ;;  %v3008_v36 = vmul.f32 %v10483_v38, %v10176_v42  ;;  %v3121_v24 = vsel %vm1532_vm3, %v3045_v45, 0.0 }
 0x40f   : > { %v3114_v26 = vadd.f32 %v3113_v29, %v3112_v11  ;;  %v3117_v11 = vsel %vm1532_vm3, %v3043_v16, 0.0  ;;  %v3049_v16 = vmul.f32 %v3008_v36, %v3008_v36 }
 0x411   : > { %v3116_v18 = vadd.f32 %v3115_v51, %v3114_v26  ;;  %v3047_v26 = vmul.f32 %v3006_v12, %v3006_v12  ;;  %v3048_v51 = vmul.f32 %v3007_v46, %v3007_v46  ;;  %v3129_v22 = vsel %vm1532_vm3, %v3049_v16, 0.0 }
 0x413   : > { %v3118_v29 = vadd.f32 %v3117_v11, %v3116_v18  ;;  %v3125_v18 = vsel %vm1532_vm3, %v3047_v26, 0.0  ;;  %v3127_v39 = vsel %vm1532_vm3, %v3048_v51, 0.0 }
 0x415   : > { %v3120_v59 = vadd.f32 %v3119_v53, %v3118_v29 }
 0x417   : > { %v3122_v63 = vadd.f32 %v3121_v24, %v3120_v59 }
 0x419   : > { %v3124_v47 = vadd.f32 %v3123_v43, %v3122_v63 }
 0x41b   : > { %v3126_v11 = vadd.f32 %v3125_v18, %v3124_v47  ;;  %v13811_v47 = vmov 0  }
 0x41d   : > { %v3128_v17 = vadd.f32 %v3127_v39, %v3126_v11 }
 0x41f   : > { %v3130_v29 = vadd.f32 %v3129_v22, %v3128_v17 }
 0x421   : > { %v3131_v53 = vrot.slane %v3130_v29, 4 }
 0x423   : > { %v3132_v42 = vadd.f32 %v3131_v53, %v3130_v29 }
 0x425   : > { %v3133_v12 = vrot.slane %v3132_v42, 2 }
 0x427   : > { %v3134_v28 = vadd.f32 %v3133_v12, %v3132_v42 }
 0x429   : > { %v3135_v45 = vrot.slane %v3134_v28, 1 }
 0x42b   : > { %v3136_v59 = vadd.f32 %v3135_v45, %v3134_v28 }
 0x42d   : > { %v3138_v46 = vsel %vm1532_vm3, %v3136_v59, 0 }
 0x42e   : > { %v3207_v31 = vand.u32 4294901760, %v3138_v46 }
 0x430   : > { %v3208_v24 = vsub.f32 %v3138_v46, %v3207_v31 }
 0x432   : > { %v3209_v36 = vand.u32 4294901760, %v3208_v24 }
 0x434   : > { %v3210_v63 = vsub.f32 %v3208_v24, %v3209_v36 }
 0x436   : > { %v3211_v26 = vand.u32 4294901760, %v3210_v63 }
 0x438   : > { %8120 = vmatmul.mubr.f32.vlgmr.msra.gmra.mrb[2].mxu1 %v3211_v26 }
 0x439   : > { %8302 = vmatpush3.bf16.msra.mxu1 %v9918_v21  ;;  %8126 = vmatprep.mubr.msk.f32.mxu1 %vm8774_vm1, %v13761_v20 }
 0x43a   : > { %8303 = vmatprep.subr.bf16.mxu1 %v13762_v5 }
 0x440   : > { %8127 = vmatmul.mubr.f32.vlgmr.msra.gmra.mrb[2].mxu1 %v3207_v31 }
 0x441   : > { %8305 = vmatpush3.bf16.msra.mxu1 %v9930_v25  ;;  %8133 = vmatprep.mubr.msk.f32.mxu1 %vm8774_vm1, %v13761_v20 }
 0x442   : > { %8306 = vmatprep.subr.bf16.mxu1 %v13762_v5 }
 0x448   : > { %8134 = vmatmul.mubr.f32.vlgmr.msra.gmra.mrb[2].mxu1 %v3208_v24 }
 0x449   : > { %8308 = vmatpush3.bf16.msra.mxu1 %v9877_v49  ;;  %8140 = vmatprep.mubr.msk.f32.mxu1 %vm8774_vm1, %v13761_v20 }
 0x44a   : > { %8309 = vmatprep.subr.bf16.mxu1 %v13762_v5 }
 0x450   : > { %8141 = vmatmul.mubr.f32.vlgmr.msra.gmra.mrb[2].mxu1 %v3209_v36 }
 0x451   : > { %8311 = vmatpush3.bf16.msra.mxu1 %v9972_v34  ;;  %8147 = vmatprep.mubr.msk.f32.mxu1 %vm8774_vm1, %v13761_v20 }
 0x452   : > { %8312 = vmatprep.subr.bf16.mxu1 %v13762_v5 }
 0x458   : > { %8148 = vmatmul.mubr.f32.vlgmr.msra.gmra.mrb[2].mxu1 %v3207_v31 }
 0x459   : > { %8314 = vmatpush3.bf16.msra.mxu1 %v9877_v49  ;;  %8154 = vmatprep.mubr.msk.f32.mxu1 %vm8774_vm1, %v13761_v20  ;;  %v13827_v20 = vld [vmem:[#allocation19_spill] sm:$0xff] }
 0x45a   : > { %8351 = vmatprep.subr.bf16.mxu1 %v13811_v47 }
 0x460   : > { %8155 = vmatmul.mubr.f32.vlgmr.msra.gmra.mrb[2].mxu1 %v3207_v31 }
 0x533   : > { %v3595_v42 = vpop.f32.mrb[2].mxu1 }
 0x534   : > { %v3599_v28 = vmul.f32 0.001953125, %v3595_v42  ;;  %v8156_v17 = vpop.f32.mrb[3].mxu1 }
 0x536   : > { %v3600_v51 = vadd.f32 1e-05, %v3599_v28 }
 0x538   : > { %8451 = vrsqrt.f32 %v3600_v51 }
 0x542   : > { %v8452_v43 = vpop.eup %8451 }
 0x543   : > { %v10520_v16 = vrot.slane %v8452_v43, %v10206_v56 }
 0x545   : > { %v3606_v18 = vmul.f32 %v10520_v16, %v10213_v61  ;;  %v3607_v11 = vmul.f32 %v10520_v16, %v10217_v62  ;;  %v3608_v39 = vmul.f32 %v10520_v16, %v10221_v33  ;;  %v3609_v22 = vmul.f32 %v10520_v16, %v10227_v54 }
 0x546   : > { %v10532_v29 = vmul.f32 %v10520_v16, %v10259_v60  ;;  %v10536_v53 = vmul.f32 %v10520_v16, %v10266_v9  ;;  %v3616_v61 = vmul.f32 %v10520_v16, %v10273_v19  ;;  %v3617_v62 = vmul.f32 %v10520_v16, %v10280_v52  ;;  %v10557_v52 = vld [vmem:[%s13454_s5] ss:$0 sm:$0xff] }
 0x547   : > { %v3618_v33 = vmul.f32 %v10520_v16, %v10287_v58  ;;  %v3619_v54 = vmul.f32 %v10520_v16, %v10294_v15  ;;  %v3620_v60 = vmul.f32 %v10520_v16, %v10301_v50  ;;  %v3621_v12 = vmul.f32 %v10520_v16, %v10308_v40 }
 0x548   : > { %v3624_v9 = vmul.f32 %v10520_v16, %v10329_v44  ;;  %v3625_v19 = vmul.f32 %v10520_v16, %v10336_v3  ;;  %v3626_v58 = vmul.f32 %v10520_v16, %v10343_v4  ;;  %v3627_v15 = vmul.f32 %v10520_v16, %v10350_v57 }
 0x549   : > { %v3628_v50 = vmul.f32 %v10520_v16, %v10357_v41  ;;  %v3629_v40 = vmul.f32 %v10520_v16, %v10364_v6  ;;  %v3630_v44 = vmul.f32 %v10520_v16, %v10371_v14  ;;  %v3631_v3 = vmul.f32 %v10520_v16, %v10378_v13 }
 0x54a   : > { %v3632_v45 = vmul.f32 %v10520_v16, %v10385_v8  ;;  %v3633_v4 = vmul.f32 %v10520_v16, %v10392_v1  ;;  %v3634_v57 = vmul.f32 %v10520_v16, %v10399_v10  ;;  %v3635_v41 = vmul.f32 %v10520_v16, %v10406_v32 }
 0x54b   : > { %v3636_v6 = vmul.f32 %v10520_v16, %v10413_v0  ;;  %v3637_v14 = vmul.f32 %v10520_v16, %v10420_v37  ;;  %v3638_v13 = vmul.f32 %v10520_v16, %v10427_v55  ;;  %v3653_v8 = vmul.f32 %v10557_v52, %v3606_v18  ;;  %v10623_v18 = vld [vmem:[%s13455_s6] ss:$0 sm:$0xff] }
 0x54c   : > { %v3654_v59 = vmul.f32 %v10557_v52, %v3607_v11  ;;  %v3655_v1 = vmul.f32 %v10557_v52, %v3608_v39  ;;  %v3639_v10 = vmul.f32 %v10520_v16, %v10434_v27  ;;  %v3640_v32 = vmul.f32 %v10520_v16, %v10441_v23 }
 0x54d   : > { %v3641_v0 = vmul.f32 %v10520_v16, %v10448_v30  ;;  %v3656_v37 = vmul.f32 %v10557_v52, %v3609_v22  ;;  %v3642_v55 = vmul.f32 %v10520_v16, %v10455_v35  ;;  %v3643_v46 = vmul.f32 %v10520_v16, %v10462_v2 }
 0x54e   : > { %v3644_v31 = vmul.f32 %v10520_v16, %v10469_v7  ;;  %v3645_v27 = vmul.f32 %v10520_v16, %v10476_v48  ;;  %v3646_v23 = vmul.f32 %v10520_v16, %v10483_v38  ;;  %v3663_v24 = vmul.f32 %v10557_v52, %v3616_v61 }
 0x54f   : > { %v3664_v30 = vmul.f32 %v10557_v52, %v3617_v62  ;;  %v3665_v36 = vmul.f32 %v10557_v52, %v3618_v33  ;;  %v3666_v35 = vmul.f32 %v10557_v52, %v3619_v54  ;;  %v3667_v63 = vmul.f32 %v10557_v52, %v3620_v60 }
 0x550   : > { %v3668_v2 = vmul.f32 %v10557_v52, %v3621_v12  ;;  %v3671_v7 = vmul.f32 %v10557_v52, %v3624_v9  ;;  %v3672_v26 = vmul.f32 %v10557_v52, %v3625_v19  ;;  %v3673_v48 = vmul.f32 %v10557_v52, %v3626_v58 }
 0x551   : > { %v3674_v38 = vmul.f32 %v10557_v52, %v3627_v15  ;;  %v3675_v42 = vmul.f32 %v10557_v52, %v3628_v50  ;;  %v3676_v28 = vmul.f32 %v10557_v52, %v3629_v40  ;;  %v3677_v17 = vmul.f32 %v10557_v52, %v3630_v44 }
 0x552   : > { %v3678_v51 = vmul.f32 %v10557_v52, %v3631_v3  ;;  %v3679_v43 = vmul.f32 %v10557_v52, %v3632_v45  ;;  %v3680_v11 = vmul.f32 %v10557_v52, %v3633_v4  ;;  %v3681_v39 = vmul.f32 %v10557_v52, %v3634_v57 }
 0x553   : > { %v3682_v22 = vmul.f32 %v10557_v52, %v3635_v41  ;;  %v3683_v61 = vmul.f32 %v10557_v52, %v3636_v6  ;;  %v3684_v62 = vmul.f32 %v10557_v52, %v3637_v14  ;;  %v3685_v33 = vmul.f32 %v10557_v52, %v3638_v13 }
 0x554   : > { %v3686_v54 = vmul.f32 %v10557_v52, %v3639_v10  ;;  %v3687_v60 = vmul.f32 %v10557_v52, %v3640_v32  ;;  %v3688_v12 = vmul.f32 %v10557_v52, %v3641_v0  ;;  %v3689_v9 = vmul.f32 %v10557_v52, %v3642_v55 }
 0x555   : > { %v3690_v19 = vmul.f32 %v10557_v52, %v3643_v46  ;;  %v3691_v58 = vmul.f32 %v10557_v52, %v3644_v31  ;;  %v3692_v15 = vmul.f32 %v10557_v52, %v3645_v27  ;;  %v3693_v50 = vmul.f32 %v10557_v52, %v3646_v23 }
 0x556   : > { %v10640_v40 = vadd.f32 %v10623_v18, %v3665_v36  ;;  %v10643_v44 = vadd.f32 %v10623_v18, %v3666_v35  ;;  %v10646_v3 = vadd.f32 %v10623_v18, %v3667_v63  ;;  %v10649_v45 = vadd.f32 %v10623_v18, %v3668_v2 }
 0x557   : > { %v10652_v4 = vadd.f32 %v10623_v18, %v3653_v8  ;;  %v10655_v57 = vadd.f32 %v10623_v18, %v3654_v59  ;;  %v10660_v14 = vadd.f32 %v10623_v18, %v3655_v1  ;;  %v10663_v13 = vadd.f32 %v10623_v18, %v3656_v37 }
 0x558   : > { %v7745_v41 = vmul.f32 -1.442695, %v10640_v40  ;;  %v7746_v6 = vmul.f32 -1.442695, %v10643_v44  ;;  %v7747_v10 = vmul.f32 -1.442695, %v10646_v3  ;;  %v3661_v8 = vmul.f32 %v10557_v52, %v10532_v29 }
 0x559   : > { %v7748_v32 = vmul.f32 -1.442695, %v10649_v45  ;;  %v3662_v59 = vmul.f32 %v10557_v52, %v10536_v53  ;;  %v10672_v0 = vadd.f32 %v10623_v18, %v3663_v24  ;;  %v10675_v1 = vadd.f32 %v10623_v18, %v3664_v30 }
 0x55a   : > { %8453 = vpow2.f32 %v7745_v41  ;;  %v10678_v37 = vadd.f32 %v10623_v18, %v3671_v7  ;;  %v10681_v55 = vadd.f32 %v10623_v18, %v3672_v26  ;;  %v10684_v29 = vadd.f32 %v10623_v18, %v3673_v48  ;;  %v13821_v41 = vld [vmem:[#allocation63_spill] sm:$0xff] }
 0x55b   : > { %8455 = vpow2.f32 %v7746_v6  ;;  %v10687_v53 = vadd.f32 %v10623_v18, %v3674_v38  ;;  %v10690_v46 = vadd.f32 %v10623_v18, %v3675_v42  ;;  %v10693_v31 = vadd.f32 %v10623_v18, %v3676_v28 }
 0x55c   : > { %8457 = vpow2.f32 %v7747_v10  ;;  %v10696_v27 = vadd.f32 %v10623_v18, %v3677_v17  ;;  %v10699_v23 = vadd.f32 %v10623_v18, %v3678_v51  ;;  %v10702_v24 = vadd.f32 %v10623_v18, %v3679_v43 }
 0x55d   : > { %8459 = vpow2.f32 %v7748_v32  ;;  %v10705_v30 = vadd.f32 %v10623_v18, %v3680_v11  ;;  %v10708_v36 = vadd.f32 %v10623_v18, %v3681_v39  ;;  %v10711_v35 = vadd.f32 %v10623_v18, %v3682_v22 }
 0x55e   : > { %v10714_v63 = vadd.f32 %v10623_v18, %v3683_v61  ;;  %v10717_v2 = vadd.f32 %v10623_v18, %v3684_v62  ;;  %v10720_v7 = vadd.f32 %v10623_v18, %v3685_v33  ;;  %v10723_v26 = vadd.f32 %v10623_v18, %v3686_v54  ;;  %v13819_v54 = vld [vmem:[#allocation61_spill] sm:$0xff] }
 0x55f   : > { %v10726_v48 = vadd.f32 %v10623_v18, %v3687_v60  ;;  %v10729_v38 = vadd.f32 %v10623_v18, %v3688_v12  ;;  %v10732_v42 = vadd.f32 %v10623_v18, %v3689_v9  ;;  %v10735_v28 = vadd.f32 %v10623_v18, %v3690_v19  ;;  %v13820_v19 = vld [vmem:[#allocation62_spill] sm:$0xff] }
 0x560   : > { %13812 = vst [vmem:[#allocation27_spill] sm:$0xff] %v10717_v2  ;;  %13813 = vst [vmem:[#allocation29_spill] sm:$0xff] %v10720_v7  ;;  %v10738_v17 = vadd.f32 %v10623_v18, %v3691_v58  ;;  %v10741_v51 = vadd.f32 %v10623_v18, %v3692_v15  ;;  %v10744_v43 = vadd.f32 %v10623_v18, %v3693_v50  ;;  %v7743_v11 = vmul.f32 -1.442695, %v10672_v0 }
 0x561   : > { %13814 = vst [vmem:[#allocation32_spill] sm:$0xff] %v10726_v48  ;;  %13815 = vst [vmem:[#allocation37_spill] sm:$0xff] %v10735_v28  ;;  %v10748_v39 = vadd.f32 %v10623_v18, %v3661_v8  ;;  %v7744_v22 = vmul.f32 -1.442695, %v10675_v1  ;;  %v10752_v62 = vadd.f32 %v10623_v18, %v3662_v59  ;;  %v3610_v60 = vmul.f32 %v10520_v16, %v13819_v54  ;;  %v13822_v8 = vld [vmem:[#allocation64_spill] sm:$0xff] }
 0x562   : > { %13816 = vst [vmem:[#allocation39_spill] sm:$0xff] %v10738_v17  ;;  %13817 = vst [vmem:[#allocation42_spill] sm:$0xff] %v10741_v51  ;;  %8461 = vpow2.f32 %v7743_v11  ;;  %v3611_v58 = vmul.f32 %v10520_v16, %v13820_v19  ;;  %v3612_v6 = vmul.f32 %v10520_v16, %v13821_v41  ;;  %v3613_v59 = vmul.f32 %v10520_v16, %v13822_v8  ;;  %v13824_v19 = vld [vmem:[#allocation66_spill] sm:$0xff] }
 0x563   : > { %13818 = vst [vmem:[#allocation45_spill] sm:$0xff] %v10744_v43  ;;  %8463 = vpow2.f32 %v7744_v22  ;;  %v7741_v32 = vmul.f32 -1.442695, %v10748_v39  ;;  %v7742_v22 = vmul.f32 -1.442695, %v10752_v62  ;;  %v13835_v43 = vld [vmem:[#allocation10_spill] sm:$0xff] }
 0x564   : > { %v8454_v61 = vpop.eup %8453  ;;  %v3659_v41 = vmul.f32 %v10557_v52, %v3612_v6  ;;  %v7734_v8 = vmul.f32 -1.442695, %v10655_v57 }
 0x565   : > { %v8456_v33 = vpop.eup %8455  ;;  %v3876_v12 = vadd.f32 1.0, %v8454_v61  ;;  %v13823_v61 = vld [vmem:[#allocation65_spill] sm:$0xff] }
 0x566   : > { %v8458_v9 = vpop.eup %8457  ;;  %v3877_v15 = vadd.f32 1.0, %v8456_v33  ;;  %v3622_v54 = vmul.f32 %v10520_v16, %v13823_v61  ;;  %v3657_v33 = vmul.f32 %v10557_v52, %v3610_v60 }
 0x567   : > { %v8460_v50 = vpop.eup %8459  ;;  %v3878_v10 = vadd.f32 1.0, %v8458_v9  ;;  %8465 = vrcp.f32 %v3876_v12  ;;  %v3623_v9 = vmul.f32 %v10520_v16, %v13824_v19  ;;  %v3658_v12 = vmul.f32 %v10557_v52, %v3611_v58 }
 0x568   : > { %v3879_v11 = vadd.f32 1.0, %v8460_v50  ;;  %8467 = vrcp.f32 %v3877_v15  ;;  %v7733_v50 = vmul.f32 -1.442695, %v10652_v4  ;;  %v3660_v15 = vmul.f32 %v10557_v52, %v3613_v59 }
 0x569   : > { %8469 = vrcp.f32 %v3878_v10  ;;  %v3669_v61 = vmul.f32 %v10557_v52, %v3622_v54  ;;  %v10776_v60 = vadd.f32 %v10623_v18, %v3657_v33  ;;  %v3670_v16 = vmul.f32 %v10557_v52, %v3623_v9  ;;  %v10794_v52 = vld [vmem:[%s476_s28] ss:$0 sm:$0xff] }
 0x56a   : > { %8471 = vrcp.f32 %v3879_v11  ;;  %v10784_v58 = vadd.f32 %v10623_v18, %v3658_v12  ;;  %v7735_v11 = vmul.f32 -1.442695, %v10660_v14  ;;  %v7736_v33 = vmul.f32 -1.442695, %v10663_v13 }
 0x56b   : > { %8473 = vpow2.f32 %v7741_v32  ;;  %v10787_v32 = vadd.f32 %v10623_v18, %v3659_v41  ;;  %v10797_v9 = vadd.f32 %v10623_v18, %v3669_v61  ;;  %v7737_v12 = vmul.f32 -1.442695, %v10776_v60 }
 0x56c   : > { %8475 = vpow2.f32 %v7742_v22  ;;  %v8462_v10 = vpop.eup %8461  ;;  %v10791_v22 = vadd.f32 %v10623_v18, %v3660_v15 }
 0x56d   : > { %v8464_v6 = vpop.eup %8463  ;;  %v3874_v59 = vadd.f32 1.0, %v8462_v10  ;;  %8477 = vpow2.f32 %v7733_v50  ;;  %v7738_v50 = vmul.f32 -1.442695, %v10784_v58  ;;  %v7739_v56 = vmul.f32 -1.442695, %v10787_v32 }
 0x56e   : > { %v3875_v54 = vadd.f32 1.0, %v8464_v6  ;;  %8479 = vpow2.f32 %v7734_v8  ;;  %v10804_v8 = vadd.f32 %v10623_v18, %v3670_v16  ;;  %v7740_v25 = vmul.f32 -1.442695, %v10791_v22 }
 0x56f   : > { %8481 = vrcp.f32 %v3874_v59 }
 0x570   : > { %8483 = vrcp.f32 %v3875_v54 }
 0x571   : > { %v8466_v19 = vpop.eup %8465  ;;  %8485 = vpow2.f32 %v7735_v11  ;;  %v13825_v11 = vld [vmem:[#allocation15_spill] sm:$0xff] }
 0x572   : > { %v8468_v41 = vpop.eup %8467  ;;  %v3999_v10 = vmul.f32 %v8466_v19, %v10640_v40  ;;  %8487 = vpow2.f32 %v7736_v33 }
 0x573   : > { %v8470_v15 = vpop.eup %8469  ;;  %v4000_v6 = vmul.f32 %v8468_v41, %v10643_v44  ;;  %v7749_v44 = vmul.f32 -1.442695, %v10797_v9  ;;  %8489 = vpow2.f32 %v7737_v12  ;;  %v13828_v12 = vld [vmem:[#allocation20_spill] sm:$0xff] }
 0x574   : > { %v8472_v61 = vpop.eup %8471  ;;  %v4001_v59 = vmul.f32 %v8470_v15, %v10646_v3  ;;  %v4047_v34 = vadd.f32 %v10794_v52, %v3999_v10  ;;  %8491 = vpow2.f32 %v7738_v50  ;;  %v13826_v10 = vld [vmem:[#allocation17_spill] sm:$0xff] }
 0x575   : > { %v8474_v40 = vpop.eup %8473  ;;  %v4002_v54 = vmul.f32 %v8472_v61, %v10649_v45  ;;  %v4048_v19 = vadd.f32 %v10794_v52, %v4000_v6  ;;  %8493 = vpow2.f32 %v7739_v56  ;;  %v7750_v6 = vmul.f32 -1.442695, %v10804_v8 }
 0x576   : > { %v8476_v18 = vpop.eup %8475  ;;  %v4049_v16 = vadd.f32 %v10794_v52, %v4001_v59  ;;  %v4088_v41 = vmul.f32 %v4047_v34, %v13825_v11  ;;  %v3872_v21 = vadd.f32 1.0, %v8474_v40  ;;  %v7751_v34 = vmul.f32 -1.442695, %v10678_v37 }
 0x577   : > { %v4050_v3 = vadd.f32 %v10794_v52, %v4002_v54  ;;  %v4089_v15 = vmul.f32 %v4048_v19, %v13826_v10  ;;  %v3873_v33 = vadd.f32 1.0, %v8476_v18  ;;  %v10819_v61 = vpop.eup %8477  ;;  %v7752_v40 = vmul.f32 -1.442695, %v10681_v55 }
 0x578   : > { %v4090_v45 = vmul.f32 %v4049_v16, %v13827_v20  ;;  %8495 = vrcp.f32 %v3872_v21  ;;  %v10825_v50 = vpop.eup %8479  ;;  %v7753_v21 = vmul.f32 -1.442695, %v10684_v29  ;;  %v7754_v16 = vmul.f32 -1.442695, %v10687_v53 }
 0x579   : > { %v4091_v49 = vmul.f32 %v4050_v3, %v13828_v12  ;;  %v10822_v59 = vpack.c.bf16 %v4089_v15, %v4088_v41  ;;  %8497 = vrcp.f32 %v3873_v33  ;;  %v8482_v56 = vpop.eup %8481  ;;  %v7756_v10 = vmul.f32 -1.442695, %v10693_v31 }
 0x57a   : > { %8499 = vpow2.f32 %v7740_v25  ;;  %v8484_v19 = vpop.eup %8483  ;;  %v3997_v18 = vmul.f32 %v8482_v56, %v10672_v0  ;;  %v7757_v33 = vmul.f32 -1.442695, %v10696_v27  ;;  %v13832_v56 = vld [vmem:[#allocation14_spill] sm:$0xff] }
 0x57b   : > { %13829 = vst [vmem:[#allocation46_spill] sm:$0xff] %v10822_v59  ;;  %v10828_v54 = vpack.c.bf16 %v4091_v49, %v4090_v45  ;;  %v13569_v20 = vrot.slane %v10822_v59, 3  ;;  %8501 = vpow2.f32 %v7749_v44  ;;  %v10834_v11 = vpop.eup %8485  ;;  %v3998_v25 = vmul.f32 %v8484_v19, %v10675_v1 }
 0x57c   : > { %8503 = vpow2.f32 %v7750_v6  ;;  %v7755_v49 = vmul.f32 -1.442695, %v10690_v46  ;;  %v10839_v3 = vpop.eup %8487  ;;  %v4045_v44 = vadd.f32 %v10794_v52, %v3997_v18  ;;  %v13831_v6 = vld [vmem:[#allocation13_spill] sm:$0xff]  ;;  %v7759_v18 = vmul.f32 -1.442695, %v10702_v24 }
 0x57d   : > { %13830 = vst [vmem:[#allocation49_spill] sm:$0xff] %v10828_v54  ;;  %v13570_v41 = vrot.slane %v10828_v54, 3  ;;  %8505 = vpow2.f32 %v7751_v34  ;;  %v10843_v0 = vpop.eup %8489  ;;  %v4046_v1 = vadd.f32 %v10794_v52, %v3998_v25  ;;  %v7758_v34 = vmul.f32 -1.442695, %v10699_v23 }
 0x57e   : > { %8507 = vpow2.f32 %v7752_v40  ;;  %v10852_v45 = vpop.eup %8491  ;;  %v4086_v12 = vmul.f32 %v4045_v44, %v13831_v6 }
 0x57f   : > { %v4831_v15 = vsel %vm4820_vm11, %v13569_v20, %v13570_v41  ;;  %8509 = vpow2.f32 %v7753_v21  ;;  %v10857_v40 = vpop.eup %8493  ;;  %v4087_v19 = vmul.f32 %v4046_v1, %v13832_v56  ;;  %v7760_v21 = vmul.f32 -1.442695, %v10705_v30 }
 0x580   : > { %7789 = vmatprep.mubr.msk.bf16.mxu1 %vm1532_vm3, %v4831_v15  ;;  %8511 = vpow2.f32 %v7754_v16  ;;  %v7761_v20 = vmul.f32 -1.442695, %v10708_v36  ;;  %v7762_v1 = vmul.f32 -1.442695, %v10711_v35 }
 0x581   : > { %8513 = vpow2.f32 %v7755_v49  ;;  %v10863_v41 = vpack.c.bf16 %v4087_v19, %v4086_v12  ;;  %v7763_v49 = vmul.f32 -1.442695, %v10714_v63  ;;  %v7764_v12 = vmul.f32 -1.442695, %v10717_v2 }
 0x582   : > { %v8496_v25 = vpop.eup %8495  ;;  %8515 = vpow2.f32 %v7756_v10  ;;  %v7767_v2 = vmul.f32 -1.442695, %v10726_v48  ;;  %v7770_v48 = vmul.f32 -1.442695, %v10735_v28 }
 0x583   : > { %v8498_v15 = vpop.eup %8497  ;;  %13833 = vst [vmem:[#allocation50_spill] sm:$0xff] %v10863_v41  ;;  %v3995_v16 = vmul.f32 %v8496_v25, %v10748_v39  ;;  %8517 = vpow2.f32 %v7757_v33  ;;  %v4354_v10 = vrot.slane %v10863_v41, 1  ;;  %v7765_v39 = vmul.f32 -1.442695, %v10720_v7 }
 0x584   : > { %v8500_v6 = vpop.eup %8499  ;;  %v3996_v56 = vmul.f32 %v8498_v15, %v10752_v62  ;;  %8519 = vpow2.f32 %v7758_v34  ;;  %v4592_v25 = vrot.slane %v10822_v59, 2  ;;  %v13834_v34 = vrot.slane %v10822_v59, 1 }
 0x585   : > { %v10870_v5 = vpop.eup %8501  ;;  %v4043_v19 = vadd.f32 %v10794_v52, %v3995_v16  ;;  %8521 = vpow2.f32 %v7759_v18  ;;  %v7769_v18 = vmul.f32 -1.442695, %v10732_v42 }
 0x586   : > { %v10875_v44 = vpop.eup %8503  ;;  %v4044_v33 = vadd.f32 %v10794_v52, %v3996_v56  ;;  %8523 = vpow2.f32 %v7760_v21  ;;  %v4357_v15 = vsel %vm4344_vm12, %v4354_v10, %v13834_v34  ;;  %v7766_v56 = vmul.f32 -1.442695, %v10723_v26  ;;  %v13836_v21 = vld [vmem:[#allocation12_spill] sm:$0xff] }
 0x587   : > { %v10880_v62 = vpop.eup %8505  ;;  %v4084_v51 = vmul.f32 %v4043_v19, %v13835_v43  ;;  %8525 = vpow2.f32 %v7761_v20  ;;  %4432 = vrot.lane.b32.xlu0 %v4357_v15, %s8777_s19  ;;  %v7768_v43 = vmul.f32 -1.442695, %v10729_v38 }
 0x588   : > { %v10887_v16 = vpop.eup %8507  ;;  %v4085_v17 = vmul.f32 %v4044_v33, %v13836_v21  ;;  %8527 = vpow2.f32 %v7762_v1  ;;  %v13838_v33 = vrot.slane %v10863_v41, 2  ;;  %v13584_v41 = vrot.slane %v10828_v54, 2 }
 0x589   : > { %v10892_v7 = vpop.eup %8509  ;;  %8529 = vpow2.f32 %v7763_v49 }
 0x58a   : > { %v10895_v34 = vpop.eup %8511  ;;  %v10898_v20 = vpack.c.bf16 %v4085_v17, %v4084_v51  ;;  %8531 = vpow2.f32 %v7764_v12  ;;  %v10904_v1 = vsel %vm4582_vm13, %v13838_v33, %v4592_v25  ;;  %v3868_v51 = vadd.f32 1.0, %v10843_v0 }
 0x58b   : > { %v8514_v19 = vpop.eup %8513  ;;  %8533 = vpow2.f32 %v7765_v39  ;;  %13839 = vst [vmem:[#allocation54_spill] sm:$0xff] %v10904_v1  ;;  %4628 = vrot.lane.b32.xlu0 %v10904_v1, %s8783_s15  ;;  %v3869_v33 = vadd.f32 1.0, %v10852_v45  ;;  %v3871_v0 = vadd.f32 1.0, %v8500_v6  ;;  %v3865_v45 = vadd.f32 1.0, %v10825_v50 }
 0x58c   : > { %13837 = vst [vmem:[#allocation53_spill] sm:$0xff] %v10898_v20  ;;  %v8516_v21 = vpop.eup %8515  ;;  %v13583_v49 = vrot.slane %v10898_v20, 1  ;;  %8535 = vpow2.f32 %v7766_v56  ;;  %v3880_v50 = vadd.f32 1.0, %v10870_v5  ;;  %v3883_v5 = vadd.f32 1.0, %v10887_v16 }
 0x58d   : > { %v8518_v17 = vpop.eup %8517  ;;  %8537 = vpow2.f32 %v7767_v2  ;;  %v3870_v2 = vadd.f32 1.0, %v10857_v40 }
 0x58e   : > { %v8520_v12 = vpop.eup %8519  ;;  %v10914_v39 = vsel %vm4344_vm12, %v13583_v49, %v4354_v10  ;;  %8539 = vpow2.f32 %v7768_v43  ;;  %v3864_v10 = vadd.f32 1.0, %v10819_v61  ;;  %v4595_v49 = vsel %vm4582_vm13, %v4592_v25, %v13584_v41 }
 0x58f   : > { %13840 = vst [vmem:[#allocation57_spill] sm:$0xff] %v10914_v39  ;;  %v8522_v56 = vpop.eup %8521  ;;  %4390 = vrot.lane.b32.xlu1 %v10914_v39, %s8775_s17  ;;  %8541 = vpow2.f32 %v7769_v18  ;;  %4392 = vrot.lane.b32.xlu0 %v4357_v15, %s8775_s17  ;;  %v13587_v18 = vrot.slane %v10828_v54, 1  ;;  %v3867_v61 = vadd.f32 1.0, %v10839_v3  ;;  %v3881_v25 = vadd.f32 1.0, %v10875_v44 }
 0x590   : > { %v8524_v1 = vpop.eup %8523  ;;  %8543 = vpow2.f32 %v7770_v48  ;;  %v3866_v48 = vadd.f32 1.0, %v10834_v11  ;;  %v3882_v41 = vadd.f32 1.0, %v10880_v62  ;;  %v3884_v44 = vadd.f32 1.0, %v10892_v7 }
 0x591   : > { %v8526_v20 = vpop.eup %8525  ;;  %8545 = vrcp.f32 %v3868_v51  ;;  %v3888_v39 = vadd.f32 1.0, %v8518_v17  ;;  %v3889_v16 = vadd.f32 1.0, %v8520_v12 }
 0x592   : > { %v8528_v43 = vpop.eup %8527  ;;  %8547 = vrcp.f32 %v3869_v33  ;;  %v13841_v33 = vrot.slane %v10822_v59, 1  ;;  %v3892_v28 = vadd.f32 1.0, %v8526_v20 }
 0x593   : > { %v8530_v40 = vpop.eup %8529  ;;  %8549 = vrcp.f32 %v3870_v2  ;;  %4670 = vrot.lane.b32.xlu1 %v4595_v49, %s8784_s16 }
 0x594   : > { %v8532_v6 = vpop.eup %8531  ;;  %8551 = vrcp.f32 %v3871_v0  ;;  %v4359_v11 = vsel %vm4344_vm12, %v13841_v33, %v13587_v18  ;;  %v3886_v33 = vadd.f32 1.0, %v8514_v19  ;;  %v3887_v18 = vadd.f32 1.0, %v8516_v21 }
 0x595   : > { %v8534_v15 = vpop.eup %8533  ;;  %8553 = vrcp.f32 %v3864_v10 }
 0x596   : > { %v8536_v51 = vpop.eup %8535  ;;  %8555 = vrcp.f32 %v3865_v45  ;;  %v3885_v45 = vadd.f32 1.0, %v10895_v34 }
 0x597   : > { %v8538_v2 = vpop.eup %8537  ;;  %8557 = vrcp.f32 %v3866_v48  ;;  %4434 = vrot.lane.b32.xlu1 %v4359_v11, %s8777_s19 }
 0x598   : > { %v8540_v3 = vpop.eup %8539  ;;  %8559 = vrcp.f32 %v3867_v61  ;;  %v3890_v61 = vadd.f32 1.0, %v8522_v56  ;;  %v3895_v56 = vadd.f32 1.0, %v8532_v6 }
 0x599   : > { %v8542_v0 = vpop.eup %8541  ;;  %8561 = vrcp.f32 %v3880_v50  ;;  %v3891_v50 = vadd.f32 1.0, %v8524_v1  ;;  %v13842_v1 = vld [vmem:[#allocation6_spill] sm:$0xff]  ;;  %v3899_v6 = vadd.f32 1.0, %v8540_v3 }
 0x59a   : > { %v8544_v10 = vpop.eup %8543  ;;  %8563 = vrcp.f32 %v3881_v25 }
 0x59b   : > { %v8546_v59 = vpop.eup %8545  ;;  %8565 = vrcp.f32 %v3882_v41  ;;  %4630 = vrot.lane.b32.xlu1 %v4595_v49, %s8783_s15  ;;  %v3893_v41 = vadd.f32 1.0, %v8528_v43  ;;  %v13843_v43 = vld [vmem:[#allocation7_spill] sm:$0xff] }
 0x59c   : > { %v8548_v62 = vpop.eup %8547  ;;  %v3991_v48 = vmul.f32 %v8546_v59, %v10776_v60  ;;  %8567 = vrcp.f32 %v3883_v5  ;;  %v3894_v59 = vadd.f32 1.0, %v8530_v40  ;;  %v3896_v5 = vadd.f32 1.0, %v8534_v15 }
 0x59d   : > { %v8550_v54 = vpop.eup %8549  ;;  %v3992_v7 = vmul.f32 %v8548_v62, %v10784_v58  ;;  %8569 = vrcp.f32 %v3884_v44  ;;  %v13844_v44 = vld [vmem:[#allocation8_spill] sm:$0xff]  ;;  %v13845_v62 = vld [vmem:[#allocation9_spill] sm:$0xff] }
 0x59e   : > { %v8552_v34 = vpop.eup %8551  ;;  %v3993_v19 = vmul.f32 %v8550_v54, %v10787_v32  ;;  %v4039_v21 = vadd.f32 %v10794_v52, %v3991_v48  ;;  %8571 = vrcp.f32 %v3885_v45  ;;  %v3897_v45 = vadd.f32 1.0, %v8536_v51 }
 0x59f   : > { %v8554_v49 = vpop.eup %8553  ;;  %v3994_v17 = vmul.f32 %v8552_v34, %v10791_v22  ;;  %v4040_v60 = vadd.f32 %v10794_v52, %v3992_v7  ;;  %8573 = vrcp.f32 %v3886_v33  ;;  %4394 = vrot.lane.b32.xlu1 %v4359_v11, %s8775_s17  ;;  %v3898_v33 = vadd.f32 1.0, %v8538_v2 }
 0x5a0   : > { %v8556_v58 = vpop.eup %8555  ;;  %v4041_v20 = vadd.f32 %v10794_v52, %v3993_v19  ;;  %v4080_v12 = vmul.f32 %v4039_v21, %v13842_v1  ;;  %8575 = vrcp.f32 %v3887_v18  ;;  %v3987_v34 = vmul.f32 %v8554_v49, %v10652_v4 }
 0x5a1   : > { %v8558_v32 = vpop.eup %8557  ;;  %v4042_v54 = vadd.f32 %v10794_v52, %v3994_v17  ;;  %v4081_v25 = vmul.f32 %v4040_v60, %v13843_v43  ;;  %8577 = vrcp.f32 %v3888_v39  ;;  %v3988_v15 = vmul.f32 %v8556_v58, %v10655_v57 }
 0x5a2   : > { %v8560_v22 = vpop.eup %8559  ;;  %v4082_v40 = vmul.f32 %v4041_v20, %v13844_v44  ;;  %8579 = vrcp.f32 %v3889_v16  ;;  %v3989_v39 = vmul.f32 %v8558_v32, %v10660_v14  ;;  %v3900_v2 = vadd.f32 1.0, %v8542_v0  ;;  %v8442_v0 = vld [vmem:[%s13456_s7] sm:$0xff]  }
 0x5a3   : > { %v8562_v11 = vpop.eup %8561  ;;  %v4083_v48 = vmul.f32 %v4042_v54, %v13845_v62  ;;  %v10957_v7 = vpack.c.bf16 %v4081_v25, %v4080_v12  ;;  %8581 = vrcp.f32 %v3890_v61  ;;  %v3901_v17 = vadd.f32 1.0, %v8544_v10  ;;  %5265 = vmatpush1.bf16.msra.mxu0 %v8442_v0  ;;  %8360 = vmatpush1.bf16.msra.mxu1 %v8442_v0  ;;  %v13848_v54 = vld [vmem:[#allocation3_spill] sm:$0xff] }
 0x5a4   : > { %v8564_v18 = vpop.eup %8563  ;;  %8583 = vrcp.f32 %v3891_v50  ;;  %v3990_v3 = vmul.f32 %v8560_v22, %v10663_v13  ;;  %v4003_v61 = vmul.f32 %v8562_v11, %v10797_v9  ;;  %v4035_v10 = vadd.f32 %v10794_v52, %v3987_v34  ;;  %5266 = vmatprep.subr.bf16.mxu0 %v13811_v47  ;;  %8352 = vmatprep.subr.bf16.mxu1 %v13811_v47 }
 0x5a5   : > { %13846 = vst [vmem:[#allocation61_spill] sm:$0xff] %v10957_v7  ;;  %v8566_v19 = vpop.eup %8565  ;;  %v10962_v21 = vpack.c.bf16 %v4083_v48, %v4082_v40  ;;  %v4821_v51 = vrot.slane %v10957_v7, 3  ;;  %8585 = vrcp.f32 %v3892_v28  ;;  %v4004_v57 = vmul.f32 %v8564_v18, %v10804_v8  ;;  %v13850_v48 = vld [vmem:[#allocation4_spill] sm:$0xff] }
 0x5a6   : > { %v8568_v16 = vpop.eup %8567  ;;  %8587 = vrcp.f32 %v3893_v41  ;;  %v4005_v14 = vmul.f32 %v8566_v19, %v10678_v37  ;;  %v4036_v13 = vadd.f32 %v10794_v52, %v3988_v15  ;;  %v4037_v9 = vadd.f32 %v10794_v52, %v3989_v39  ;;  %v13852_v19 = vld [vmem:[#allocation21_spill] sm:$0xff] }
 0x5a7   : > { %13847 = vst [vmem:[#allocation62_spill] sm:$0xff] %v10962_v21  ;;  %v8570_v50 = vpop.eup %8569  ;;  %v13593_v4 = vrot.slane %v10962_v21, 3  ;;  %8589 = vrcp.f32 %v3894_v59  ;;  %v4006_v37 = vmul.f32 %v8568_v16, %v10681_v55  ;;  %v4038_v58 = vadd.f32 %v10794_v52, %v3990_v3 }
 0x5a8   : > { %v8572_v28 = vpop.eup %8571  ;;  %8591 = vrcp.f32 %v3895_v56  ;;  %v4007_v8 = vmul.f32 %v8570_v50, %v10684_v29  ;;  %v4051_v20 = vadd.f32 %v10794_v52, %v4003_v61  ;;  %v4052_v29 = vadd.f32 %v10794_v52, %v4004_v57  ;;  %v13854_v61 = vld [vmem:[#allocation24_spill] sm:$0xff] }
 0x5a9   : > { %v8574_v41 = vpop.eup %8573  ;;  %v4823_v49 = vsel %vm4820_vm11, %v4821_v51, %v13593_v4  ;;  %8593 = vrcp.f32 %v3896_v5  ;;  %v4008_v59 = vmul.f32 %v8572_v28, %v10687_v53  ;;  %v4053_v12 = vadd.f32 %v10794_v52, %v4005_v14  ;;  %v13855_v28 = vld [vmem:[#allocation25_spill] sm:$0xff] }
 0x5aa   : > { %v8576_v60 = vpop.eup %8575  ;;  %7785 = vmatprep.mubr.msk.bf16.mxu0 %vm1532_vm3, %v4823_v49  ;;  %8595 = vrcp.f32 %v3897_v45  ;;  %v4009_v55 = vmul.f32 %v8574_v41, %v10690_v46  ;;  %v4076_v43 = vmul.f32 %v4035_v10, %v13848_v54  ;;  %v4054_v46 = vadd.f32 %v10794_v52, %v4006_v37  ;;  %v13857_v49 = vld [vmem:[#allocation26_spill] sm:$0xff]  ;;  %v13862_v54 = vld [vmem:[#allocation33_spill] sm:$0xff] }
 0x5ab   : > { %v8578_v1 = vpop.eup %8577  ;;  %8597 = vrcp.f32 %v3898_v33  ;;  %v4010_v53 = vmul.f32 %v8576_v60, %v10693_v31  ;;  %v4055_v22 = vadd.f32 %v10794_v52, %v4007_v8  ;;  %v4056_v45 = vadd.f32 %v10794_v52, %v4008_v59  ;;  %v13849_v33 = vld [vmem:[#allocation2_spill] sm:$0xff]  ;;  %v13858_v8 = vld [vmem:[#allocation28_spill] sm:$0xff] }
 0x5ac   : > { %v8580_v56 = vpop.eup %8579  ;;  %8599 = vrcp.f32 %v3899_v6  ;;  %v4011_v32 = vmul.f32 %v8578_v1, %v10696_v27  ;;  %v4077_v31 = vmul.f32 %v4036_v13, %v13849_v33  ;;  %v4057_v62 = vadd.f32 %v10794_v52, %v4009_v55  ;;  %v13860_v1 = vld [vmem:[#allocation30_spill] sm:$0xff]  ;;  %v13865_v33 = vld [vmem:[#allocation35_spill] sm:$0xff] }
 0x5ad   : > { %v8582_v25 = vpop.eup %8581  ;;  %8601 = vrcp.f32 %v3900_v2  ;;  %v4012_v5 = vmul.f32 %v8580_v56, %v10699_v23  ;;  %v4078_v6 = vmul.f32 %v4037_v9, %v13850_v48  ;;  %v13851_v23 = vld [vmem:[#allocation5_spill] sm:$0xff]  ;;  %v4058_v39 = vadd.f32 %v10794_v52, %v4010_v53  ;;  %v13856_v9 = vld [vmem:[#allocation27_spill] sm:$0xff] }
 0x5ae   : > { %v8584_v44 = vpop.eup %8583  ;;  %8603 = vrcp.f32 %v3901_v17  ;;  %v4013_v40 = vmul.f32 %v8582_v25, %v10702_v24  ;;  %v4079_v18 = vmul.f32 %v4038_v58, %v13851_v23  ;;  %v4059_v24 = vadd.f32 %v10794_v52, %v4011_v32  ;;  %v13853_v17 = vld [vmem:[#allocation22_spill] sm:$0xff]  ;;  %v13859_v58 = vld [vmem:[#allocation29_spill] sm:$0xff] }
 0x5af   : > { %v8586_v11 = vpop.eup %8585  ;;  %v4014_v27 = vmul.f32 %v8584_v44, %v10705_v30  ;;  %v4092_v51 = vmul.f32 %v4051_v20, %v13852_v19  ;;  %v4060_v30 = vadd.f32 %v10794_v52, %v4012_v5  ;;  %v4093_v3 = vmul.f32 %v4052_v29, %v13853_v17  ;;  %v13861_v29 = vld [vmem:[#allocation31_spill] sm:$0xff]  ;;  %v13863_v5 = vld [vmem:[#allocation34_spill] sm:$0xff]  ;;  %v13864_v44 = vld [vmem:[#allocation32_spill] sm:$0xff] }
 0x5b0   : > { %v8588_v34 = vpop.eup %8587  ;;  %v4015_v15 = vmul.f32 %v8586_v11, %v10708_v36  ;;  %v4094_v50 = vmul.f32 %v4053_v12, %v13854_v61  ;;  %v4061_v36 = vadd.f32 %v10794_v52, %v4013_v40  ;;  %v4095_v10 = vmul.f32 %v4054_v46, %v13855_v28  ;;  %v13870_v17 = vld [vmem:[#allocation37_spill] sm:$0xff]  ;;  %v13873_v28 = vld [vmem:[#allocation43_spill] sm:$0xff] }
 0x5b1   : > { %v8590_v2 = vpop.eup %8589  ;;  %v4016_v16 = vmul.f32 %v8588_v34, %v10711_v35  ;;  %v4062_v0 = vadd.f32 %v10794_v52, %v4014_v27  ;;  %v4096_v37 = vmul.f32 %v4055_v22, %v13857_v49  ;;  %v4097_v60 = vmul.f32 %v4056_v45, %v13858_v8  ;;  %v13866_v27 = vld [vmem:[#allocation36_spill] sm:$0xff]  ;;  %v13877_v8 = vld [vmem:[#allocation49_spill] sm:$0xff] }
 0x5b2   : > { %v8592_v57 = vpop.eup %8591  ;;  %v4017_v14 = vmul.f32 %v8590_v2, %v10714_v63  ;;  %v4063_v35 = vadd.f32 %v10794_v52, %v4015_v15  ;;  %v4098_v55 = vmul.f32 %v4057_v62, %v13860_v1  ;;  %v4099_v12 = vmul.f32 %v4058_v39, %v13861_v29  ;;  %v13868_v2 = vld [vmem:[#allocation38_spill] sm:$0xff]  ;;  %v13880_v1 = vld [vmem:[#allocation51_spill] sm:$0xff] }
 0x5b3   : > { %v8594_v13 = vpop.eup %8593  ;;  %v4018_v41 = vmul.f32 %v8592_v57, %v13856_v9  ;;  %v4064_v63 = vadd.f32 %v10794_v52, %v4016_v16  ;;  %v4100_v25 = vmul.f32 %v4059_v24, %v13862_v54  ;;  %v4101_v46 = vmul.f32 %v4060_v30, %v13863_v5  ;;  %v13875_v9 = vld [vmem:[#allocation44_spill] sm:$0xff] }
 0x5b4   : > { %v8596_v59 = vpop.eup %8595  ;;  %v4019_v20 = vmul.f32 %v8594_v13, %v13859_v58  ;;  %v4065_v32 = vadd.f32 %v10794_v52, %v4017_v14  ;;  %v4102_v11 = vmul.f32 %v4061_v36, %v13865_v33  ;;  %v4103_v62 = vmul.f32 %v4062_v0, %v13866_v27  ;;  %v13892_v27 = vld [vmem:[#allocation39_spill] sm:$0xff] }
 0x5b5   : > { %v8598_v56 = vpop.eup %8597  ;;  %v4020_v53 = vmul.f32 %v8596_v59, %v10723_v26  ;;  %v4066_v45 = vadd.f32 %v10794_v52, %v4018_v41  ;;  %v11034_v15 = vpack.c.bf16 %v4093_v3, %v4092_v51  ;;  %v4104_v16 = vmul.f32 %v4063_v35, %v13868_v2  ;;  %v8443_v51 = vld [vmem:[%s13456_s7 + $0x8] sm:$0xff]   ;;  %v13872_v3 = vld [vmem:[#allocation41_spill] sm:$0xff] }
 0x5b6   : > { %v8600_v22 = vpop.eup %8599  ;;  %v4021_v40 = vmul.f32 %v8598_v56, %v13864_v44  ;;  %v4067_v26 = vadd.f32 %v10794_v52, %v4019_v20  ;;  %v11039_v30 = vpack.c.bf16 %v4077_v31, %v4076_v43  ;;  %v4106_v0 = vmul.f32 %v4065_v32, %v13872_v3  ;;  %v13876_v35 = vld [vmem:[#allocation47_spill] sm:$0xff]  ;;  %5267 = vmatpush1.bf16.msra.mxu0 %v8443_v51  ;;  %v13879_v20 = vld [vmem:[#allocation48_spill] sm:$0xff] }
 0x5b7   : > { %v8602_v48 = vpop.eup %8601  ;;  %v4022_v23 = vmul.f32 %v8600_v22, %v10729_v38  ;;  %v4068_v34 = vadd.f32 %v10794_v52, %v4020_v53  ;;  %13867 = vst [vmem:[#allocation63_spill] sm:$0xff] %v11034_v15  ;;  %v13871_v38 = vld [vmem:[#allocation40_spill] sm:$0xff]  ;;  %v4596_v36 = vrot.slane %v11034_v15, 2  ;;  %v4107_v13 = vmul.f32 %v4066_v45, %v13873_v28  ;;  %5268 = vmatprep.subr.bf16.mxu0 %v13811_v47 }
 0x5b8   : > { %v8604_v39 = vpop.eup %8603  ;;  %v4023_v24 = vmul.f32 %v8602_v48, %v10732_v42  ;;  %v4069_v19 = vadd.f32 %v10794_v52, %v4021_v40  ;;  %13869 = vst [vmem:[#allocation64_spill] sm:$0xff] %v11039_v30  ;;  %v4105_v14 = vmul.f32 %v4064_v63, %v13871_v38  ;;  %v11051_v43 = vpack.c.bf16 %v4079_v18, %v4078_v6  ;;  %v13881_v56 = vld [vmem:[#allocation52_spill] sm:$0xff]  ;;  %v13883_v18 = vld [vmem:[#allocation55_spill] sm:$0xff]  ;;  %v13893_v48 = vld [vmem:[#allocation42_spill] sm:$0xff] }
 0x5b9   : > { %v4024_v61 = vmul.f32 %v8604_v39, %v13870_v17  ;;  %v4070_v57 = vadd.f32 %v10794_v52, %v4022_v23  ;;  %v4108_v41 = vmul.f32 %v4067_v26, %v13875_v9  ;;  %v4109_v49 = vmul.f32 %v4068_v34, %v13876_v35  ;;  %8361 = vmatpush1.bf16.msra.mxu1 %v8443_v51 }
 0x5ba   : > { %v4071_v42 = vadd.f32 %v10794_v52, %v4023_v24  ;;  %13874 = vst [vmem:[#allocation65_spill] sm:$0xff] %v11051_v43  ;;  %v13878_v59 = vrot.slane %v13877_v8, 2  ;;  %v4110_v63 = vmul.f32 %v4069_v19, %v13879_v20  ;;  %v11065_v6 = vpack.c.bf16 %v4095_v10, %v4094_v50  ;;  %8353 = vmatprep.subr.bf16.mxu1 %v13811_v47  ;;  %v8445_v20 = vld [vmem:[%s13456_s7 + $0x18] sm:$0xff]  }
 0x5bb   : > { %v4072_v31 = vadd.f32 %v10794_v52, %v4024_v61  ;;  %v4111_v29 = vmul.f32 %v4070_v57, %v13880_v1  ;;  %v11068_v54 = vpack.c.bf16 %v4097_v60, %v4096_v37  ;;  %v11070_v5 = vpack.c.bf16 %v4099_v12, %v4098_v55  ;;  %v13894_v61 = vld [vmem:[#allocation45_spill] sm:$0xff] }
 0x5bc   : > { %v4597_v58 = vsel %vm4582_vm13, %v13878_v59, %v4596_v36  ;;  %v11062_v53 = vmul.f32 %v4071_v42, %v13881_v56  ;;  %13882 = vst [vmem:[#allocation66_spill] sm:$0xff] %v11065_v6  ;;  %v11073_v22 = vpack.c.bf16 %v4101_v46, %v4100_v25  ;;  %v11075_v44 = vpack.c.bf16 %v4103_v62, %v4102_v11  ;;  %v13895_v59 = vld [vmem:[#allocation53_spill] sm:$0xff] }
 0x5bd   : > { %4672 = vrot.lane.b32.xlu0 %v4597_v58, %s8784_s16  ;;  %v4113_v32 = vmul.f32 %v4072_v31, %v13883_v18  ;;  %13884 = vst [vmem:[#allocation15_spill] sm:$0xff] %v11068_v54  ;;  %13885 = vst [vmem:[#allocation17_spill] sm:$0xff] %v11070_v5  ;;  %v11077_v40 = vpack.c.bf16 %v4105_v14, %v4104_v16  ;;  %v11079_v45 = vpack.c.bf16 %v4107_v13, %v4106_v0  ;;  %v8444_v16 = vld [vmem:[%s13456_s7 + $0x10] sm:$0xff]  }
 0x5be   : > { %v11081_v33 = vpack.c.bf16 %v4109_v49, %v4108_v41  ;;  %v11084_v50 = vpack.c.bf16 %v4111_v29, %v4110_v63  ;;  %v4360_v37 = vrot.slane %v11034_v15, 1  ;;  %v4598_v60 = vrot.slane %v11065_v6, 2  ;;  %5269 = vmatpush1.bf16.msra.mxu0 %v8444_v16  ;;  %8362 = vmatpush1.bf16.msra.mxu1 %v8444_v16  ;;  %v8446_v16 = vld [vmem:[%s13456_s7 + $0x20] sm:$0xff]  }
 0x5bf   : > { %13886 = vst [vmem:[#allocation19_spill] sm:$0xff] %v11077_v40  ;;  %13887 = vst [vmem:[#allocation20_spill] sm:$0xff] %v11079_v45  ;;  %v11087_v10 = vpack.c.bf16 %v4113_v32, %v11062_v53  ;;  %v13891_v55 = vrot.slane %v13877_v8, 1  ;;  %v4345_v46 = vrot.slane %v11039_v30, 1  ;;  %v4346_v11 = vrot.slane %v11051_v43, 1  ;;  %5270 = vmatprep.subr.bf16.mxu0 %v13811_v47  ;;  %8354 = vmatprep.subr.bf16.mxu1 %v13811_v47 }
 0x5c0   : > { %13888 = vst [vmem:[#allocation13_spill] sm:$0xff] %v11081_v33  ;;  %13889 = vst [vmem:[#allocation14_spill] sm:$0xff] %v11084_v50  ;;  %v4599_v25 = vsel %vm4582_vm13, %v4596_v36, %v4598_v60  ;;  %v7771_v62 = vmul.f32 -1.442695, %v13892_v27  ;;  %v7772_v23 = vmul.f32 -1.442695, %v13893_v48 }
 0x5c1   : > { %13890 = vst [vmem:[#allocation10_spill] sm:$0xff] %v11087_v10  ;;  %v4361_v12 = vsel %vm4344_vm12, %v13891_v55, %v4360_v37  ;;  %4674 = vrot.lane.b32.xlu1 %v4599_v25, %s8784_s16  ;;  %v4347_v26 = vsel %vm4344_vm12, %v4345_v46, %v4346_v11  ;;  %v4348_v34 = vrot.slane %v10957_v7, 1  ;;  %v4362_v39 = vrot.slane %v11065_v6, 1 }
 0x5c2   : > { %4436 = vrot.lane.b32.xlu0 %v4361_v12, %s8777_s19  ;;  %8605 = vpow2.f32 %v7771_v62  ;;  %v4583_v19 = vrot.slane %v11051_v43, 2  ;;  %v4584_v2 = vrot.slane %v10957_v7, 2  ;;  %v7773_v57 = vmul.f32 -1.442695, %v13894_v61  ;;  %5271 = vmatpush1.bf16.msra.mxu0 %v8445_v20 }
 0x5c3   : > { %8607 = vpow2.f32 %v7772_v23  ;;  %v4349_v24 = vsel %vm4344_vm12, %v4346_v11, %v4348_v34  ;;  %v4363_v17 = vsel %vm4344_vm12, %v4360_v37, %v4362_v39  ;;  %v4586_v14 = vrot.slane %v10962_v21, 2  ;;  %8363 = vmatpush1.bf16.msra.mxu1 %v8445_v20  ;;  %5272 = vmatprep.subr.bf16.mxu0 %v13811_v47  ;;  %v13902_v20 = vld [vmem:[#allocation57_spill] sm:$0xff] }
 0x5c4   : > { %v4585_v38 = vsel %vm4582_vm13, %v4583_v19, %v4584_v2  ;;  %v4600_v36 = vrot.slane %v11068_v54, 2  ;;  %8609 = vpow2.f32 %v7773_v57  ;;  %v4350_v31 = vrot.slane %v10962_v21, 1  ;;  %8355 = vmatprep.subr.bf16.mxu1 %v13811_v47  ;;  %v13899_v57 = vld [vmem:[#allocation50_spill] sm:$0xff] }
 0x5c5   : > { %4382 = vrot.lane.b32.xlu1 %v4347_v26, %s8775_s17  ;;  %v4587_v42 = vsel %vm4582_vm13, %v4584_v2, %v4586_v14  ;;  %v4364_v9 = vrot.slane %v11068_v54, 1  ;;  %v4602_v1 = vrot.slane %v11070_v5, 2  ;;  %v4366_v55 = vrot.slane %v11070_v5, 1 }
 0x5c6   : > { %4632 = vrot.lane.b32.xlu0 %v4597_v58, %s8783_s15  ;;  %v4601_v28 = vsel %vm4582_vm13, %v4598_v60, %v4600_v36  ;;  %v4351_v41 = vsel %vm4344_vm12, %v4348_v34, %v4350_v31  ;;  %v4588_v58 = vrot.slane %v13895_v59, 2  ;;  %v11158_v46 = vrot.slane %v11084_v50, 1  ;;  %v13897_v34 = vld [vmem:[#allocation56_spill] sm:$0xff]  ;;  %5273 = vmatpush1.bf16.msra.mxu0 %v8446_v16 }
 0x5c7   : > { %v4365_v49 = vsel %vm4344_vm12, %v4362_v39, %v4364_v9  ;;  %v4603_v32 = vsel %vm4582_vm13, %v4600_v36, %v4602_v1  ;;  %v4367_v23 = vsel %vm4344_vm12, %v4364_v9, %v4366_v55  ;;  %v11184_v36 = vrot.slane %v11087_v10, 2  ;;  %5274 = vmatprep.subr.bf16.mxu0 %v13811_v47  ;;  %8364 = vmatpush1.bf16.msra.mxu1 %v8446_v16 }
 0x5c8   : > { %v4589_v29 = vsel %vm4582_vm13, %v4586_v14, %v4588_v58  ;;  %8356 = vmatprep.subr.bf16.mxu1 %v13811_v47  ;;  %v4368_v9 = vrot.slane %v11073_v22, 1  ;;  %v11366_v4 = vshrl.u32 %v11034_v15, 16 }
 0x5c9   : > { %4424 = vrot.lane.b32.xlu1 %v4349_v24, %s8777_s19 }
 0x5ca   : > { %4396 = vrot.lane.b32.xlu0 %v4361_v12, %s8775_s17  ;;  %v13896_v12 = vrot.slane %v13895_v59, 1 }
 0x5cc   : > { %v8606_v51 = vpop.eup %8605 }
 0x5cd   : > { %4620 = vrot.lane.b32.xlu1 %v4585_v38, %s8783_s15  ;;  %v8608_v3 = vpop.eup %8607  ;;  %v3902_v0 = vadd.f32 1.0, %v8606_v51  ;;  %v13900_v38 = vrot.slane %v13899_v57, 2 }
 0x5ce   : > { %4438 = vrot.lane.b32.xlu0 %v4363_v17, %s8777_s19  ;;  %v3903_v13 = vadd.f32 1.0, %v8608_v3  ;;  %v8610_v35 = vpop.eup %8609 }
 0x5cf   : > { %8611 = vrcp.f32 %v3902_v0  ;;  %v3904_v63 = vadd.f32 1.0, %v8610_v35  ;;  %v4591_v14 = vsel %vm4582_vm13, %v4588_v58, %v13900_v38  ;;  %v11208_v58 = vpack.c.bf16 %v11062_v53, %v11062_v53 }
 0x5d0   : > { %8613 = vrcp.f32 %v3903_v13  ;;  %v4370_v38 = vrot.slane %v11075_v44, 1 }
 0x5d1   : > { %4662 = vrot.lane.b32.xlu1 %v4587_v42, %s8784_s16  ;;  %8615 = vrcp.f32 %v3904_v63 }
 0x5d2   : > { %4634 = vrot.lane.b32.xlu0 %v4599_v25, %s8783_s15  ;;  %v4353_v25 = vsel %vm4344_vm12, %v4350_v31, %v13896_v12  ;;  %v4532_v31 = vshll.u32 %v11087_v10, 16 }
 0x5d5   : > { %4384 = vrot.lane.b32.xlu1 %v4349_v24, %s8775_s17  ;;  %v13898_v24 = vld [vmem:[#allocation58_spill] sm:$0xff] }
 0x5d6   : > { %4676 = vrot.lane.b32.xlu0 %v4601_v28, %s8784_s16 }
 0x5d9   : > { %4426 = vrot.lane.b32.xlu1 %v4351_v41, %s8777_s19  ;;  %v8612_v56 = vpop.eup %8611 }
 0x5da   : > { %4398 = vrot.lane.b32.xlu0 %v4363_v17, %s8775_s17  ;;  %v8614_v18 = vpop.eup %8613  ;;  %v4025_v37 = vmul.f32 %v8612_v56, %v13892_v27  ;;  %v4420_v27 = vrot.slane %v11087_v10, 1  ;;  %v4604_v17 = vrot.slane %v11073_v22, 2 }
 0x5db   : > { %v4026_v60 = vmul.f32 %v8614_v18, %v13893_v48  ;;  %v8616_v48 = vpop.eup %8615  ;;  %v4534_v18 = vrot.slane %v4532_v31, 2 }
 0x5dc   : > { %v4073_v11 = vadd.f32 %v10794_v52, %v4025_v37  ;;  %v11168_v26 = vsel %vm4344_vm12, %v11158_v46, %v4420_v27  ;;  %v4027_v2 = vmul.f32 %v8616_v48, %v13894_v61  ;;  %v4606_v48 = vrot.slane %v11075_v44, 2 }
 0x5dd   : > { %4622 = vrot.lane.b32.xlu1 %v4587_v42, %s8783_s15  ;;  %v4074_v62 = vadd.f32 %v10794_v52, %v4026_v60  ;;  %v4605_v42 = vsel %vm4582_vm13, %v4602_v1, %v4604_v17 }
 0x5de   : > { %4440 = vrot.lane.b32.xlu0 %v4365_v49, %s8777_s19  ;;  %v4114_v39 = vmul.f32 %v4073_v11, %v13897_v34  ;;  %v4075_v51 = vadd.f32 %v10794_v52, %v4027_v2  ;;  %v4529_v52 = vshrl.u32 %v11087_v10, 16 }
 0x5df   : > { %v4115_v19 = vmul.f32 %v4074_v62, %v13898_v24 }
 0x5e0   : > { %v4762_v35 = vrot.slane %v4529_v52, 2  ;;  %v4531_v56 = vrot.slane %v4529_v52, 1 }
 0x5e1   : > { %4664 = vrot.lane.b32.xlu1 %v4589_v29, %s8784_s16  ;;  %v11187_v61 = vpack.c.bf16 %v4115_v19, %v4114_v39 }
 0x5e2   : > { %4636 = vrot.lane.b32.xlu0 %v4601_v28, %s8783_s15  ;;  %v13901_v28 = vld [vmem:[#allocation59_spill] sm:$0xff] }
 0x5e3   : > { %v4658_v3 = vrot.slane %v11187_v61, 2  ;;  %v4116_v13 = vmul.f32 %v4075_v51, %v13901_v28  ;;  %v4767_v60 = vshrl.u32 %v11187_v61, 16  ;;  %v4770_v12 = vshll.u32 %v11187_v61, 16 }
 0x5e5   : > { %4386 = vrot.lane.b32.xlu1 %v4351_v41, %s8775_s17  ;;  %v11199_v0 = vsel %vm4582_vm13, %v11184_v36, %v4658_v3  ;;  %v4137_v41 = vpack.c.bf16 %v4114_v39, %v4114_v39  ;;  %v4139_v1 = vpack.c.bf16 %v4116_v13, %v4116_v13  ;;  %v4772_v11 = vrot.slane %v4770_v12, 3  ;;  %v13904_v13 = vld [vmem:[#allocation54_spill] sm:$0xff] }
 0x5e6   : > { %4678 = vrot.lane.b32.xlu0 %v4603_v32, %s8784_s16 }
 0x5e7   : > { %v4422_v63 = vrot.slane %v4137_v41, 1  ;;  %v4538_v62 = vshrl.u32 %v4137_v41, 16  ;;  %v4618_v34 = vrot.slane %v4137_v41, 2  ;;  %v4660_v39 = vrot.slane %v4139_v1, 2 }
 0x5e8   : > { %v4776_v16 = vshrl.u32 %v4139_v1, 16  ;;  %v4779_v28 = vshll.u32 %v4139_v1, 16 }
 0x5e9   : > { %4428 = vrot.lane.b32.xlu1 %v4353_v25, %s8777_s19  ;;  %v11215_v37 = vsel %vm4344_vm12, %v4420_v27, %v4422_v63  ;;  %v4541_v27 = vshll.u32 %v4137_v41, 16  ;;  %v4540_v19 = vrot.slane %v4538_v62, 1  ;;  %v11237_v51 = vsel %vm4582_vm13, %v4658_v3, %v4660_v39 }
 0x5ea   : > { %4400 = vrot.lane.b32.xlu0 %v4365_v49, %s8775_s17  ;;  %v4763_v49 = vrot.slane %v4532_v31, 3  ;;  %13903 = vst [vmem:[#allocation12_spill] sm:$0xff] %v11237_v51  ;;  %v4778_v41 = vrot.slane %v4776_v16, 2  ;;  %v4607_v3 = vsel %vm4582_vm13, %v4604_v17, %v4606_v48  ;;  %v4608_v17 = vrot.slane %v11077_v40, 2 }
 0x5eb   : > { %v4543_v2 = vrot.slane %v4541_v27, 2  ;;  %v4374_v62 = vrot.slane %v11079_v45, 1  ;;  %v4612_v39 = vrot.slane %v11081_v33, 2 }
 0x5ec   : > { %v11220_v53 = vor.u32 %v4763_v49, %v4762_v35  ;;  %v4781_v35 = vrot.slane %v4779_v28, 3 }
 0x5ed   : > { %4624 = vrot.lane.b32.xlu1 %v4589_v29, %s8783_s15  ;;  %v4380_v29 = vrot.slane %v11208_v58, 1  ;;  %v4544_v31 = vor.u32 %v4543_v2, %v4540_v19  ;;  %v4376_v2 = vrot.slane %v11081_v33, 1 }
 0x5ee   : > { %4442 = vrot.lane.b32.xlu0 %v4367_v23, %s8777_s19  ;;  %v4782_v63 = vor.u32 %v4781_v35, %v4778_v41 }
 0x5ef   : > { %v4377_v28 = vsel %vm4344_vm12, %v4374_v62, %v4376_v2 }
 0x5f1   : > { %4666 = vrot.lane.b32.xlu1 %v4591_v14, %s8784_s16 }
 0x5f2   : > { %4638 = vrot.lane.b32.xlu0 %v4603_v32, %s8783_s15  ;;  %v4369_v32 = vsel %vm4344_vm12, %v4366_v55, %v4368_v9  ;;  %v4769_v55 = vrot.slane %v4767_v60, 2 }
 0x5f4   : > { %v4773_v24 = vor.u32 %v4772_v11, %v4769_v55  ;;  %v4609_v55 = vsel %vm4582_vm13, %v4606_v48, %v4608_v17  ;;  %v4372_v11 = vrot.slane %v11077_v40, 1  ;;  %v8448_v48 = vld [vmem:[%s13456_s7 + $0x30] sm:$0xff]  }
 0x5f5   : > { %4388 = vrot.lane.b32.xlu1 %v4353_v25, %s8775_s17  ;;  %v11224_v25 = vsel %vm4344_vm12, %v11158_v46, %v4380_v29 }
 0x5f6   : > { %4680 = vrot.lane.b32.xlu0 %v4605_v42, %s8784_s16  ;;  %v11243_v52 = vsel %vm4698_vm15, %v11220_v53, %v4773_v24  ;;  %v11260_v29 = vsel %vm4698_vm15, %v4773_v24, %v4782_v63  ;;  %v4375_v27 = vsel %vm4344_vm12, %v4372_v11, %v4374_v62  ;;  %v11348_v62 = vshrl.u32 %v13877_v8, 16 }
 0x5f7   : > { %13905 = vst [vmem:[#allocation6_spill] sm:$0xff] %v11260_v29 }
 0x5f9   : > { %4430 = vrot.lane.b32.xlu1 %v13902_v20, %s8777_s19  ;;  %v4371_v20 = vsel %vm4344_vm12, %v4368_v9, %v4370_v38  ;;  %v4854_v9 = vrot.slane %v11187_v61, 3  ;;  %v4373_v61 = vsel %vm4344_vm12, %v4370_v38, %v4372_v11  ;;  %v11299_v24 = vpop.permute.xlu0 %4432  ;;  %v4614_v38 = vrot.slane %v11084_v50, 2 }
 0x5fa   : > { %4402 = vrot.lane.b32.xlu0 %v4367_v23, %s8775_s17  ;;  %v11228_v23 = vor.u32 %v4534_v18, %v4531_v56  ;;  %v13592_v56 = vrot.slane %v11087_v10, 3  ;;  %v4856_v18 = vrot.slane %v4139_v1, 3 }
 0x5fc   : > { %v11253_v49 = vsel %vm4460_vm14, %v11228_v23, %v4544_v31  ;;  %v11271_v60 = vsel %vm4820_vm11, %v13592_v56, %v4854_v9  ;;  %v11274_v12 = vsel %vm4820_vm11, %v4854_v9, %v4856_v18  ;;  %v11363_v56 = vshll.u32 %v11034_v15, 16 }
 0x5fd   : > { %4626 = vrot.lane.b32.xlu1 %v4591_v14, %s8783_s15  ;;  %v11234_v14 = vsel %vm4582_vm13, %v11184_v36, %v4618_v34  ;;  %13906 = vst [vmem:[#allocation7_spill] sm:$0xff] %v11271_v60  ;;  %13907 = vst [vmem:[#allocation8_spill] sm:$0xff] %v11274_v12  ;;  %v11317_v35 = vpop.permute.xlu0 %4628 }
 0x5fe   : > { %4444 = vrot.lane.b32.xlu0 %v4369_v32, %s8777_s19  ;;  %13910 = vst [vmem:[#allocation3_spill] sm:$0xff] %v11317_v35  ;;  %v4489_v35 = vrot.slane %v11363_v56, 2 }
 0x601   : > { %4668 = vrot.lane.b32.xlu1 %v13904_v13, %s8784_s16  ;;  %v11292_v34 = vpop.permute.xlu1 %4390  ;;  %v13909_v13 = vld [vmem:[#allocation46_spill] sm:$0xff] }
 0x602   : > { %4640 = vrot.lane.b32.xlu0 %v4605_v42, %s8783_s15  ;;  %v8447_v42 = vld [vmem:[%s13456_s7 + $0x28] sm:$0xff]   ;;  %v11310_v31 = vshll.u32 %v13909_v13, 16  ;;  %v11313_v41 = vshrl.u32 %v13909_v13, 16 }
 0x603   : > { %5275 = vmatpush1.bf16.msra.mxu0 %v8447_v42  ;;  %8365 = vmatpush1.bf16.msra.mxu1 %v8447_v42  ;;  %v4615_v42 = vsel %vm4582_vm13, %v4612_v39, %v4614_v38 }
 0x604   : > { %5276 = vmatprep.subr.bf16.mxu0 %v13811_v47  ;;  %8357 = vmatprep.subr.bf16.mxu1 %v13811_v47  ;;  %v4480_v9 = vrot.slane %v11313_v41, 1  ;;  %v4481_v18 = vrot.slane %v11310_v31, 2 }
 0x605   : > { %4446 = vrot.lane.b32.xlu1 %v4371_v20, %s8777_s19  ;;  %v11303_v16 = vpop.permute.xlu1 %4670 }
 0x606   : > { %4682 = vrot.lane.b32.xlu0 %v4607_v3, %s8784_s16  ;;  %13908 = vst [vmem:[#allocation9_spill] sm:$0xff] %v11303_v16  ;;  %v4488_v16 = vrot.slane %v11366_v4, 1 }
 0x607   : > { %5277 = vmatpush1.bf16.msra.mxu0 %v8448_v48  ;;  %8366 = vmatpush1.bf16.msra.mxu1 %v8448_v48  ;;  %v11353_v48 = vor.u32 %v4481_v18, %v4480_v9  ;;  %v11370_v9 = vshrl.u32 %v13895_v59, 16  ;;  %v4714_v18 = vrot.slane %v11313_v41, 2 }
 0x608   : > { %8358 = vmatprep.subr.bf16.mxu1 %v13811_v47  ;;  %5278 = vmatprep.subr.bf16.mxu0 %v13811_v47 }
 0x609   : > { %4642 = vrot.lane.b32.xlu1 %v4607_v3, %s8783_s15  ;;  %v11320_v3 = vshll.u32 %v13899_v57, 16  ;;  %v11326_v63 = vpop.permute.xlu1 %4434 }
 0x60a   : > { %4404 = vrot.lane.b32.xlu0 %v4369_v32, %s8775_s17  ;;  %v4610_v32 = vrot.slane %v11079_v45, 2  ;;  %13911 = vst [vmem:[#allocation2_spill] sm:$0xff] %v11326_v63 }
 0x60c   : > { %v4611_v1 = vsel %vm4582_vm13, %v4608_v17, %v4610_v32  ;;  %v4613_v19 = vsel %vm4582_vm13, %v4610_v32, %v4612_v39  ;;  %v11329_v17 = vshll.u32 %v13895_v59, 16  ;;  %v4477_v32 = vrot.slane %v11320_v3, 2  ;;  %v8449_v39 = vld [vmem:[%s13456_s7 + $0x38] sm:$0xff]  }
 0x60d   : > { %4406 = vrot.lane.b32.xlu1 %v4371_v20, %s8775_s17  ;;  %v11323_v20 = vshrl.u32 %v13899_v57, 16  ;;  %8367 = vmatpush1.bf16.msra.mxu1 %v8449_v39 }
 0x60e   : > { %4684 = vrot.lane.b32.xlu0 %v4609_v55, %s8784_s16  ;;  %8359 = vmatprep.subr.bf16.mxu1 %v13811_v47  ;;  %v13913_v12 = vrot.slane %v11329_v17, 1 }
 0x60f   : > { %v4476_v11 = vrot.slane %v11323_v20, 1  ;;  %5279 = vmatpush1.bf16.msra.mxu0 %v8449_v39 }
 0x610   : > { %v4179_v60 = vor.u32 %v11370_v9, %v13913_v12  ;;  %5280 = vmatprep.subr.bf16.mxu0 %v13811_v47 }
 0x611   : > { %4686 = vrot.lane.b32.xlu1 %v4611_v1, %s8784_s16 }
 0x612   : > { %4448 = vrot.lane.b32.xlu0 %v4373_v61, %s8777_s19 }
 0x615   : > { %4450 = vrot.lane.b32.xlu1 %v4375_v27, %s8777_s19 }
 0x616   : > { %4644 = vrot.lane.b32.xlu0 %v4609_v55, %s8783_s15  ;;  %v11336_v55 = vsel %vm4344_vm12, %v4376_v2, %v11158_v46  ;;  %v11360_v2 = vor.u32 %v4477_v32, %v4476_v11  ;;  %v4715_v46 = vrot.slane %v11310_v31, 3  ;;  %v4718_v11 = vrot.slane %v11348_v62, 2 }
 0x618   : > { %v4483_v39 = vsel %vm4460_vm14, %v11360_v2, %v11353_v48  ;;  %v11401_v47 = vor.u32 %v4715_v46, %v4714_v18 }
 0x619   : > { %4646 = vrot.lane.b32.xlu1 %v4611_v1, %s8783_s15  ;;  %v11345_v1 = vshll.u32 %v13877_v8, 16  ;;  %v4484_v8 = vrot.slane %v11348_v62, 1 }
 0x61a   : > { %4408 = vrot.lane.b32.xlu0 %v4373_v61, %s8775_s17  ;;  %v11342_v61 = vpop.permute.xlu0 %4392 }
 0x61b   : > { %v4719_v32 = vrot.slane %v11345_v1, 3  ;;  %v4485_v63 = vrot.slane %v11345_v1, 2 }
 0x61d   : > { %4410 = vrot.lane.b32.xlu1 %v4375_v27, %s8775_s17  ;;  %v11350_v27 = vpop.permute.xlu1 %4630 }
 0x61e   : > { %4688 = vrot.lane.b32.xlu0 %v4613_v19, %s8784_s16  ;;  %13912 = vst [vmem:[#allocation4_spill] sm:$0xff] %v11350_v27  ;;  %v4720_v27 = vor.u32 %v4719_v32, %v4718_v11  ;;  %v11422_v11 = vshrl.u32 %v11065_v6, 16 }
 0x621   : > { %4690 = vrot.lane.b32.xlu1 %v4615_v42, %s8784_s16  ;;  %v11399_v12 = vpop.permute.xlu1 %4394 }
 0x622   : > { %4452 = vrot.lane.b32.xlu0 %v4377_v28, %s8777_s19  ;;  %13915 = vst [vmem:[#allocation21_spill] sm:$0xff] %v11399_v12  ;;  %v13916_v12 = vmov 0.0|0.0  }
 0x625   : > { %4454 = vrot.lane.b32.xlu1 %v11336_v55, %s8777_s19 }
 0x626   : > { %4648 = vrot.lane.b32.xlu0 %v4613_v19, %s8783_s15  ;;  %v4183_v19 = vrot.slane %v11320_v3, 1 }
 0x628   : > { %v4187_v13 = vor.u32 %v11323_v20, %v4183_v19  ;;  %v4184_v51 = vsel %vm4140_vm4, %v4179_v60, %v4183_v19  ;;  %v4721_v60 = vsel %vm4698_vm15, %v11401_v47, %v4720_v27  ;;  %v4486_v19 = vor.u32 %v4485_v63, %v4484_v8 }
 0x629   : > { %4650 = vrot.lane.b32.xlu1 %v4615_v42, %s8783_s15  ;;  %v11382_v42 = vsel %vm4582_vm13, %v4614_v38, %v11184_v36  ;;  %v4722_v36 = vrot.slane %v11366_v4, 2  ;;  %v4723_v38 = vrot.slane %v11363_v56, 3  ;;  %v11433_v63 = vshll.u32 %v10957_v7, 16 }
 0x62a   : > { %4412 = vrot.lane.b32.xlu0 %v4377_v28, %s8775_s17  ;;  %v8450_v28 = vld [vmem:[%s13456_s7 + $0x40] sm:$0xff]  }
 0x62b   : > { %8368 = vmatpush1.bf16.msra.mxu1 %v8450_v28  ;;  %5281 = vmatpush1.bf16.msra.mxu0 %v8450_v28  ;;  %v11419_v28 = vshll.u32 %v11065_v6, 16 }
 0x62c   : > { %8315 = vmatprep.subr.bf16.mxu0 %v13916_v12  ;;  %v4487_v12 = vsel %vm4460_vm14, %v11353_v48, %v4486_v19  ;;  %v4465_v48 = vrot.slane %v11433_v63, 2 }
 0x62d   : > { %4554 = vrot.lane.b32.xlu1 %v4483_v39, %s8779_s21  ;;  %v4144_v39 = vshll.u32 %v11039_v30, 16 }
 0x62e   : > { %4692 = vrot.lane.b32.xlu0 %v11382_v42, %s8784_s16 }
 0x62f   : > { %v11390_v10 = vpop.permute.xlu0 %4672 }
 0x630   : > { %13914 = vst [vmem:[#allocation5_spill] sm:$0xff] %v11390_v10  ;;  %v4191_v10 = vrot.slane %v11310_v31, 1  ;;  %v4724_v31 = vor.u32 %v4723_v38, %v4722_v36  ;;  %v4149_v36 = vshll.u32 %v11051_v43, 16  ;;  %v4153_v38 = vshrl.u32 %v11051_v43, 16 }
 0x631   : > { %v4727_v43 = vrot.slane %v11419_v28, 3 }
 0x632   : > { %4297 = vrot.lane.b32.xlu0 %v4184_v51, %s8776_s18  ;;  %v4192_v46 = vsel %vm4140_vm4, %v4187_v13, %v4191_v10  ;;  %v11426_v51 = vor.u32 %v4489_v35, %v4488_v16  ;;  %v4146_v13 = vrot.slane %v4144_v39, 1  ;;  %v4725_v8 = vsel %vm4698_vm15, %v4720_v27, %v4724_v31 }
 0x633   : > { %4299 = vrot.lane.b32.xlu1 %v4192_v46, %s8776_s18  ;;  %v11424_v32 = vpop.permute.xlu1 %4674  ;;  %v11436_v46 = vshrl.u32 %v10957_v7, 16  ;;  %v4195_v16 = vor.u32 %v11313_v41, %v4191_v10  ;;  %v4142_v35 = vshrl.u32 %v11039_v30, 16  ;;  %v4726_v27 = vrot.slane %v11422_v11, 2 }
 0x634   : > { %v11414_v18 = vpop.permute.xlu0 %4436  ;;  %13918 = vst [vmem:[#allocation24_spill] sm:$0xff] %v11424_v32  ;;  %v4461_v10 = vrot.slane %v4153_v38, 1  ;;  %v4462_v41 = vrot.slane %v4149_v36, 2 }
 0x635   : > { %13917 = vst [vmem:[#allocation22_spill] sm:$0xff] %v11414_v18  ;;  %v4147_v7 = vor.u32 %v4146_v13, %v4142_v35  ;;  %v11459_v18 = vshrl.u32 %v10962_v21, 16  ;;  %v4699_v15 = vrot.slane %v11436_v46, 2 }
 0x636   : > { %4792 = vrot.lane.b32.xlu0 %v4721_v60, %s8785_s26  ;;  %v4199_v60 = vrot.slane %v11345_v1, 1  ;;  %v11456_v1 = vshll.u32 %v10962_v21, 16  ;;  %v4463_v6 = vor.u32 %v4462_v41, %v4461_v10  ;;  %v4700_v21 = vrot.slane %v11433_v63, 3 }
 0x637   : > { %4794 = vrot.lane.b32.xlu1 %v4725_v8, %s8785_s26  ;;  %v11448_v32 = vpop.permute.xlu1 %4382  ;;  %v4491_v8 = vsel %vm4460_vm14, %v4486_v19, %v11426_v51  ;;  %v11483_v41 = vshll.u32 %v11068_v54, 16 }
 0x638   : > { %v11441_v39 = vpop.permute.xlu0 %4632  ;;  %13920 = vst [vmem:[#allocation27_spill] sm:$0xff] %v11448_v32  ;;  %v4151_v32 = vrot.slane %v4149_v36, 1  ;;  %v4200_v19 = vsel %vm4140_vm4, %v4195_v16, %v4199_v60  ;;  %v4703_v36 = vrot.slane %v11456_v1, 3 }
 0x639   : > { %13919 = vst [vmem:[#allocation25_spill] sm:$0xff] %v11441_v39  ;;  %v4464_v39 = vrot.slane %v11436_v46, 1 }
 0x63a   : > { %4556 = vrot.lane.b32.xlu0 %v4487_v12, %s8779_s21  ;;  %v4728_v12 = vor.u32 %v4727_v43, %v4726_v27  ;;  %v4152_v35 = vsel %vm4140_vm4, %v4147_v7, %v4151_v32  ;;  %v4203_v43 = vor.u32 %v11348_v62, %v4199_v60  ;;  %v4492_v7 = vrot.slane %v11422_v11, 1 }
 0x63b   : > { %4558 = vrot.lane.b32.xlu1 %v4491_v8, %s8779_s21  ;;  %v11465_v13 = vpop.permute.xlu1 %4424  ;;  %v4466_v29 = vor.u32 %v4465_v48, %v4464_v39  ;;  %v4702_v8 = vrot.slane %v11459_v18, 2  ;;  %v4493_v39 = vrot.slane %v11419_v28, 2  ;;  %v11486_v48 = vshrl.u32 %v11068_v54, 16 }
 0x63c   : > { %v11462_v30 = vpop.permute.xlu0 %4396  ;;  %13922 = vst [vmem:[#allocation28_spill] sm:$0xff] %v11465_v13  ;;  %v4729_v27 = vsel %vm4698_vm15, %v4724_v31, %v4728_v12  ;;  %v4207_v60 = vrot.slane %v11363_v56, 1  ;;  %v4731_v13 = vrot.slane %v11483_v41, 3  ;;  %v4469_v56 = vrot.slane %v11456_v1, 2 }
 0x63d   : > { %13921 = vst [vmem:[#allocation26_spill] sm:$0xff] %v11462_v30  ;;  %v4704_v62 = vor.u32 %v4703_v36, %v4702_v8  ;;  %v4730_v54 = vrot.slane %v11486_v48, 2  ;;  %v4159_v36 = vrot.slane %v11433_v63, 1 }
 0x63e   : > { %4301 = vrot.lane.b32.xlu0 %v4200_v19, %s8776_s18  ;;  %v4467_v19 = vsel %vm4460_vm14, %v4463_v6, %v4466_v29  ;;  %v4468_v6 = vrot.slane %v11459_v18, 1  ;;  %v4211_v63 = vor.u32 %v11366_v4, %v4207_v60  ;;  %v4215_v4 = vrot.slane %v11419_v28, 1 }
 0x63f   : > { %4289 = vrot.lane.b32.xlu1 %v4152_v35, %s8776_s18  ;;  %v11479_v10 = vpop.permute.xlu1 %4620  ;;  %v4701_v35 = vor.u32 %v4700_v21, %v4699_v15  ;;  %v4155_v15 = vor.u32 %v4153_v38, %v4151_v32  ;;  %v4472_v28 = vrot.slane %v11370_v9, 1 }
 0x640   : > { %v11474_v16 = vpop.permute.xlu0 %4438  ;;  %13924 = vst [vmem:[#allocation30_spill] sm:$0xff] %v11479_v10  ;;  %v4494_v10 = vor.u32 %v4493_v39, %v4492_v7  ;;  %v4470_v38 = vor.u32 %v4469_v56, %v4468_v6  ;;  %v4707_v39 = vrot.slane %v11329_v17, 3 }
 0x641   : > { %13923 = vst [vmem:[#allocation29_spill] sm:$0xff] %v11474_v16  ;;  %v4208_v16 = vsel %vm4140_vm4, %v4203_v43, %v4207_v60  ;;  %v4705_v21 = vsel %vm4698_vm15, %v4701_v35, %v4704_v62  ;;  %v4160_v32 = vsel %vm4140_vm4, %v4155_v15, %v4159_v36  ;;  %v11528_v15 = vshrl.u32 %v11070_v5, 16 }
 0x642   : > { %4796 = vrot.lane.b32.xlu0 %v4729_v27, %s8785_s26  ;;  %v4495_v43 = vsel %vm4460_vm14, %v11426_v51, %v4494_v10  ;;  %v4732_v27 = vor.u32 %v4731_v13, %v4730_v54  ;;  %v4496_v51 = vrot.slane %v11486_v48, 1  ;;  %v4497_v13 = vrot.slane %v11483_v41, 2 }
 0x643   : > { %4546 = vrot.lane.b32.xlu1 %v4467_v19, %s8779_s21  ;;  %v11495_v30 = vpop.permute.xlu1 %4662  ;;  %v4471_v6 = vsel %vm4460_vm14, %v4466_v29, %v4470_v38  ;;  %v4216_v60 = vsel %vm4140_vm4, %v4211_v63, %v4215_v4 }
 0x644   : > { %v11492_v31 = vpop.permute.xlu0 %4634  ;;  %v4733_v35 = vsel %vm4698_vm15, %v4728_v12, %v4732_v27 }
 0x646   : > { %4303 = vrot.lane.b32.xlu0 %v4208_v16, %s8776_s18  ;;  %v4706_v16 = vrot.slane %v11370_v9, 2  ;;  %v4710_v9 = vrot.slane %v11323_v20, 2  ;;  %v11570_v20 = vshrl.u32 %v11073_v22, 16 }
 0x647   : > { %4784 = vrot.lane.b32.xlu1 %v4705_v21, %s8785_s26  ;;  %v11509_v7 = vpop.permute.xlu1 %4384  ;;  %v11525_v21 = vshll.u32 %v11070_v5, 16 }
 0x648   : > { %v11504_v8 = vpop.permute.xlu0 %4676  ;;  %v4708_v56 = vor.u32 %v4707_v39, %v4706_v16  ;;  %v4163_v16 = vor.u32 %v11436_v46, %v4159_v36  ;;  %v4473_v39 = vrot.slane %v11329_v17, 2  ;;  %v4711_v36 = vrot.slane %v11320_v3, 3 }
 0x649   : > { %v4735_v5 = vrot.slane %v11525_v21, 3 }
 0x64a   : > { %4560 = vrot.lane.b32.xlu0 %v4495_v43, %s8779_s21  ;;  %v4709_v29 = vsel %vm4698_vm15, %v4704_v62, %v4708_v56  ;;  %v4474_v46 = vor.u32 %v4473_v39, %v4472_v28  ;;  %v4712_v28 = vor.u32 %v4711_v36, %v4710_v9 }
 0x64b   : > { %4291 = vrot.lane.b32.xlu1 %v4160_v32, %s8776_s18  ;;  %v11521_v54 = vpop.permute.xlu1 %4426  ;;  %v4498_v32 = vor.u32 %v4497_v13, %v4496_v51  ;;  %v4167_v51 = vrot.slane %v11456_v1, 1  ;;  %v4219_v1 = vor.u32 %v11422_v11, %v4215_v4  ;;  %v4223_v11 = vrot.slane %v11483_v41, 1 }
 0x64c   : > { %v11516_v19 = vpop.permute.xlu0 %4398  ;;  %v4475_v3 = vsel %vm4460_vm14, %v4470_v38, %v4474_v46  ;;  %v4713_v38 = vsel %vm4698_vm15, %v4708_v56, %v4712_v28 }
 0x64d   : > { %13925 = vst [vmem:[#allocation31_spill] sm:$0xff] %v11516_v19  ;;  %v4734_v19 = vrot.slane %v11528_v15, 2  ;;  %v4168_v62 = vsel %vm4140_vm4, %v4163_v16, %v4167_v51  ;;  %v11567_v16 = vshll.u32 %v11073_v22, 16  ;;  %v4224_v4 = vsel %vm4140_vm4, %v4219_v1, %v4223_v11 }
 0x64e   : > { %4798 = vrot.lane.b32.xlu0 %v4733_v35, %s8785_s26  ;;  %v4499_v35 = vsel %vm4460_vm14, %v4494_v10, %v4498_v32  ;;  %v4500_v10 = vrot.slane %v11528_v15, 1  ;;  %v4171_v9 = vor.u32 %v11459_v18, %v4167_v51  ;;  %v4227_v18 = vor.u32 %v11486_v48, %v4223_v11 }
 0x64f   : > { %4548 = vrot.lane.b32.xlu1 %v4471_v6, %s8779_s21  ;;  %v11537_v43 = vpop.permute.xlu1 %4622  ;;  %v4736_v6 = vor.u32 %v4735_v5, %v4734_v19  ;;  %v4501_v19 = vrot.slane %v11525_v21, 2  ;;  %v4504_v51 = vrot.slane %v11570_v20, 1 }
 0x650   : > { %v11534_v12 = vpop.permute.xlu0 %4440 }
 0x652   : > { %4305 = vrot.lane.b32.xlu0 %v4216_v60, %s8776_s18 }
 0x653   : > { %4786 = vrot.lane.b32.xlu1 %v4709_v29, %s8785_s26  ;;  %v11551_v13 = vpop.permute.xlu1 %4664  ;;  %v4737_v29 = vsel %vm4698_vm15, %v4732_v27, %v4736_v6 }
 0x654   : > { %v11547_v63 = vpop.permute.xlu0 %4636 }
 0x656   : > { %4562 = vrot.lane.b32.xlu0 %v4499_v35, %s8779_s21  ;;  %v4502_v35 = vor.u32 %v4501_v19, %v4500_v10  ;;  %v13927_v10 = vrot.slane %v11329_v17, 1  ;;  %v4249_v17 = vshrl.u32 %v11075_v44, 16 }
 0x657   : > { %4293 = vrot.lane.b32.xlu1 %v4168_v62, %s8776_s18  ;;  %v11563_v5 = vpop.permute.xlu1 %4386  ;;  %v4738_v62 = vrot.slane %v11570_v20, 2 }
 0x658   : > { %v11558_v60 = vpop.permute.xlu0 %4678  ;;  %v4503_v36 = vsel %vm4460_vm14, %v4498_v32, %v4502_v35  ;;  %v4176_v19 = vsel %vm4140_vm4, %v4171_v9, %v13927_v10 }
 0x659   : > { %13926 = vst [vmem:[#allocation33_spill] sm:$0xff] %v11558_v60  ;;  %v4739_v60 = vrot.slane %v11567_v16, 3 }
 0x65a   : > { %4800 = vrot.lane.b32.xlu0 %v4737_v29, %s8785_s26 }
 0x65b   : > { %4550 = vrot.lane.b32.xlu1 %v4475_v3, %s8779_s21  ;;  %v11579_v39 = vpop.permute.xlu1 %4428  ;;  %v4740_v29 = vor.u32 %v4739_v60, %v4738_v62  ;;  %v4505_v60 = vrot.slane %v11567_v16, 2  ;;  %v4231_v62 = vrot.slane %v11525_v21, 1 }
 0x65c   : > { %v11576_v27 = vpop.permute.xlu0 %4400 }
 0x65d   : > { %v4741_v3 = vsel %vm4698_vm15, %v4736_v6, %v4740_v29  ;;  %v4232_v6 = vsel %vm4140_vm4, %v4227_v18, %v4231_v62  ;;  %v4506_v9 = vor.u32 %v4505_v60, %v4504_v51  ;;  %v4235_v21 = vor.u32 %v11528_v15, %v4231_v62 }
 0x65e   : > { %4307 = vrot.lane.b32.xlu0 %v4224_v4, %s8776_s18  ;;  %v4245_v4 = vshll.u32 %v11075_v44, 16  ;;  %v4239_v51 = vrot.slane %v11567_v16, 1 }
 0x65f   : > { %4788 = vrot.lane.b32.xlu1 %v4713_v38, %s8785_s26  ;;  %v11590_v1 = vpop.permute.xlu1 %4624  ;;  %v4479_v38 = vsel %vm4460_vm14, %v4474_v46, %v11360_v2  ;;  %v11622_v2 = vshll.u32 %v11077_v40, 16  ;;  %v11625_v46 = vshrl.u32 %v11077_v40, 16 }
 0x660   : > { %v11587_v41 = vpop.permute.xlu0 %4442  ;;  %v4743_v10 = vrot.slane %v4245_v4, 3  ;;  %v4240_v15 = vsel %vm4140_vm4, %v4235_v21, %v4239_v51 }
 0x661   : > { %v4746_v62 = vrot.slane %v11625_v46, 2  ;;  %v4513_v21 = vrot.slane %v11622_v2, 2 }
 0x662   : > { %4564 = vrot.lane.b32.xlu0 %v4503_v36, %s8779_s21  ;;  %v4742_v36 = vrot.slane %v4249_v17, 2 }
 0x663   : > { %4295 = vrot.lane.b32.xlu1 %v4176_v19, %s8776_s18  ;;  %v11602_v32 = vpop.permute.xlu1 %4666  ;;  %v4717_v19 = vsel %vm4698_vm15, %v4712_v28, %v11401_v47  ;;  %v4508_v47 = vrot.slane %v4249_v17, 1  ;;  %v4509_v28 = vrot.slane %v4245_v4, 2 }
 0x664   : > { %v11597_v56 = vpop.permute.xlu0 %4638 }
 0x665   : > { %v4510_v40 = vor.u32 %v4509_v28, %v4508_v47  ;;  %v4261_v47 = vshll.u32 %v11079_v45, 16  ;;  %v4265_v28 = vshrl.u32 %v11079_v45, 16 }
 0x666   : > { %4802 = vrot.lane.b32.xlu0 %v4741_v3, %s8785_s26  ;;  %v4507_v3 = vsel %vm4460_vm14, %v4502_v35, %v4506_v9 }
 0x667   : > { %4552 = vrot.lane.b32.xlu1 %v4479_v38, %s8779_s21  ;;  %v11615_v11 = vpop.permute.xlu1 %4388  ;;  %v4744_v38 = vor.u32 %v4743_v10, %v4742_v36  ;;  %v4512_v10 = vrot.slane %v11625_v46, 1  ;;  %v4751_v45 = vrot.slane %v4261_v47, 3 }
 0x668   : > { %v11612_v48 = vpop.permute.xlu0 %4680 }
 0x669   : > { %v4745_v16 = vsel %vm4698_vm15, %v4740_v29, %v4744_v38 }
 0x66a   : > { %4309 = vrot.lane.b32.xlu0 %v4232_v6, %s8776_s18  ;;  %v4747_v6 = vrot.slane %v11622_v2, 3 }
 0x66b   : > { %4790 = vrot.lane.b32.xlu1 %v4717_v19, %s8785_s26  ;;  %v11632_v60 = vpop.permute.xlu1 %4430 }
 0x66c   : > { %v11628_v18 = vpop.permute.xlu0 %4402  ;;  %v4748_v36 = vor.u32 %v4747_v6, %v4746_v62  ;;  %v4514_v6 = vor.u32 %v4513_v21, %v4512_v10 }
 0x66d   : > { %13928 = vst [vmem:[#allocation34_spill] sm:$0xff] %v11628_v18  ;;  %v4247_v18 = vrot.slane %v4245_v4, 1 }
 0x66e   : > { %4566 = vrot.lane.b32.xlu0 %v4507_v3, %s8779_s21  ;;  %v4749_v62 = vsel %vm4698_vm15, %v4744_v38, %v4748_v36  ;;  %v4515_v38 = vsel %vm4460_vm14, %v4510_v40, %v4514_v6 }
 0x66f   : > { %4311 = vrot.lane.b32.xlu1 %v4240_v15, %s8776_s18  ;;  %v11642_v35 = vpop.permute.xlu1 %4626  ;;  %v4243_v15 = vor.u32 %v11570_v20, %v4239_v51  ;;  %v4750_v51 = vrot.slane %v4265_v28, 2 }
 0x670   : > { %v11639_v19 = vpop.permute.xlu0 %4444 }
 0x671   : > { %13929 = vst [vmem:[#allocation32_spill] sm:$0xff] %v11639_v19  ;;  %v4511_v19 = vsel %vm4460_vm14, %v4506_v9, %v4510_v40  ;;  %v4248_v4 = vsel %vm4140_vm4, %v4243_v15, %v4247_v18 }
 0x672   : > { %4804 = vrot.lane.b32.xlu0 %v4745_v16, %s8785_s26  ;;  %v11663_v16 = vshrl.u32 %v11081_v33, 16 }
 0x673   : > { %4414 = vrot.lane.b32.xlu1 %v11336_v55, %s8775_s17  ;;  %v11653_v29 = vpop.permute.xlu1 %4668  ;;  %v11660_v55 = vshll.u32 %v11081_v33, 16  ;;  %v4255_v33 = vrot.slane %v11622_v2, 1 }
 0x674   : > { %v11649_v3 = vpop.permute.xlu0 %4640  ;;  %v4754_v10 = vrot.slane %v11663_v16, 2 }
 0x675   : > { %13930 = vst [vmem:[#allocation35_spill] sm:$0xff] %v11649_v3  ;;  %v4755_v21 = vrot.slane %v11660_v55, 3  ;;  %v4517_v3 = vrot.slane %v4261_v47, 2 }
 0x676   : > { %4568 = vrot.lane.b32.xlu0 %v4511_v19, %s8779_s21  ;;  %v4251_v19 = vor.u32 %v4249_v17, %v4247_v18 }
 0x677   : > { %4806 = vrot.lane.b32.xlu1 %v4749_v62, %s8785_s26  ;;  %v11669_v9 = vpop.permute.xlu1 %4446  ;;  %v4756_v17 = vor.u32 %v4755_v21, %v4754_v10 }
 0x678   : > { %v11666_v20 = vpop.permute.xlu0 %4682  ;;  %13932 = vst [vmem:[#allocation38_spill] sm:$0xff] %v11669_v9  ;;  %v4752_v9 = vor.u32 %v4751_v45, %v4750_v51  ;;  %v4256_v40 = vsel %vm4140_vm4, %v4251_v19, %v4255_v33  ;;  %v4520_v51 = vrot.slane %v11663_v16, 1 }
 0x679   : > { %13931 = vst [vmem:[#allocation36_spill] sm:$0xff] %v11666_v20  ;;  %v4516_v20 = vrot.slane %v4265_v28, 1 }
 0x67a   : > { %4313 = vrot.lane.b32.xlu0 %v4248_v4, %s8776_s18  ;;  %v4753_v4 = vsel %vm4698_vm15, %v4748_v36, %v4752_v9  ;;  %v4757_v45 = vsel %vm4698_vm15, %v4752_v9, %v4756_v17  ;;  %v4259_v36 = vor.u32 %v11625_v46, %v4255_v33  ;;  %v4263_v9 = vrot.slane %v4261_v47, 1 }
 0x67b   : > { %4570 = vrot.lane.b32.xlu1 %v4515_v38, %s8779_s21  ;;  %v11679_v15 = vpop.permute.xlu1 %4642  ;;  %v4518_v2 = vor.u32 %v4517_v3, %v4516_v20  ;;  %v4277_v3 = vshll.u32 %v11084_v50, 16  ;;  %v4281_v20 = vshrl.u32 %v11084_v50, 16 }
 0x67c   : > { %v11676_v62 = vpop.permute.xlu0 %4404  ;;  %v4267_v46 = vor.u32 %v4265_v28, %v4263_v9 }
 0x67d   : > { %v4519_v10 = vsel %vm4460_vm14, %v4514_v6, %v4518_v2 }
 0x67e   : > { %4456 = vrot.lane.b32.xlu0 %v11168_v26, %s8777_s19  ;;  %v4521_v26 = vrot.slane %v11660_v55, 2 }
 0x67f   : > { %4315 = vrot.lane.b32.xlu1 %v4256_v40, %s8776_s18  ;;  %v11688_v38 = vpop.permute.xlu1 %4406 }
 0x680   : > { %v11685_v18 = vpop.permute.xlu0 %4684  ;;  %v4522_v40 = vor.u32 %v4521_v26, %v4520_v51  ;;  %v4271_v51 = vrot.slane %v11660_v55, 1 }
 0x682   : > { %4808 = vrot.lane.b32.xlu0 %v4753_v4, %s8785_s26  ;;  %v4523_v33 = vsel %vm4460_vm14, %v4518_v2, %v4522_v40  ;;  %v4272_v50 = vsel %vm4140_vm4, %v4267_v46, %v4271_v51 }
 0x683   : > { %4810 = vrot.lane.b32.xlu1 %v4757_v45, %s8785_s26  ;;  %v11698_v21 = vpop.permute.xlu1 %4686  ;;  %v4264_v45 = vsel %vm4140_vm4, %v4259_v36, %v4263_v9  ;;  %v4525_v36 = vrot.slane %v4277_v3, 2 }
 0x684   : > { %v11695_v19 = vpop.permute.xlu0 %4448  ;;  %13934 = vst [vmem:[#allocation40_spill] sm:$0xff] %v11698_v21  ;;  %v4758_v21 = vrot.slane %v4281_v20, 2 }
 0x685   : > { %13933 = vst [vmem:[#allocation37_spill] sm:$0xff] %v11695_v19  ;;  %v4759_v19 = vrot.slane %v4277_v3, 3 }
 0x686   : > { %4572 = vrot.lane.b32.xlu0 %v4519_v10, %s8779_s21  ;;  %v4524_v10 = vrot.slane %v4281_v20, 1 }
 0x687   : > { %4694 = vrot.lane.b32.xlu1 %v11199_v0, %s8784_s16  ;;  %v11709_v6 = vpop.permute.xlu1 %4450  ;;  %v4760_v26 = vor.u32 %v4759_v19, %v4758_v21 }
 0x688   : > { %v11706_v4 = vpop.permute.xlu0 %4644 }
 0x689   : > { %v4761_v28 = vsel %vm4698_vm15, %v4756_v17, %v4760_v26  ;;  %v4765_v55 = vsel %vm4698_vm15, %v4760_v26, %v11220_v53  ;;  %v4279_v17 = vrot.slane %v4277_v3, 1  ;;  %v4285_v53 = vshll.u32 %v11208_v58, 16 }
 0x68a   : > { %4317 = vrot.lane.b32.xlu0 %v4264_v45, %s8776_s18  ;;  %v4526_v45 = vor.u32 %v4525_v36, %v4524_v10 }
 0x68b   : > { %4574 = vrot.lane.b32.xlu1 %v4523_v33, %s8779_s21  ;;  %v11717_v0 = vpop.permute.xlu1 %4646 }
 0x68c   : > { %v11714_v47 = vpop.permute.xlu0 %4408 }
 0x68e   : > { %4652 = vrot.lane.b32.xlu0 %v11382_v42, %s8783_s15  ;;  %v4527_v42 = vsel %vm4460_vm14, %v4522_v40, %v4526_v45  ;;  %v4536_v40 = vsel %vm4460_vm14, %v4526_v45, %v11228_v23 }
 0x68f   : > { %4319 = vrot.lane.b32.xlu1 %v4272_v50, %s8776_s18  ;;  %v11726_v9 = vpop.permute.xlu1 %4410  ;;  %v4275_v50 = vor.u32 %v11663_v16, %v4271_v51  ;;  %v4283_v16 = vor.u32 %v4281_v20, %v4279_v17  ;;  %v4287_v51 = vrot.slane %v4285_v53, 1  ;;  %v13939_v53 = vld [vmem:[#allocation3_spill] sm:$0xff] }
 0x690   : > { %v11723_v2 = vpop.permute.xlu0 %4688 }
 0x691   : > { %v4280_v46 = vsel %vm4140_vm4, %v4275_v50, %v4279_v17  ;;  %v4288_v58 = vsel %vm4140_vm4, %v4283_v16, %v4287_v51  ;;  %v13938_v50 = vld [vmem:[#allocation63_spill] sm:$0xff]  ;;  %v13941_v16 = vld [vmem:[#allocation12_spill] sm:$0xff]  ;;  %v13942_v51 = vld [vmem:[#allocation2_spill] sm:$0xff] }
 0x692   : > { %4812 = vrot.lane.b32.xlu0 %v4761_v28, %s8785_s26  ;;  %v4832_v17 = vrot.slane %v13938_v50, 3 }
 0x693   : > { %4814 = vrot.lane.b32.xlu1 %v4765_v55, %s8785_s26  ;;  %v11735_v21 = vpop.permute.xlu1 %4690  ;;  %v13937_v55 = vld [vmem:[#allocation6_spill] sm:$0xff] }
 0x694   : > { %v11732_v19 = vpop.permute.xlu0 %4452 }
 0x696   : > { %4576 = vrot.lane.b32.xlu0 %v4527_v42, %s8779_s21 }
 0x697   : > { %4458 = vrot.lane.b32.xlu1 %v11215_v37, %s8777_s19  ;;  %v11745_v26 = vpop.permute.xlu1 %4454 }
 0x698   : > { %v11741_v33 = vpop.permute.xlu0 %4648 }
 0x69a   : > { %4321 = vrot.lane.b32.xlu0 %v4280_v46, %s8776_s18 }
 0x69b   : > { %4578 = vrot.lane.b32.xlu1 %v4536_v40, %s8779_s21  ;;  %v11753_v37 = vpop.permute.xlu1 %4650  ;;  %v13940_v40 = vld [vmem:[#allocation9_spill] sm:$0xff] }
 0x69c   : > { %v11751_v3 = vpop.permute.xlu0 %4412  ;;  %13935 = vst [vmem:[#allocation41_spill] sm:$0xff] %v11753_v37 }
 0x69e   : > { %4416 = vrot.lane.b32.xlu0 %v11224_v25, %s8775_s17 }
 0x69f   : > { %4323 = vrot.lane.b32.xlu1 %v4288_v58, %s8776_s18  ;;  %v4555_v36 = vpop.permute.xlu1 %4554 }
 0x6a0   : > { %v11759_v10 = vpop.permute.xlu0 %4692 }
 0x6a1   : > { %13936 = vst [vmem:[#allocation43_spill] sm:$0xff] %v11759_v10 }
 0x6a2   : > { %4816 = vrot.lane.b32.xlu0 %v11243_v52, %s8785_s26 }
 0x6a3   : > { %4654 = vrot.lane.b32.xlu1 %v11234_v14, %s8783_s15 }
 0x6a4   : > { %v4298_v23 = vpop.permute.xlu0 %4297 }
 0x6a5   : > { %v4867_v20 = vsel %vm1532_vm3, %v13895_v59, %v4298_v23  ;;  %v4300_v28 = vpop.permute.xlu1 %4299  ;;  %v524_v23 = vld [vmem:[%s13451_s2 + $0x13] sm:$0xff] }
 0x6a6   : > { %v4903_v25 = vsel %vm1618_vm5, %v4867_v20, %v11292_v34  ;;  %4580 = vrot.lane.b32.xlu0 %v11253_v49, %s8779_s21  ;;  %v4869_v45 = vsel %vm1532_vm3, %v13899_v57, %v4300_v28  ;;  %v525_v49 = vld [vmem:[%s13451_s2 + $0x1b] sm:$0xff]  ;;  %s8411_s21 = smul.u32 288, %s14184_s30 }
 0x6a7   : > { %v4939_v52 = vsel %vm1704_vm7, %v4903_v25, %v11299_v24  ;;  %v4905_v14 = vsel %vm1618_vm5, %v4869_v45, %v11342_v61  ;;  %4818 = vrot.lane.b32.xlu1 %v13937_v55, %s8785_s26  ;;  %v13943_v28 = vld [vmem:[#allocation49_spill] sm:$0xff] }
 0x6a8   : > { %v4975_v42 = vsel %vm1790_vm9, %v4939_v52, %v4555_v36  ;;  %v4793_v34 = vpop.permute.xlu0 %4792  ;;  %v4941_v58 = vsel %vm1704_vm7, %v4905_v14, %v13942_v51  ;;  %v13944_v25 = vrot.slane %v13943_v28, 3  ;;  %v527_v52 = vld [vmem:[%s13451_s2 + $0x2b] sm:$0xff]  ;;  %v529_v51 = vld [vmem:[%s13451_s2 + $0x3b] sm:$0xff]  ;;  %s13177_s27 = scalar_lea.vmem %s13463_s14, %s8411_s21 }
 0x6a9   : > { %v5012_v24 = vsel %vm5002_vm6, %v4975_v42, %v13939_v53  ;;  %v4795_v46 = vpop.permute.xlu1 %4794  ;;  %v13945_v42 = vld [vmem:[#allocation4_spill] sm:$0xff] }
 0x6aa   : > { %v5049_v61 = vsel %vm5039_vm8, %v5012_v24, %v13940_v40  ;;  %4696 = vrot.lane.b32.xlu0 %v13941_v16, %s8784_s16  ;;  %v4833_v45 = vsel %vm4820_vm11, %v13944_v25, %v4832_v17  ;;  %v13946_v24 = vld [vmem:[#allocation5_spill] sm:$0xff] }
 0x6ab   : > { %v5090_v36 = vsel %vm5076_vm10, %v5049_v61, %v4793_v34  ;;  %5450 = vperm.xlu1 %8436, %v525_v49   ;;  %v526_v49 = vld [vmem:[%s13451_s2 + $0x23] sm:$0xff] }
 0x6ac   : > { %v4557_v20 = vpop.permute.xlu0 %4556  ;;  %5329 = vmatmul.mubr.bf16.vlgmr.msra.gmra.mrb[4].mxu1 %v5090_v36  ;;  %v13947_v61 = vld [vmem:[#allocation66_spill] sm:$0xff] }
 0x6ad   : > { %v4977_v55 = vsel %vm1790_vm9, %v4941_v58, %v4557_v20  ;;  %7790 = vmatprep.mubr.msk.bf16.mxu1 %vm1532_vm3, %v4833_v45  ;;  %v4559_v14 = vpop.permute.xlu1 %4558  ;;  %v4834_v16 = vrot.slane %v13947_v61, 3  ;;  %v13948_v58 = vld [vmem:[#allocation46_spill] sm:$0xff]  ;;  %v13950_v45 = vld [vmem:[#allocation64_spill] sm:$0xff] }
 0x6ae   : > { %v5014_v34 = vsel %vm5002_vm6, %v4977_v55, %v13945_v42  ;;  %5445 = vperm.xlu0 %8435, %v524_v23   ;;  %v13949_v23 = vld [vmem:[#allocation21_spill] sm:$0xff]  ;;  %v13951_v55 = vld [vmem:[#allocation22_spill] sm:$0xff] }
 0x6af   : > { %5460 = vperm.xlu1 %8436, %v527_v52   ;;  %v5051_v40 = vsel %vm5039_vm8, %v5014_v34, %v13946_v24  ;;  %v13952_v24 = vld [vmem:[#allocation27_spill] sm:$0xff] }
 0x6b0   : > { %v4302_v53 = vpop.permute.xlu0 %4301  ;;  %v5093_v34 = vsel %vm5076_vm10, %v5051_v40, %v4795_v46  ;;  %v531_v46 = vld [vmem:[%s13451_s2 + $0x4b] sm:$0xff]  ;;  %v13954_v40 = vld [vmem:[#allocation25_spill] sm:$0xff] }
 0x6b1   : > { %v4871_v36 = vsel %vm1532_vm3, %v13948_v58, %v4302_v53  ;;  %v4290_v20 = vpop.permute.xlu1 %4289  ;;  %v528_v53 = vld [vmem:[%s13451_s2 + $0x33] sm:$0xff] }
 0x6b2   : > { %v4907_v25 = vsel %vm1618_vm5, %v4871_v36, %v13949_v23  ;;  %5455 = vperm.xlu0 %8435, %v526_v49   ;;  %v4859_v52 = vsel %vm1532_vm3, %v13950_v45, %v4290_v20  ;;  %v4835_v49 = vsel %vm4820_vm11, %v4832_v17, %v4834_v16  ;;  %v13953_v20 = vld [vmem:[#allocation28_spill] sm:$0xff]  ;;  %v4824_v17 = vrot.slane %v13895_v59, 3 }
 0x6b3   : > { %v4943_v42 = vsel %vm1704_vm7, %v4907_v25, %v13951_v55  ;;  %v4895_v10 = vsel %vm1618_vm5, %v4859_v52, %v13952_v24  ;;  %5470 = vperm.xlu1 %8436, %v529_v51   ;;  %v13955_v51 = vld [vmem:[#allocation30_spill] sm:$0xff]  ;;  %v13957_v24 = vld [vmem:[#allocation15_spill] sm:$0xff] }
 0x6b4   : > { %v4979_v37 = vsel %vm1790_vm9, %v4943_v42, %v4559_v14  ;;  %v4797_v36 = vpop.permute.xlu0 %4796  ;;  %5337 = vmatmul.mubr.bf16.gmra.mrb[8].mxu1 %v5093_v34  ;;  %v4931_v23 = vsel %vm1704_vm7, %v4895_v10, %v13953_v20  ;;  %v530_v10 = vld [vmem:[%s13451_s2 + $0x43] sm:$0xff]  ;;  %v13956_v42 = vld [vmem:[#allocation24_spill] sm:$0xff] }
 0x6b5   : > { %v5016_v25 = vsel %vm5002_vm6, %v4979_v37, %v13954_v40  ;;  %7791 = vmatprep.mubr.msk.bf16.mxu1 %vm1532_vm3, %v4835_v49  ;;  %v4547_v45 = vpop.permute.xlu1 %4546  ;;  %v533_v49 = vld [vmem:[%s13451_s2 + $0x5b] sm:$0xff] }
 0x6b6   : > { %5465 = vperm.xlu0 %8435, %v528_v53   ;;  %v4967_v14 = vsel %vm1790_vm9, %v4931_v23, %v4547_v45  ;;  %v5053_v37 = vsel %vm5039_vm8, %v5016_v25, %v13956_v42  ;;  %v4836_v53 = vrot.slane %v13957_v24, 3  ;;  %v13959_v25 = vld [vmem:[#allocation29_spill] sm:$0xff] }
 0x6b7   : > { %v5004_v52 = vsel %vm5002_vm6, %v4967_v14, %v13955_v51  ;;  %5480 = vperm.xlu1 %8436, %v531_v46   ;;  %v13958_v46 = vld [vmem:[#allocation26_spill] sm:$0xff]  ;;  %v532_v14 = vld [vmem:[%s13451_s2 + $0x53] sm:$0xff] }
 0x6b8   : > { %v4304_v55 = vpop.permute.xlu0 %4303  ;;  %v5041_v34 = vsel %vm5039_vm8, %v5004_v52, %v11495_v30  ;;  %v5096_v30 = vsel %vm5076_vm10, %v5053_v37, %v4797_v36  ;;  %v13960_v51 = vld [vmem:[#allocation62_spill] sm:$0xff]  ;;  %v535_v36 = vld [vmem:[%s13451_s2 + $0x6b] sm:$0xff] }
 0x6b9   : > { %v4873_v20 = vsel %vm1532_vm3, %v13943_v28, %v4304_v55  ;;  %v4785_v23 = vpop.permute.xlu1 %4784  ;;  %v13961_v28 = vrot.slane %v13960_v51, 3 }
 0x6ba   : > { %v4909_v59 = vsel %vm1618_vm5, %v4873_v20, %v13958_v46  ;;  %5475 = vperm.xlu0 %8435, %v530_v10   ;;  %v5078_v40 = vsel %vm5076_vm10, %v5041_v34, %v4785_v23  ;;  %v4837_v10 = vsel %vm4820_vm11, %v4834_v16, %v4836_v53  ;;  %v13962_v34 = vld [vmem:[#allocation11_spill] sm:$0xff]  ;;  %v13963_v20 = vld [vmem:[#allocation65_spill] sm:$0xff]  ;;  %v13964_v23 = vmov 0.0|0.0  }
 0x6bb   : > { %v4945_v45 = vsel %vm1704_vm7, %v4909_v59, %v13959_v25  ;;  %5490 = vperm.xlu1 %8436, %v533_v49   ;;  %5297 = vmatmul.mubr.bf16.vlgmr.msra.gmra.mrb[84].mxu0 %v5078_v40  ;;  %v4825_v52 = vsel %vm4820_vm11, %v13961_v28, %v4824_v17  ;;  %v534_v59 = vld [vmem:[%s13451_s2 + $0x63] sm:$0xff] }
 0x6bc   : > { %v4561_v55 = vpop.permute.xlu0 %4560  ;;  %5345 = vmatmul.mubr.bf16.gmra.mrb[12].mxu1 %v5096_v30  ;;  %7786 = vmatprep.mubr.msk.bf16.mxu0 %vm1532_vm3, %v4825_v52 }
 0x6bd   : > { %v4981_v42 = vsel %vm1790_vm9, %v4945_v45, %v4561_v55  ;;  %7792 = vmatprep.mubr.msk.bf16.mxu1 %vm1532_vm3, %v4837_v10  ;;  %v4292_v37 = vpop.permute.xlu1 %4291  ;;  %8317 = vmatpush3.bf16.msra.mxu0 %v13962_v34  ;;  %v13965_v45 = vld [vmem:[#allocation17_spill] sm:$0xff] }
 0x6be   : > { %v5018_v49 = vsel %vm5002_vm6, %v4981_v42, %v11492_v31  ;;  %5485 = vperm.xlu0 %8435, %v532_v14   ;;  %v4861_v16 = vsel %vm1532_vm3, %v13963_v20, %v4292_v37  ;;  %8318 = vmatprep.subr.bf16.mxu0 %v13964_v23  ;;  %v4838_v30 = vrot.slane %v13965_v45, 3  ;;  %v537_v14 = vld [vmem:[%s13451_s2 + $0x7b] sm:$0xff]  ;;  %v539_v42 = vld [vmem:[%s13451_s2 + $0x8b] sm:$0xff] }
 0x6bf   : > { %v4897_v46 = vsel %vm1618_vm5, %v4861_v16, %v11509_v7  ;;  %5500 = vperm.xlu1 %8436, %v535_v36   ;;  %v5055_v25 = vsel %vm5039_vm8, %v5018_v49, %v11504_v8  ;;  %v536_v8 = vld [vmem:[%s13451_s2 + $0x73] sm:$0xff]  ;;  %v13966_v20 = vld [vmem:[#allocation31_spill] sm:$0xff] }
 0x6c0   : > { %v4799_v40 = vpop.permute.xlu0 %4798  ;;  %v4933_v31 = vsel %vm1704_vm7, %v4897_v46, %v11521_v54  ;;  %v4826_v54 = vrot.slane %v13899_v57, 3  ;;  %v4839_v36 = vsel %vm4820_vm11, %v4836_v53, %v4838_v30  ;;  %v538_v46 = vld [vmem:[%s13451_s2 + $0x83] sm:$0xff] }
 0x6c1   : > { %v4549_v28 = vpop.permute.xlu1 %4548  ;;  %v5099_v52 = vsel %vm5076_vm10, %v5055_v25, %v4799_v40 }
 0x6c2   : > { %5495 = vperm.xlu0 %8435, %v534_v59   ;;  %v4969_v7 = vsel %vm1790_vm9, %v4933_v31, %v4549_v28  ;;  %v541_v59 = vld [vmem:[%s13451_s2 + $0x9b] sm:$0xff]  ;;  %v4840_v28 = vrot.slane %v11073_v22, 3 }
 0x6c3   : > { %v5006_v55 = vsel %vm5002_vm6, %v4969_v7, %v11537_v43  ;;  %5510 = vperm.xlu1 %8436, %v537_v14   ;;  %v13967_v31 = vld [vmem:[#allocation61_spill] sm:$0xff] }
 0x6c4   : > { %v4306_v10 = vpop.permute.xlu0 %4305  ;;  %5353 = vmatmul.mubr.bf16.gmra.mrb[16].mxu1 %v5099_v52  ;;  %v5043_v37 = vsel %vm5039_vm8, %v5006_v55, %v11551_v13  ;;  %v4827_v13 = vsel %vm4820_vm11, %v4824_v17, %v4826_v54  ;;  %v540_v7 = vld [vmem:[%s13451_s2 + $0x93] sm:$0xff] }
 0x6c5   : > { %v4875_v43 = vsel %vm1532_vm3, %v13938_v50, %v4306_v10  ;;  %7793 = vmatprep.mubr.msk.bf16.mxu1 %vm1532_vm3, %v4839_v36  ;;  %v4787_v49 = vpop.permute.xlu1 %4786  ;;  %v13968_v52 = vld [vmem:[#allocation33_spill] sm:$0xff]  ;;  %v543_v10 = vld [vmem:[%s13451_s2 + $0xab] sm:$0xff] }
 0x6c6   : > { %v4911_v57 = vsel %vm1618_vm5, %v4875_v43, %v13966_v20  ;;  %5505 = vperm.xlu0 %8435, %v536_v8   ;;  %v5081_v16 = vsel %vm5076_vm10, %v5043_v37, %v4787_v49  ;;  %v545_v20 = vld [vmem:[%s13451_s2 + $0xbb] sm:$0xff] }
 0x6c7   : > { %v4947_v53 = vsel %vm1704_vm7, %v4911_v57, %v11534_v12  ;;  %5520 = vperm.xlu1 %8436, %v539_v42   ;;  %5305 = vmatmul.mubr.bf16.gmra.mrb[88].mxu0 %v5081_v16 }
 0x6c8   : > { %v4563_v50 = vpop.permute.xlu0 %4562  ;;  %7787 = vmatprep.mubr.msk.bf16.mxu0 %vm1532_vm3, %v4827_v13  ;;  %v544_v13 = vld [vmem:[%s13451_s2 + $0xb3] sm:$0xff] }
 0x6c9   : > { %v4983_v40 = vsel %vm1790_vm9, %v4947_v53, %v4563_v50  ;;  %v4294_v25 = vpop.permute.xlu1 %4293 }
 0x6ca   : > { %v5020_v12 = vsel %vm5002_vm6, %v4983_v40, %v11547_v63  ;;  %5515 = vperm.xlu0 %8435, %v538_v46   ;;  %v4863_v14 = vsel %vm1532_vm3, %v13967_v31, %v4294_v25 }
 0x6cb   : > { %v4899_v17 = vsel %vm1618_vm5, %v4863_v14, %v11563_v5  ;;  %v5057_v55 = vsel %vm5039_vm8, %v5020_v12, %v13968_v52  ;;  %5530 = vperm.xlu1 %8436, %v541_v59   ;;  %v4841_v5 = vsel %vm4820_vm11, %v4838_v30, %v4840_v28  ;;  %v546_v12 = vld [vmem:[%s13451_s2 + $0xc3] sm:$0xff] }
 0x6cc   : > { %v4801_v8 = vpop.permute.xlu0 %4800  ;;  %v4935_v63 = vsel %vm1704_vm7, %v4899_v17, %v11579_v39  ;;  %v542_v39 = vld [vmem:[%s13451_s2 + $0xa3] sm:$0xff] }
 0x6cd   : > { %v5102_v36 = vsel %vm5076_vm10, %v5057_v55, %v4801_v8  ;;  %v4551_v42 = vpop.permute.xlu1 %4550  ;;  %v551_v8 = vld [vmem:[%s13451_s2 + $0xeb] sm:$0xff] }
 0x6ce   : > { %5525 = vperm.xlu0 %8435, %v540_v7   ;;  %5361 = vmatmul.mubr.bf16.gmra.mrb[20].mxu1 %v5102_v36  ;;  %v4971_v37 = vsel %vm1790_vm9, %v4935_v63, %v4551_v42  ;;  %v13970_v36 = vld [vmem:[#allocation34_spill] sm:$0xff] }
 0x6cf   : > { %7794 = vmatprep.mubr.msk.bf16.mxu1 %vm1532_vm3, %v4841_v5  ;;  %v5008_v43 = vsel %vm5002_vm6, %v4971_v37, %v11590_v1  ;;  %5540 = vperm.xlu1 %8436, %v543_v10   ;;  %v13971_v5 = vld [vmem:[#allocation32_spill] sm:$0xff] }
 0x6d0   : > { %v4308_v49 = vpop.permute.xlu0 %4307  ;;  %v5045_v30 = vsel %vm5039_vm8, %v5008_v43, %v11602_v32  ;;  %v13969_v32 = vrot.slane %v13948_v58, 3  ;;  %v4842_v58 = vrot.slane %v11075_v44, 3  ;;  %v550_v43 = vld [vmem:[%s13451_s2 + $0xe3] sm:$0xff] }
 0x6d1   : > { %v4877_v57 = vsel %vm1532_vm3, %v13947_v61, %v4308_v49  ;;  %v4789_v16 = vpop.permute.xlu1 %4788 }
 0x6d2   : > { %v4913_v1 = vsel %vm1618_vm5, %v4877_v57, %v11576_v27  ;;  %5535 = vperm.xlu0 %8435, %v542_v39   ;;  %v5084_v53 = vsel %vm5076_vm10, %v5045_v30, %v4789_v16  ;;  %v4829_v61 = vsel %vm4820_vm11, %v4826_v54, %v13969_v32  ;;  %v547_v27 = vld [vmem:[%s13451_s2 + $0xcb] sm:$0xff]  ;;  %v13972_v39 = vmov 0.0  }
 0x6d3   : > { %v4949_v46 = vsel %vm1704_vm7, %v4913_v1, %v11587_v41  ;;  %5550 = vperm.xlu1 %8436, %v545_v20   ;;  %5313 = vmatmul.mubr.bf16.gmra.mrb[92].mxu0 %v5084_v53  ;;  %v13973_v30 = vld [vmem:[#allocation35_spill] sm:$0xff]  ;;  %v13975_v32 = vld [vmem:[#allocation36_spill] sm:$0xff] }
 0x6d4   : > { %v4565_v50 = vpop.permute.xlu0 %4564  ;;  %7788 = vmatprep.mubr.msk.bf16.mxu0 %vm1532_vm3, %v4829_v61  ;;  %v13974_v1 = vld [vmem:[#allocation19_spill] sm:$0xff] }
 0x6d5   : > { %v4985_v59 = vsel %vm1790_vm9, %v4949_v46, %v4565_v50  ;;  %v4296_v41 = vpop.permute.xlu1 %4295  ;;  %v4844_v53 = vrot.slane %v13974_v1, 3 }
 0x6d6   : > { %v5022_v40 = vsel %vm5002_vm6, %v4985_v59, %v11597_v56  ;;  %5545 = vperm.xlu0 %8435, %v544_v13   ;;  %v4865_v25 = vsel %vm1532_vm3, %v13960_v51, %v4296_v41  ;;  %v549_v51 = vld [vmem:[%s13451_s2 + $0xdb] sm:$0xff]  ;;  %v552_v13 = vld [vmem:[%s13451_s2 + $0xf3] sm:$0xff] }
 0x6d7   : > { %v4901_v54 = vsel %vm1618_vm5, %v4865_v25, %v11615_v11  ;;  %v5059_v31 = vsel %vm5039_vm8, %v5022_v40, %v11612_v48  ;;  %5560 = vperm.xlu1 %8436, %v547_v27   ;;  %v4843_v11 = vsel %vm4820_vm11, %v4840_v28, %v4842_v58  ;;  %v555_v27 = vld [vmem:[%s13451_s2 + $0x10b] sm:$0xff]  ;;  %v13976_v41 = vld [vmem:[#allocation38_spill] sm:$0xff] }
 0x6d8   : > { %v4803_v14 = vpop.permute.xlu0 %4802  ;;  %v4937_v56 = vsel %vm1704_vm7, %v4901_v54, %v11632_v60  ;;  %v548_v60 = vld [vmem:[%s13451_s2 + $0xd3] sm:$0xff]  ;;  %v554_v25 = vld [vmem:[%s13451_s2 + $0x103] sm:$0xff] }
 0x6d9   : > { %v5105_v17 = vsel %vm5076_vm10, %v5059_v31, %v4803_v14  ;;  %v4553_v7 = vpop.permute.xlu1 %4552 }
 0x6da   : > { %5555 = vperm.xlu0 %8435, %v546_v12   ;;  %5369 = vmatmul.mubr.bf16.gmra.mrb[24].mxu1 %v5105_v17  ;;  %v4973_v52 = vsel %vm1790_vm9, %v4937_v56, %v4553_v7  ;;  %v557_v12 = vld [vmem:[%s13451_s2 + $0x11b] sm:$0xff]  ;;  %v13977_v56 = vld [vmem:[#allocation20_spill] sm:$0xff] }
 0x6db   : > { %7795 = vmatprep.mubr.msk.bf16.mxu1 %vm1532_vm3, %v4843_v11  ;;  %v5010_v48 = vsel %vm5002_vm6, %v4973_v52, %v11642_v35  ;;  %5570 = vperm.xlu1 %8436, %v549_v51   ;;  %v4846_v51 = vrot.slane %v13977_v56, 3  ;;  %v556_v17 = vld [vmem:[%s13451_s2 + $0x113] sm:$0xff] }
 0x6dc   : > { %v4310_v55 = vpop.permute.xlu0 %4309  ;;  %v5047_v28 = vsel %vm5039_vm8, %v5010_v48, %v11653_v29  ;;  %v559_v48 = vld [vmem:[%s13451_s2 + $0x12b] sm:$0xff] }
 0x6dd   : > { %v4879_v63 = vsel %vm1532_vm3, %v13957_v24, %v4310_v55  ;;  %v4791_v10 = vpop.permute.xlu1 %4790  ;;  %v553_v24 = vld [vmem:[%s13451_s2 + $0xfb] sm:$0xff] }
 0x6de   : > { %v4915_v35 = vsel %vm1618_vm5, %v4879_v63, %v13970_v36  ;;  %5565 = vperm.xlu0 %8435, %v548_v60   ;;  %v5087_v42 = vsel %vm5076_vm10, %v5047_v28, %v4791_v10  ;;  %v558_v63 = vld [vmem:[%s13451_s2 + $0x123] sm:$0xff] }
 0x6df   : > { %v4951_v37 = vsel %vm1704_vm7, %v4915_v35, %v13971_v5  ;;  %5580 = vperm.xlu1 %8436, %v551_v8   ;;  %5321 = vmatmul.mubr.bf16.gmra.mrb[96].mxu0 %v5087_v42  ;;  %v4847_v8 = vsel %vm4820_vm11, %v4844_v53, %v4846_v51  ;;  %v13979_v42 = vld [vmem:[#allocation40_spill] sm:$0xff] }
 0x6e0   : > { %v4567_v29 = vpop.permute.xlu0 %4566  ;;  %8161 = vmatprep.mubr.msk.f32.mxu0 %vm8774_vm1, %v13972_v39 }
 0x6e1   : > { %v4987_v49 = vsel %vm1790_vm9, %v4951_v37, %v4567_v29  ;;  %v4312_v20 = vpop.permute.xlu1 %4311  ;;  %v13980_v37 = vld [vmem:[#allocation13_spill] sm:$0xff] }
 0x6e2   : > { %v5024_v57 = vsel %vm5002_vm6, %v4987_v49, %v13973_v30  ;;  %5575 = vperm.xlu0 %8435, %v550_v43   ;;  %v4881_v16 = vsel %vm1532_vm3, %v13965_v45, %v4312_v20  ;;  %v4848_v43 = vrot.slane %v13980_v37, 3 }
 0x6e3   : > { %v4917_v46 = vsel %vm1618_vm5, %v4881_v16, %v11676_v62  ;;  %v5061_v61 = vsel %vm5039_vm8, %v5024_v57, %v13975_v32  ;;  %5590 = vperm.xlu1 %8436, %v553_v24   ;;  %v4845_v62 = vsel %vm4820_vm11, %v4842_v58, %v4844_v53 }
 0x6e4   : > { %v4805_v50 = vpop.permute.xlu0 %4804  ;;  %v4953_v40 = vsel %vm1704_vm7, %v4917_v46, %v13976_v41 }
 0x6e5   : > { %v5108_v45 = vsel %vm5076_vm10, %v5061_v61, %v4805_v50  ;;  %v12037_v59 = vpop.permute.xlu1 %4414 }
 0x6e6   : > { %5585 = vperm.xlu0 %8435, %v552_v13   ;;  %5377 = vmatmul.mubr.bf16.gmra.mrb[28].mxu1 %v5108_v45 }
 0x6e7   : > { %7796 = vmatprep.mubr.msk.bf16.mxu1 %vm1532_vm3, %v4845_v62  ;;  %5600 = vperm.xlu1 %8436, %v555_v27  }
 0x6e8   : > { %v4569_v54 = vpop.permute.xlu0 %4568 }
 0x6e9   : > { %v4989_v31 = vsel %vm1790_vm9, %v4953_v40, %v4569_v54  ;;  %v4807_v14 = vpop.permute.xlu1 %4806 }
 0x6ea   : > { %v5026_v58 = vsel %vm5002_vm6, %v4989_v31, %v11679_v15  ;;  %5595 = vperm.xlu0 %8435, %v554_v25   ;;  %v13982_v31 = vld [vmem:[#allocation10_spill] sm:$0xff] }
 0x6eb   : > { %5610 = vperm.xlu1 %8436, %v557_v12   ;;  %v5063_v7 = vsel %vm5039_vm8, %v5026_v58, %v11685_v18  ;;  %v13978_v18 = vld [vmem:[#allocation37_spill] sm:$0xff] }
 0x6ec   : > { %v4314_v11 = vpop.permute.xlu0 %4313  ;;  %v5111_v52 = vsel %vm5076_vm10, %v5063_v7, %v4807_v14  ;;  %v13983_v14 = vrot.slane %v13982_v31, 3  ;;  %v13985_v7 = vld [vmem:[#allocation43_spill] sm:$0xff] }
 0x6ed   : > { %v4883_v15 = vsel %vm1532_vm3, %v11073_v22, %v4314_v11  ;;  %v4571_v60 = vpop.permute.xlu1 %4570 }
 0x6ee   : > { %v4919_v55 = vsel %vm1618_vm5, %v4883_v15, %v11688_v38  ;;  %5605 = vperm.xlu0 %8435, %v556_v17   ;;  %5385 = vmatmul.mubr.bf16.gmra.mrb[32].mxu1 %v5111_v52  ;;  %v13984_v17 = vld [vmem:[#allocation41_spill] sm:$0xff] }
 0x6ef   : > { %7797 = vmatprep.mubr.msk.bf16.mxu1 %vm1532_vm3, %v4847_v8  ;;  %v4955_v28 = vsel %vm1704_vm7, %v4919_v55, %v13978_v18  ;;  %5620 = vperm.xlu1 %8436, %v559_v48   ;;  %v13986_v55 = vld [vmem:[#allocation7_spill] sm:$0xff] }
 0x6f0   : > { %v4457_v10 = vpop.permute.xlu0 %4456  ;;  %v4991_v22 = vsel %vm1790_vm9, %v4955_v28, %v4571_v60 }
 0x6f1   : > { %v5028_v38 = vsel %vm5002_vm6, %v4991_v22, %v11706_v4  ;;  %v4316_v36 = vpop.permute.xlu1 %4315  ;;  %v4849_v4 = vsel %vm4820_vm11, %v4846_v51, %v4848_v43 }
 0x6f2   : > { %5615 = vperm.xlu0 %8435, %v558_v63   ;;  %v4885_v35 = vsel %vm1532_vm3, %v11075_v44, %v4316_v36  ;;  %v5065_v5 = vsel %vm5039_vm8, %v5028_v38, %v13979_v42 }
 0x6f3   : > { %v4921_v29 = vsel %vm1618_vm5, %v4885_v35, %v11714_v47  ;;  %v13981_v47 = vld [vmem:[#allocation14_spill] sm:$0xff] }
 0x6f4   : > { %v4809_v24 = vpop.permute.xlu0 %4808  ;;  %v4957_v30 = vsel %vm1704_vm7, %v4921_v29, %v11709_v6  ;;  %v4850_v46 = vrot.slane %v13981_v47, 3 }
 0x6f5   : > { %v5114_v49 = vsel %vm5076_vm10, %v5065_v5, %v4809_v24  ;;  %v4811_v20 = vpop.permute.xlu1 %4810 }
 0x6f6   : > { %5393 = vmatmul.mubr.bf16.gmra.mrb[36].mxu1 %v5114_v49  ;;  %v4851_v45 = vsel %vm4820_vm11, %v4848_v43, %v4850_v46  ;;  %v4853_v58 = vsel %vm4820_vm11, %v4850_v46, %v13983_v14 }
 0x6f7   : > { %7798 = vmatprep.mubr.msk.bf16.mxu1 %vm1532_vm3, %v4849_v4 }
 0x6f8   : > { %v4573_v44 = vpop.permute.xlu0 %4572 }
 0x6f9   : > { %v4993_v57 = vsel %vm1790_vm9, %v4957_v30, %v4573_v44  ;;  %v4695_v16 = vpop.permute.xlu1 %4694 }
 0x6fa   : > { %v5030_v53 = vsel %vm5002_vm6, %v4993_v57, %v11717_v0 }
 0x6fb   : > { %v5067_v13 = vsel %vm5039_vm8, %v5030_v53, %v11723_v2 }
 0x6fc   : > { %v4318_v32 = vpop.permute.xlu0 %4317  ;;  %v5117_v61 = vsel %vm5076_vm10, %v5067_v13, %v4811_v20 }
 0x6fd   : > { %v4887_v6 = vsel %vm1532_vm3, %v13974_v1, %v4318_v32  ;;  %v4575_v50 = vpop.permute.xlu1 %4574 }
 0x6fe   : > { %v4923_v27 = vsel %vm1618_vm5, %v4887_v6, %v11726_v9  ;;  %5401 = vmatmul.mubr.bf16.gmra.mrb[40].mxu1 %v5117_v61 }
 0x6ff   : > { %7799 = vmatprep.mubr.msk.bf16.mxu1 %vm1532_vm3, %v4851_v45  ;;  %v4959_v0 = vsel %vm1704_vm7, %v4923_v27, %v11732_v19 }
 0x700   : > { %v4653_v62 = vpop.permute.xlu0 %4652  ;;  %v4995_v2 = vsel %vm1790_vm9, %v4959_v0, %v4575_v50 }
 0x701   : > { %v5032_v41 = vsel %vm5002_vm6, %v4995_v2, %v11741_v33  ;;  %v4320_v40 = vpop.permute.xlu1 %4319 }
 0x702   : > { %v4889_v1 = vsel %vm1532_vm3, %v13977_v56, %v4320_v40  ;;  %v5069_v9 = vsel %vm5039_vm8, %v5032_v41, %v11735_v21 }
 0x703   : > { %v4925_v25 = vsel %vm1618_vm5, %v4889_v1, %v11751_v3 }
 0x704   : > { %v4813_v54 = vpop.permute.xlu0 %4812  ;;  %v4961_v33 = vsel %vm1704_vm7, %v4925_v25, %v11745_v26 }
 0x705   : > { %v5120_v12 = vsel %vm5076_vm10, %v5069_v9, %v4813_v54  ;;  %v4815_v19 = vpop.permute.xlu1 %4814 }
 0x706   : > { %5409 = vmatmul.mubr.bf16.gmra.mrb[44].mxu1 %v5120_v12 }
 0x707   : > { %7800 = vmatprep.mubr.msk.bf16.mxu1 %vm1532_vm3, %v4853_v58 }
 0x708   : > { %v4577_v56 = vpop.permute.xlu0 %4576 }
 0x709   : > { %v4997_v21 = vsel %vm1790_vm9, %v4961_v33, %v4577_v56  ;;  %v4459_v51 = vpop.permute.xlu1 %4458 }
 0x70a   : > { %v5034_v3 = vsel %vm5002_vm6, %v4997_v21, %v13984_v17 }
 0x70b   : > { %v5071_v11 = vsel %vm5039_vm8, %v5034_v3, %v13985_v7  ;;  %v12181_v3 = vld [vmem:[%s13457_s8] ss:$0 sm:$0xff] }
 0x70c   : > { %v4322_v52 = vpop.permute.xlu0 %4321  ;;  %v5123_v48 = vsel %vm5076_vm10, %v5071_v11, %v4815_v19 }
 0x70d   : > { %v4891_v15 = vsel %vm1532_vm3, %v13980_v37, %v4322_v52  ;;  %v4579_v60 = vpop.permute.xlu1 %4578  ;;  %v13987_v37 = vld [vmem:[#allocation8_spill] sm:$0xff] }
 0x70e   : > { %v4927_v26 = vsel %vm1618_vm5, %v4891_v15, %v12037_v59  ;;  %5417 = vmatmul.mubr.bf16.gmra.mrb[48].mxu1 %v5123_v48 }
 0x70f   : > { %7801 = vmatprep.mubr.msk.bf16.mxu1 %vm1532_vm3, %v13986_v55  ;;  %v4963_v8 = vsel %vm1704_vm7, %v4927_v26, %v4457_v10 }
 0x710   : > { %v4417_v18 = vpop.permute.xlu0 %4416  ;;  %v4999_v28 = vsel %vm1790_vm9, %v4963_v8, %v4579_v60 }
 0x711   : > { %v5036_v63 = vsel %vm5002_vm6, %v4999_v28, %v4653_v62  ;;  %v4324_v22 = vpop.permute.xlu1 %4323 }
 0x712   : > { %v4893_v38 = vsel %vm1532_vm3, %v13981_v47, %v4324_v22  ;;  %v5073_v36 = vsel %vm5039_vm8, %v5036_v63, %v4695_v16 }
 0x713   : > { %v4929_v35 = vsel %vm1618_vm5, %v4893_v38, %v4417_v18 }
 0x714   : > { %v4817_v59 = vpop.permute.xlu0 %4816  ;;  %v4965_v10 = vsel %vm1704_vm7, %v4929_v35, %v4459_v51 }
 0x715   : > { %v5126_v42 = vsel %vm5076_vm10, %v5073_v36, %v4817_v59  ;;  %v4655_v5 = vpop.permute.xlu1 %4654 }
 0x716   : > { %5425 = vmatmul.mubr.bf16.gmra.mrb[52].mxu1 %v5126_v42 }
 0x717   : > { %7802 = vmatprep.mubr.msk.bf16.mxu1 %vm1532_vm3, %v13987_v37 }
 0x718   : > { %v4581_v43 = vpop.permute.xlu0 %4580 }
 0x719   : > { %v5001_v29 = vsel %vm1790_vm9, %v4965_v10, %v4581_v43  ;;  %v4819_v24 = vpop.permute.xlu1 %4818 }
 0x71a   : > { %v5038_v49 = vsel %vm5002_vm6, %v5001_v29, %v4655_v5 }
 0x71c   : > { %v4697_v20 = vpop.permute.xlu0 %4696 }
 0x71d   : > { %v5075_v4 = vsel %vm5039_vm8, %v5038_v49, %v4697_v20 }
 0x71e   : > { %v5129_v30 = vsel %vm5076_vm10, %v5075_v4, %v4819_v24 }
 0x71f   : > { %5433 = vmatmul.mubr.bf16.gmra.mrb[56].mxu1 %v5129_v30 }
 0x72a   : > { %v12156_v6 = vpop.permute.xlu1 %5450 }
 0x72b   : > { %13989 = vst [vmem:[#allocation47_spill] sm:$0xff] %v12156_v6 }
 0x72d   : > { %v12152_v46 = vpop.permute.xlu0 %5445 }
 0x72e   : > { %13988 = vst [vmem:[#allocation44_spill] sm:$0xff] %v12152_v46  ;;  %v12164_v1 = vpop.permute.xlu1 %5460 }
 0x72f   : > { %13991 = vst [vmem:[#allocation51_spill] sm:$0xff] %v12164_v1 }
 0x731   : > { %v12158_v50 = vpop.permute.xlu0 %5455 }
 0x732   : > { %13990 = vst [vmem:[#allocation48_spill] sm:$0xff] %v12158_v50  ;;  %v12170_v12 = vpop.permute.xlu1 %5470 }
 0x733   : > { %13993 = vst [vmem:[#allocation55_spill] sm:$0xff] %v12170_v12 }
 0x735   : > { %v12166_v25 = vpop.permute.xlu0 %5465 }
 0x736   : > { %13992 = vst [vmem:[#allocation52_spill] sm:$0xff] %v12166_v25  ;;  %v12176_v17 = vpop.permute.xlu1 %5480 }
 0x737   : > { %13995 = vst [vmem:[#allocation42_spill] sm:$0xff] %v12176_v17 }
 0x739   : > { %v12174_v56 = vpop.permute.xlu0 %5475 }
 0x73a   : > { %13994 = vst [vmem:[#allocation39_spill] sm:$0xff] %v12174_v56  ;;  %v12200_v8 = vpop.permute.xlu1 %5490 }
 0x73b   : > { %13997 = vst [vmem:[#allocation53_spill] sm:$0xff] %v12200_v8 }
 0x73d   : > { %v12194_v15 = vpop.permute.xlu0 %5485 }
 0x73e   : > { %13996 = vst [vmem:[#allocation45_spill] sm:$0xff] %v12194_v15  ;;  %v12219_v24 = vpop.permute.xlu1 %5500 }
 0x73f   : > { %13999 = vst [vmem:[#allocation58_spill] sm:$0xff] %v12219_v24 }
 0x741   : > { %v12213_v42 = vpop.permute.xlu0 %5495 }
 0x742   : > { %13998 = vst [vmem:[#allocation56_spill] sm:$0xff] %v12213_v42 }
 0x77f   : > { %v12146_v44 = vpop.f32.mrb[4].mxu1 }
 0x780   : > { %v5332_v57 = vpop.f32.mrb[5].mxu1 }
 0x781   : > { %v12148_v16 = vpop.f32.mrb[6].mxu1 }
 0x782   : > { %v5335_v53 = vpop.f32.mrb[7].mxu1 }
 0x787   : > { %v12150_v47 = vpop.f32.mrb[8].mxu1 }
 0x788   : > { %v5340_v13 = vpop.f32.mrb[9].mxu1 }
 0x789   : > { %v12154_v32 = vpop.f32.mrb[10].mxu1  ;;  %v12229_v13 = vpop.permute.xlu0 %5505 }
 0x78a   : > { %v5343_v61 = vpop.f32.mrb[11].mxu1  ;;  %14000 = vst [vmem:[#allocation50_spill] sm:$0xff] %v12229_v13 }
 0x78e   : > { %v5298_v27 = vpop.f32.mrb[84].mxu0 }
 0x78f   : > { %v12160_v45 = vpop.f32.mrb[12].mxu1  ;;  %v5300_v0 = vpop.f32.mrb[85].mxu0  ;;  %v12187_v11 = vadd.f32 %v12181_v3, %v5298_v27 }
 0x790   : > { %v5348_v62 = vpop.f32.mrb[13].mxu1  ;;  %v5301_v2 = vpop.f32.mrb[86].mxu0 }
 0x791   : > { %v12162_v41 = vpop.f32.mrb[14].mxu1  ;;  %v5303_v40 = vpop.f32.mrb[87].mxu0  ;;  %v12184_v7 = vadd.f32 %v12181_v3, %v5301_v2  ;;  %v5623_v28 = vmul.f32 %v12152_v46, %v12187_v11 }
 0x792   : > { %v5351_v9 = vpop.f32.mrb[15].mxu1  ;;  %v12236_v2 = vpop.permute.xlu1 %5510 }
 0x793   : > { %v5624_v26 = vmul.f32 %v12156_v6, %v12184_v7  ;;  %v5659_v10 = vsel %vm1532_vm3, %v5623_v28, 0.0  ;;  %14001 = vst [vmem:[#allocation59_spill] sm:$0xff] %v12236_v2 }
 0x795   : > { %v5660_v36 = vsel %vm1532_vm3, %v5624_v26, 0.0 }
 0x796   : > { %v5661_v49 = vadd.f32 %v5660_v36, %v5659_v10 }
 0x797   : > { %v12168_v54 = vpop.f32.mrb[16].mxu1 }
 0x798   : > { %v5356_v19 = vpop.f32.mrb[17].mxu1 }
 0x799   : > { %v12172_v31 = vpop.f32.mrb[18].mxu1 }
 0x79a   : > { %v5359_v14 = vpop.f32.mrb[19].mxu1  ;;  %v5306_v58 = vpop.f32.mrb[88].mxu0 }
 0x79b   : > { %v5308_v33 = vpop.f32.mrb[89].mxu0  ;;  %v12190_v52 = vadd.f32 %v12181_v3, %v5306_v58  ;;  %v12240_v58 = vadd.f32 %v12181_v3, %v12146_v44 }
 0x79c   : > { %v5309_v21 = vpop.f32.mrb[90].mxu0 }
 0x79d   : > { %v5311_v51 = vpop.f32.mrb[91].mxu0  ;;  %v5625_v63 = vmul.f32 %v12158_v50, %v12190_v52  ;;  %v12207_v22 = vadd.f32 %v12181_v3, %v5309_v21 }
 0x79f   : > { %v5662_v37 = vsel %vm1532_vm3, %v5625_v63, 0.0  ;;  %v5626_v43 = vmul.f32 %v12164_v1, %v12207_v22 }
 0x7a0   : > { %v5663_v30 = vadd.f32 %v5662_v37, %v5661_v49 }
 0x7a1   : > { %v12192_v48 = vpop.f32.mrb[20].mxu1  ;;  %v5664_v57 = vsel %vm1532_vm3, %v5626_v43, 0.0 }
 0x7a2   : > { %v5364_v60 = vpop.f32.mrb[21].mxu1  ;;  %v5665_v40 = vadd.f32 %v5664_v57, %v5663_v30 }
 0x7a3   : > { %v12198_v55 = vpop.f32.mrb[22].mxu1  ;;  %v12246_v60 = vpop.permute.xlu0 %5515 }
 0x7a4   : > { %v5367_v18 = vpop.f32.mrb[23].mxu1  ;;  %14002 = vst [vmem:[#allocation57_spill] sm:$0xff] %v12246_v60 }
 0x7a5   : > { %v12250_v18 = vadd.f32 %v12181_v3, %v12148_v16 }
 0x7a6   : > { %v5314_v38 = vpop.f32.mrb[92].mxu0 }
 0x7a7   : > { %v12211_v35 = vadd.f32 %v12181_v3, %v5314_v38  ;;  %v5316_v59 = vpop.f32.mrb[93].mxu0  ;;  %v12257_v38 = vpop.permute.xlu1 %5520  ;;  %v5632_v43 = vmul.f32 %v12200_v8, %v12250_v18 }
 0x7a8   : > { %v5317_v5 = vpop.f32.mrb[94].mxu0  ;;  %14003 = vst [vmem:[#allocation54_spill] sm:$0xff] %v12257_v38  ;;  %v5631_v59 = vmul.f32 %v12194_v15, %v12240_v58  ;;  %v12275_v30 = vpop.permute.xlu0 %5525 }
 0x7a9   : > { %v5319_v29 = vpop.f32.mrb[95].mxu0  ;;  %v5627_v20 = vmul.f32 %v12166_v25, %v12211_v35  ;;  %v12224_v4 = vadd.f32 %v12181_v3, %v5317_v5  ;;  %v12263_v5 = vadd.f32 %v12181_v3, %v12150_v47  ;;  %14004 = vst [vmem:[#allocation6_spill] sm:$0xff] %v12275_v30 }
 0x7aa   : > { %v12272_v29 = vadd.f32 %v12181_v3, %v12154_v32 }
 0x7ab   : > { %v5666_v27 = vsel %vm1532_vm3, %v5627_v20, 0.0  ;;  %v5628_v0 = vmul.f32 %v12170_v12, %v12224_v4 }
 0x7ac   : > { %v5667_v19 = vadd.f32 %v5666_v27, %v5665_v40  ;;  %v5633_v27 = vmul.f32 %v12213_v42, %v12263_v5 }
 0x7ad   : > { %v12227_v53 = vpop.f32.mrb[24].mxu1  ;;  %v5668_v33 = vsel %vm1532_vm3, %v5628_v0, 0.0  ;;  %v12282_v0 = vadd.f32 %v12181_v3, %v12160_v45 }
 0x7ae   : > { %v5372_v61 = vpop.f32.mrb[25].mxu1  ;;  %v5669_v36 = vadd.f32 %v5668_v33, %v5667_v19  ;;  %v5634_v33 = vmul.f32 %v12219_v24, %v12272_v29 }
 0x7af   : > { %v12234_v62 = vpop.f32.mrb[26].mxu1  ;;  %v5674_v61 = vsel %vm1532_vm3, %v5631_v59, 0.0  ;;  %v5635_v45 = vmul.f32 %v12229_v13, %v12282_v0 }
 0x7b0   : > { %v5375_v9 = vpop.f32.mrb[27].mxu1 }
 0x7b1   : > { %v12284_v9 = vpop.permute.xlu1 %5530 }
 0x7b2   : > { %v5322_v14 = vpop.f32.mrb[96].mxu0  ;;  %14005 = vst [vmem:[#allocation63_spill] sm:$0xff] %v12284_v9 }
 0x7b3   : > { %v12244_v21 = vadd.f32 %v12181_v3, %v5322_v14  ;;  %v5324_v51 = vpop.f32.mrb[97].mxu0  ;;  %v5676_v14 = vsel %vm1532_vm3, %v5632_v43, 0.0 }
 0x7b4   : > { %v5325_v26 = vpop.f32.mrb[98].mxu0  ;;  %v12291_v51 = vadd.f32 %v12181_v3, %v12162_v41  ;;  %v12307_v41 = vadd.f32 %v12181_v3, %v12172_v31 }
 0x7b5   : > { %v5629_v28 = vmul.f32 %v12174_v56, %v12244_v21  ;;  %v12255_v63 = vadd.f32 %v12181_v3, %v5325_v26  ;;  %v5327_v44 = vpop.f32.mrb[99].mxu0  ;;  %v12309_v43 = vpop.permute.xlu1 %5540 }
 0x7b6   : > { %v12298_v44 = vadd.f32 %v12181_v3, %v12168_v54  ;;  %14007 = vst [vmem:[#allocation9_spill] sm:$0xff] %v12309_v43  ;;  %v5682_v54 = vsel %vm1532_vm3, %v5635_v45, 0.0 }
 0x7b7   : > { %v5670_v16 = vsel %vm1532_vm3, %v5629_v28, 0.0  ;;  %v5630_v10 = vmul.f32 %v12176_v17, %v12255_v63  ;;  %v5678_v28 = vsel %vm1532_vm3, %v5633_v27, 0.0 }
 0x7b8   : > { %v5671_v37 = vadd.f32 %v5670_v16, %v5669_v36  ;;  %v12300_v36 = vpop.permute.xlu0 %5535  ;;  %v5680_v16 = vsel %vm1532_vm3, %v5634_v33, 0.0  ;;  %v12323_v33 = vadd.f32 %v12181_v3, %v12198_v55 }
 0x7b9   : > { %v5672_v49 = vsel %vm1532_vm3, %v5630_v10, 0.0  ;;  %v5378_v20 = vpop.f32.mrb[28].mxu1  ;;  %14006 = vst [vmem:[#allocation3_spill] sm:$0xff] %v12300_v36  ;;  %v5636_v10 = vmul.f32 %v12236_v2, %v12291_v51 }
 0x7ba   : > { %v5673_v47 = vadd.f32 %v5672_v49, %v5671_v37  ;;  %v5380_v57 = vpop.f32.mrb[29].mxu1  ;;  %v5640_v55 = vmul.f32 %v12284_v9, %v12323_v33 }
 0x7bb   : > { %v5381_v40 = vpop.f32.mrb[30].mxu1  ;;  %v5637_v57 = vmul.f32 %v12246_v60, %v12298_v44  ;;  %v5684_v31 = vsel %vm1532_vm3, %v5636_v10, 0.0 }
 0x7bc   : > { %v5675_v32 = vadd.f32 %v5674_v61, %v5673_v47  ;;  %v5383_v19 = vpop.f32.mrb[31].mxu1  ;;  %v12316_v61 = vadd.f32 %v12181_v3, %v12192_v48 }
 0x7bd   : > { %v5686_v45 = vsel %vm1532_vm3, %v5637_v57, 0.0 }
 0x7be   : > { %v5677_v26 = vadd.f32 %v5676_v14, %v5675_v32  ;;  %v5638_v14 = vmul.f32 %v12257_v38, %v12307_v41  ;;  %v5639_v48 = vmul.f32 %v12275_v30, %v12316_v61  ;;  %v5692_v30 = vsel %vm1532_vm3, %v5640_v55, 0.0 }
 0x7c0   : > { %v5679_v59 = vadd.f32 %v5678_v28, %v5677_v26  ;;  %v12325_v26 = vpop.permute.xlu0 %5545 }
 0x7c1   : > { %v5386_v37 = vpop.f32.mrb[32].mxu1  ;;  %14008 = vst [vmem:[#allocation12_spill] sm:$0xff] %v12325_v26 }
 0x7c2   : > { %v5681_v49 = vadd.f32 %v5680_v16, %v5679_v59  ;;  %v5388_v47 = vpop.f32.mrb[33].mxu1  ;;  %v12332_v59 = vadd.f32 %v12181_v3, %v12227_v53  ;;  %v12334_v16 = vpop.permute.xlu1 %5550 }
 0x7c3   : > { %v5389_v27 = vpop.f32.mrb[34].mxu1  ;;  %14009 = vst [vmem:[#allocation2_spill] sm:$0xff] %v12334_v16  ;;  %v12341_v47 = vadd.f32 %v12181_v3, %v12234_v62 }
 0x7c4   : > { %v5683_v32 = vadd.f32 %v5682_v54, %v5681_v49  ;;  %v5391_v19 = vpop.f32.mrb[35].mxu1  ;;  %v5688_v49 = vsel %vm1532_vm3, %v5638_v14, 0.0  ;;  %v5641_v53 = vmul.f32 %v12300_v36, %v12332_v59  ;;  %v12349_v14 = vpop.permute.xlu0 %5555  ;;  %v12363_v36 = vadd.f32 %v12181_v3, %v5386_v37 }
 0x7c5   : > { %v5690_v19 = vsel %vm1532_vm3, %v5639_v48, 0.0  ;;  %14010 = vst [vmem:[#allocation49_spill] sm:$0xff] %v12349_v14  ;;  %v5642_v62 = vmul.f32 %v12309_v43, %v12341_v47 }
 0x7c6   : > { %v5685_v28 = vadd.f32 %v5684_v31, %v5683_v32  ;;  %v12347_v31 = vadd.f32 %v12181_v3, %v5378_v20  ;;  %v12357_v48 = vpop.permute.xlu1 %5560  ;;  %v5645_v37 = vmul.f32 %v12349_v14, %v12363_v36 }
 0x7c7   : > { %14012 = vst [vmem:[#allocation5_spill] sm:$0xff] %v12357_v48  ;;  %v5696_v55 = vsel %vm1532_vm3, %v5642_v62, 0.0 }
 0x7c8   : > { %v5687_v10 = vadd.f32 %v5686_v45, %v5685_v28  ;;  %v5643_v20 = vmul.f32 %v12325_v26, %v12347_v31  ;;  %v12371_v43 = vpop.permute.xlu0 %5565 }
 0x7c9   : > { %v5394_v54 = vpop.f32.mrb[36].mxu1  ;;  %14013 = vst [vmem:[#allocation66_spill] sm:$0xff] %v12371_v43 }
 0x7ca   : > { %v5689_v57 = vadd.f32 %v5688_v49, %v5687_v10  ;;  %v5396_v32 = vpop.f32.mrb[37].mxu1  ;;  %v12355_v10 = vadd.f32 %v12181_v3, %v5381_v40  ;;  %v12369_v40 = vadd.f32 %v12181_v3, %v5389_v27 }
 0x7cb   : > { %v5397_v28 = vpop.f32.mrb[38].mxu1  ;;  %v5694_v32 = vsel %vm1532_vm3, %v5641_v53, 0.0 }
 0x7cc   : > { %v5691_v45 = vadd.f32 %v5690_v19, %v5689_v57  ;;  %v5399_v9 = vpop.f32.mrb[39].mxu1  ;;  %14011 = vst [vmem:[#allocation4_spill] sm:$0xff] %v12355_v10  ;;  %v5644_v57 = vmul.f32 %v12334_v16, %v12355_v10  ;;  %v5646_v10 = vmul.f32 %v12357_v48, %v12369_v40  ;;  %v12393_v14 = vpop.permute.xlu0 %5575 }
 0x7cd   : > { %14017 = vst [vmem:[#allocation22_spill] sm:$0xff] %v12393_v14 }
 0x7ce   : > { %v5693_v49 = vadd.f32 %v5692_v30, %v5691_v45  ;;  %v5698_v45 = vsel %vm1532_vm3, %v5643_v20, 0.0  ;;  %v5700_v27 = vsel %vm1532_vm3, %v5644_v57, 0.0  ;;  %v5704_v57 = vsel %vm1532_vm3, %v5646_v10, 0.0 }
 0x7d0   : > { %v5695_v9 = vadd.f32 %v5694_v32, %v5693_v49  ;;  %v12377_v49 = vadd.f32 %v12181_v3, %v5394_v54  ;;  %v12379_v32 = vpop.permute.xlu1 %5570 }
 0x7d1   : > { %v5402_v19 = vpop.f32.mrb[40].mxu1  ;;  %14014 = vst [vmem:[#allocation46_spill] sm:$0xff] %v12379_v32 }
 0x7d2   : > { %v5697_v30 = vadd.f32 %v5696_v55, %v5695_v9  ;;  %v5404_v53 = vpop.f32.mrb[41].mxu1  ;;  %v12385_v9 = vadd.f32 %v12181_v3, %v5397_v28  ;;  %v5702_v55 = vsel %vm1532_vm3, %v5645_v37, 0.0  ;;  %v5647_v54 = vmul.f32 %v12371_v43, %v12377_v49 }
 0x7d3   : > { %v5405_v62 = vpop.f32.mrb[42].mxu1  ;;  %v12391_v53 = vadd.f32 %v12181_v3, %v5402_v19 }
 0x7d4   : > { %v5699_v16 = vadd.f32 %v5698_v45, %v5697_v30  ;;  %v5407_v26 = vpop.f32.mrb[43].mxu1  ;;  %14015 = vst [vmem:[#allocation21_spill] sm:$0xff] %v12385_v9  ;;  %v5648_v30 = vmul.f32 %v12379_v32, %v12385_v9  ;;  %v12399_v28 = vadd.f32 %v12181_v3, %v5405_v62  ;;  %v12401_v45 = vpop.permute.xlu1 %5580  ;;  %v5706_v43 = vsel %vm1532_vm3, %v5647_v54, 0.0 }
 0x7d5   : > { %14016 = vst [vmem:[#allocation64_spill] sm:$0xff] %v12391_v53  ;;  %14019 = vst [vmem:[#allocation28_spill] sm:$0xff] %v12401_v45  ;;  %v5649_v19 = vmul.f32 %v12393_v14, %v12391_v53  ;;  %v14035_v53 = vld [vmem:[#allocation16_spill] sm:$0xff] }
 0x7d6   : > { %v5701_v20 = vadd.f32 %v5700_v27, %v5699_v16  ;;  %14018 = vst [vmem:[#allocation27_spill] sm:$0xff] %v12399_v28  ;;  %v5708_v32 = vsel %vm1532_vm3, %v5648_v30, 0.0  ;;  %v5650_v62 = vmul.f32 %v12401_v45, %v12399_v28 }
 0x7d8   : > { %v5703_v26 = vadd.f32 %v5702_v55, %v5701_v20 }
 0x7d9   : > { %v5410_v16 = vpop.f32.mrb[44].mxu1 }
 0x7da   : > { %v5705_v37 = vadd.f32 %v5704_v57, %v5703_v26  ;;  %v5412_v27 = vpop.f32.mrb[45].mxu1  ;;  %v12407_v20 = vadd.f32 %v12181_v3, %v5410_v16  ;;  %v12415_v26 = vpop.permute.xlu0 %5585  ;;  %v5710_v57 = vsel %vm1532_vm3, %v5649_v19, 0.0 }
 0x7db   : > { %v5413_v10 = vpop.f32.mrb[46].mxu1  ;;  %14022 = vst [vmem:[#allocation24_spill] sm:$0xff] %v12415_v26  ;;  %v12420_v27 = vpop.permute.xlu1 %5590 }
 0x7dc   : > { %14020 = vst [vmem:[#allocation25_spill] sm:$0xff] %v12407_v20  ;;  %v5707_v55 = vadd.f32 %v5706_v43, %v5705_v37  ;;  %v5415_v48 = vpop.f32.mrb[47].mxu1  ;;  %v12413_v9 = vadd.f32 %v12181_v3, %v5413_v10  ;;  %v5651_v16 = vmul.f32 %v12415_v26, %v12407_v20  ;;  %14023 = vst [vmem:[#allocation15_spill] sm:$0xff] %v12420_v27 }
 0x7dd   : > { %v5712_v48 = vsel %vm1532_vm3, %v5650_v62, 0.0 }
 0x7de   : > { %14021 = vst [vmem:[#allocation30_spill] sm:$0xff] %v12413_v9  ;;  %v5709_v54 = vadd.f32 %v5708_v32, %v5707_v55  ;;  %v5652_v30 = vmul.f32 %v12420_v27, %v12413_v9  ;;  %v5714_v32 = vsel %vm1532_vm3, %v5651_v16, 0.0  ;;  %v12429_v55 = vpop.permute.xlu0 %5595 }
 0x7df   : > { %14025 = vst [vmem:[#allocation29_spill] sm:$0xff] %v12429_v55 }
 0x7e0   : > { %v5711_v43 = vadd.f32 %v5710_v57, %v5709_v54  ;;  %v5716_v54 = vsel %vm1532_vm3, %v5652_v30, 0.0 }
 0x7e1   : > { %v5418_v37 = vpop.f32.mrb[48].mxu1 }
 0x7e2   : > { %v5713_v45 = vadd.f32 %v5712_v48, %v5711_v43  ;;  %v12426_v10 = vadd.f32 %v12181_v3, %v5418_v37  ;;  %v5420_v14 = vpop.f32.mrb[49].mxu1  ;;  %v12437_v48 = vpop.permute.xlu1 %5600 }
 0x7e3   : > { %v5421_v19 = vpop.f32.mrb[50].mxu1  ;;  %14027 = vst [vmem:[#allocation11_spill] sm:$0xff] %v12437_v48  ;;  %v12445_v30 = vpop.permute.xlu0 %5605 }
 0x7e4   : > { %14024 = vst [vmem:[#allocation26_spill] sm:$0xff] %v12426_v10  ;;  %v5715_v26 = vadd.f32 %v5714_v32, %v5713_v45  ;;  %v5423_v20 = vpop.f32.mrb[51].mxu1  ;;  %v5653_v62 = vmul.f32 %v12429_v55, %v12426_v10  ;;  %v12435_v57 = vadd.f32 %v12181_v3, %v5421_v19  ;;  %14029 = vst [vmem:[#allocation17_spill] sm:$0xff] %v12445_v30 }
 0x7e6   : > { %14026 = vst [vmem:[#allocation62_spill] sm:$0xff] %v12435_v57  ;;  %v5717_v43 = vadd.f32 %v5716_v54, %v5715_v26  ;;  %v5718_v14 = vsel %vm1532_vm3, %v5653_v62, 0.0  ;;  %v5654_v16 = vmul.f32 %v12437_v48, %v12435_v57  ;;  %v12453_v55 = vpop.permute.xlu1 %5610 }
 0x7e7   : > { %14031 = vst [vmem:[#allocation61_spill] sm:$0xff] %v12453_v55 }
 0x7e8   : > { %v5719_v27 = vadd.f32 %v5718_v14, %v5717_v43  ;;  %v5720_v62 = vsel %vm1532_vm3, %v5654_v16, 0.0 }
 0x7e9   : > { %v5426_v37 = vpop.f32.mrb[52].mxu1 }
 0x7ea   : > { %v12443_v45 = vadd.f32 %v12181_v3, %v5426_v37  ;;  %v5428_v20 = vpop.f32.mrb[53].mxu1  ;;  %v5721_v48 = vadd.f32 %v5720_v62, %v5719_v27  ;;  %v12469_v62 = vpop.permute.xlu1 %5620 }
 0x7eb   : > { %v5429_v32 = vpop.f32.mrb[54].mxu1  ;;  %14034 = vst [vmem:[#allocation32_spill] sm:$0xff] %v12469_v62 }
 0x7ec   : > { %14028 = vst [vmem:[#allocation65_spill] sm:$0xff] %v12443_v45  ;;  %v5655_v19 = vmul.f32 %v12445_v30, %v12443_v45  ;;  %v12450_v26 = vadd.f32 %v12181_v3, %v5429_v32  ;;  %v5431_v54 = vpop.f32.mrb[55].mxu1  ;;  %v12462_v45 = vpop.permute.xlu0 %5615 }
 0x7ed   : > { %14033 = vst [vmem:[#allocation34_spill] sm:$0xff] %v12462_v45 }
 0x7ee   : > { %14030 = vst [vmem:[#allocation31_spill] sm:$0xff] %v12450_v26  ;;  %v5722_v43 = vsel %vm1532_vm3, %v5655_v19, 0.0  ;;  %v5656_v14 = vmul.f32 %v12453_v55, %v12450_v26 }
 0x7ef   : > { %v5723_v37 = vadd.f32 %v5722_v43, %v5721_v48 }
 0x7f0   : > { %v5724_v57 = vsel %vm1532_vm3, %v5656_v14, 0.0 }
 0x7f1   : > { %v5725_v48 = vadd.f32 %v5724_v57, %v5723_v37 }
 0x7f2   : > { %v5434_v20 = vpop.f32.mrb[56].mxu1 }
 0x7f3   : > { %v12460_v30 = vadd.f32 %v12181_v3, %v5434_v20  ;;  %v5436_v32 = vpop.f32.mrb[57].mxu1 }
 0x7f4   : > { %v5437_v54 = vpop.f32.mrb[58].mxu1 }
 0x7f5   : > { %14032 = vst [vmem:[#allocation33_spill] sm:$0xff] %v12460_v30  ;;  %v5657_v16 = vmul.f32 %v12462_v45, %v12460_v30  ;;  %v12467_v27 = vadd.f32 %v12181_v3, %v5437_v54  ;;  %v5439_v19 = vpop.f32.mrb[59].mxu1 }
 0x7f7   : > { %v5726_v43 = vsel %vm1532_vm3, %v5657_v16, 0.0  ;;  %v5658_v14 = vmul.f32 %v12469_v62, %v12467_v27 }
 0x7f8   : > { %v5727_v20 = vadd.f32 %v5726_v43, %v5725_v48  ;;  %v14038_v48 = vld [vmem:[#allocation60_spill] sm:$0xff] }
 0x7f9   : > { %v5728_v32 = vsel %vm1532_vm3, %v5658_v14, 0.0 }
 0x7fa   : > { %v5729_v55 = vadd.f32 %v5728_v32, %v5727_v20 }
 0x7fc   : > { %v5730_v26 = vrot.slane %v5729_v55, 4 }
 0x7fe   : > { %v5731_v10 = vadd.f32 %v5730_v26, %v5729_v55  ;;  %v14036_v55 = vld [vmem:[#allocation18_spill] sm:$0xff] }
 0x800   : > { %v5732_v9 = vrot.slane %v5731_v10, 2 }
 0x802   : > { %v5733_v45 = vadd.f32 %v5732_v9, %v5731_v10  ;;  %v14037_v9 = vld [vmem:[#allocation23_spill] sm:$0xff] }
 0x804   : > { %v5734_v30 = vrot.slane %v5733_v45, 1 }
 0x806   : > { %v5735_v3 = vadd.f32 %v5734_v30, %v5733_v45 }
 0x808   : > { %v5737_v54 = vsel %vm1532_vm3, %v5735_v3, 0 }
 0x809   : > { %v5806_v19 = vand.u32 4294901760, %v5737_v54 }
 0x80b   : > { %v5807_v28 = vsub.f32 %v5737_v54, %v5806_v19 }
 0x80d   : > { %v5808_v57 = vand.u32 4294901760, %v5807_v28 }
 0x80f   : > { %v5809_v37 = vsub.f32 %v5807_v28, %v5808_v57 }
 0x811   : > { %v5810_v16 = vand.u32 4294901760, %v5809_v37 }
 0x813   : > { %8162 = vmatmul.mubr.f32.vlgmr.msra.gmra.mrb[100].mxu0 %v5810_v16 }
 0x814   : > { %8320 = vmatpush3.bf16.msra.mxu0 %v14035_v53  ;;  %8168 = vmatprep.mubr.msk.f32.mxu0 %vm8774_vm1, %v13972_v39 }
 0x815   : > { %8321 = vmatprep.subr.bf16.mxu0 %v13964_v23 }
 0x81b   : > { %8169 = vmatmul.mubr.f32.vlgmr.msra.gmra.mrb[100].mxu0 %v5806_v19 }
 0x81c   : > { %8323 = vmatpush3.bf16.msra.mxu0 %v14036_v55  ;;  %8175 = vmatprep.mubr.msk.f32.mxu0 %vm8774_vm1, %v13972_v39 }
 0x81d   : > { %8324 = vmatprep.subr.bf16.mxu0 %v13964_v23 }
 0x823   : > { %8176 = vmatmul.mubr.f32.vlgmr.msra.gmra.mrb[100].mxu0 %v5807_v28  ;;  %v7283_v28 = vld [vmem:[%s13461_s12] sm:$0xf] }
 0x824   : > { %8326 = vmatpush3.bf16.msra.mxu0 %v13962_v34  ;;  %8182 = vmatprep.mubr.msk.f32.mxu0 %vm8774_vm1, %v13972_v39  ;;  %v7346_v10 = vsel %vm1919_vm0, %v7283_v28, 0 }
 0x825   : > { %8327 = vmatprep.subr.bf16.mxu0 %v13964_v23  ;;  %8409 = vmatprep.subr.msk.bf16.mxu1 %vm1919_vm0, %v7283_v28  ;;  %v7229_v28 = vld [vmem:[%s8883_s22 + $0x26] sm:$0xff] }
 0x826   : > { %8242 = vmatpush3.bf16.msra.mxu1 %v7346_v10  ;;  %v7231_v10 = vld [vmem:[%s8883_s22 + $0x36] sm:$0xff] }
 0x82b   : > { %8183 = vmatmul.mubr.f32.vlgmr.msra.gmra.mrb[100].mxu0 %v5808_v57 }
 0x82c   : > { %8329 = vmatpush3.bf16.msra.mxu0 %v14037_v9  ;;  %8189 = vmatprep.mubr.msk.f32.mxu0 %vm8774_vm1, %v13972_v39 }
 0x82d   : > { %8330 = vmatprep.subr.bf16.mxu0 %v13964_v23 }
 0x833   : > { %8190 = vmatmul.mubr.f32.vlgmr.msra.gmra.mrb[100].mxu0 %v5806_v19 }
 0x834   : > { %8332 = vmatpush3.bf16.msra.mxu0 %v13962_v34  ;;  %8196 = vmatprep.mubr.msk.f32.mxu0 %vm8774_vm1, %v13972_v39 }
 0x835   : > { %8333 = vmatprep.subr.bf16.mxu0 %v13964_v23 }
 0x83b   : > { %8197 = vmatmul.mubr.f32.vlgmr.msra.gmra.mrb[100].mxu0 %v5806_v19 }
 0x83c   : > { %8335 = vmatpush3.bf16.msra.mxu0 %v13962_v34  ;;  %8203 = vmatprep.mubr.msk.f32.mxu0 %vm8774_vm1, %v13972_v39 }
 0x83d   : > { %8336 = vmatprep.subr.bf16.mxu0 %v13964_v23 }
 0x90e   : > { %v6194_v45 = vpop.f32.mrb[100].mxu0 }
 0x90f   : > { %v8198_v30 = vpop.f32.mrb[101].mxu0  ;;  %v6198_v26 = vmul.f32 0.001953125, %v6194_v45 }
 0x911   : > { %v12506_v43 = vrot.slane %v6198_v26, %v14038_v48 }
 0x913   : > { %v12510_v14 = vsub.f32 %v12187_v11, %v12506_v43  ;;  %v12514_v20 = vsub.f32 %v12184_v7, %v12506_v43  ;;  %v12518_v32 = vsub.f32 %v12190_v52, %v12506_v43  ;;  %v12526_v19 = vsub.f32 %v12207_v22, %v12506_v43 }
 0x914   : > { %v12530_v7 = vsub.f32 %v12211_v35, %v12506_v43  ;;  %v12536_v37 = vsub.f32 %v12224_v4, %v12506_v43  ;;  %v12542_v22 = vsub.f32 %v12244_v21, %v12506_v43  ;;  %v7230_v35 = vld [vmem:[%s8883_s22 + $0x2e] sm:$0xff]  ;;  %v7232_v4 = vld [vmem:[%s8883_s22 + $0x3e] sm:$0xff] }
 0x915   : > { %14039 = vst [vmem:[#allocation35_spill] sm:$0xff] %v12518_v32  ;;  %v6239_v3 = vmul.f32 %v12510_v14, %v12152_v46  ;;  %v6240_v54 = vmul.f32 %v12514_v20, %v12156_v6  ;;  %14040 = vst [vmem:[#allocation19_spill] sm:$0xff] %v12526_v19  ;;  %v6241_v11 = vmul.f32 %v12518_v32, %v12158_v50  ;;  %v7234_v50 = vld [vmem:[%s8883_s22 + $0x4e] sm:$0xff] }
 0x916   : > { %14041 = vst [vmem:[#allocation36_spill] sm:$0xff] %v12530_v7  ;;  %v6242_v16 = vmul.f32 %v12526_v19, %v12164_v1  ;;  %v6243_v45 = vmul.f32 %v12530_v7, %v12166_v25  ;;  %v12556_v1 = vsub.f32 %v12255_v63, %v12506_v43  ;;  %v6244_v21 = vmul.f32 %v12536_v37, %v12170_v12 }
 0x917   : > { %v6275_v52 = vmul.f32 %v6239_v3, %v6239_v3  ;;  %v6276_v57 = vmul.f32 %v6240_v54, %v6240_v54  ;;  %v6277_v30 = vmul.f32 %v6241_v11, %v6241_v11  ;;  %v7233_v54 = vld [vmem:[%s8883_s22 + $0x46] sm:$0xff]  ;;  %v7265_v19 = vpack.c.bf16 %v7230_v35, %v7229_v28 }
 0x918   : > { %v6278_v6 = vmul.f32 %v6242_v16, %v6242_v16  ;;  %v7266_v25 = vpack.c.bf16 %v7232_v4, %v7231_v10  ;;  %v7267_v11 = vpack.c.bf16 %v7234_v50, %v7233_v54  ;;  %v6279_v7 = vmul.f32 %v6243_v45, %v6243_v45  ;;  %v7235_v10 = vld [vmem:[%s8883_s22 + $0x56] sm:$0xff] }
 0x919   : > { %v6311_v26 = vsel %vm1532_vm3, %v6275_v52, 0.0  ;;  %v6312_v3 = vsel %vm1532_vm3, %v6276_v57, 0.0  ;;  %v12562_v52 = vsub.f32 %v12240_v58, %v12506_v43  ;;  %v6245_v57 = vmul.f32 %v12542_v22, %v12174_v56  ;;  %8243 = vmatprep.mubr.msk.bf16.mxu1 %vm1468_vm2, %v7265_v19 }
 0x91a   : > { %v6313_v46 = vadd.f32 %v6312_v3, %v6311_v26  ;;  %v6314_v63 = vsel %vm1532_vm3, %v6277_v30, 0.0  ;;  %v12570_v16 = vsub.f32 %v12250_v18, %v12506_v43  ;;  %v6246_v50 = vmul.f32 %v12556_v1, %v12176_v17  ;;  %8244 = vmatmul.mubr.msk.bf16.vlgmr.msra.gmra.mrb[60].mxu1 %vm1468_vm2, %v7266_v25  ;;  %v7237_v26 = vld [vmem:[%s8883_s22 + $0x66] sm:$0xff]  ;;  %v7238_v3 = vld [vmem:[%s8883_s22 + $0x6e] sm:$0xff] }
 0x91b   : > { %v6280_v58 = vmul.f32 %v6244_v21, %v6244_v21  ;;  %v6316_v28 = vsel %vm1532_vm3, %v6278_v6, 0.0  ;;  %8247 = vmatprep.mubr.msk.bf16.mxu1 %vm1468_vm2, %v7267_v11  ;;  %v12581_v19 = vsub.f32 %v12263_v5, %v12506_v43  ;;  %v6247_v18 = vmul.f32 %v12562_v52, %v12194_v15 }
 0x91c   : > { %v6315_v32 = vadd.f32 %v6314_v63, %v6313_v46  ;;  %v7236_v46 = vld [vmem:[%s8883_s22 + $0x5e] sm:$0xff]  ;;  %v6281_v45 = vmul.f32 %v6245_v57, %v6245_v57  ;;  %v6318_v30 = vsel %vm1532_vm3, %v6279_v7, 0.0  ;;  %v12590_v6 = vsub.f32 %v12272_v29, %v12506_v43 }
 0x91d   : > { %v6282_v4 = vmul.f32 %v6246_v50, %v6246_v50  ;;  %v6320_v5 = vsel %vm1532_vm3, %v6280_v58, 0.0  ;;  %v7268_v54 = vpack.c.bf16 %v7236_v46, %v7235_v10  ;;  %v7269_v11 = vpack.c.bf16 %v7238_v3, %v7237_v26  ;;  %v7239_v46 = vld [vmem:[%s8883_s22 + $0x76] sm:$0xff]  ;;  %v7241_v3 = vld [vmem:[%s8883_s22 + $0x86] sm:$0xff] }
 0x91e   : > { %v6317_v35 = vadd.f32 %v6316_v28, %v6315_v32  ;;  %v6248_v32 = vmul.f32 %v12570_v16, %v12200_v8  ;;  %v12597_v7 = vsub.f32 %v12282_v0, %v12506_v43  ;;  %v6249_v29 = vmul.f32 %v12581_v19, %v12213_v42  ;;  %v14070_v8 = vld [vmem:[#allocation29_spill] sm:$0xff] }
 0x91f   : > { %v6283_v57 = vmul.f32 %v6247_v18, %v6247_v18  ;;  %v6322_v63 = vsel %vm1532_vm3, %v6281_v45, 0.0  ;;  %v12604_v58 = vsub.f32 %v12291_v51, %v12506_v43  ;;  %v6250_v28 = vmul.f32 %v12590_v6, %v12219_v24  ;;  %v7240_v18 = vld [vmem:[%s8883_s22 + $0x7e] sm:$0xff] }
 0x920   : > { %v6319_v25 = vadd.f32 %v6318_v30, %v6317_v35  ;;  %v6284_v35 = vmul.f32 %v6248_v32, %v6248_v32  ;;  %v6324_v0 = vsel %vm1532_vm3, %v6282_v4, 0.0  ;;  %v12615_v45 = vsub.f32 %v12298_v44, %v12506_v43 }
 0x921   : > { %v6251_v51 = vmul.f32 %v12597_v7, %v12229_v13  ;;  %v6285_v30 = vmul.f32 %v6249_v29, %v6249_v29  ;;  %v6326_v26 = vsel %vm1532_vm3, %v6283_v57, 0.0  ;;  %v12624_v32 = vsub.f32 %v12307_v41, %v12506_v43 }
 0x922   : > { %v6321_v21 = vadd.f32 %v6320_v5, %v6319_v25  ;;  %8248 = vmatmul.mubr.msk.bf16.gmra.mrb[64].mxu1 %vm1468_vm2, %v7268_v54  ;;  %v7242_v25 = vld [vmem:[%s8883_s22 + $0x8e] sm:$0xff]  ;;  %v6252_v5 = vmul.f32 %v12604_v58, %v12236_v2  ;;  %v6286_v54 = vmul.f32 %v6250_v28, %v6250_v28  ;;  %v6328_v44 = vsel %vm1532_vm3, %v6284_v35, 0.0 }
 0x923   : > { %8251 = vmatprep.mubr.msk.bf16.mxu1 %vm1468_vm2, %v7269_v11  ;;  %v7271_v29 = vpack.c.bf16 %v7242_v25, %v7241_v3  ;;  %v12631_v57 = vsub.f32 %v12316_v61, %v12506_v43  ;;  %v6253_v41 = vmul.f32 %v12615_v45, %v12246_v60  ;;  %v12638_v35 = vsub.f32 %v12323_v33, %v12506_v43  ;;  %v14058_v60 = vld [vmem:[#allocation22_spill] sm:$0xff] }
 0x924   : > { %v6323_v50 = vadd.f32 %v6322_v63, %v6321_v21  ;;  %v7270_v21 = vpack.c.bf16 %v7240_v18, %v7239_v46  ;;  %v6287_v63 = vmul.f32 %v6251_v51, %v6251_v51  ;;  %v6332_v61 = vsel %vm1532_vm3, %v6286_v54, 0.0  ;;  %v7243_v18 = vld [vmem:[%s8883_s22 + $0x96] sm:$0xff]  ;;  %v7244_v51 = vld [vmem:[%s8883_s22 + $0x9e] sm:$0xff] }
 0x925   : > { %v6289_v3 = vmul.f32 %v6253_v41, %v6253_v41  ;;  %v12658_v54 = vsub.f32 %v12341_v47, %v12506_v43 }
 0x926   : > { %v6325_v10 = vadd.f32 %v6324_v0, %v6323_v50  ;;  %v6330_v50 = vsel %vm1532_vm3, %v6285_v30, 0.0  ;;  %v6254_v0 = vmul.f32 %v12624_v32, %v12257_v38  ;;  %v12649_v30 = vsub.f32 %v12332_v59, %v12506_v43 }
 0x927   : > { %v6334_v25 = vsel %vm1532_vm3, %v6287_v63, 0.0  ;;  %v12665_v63 = vsub.f32 %v12347_v31, %v12506_v43 }
 0x928   : > { %v6327_v4 = vadd.f32 %v6326_v26, %v6325_v10  ;;  %v6288_v10 = vmul.f32 %v6252_v5, %v6252_v5  ;;  %v14042_v26 = vld [vmem:[#allocation6_spill] sm:$0xff]  ;;  %v7246_v5 = vld [vmem:[%s8883_s22 + $0xae] sm:$0xff] }
 0x929   : > { %v6255_v33 = vmul.f32 %v12631_v57, %v14042_v26 }
 0x92a   : > { %v6329_v11 = vadd.f32 %v6328_v44, %v6327_v4  ;;  %8252 = vmatmul.mubr.msk.bf16.gmra.mrb[68].mxu1 %vm1468_vm2, %v7270_v21  ;;  %v7245_v4 = vld [vmem:[%s8883_s22 + $0xa6] sm:$0xff]  ;;  %v6336_v59 = vsel %vm1532_vm3, %v6288_v10, 0.0  ;;  %v14045_v10 = vld [vmem:[#allocation4_spill] sm:$0xff] }
 0x92b   : > { %8255 = vmatprep.mubr.msk.bf16.mxu1 %vm1468_vm2, %v7271_v29  ;;  %v14043_v21 = vld [vmem:[#allocation63_spill] sm:$0xff]  ;;  %v6290_v29 = vmul.f32 %v6254_v0, %v6254_v0  ;;  %v7273_v41 = vpack.c.bf16 %v7246_v5, %v7245_v4  ;;  %v6291_v26 = vmul.f32 %v6255_v33, %v6255_v33  ;;  %v7247_v33 = vld [vmem:[%s8883_s22 + $0xb6] sm:$0xff] }
 0x92c   : > { %v6331_v28 = vadd.f32 %v6330_v50, %v6329_v11  ;;  %v6256_v11 = vmul.f32 %v12638_v35, %v14043_v21  ;;  %v7272_v50 = vpack.c.bf16 %v7244_v51, %v7243_v18  ;;  %v14046_v18 = vld [vmem:[#allocation9_spill] sm:$0xff]  ;;  %v7250_v21 = vld [vmem:[%s8883_s22 + $0xce] sm:$0xff] }
 0x92d   : > { %v6258_v51 = vmul.f32 %v12658_v54, %v14046_v18  ;;  %v6340_v31 = vsel %vm1532_vm3, %v6290_v29, 0.0  ;;  %v12692_v29 = vsub.f32 %v12369_v40, %v12506_v43 }
 0x92e   : > { %v6333_v46 = vadd.f32 %v6332_v61, %v6331_v28  ;;  %v14044_v61 = vld [vmem:[#allocation3_spill] sm:$0xff]  ;;  %v6292_v4 = vmul.f32 %v6256_v11, %v6256_v11 }
 0x92f   : > { %v6257_v47 = vmul.f32 %v12649_v30, %v14044_v61  ;;  %v7249_v11 = vld [vmem:[%s8883_s22 + $0xc6] sm:$0xff]  ;;  %v14049_v61 = vld [vmem:[#allocation49_spill] sm:$0xff] }
 0x930   : > { %v6335_v44 = vadd.f32 %v6334_v25, %v6333_v46  ;;  %v6338_v46 = vsel %vm1532_vm3, %v6289_v3, 0.0  ;;  %v12672_v25 = vsub.f32 %v14045_v10, %v12506_v43  ;;  %v12683_v3 = vsub.f32 %v12363_v36, %v12506_v43 }
 0x931   : > { %v6342_v10 = vsel %vm1532_vm3, %v6291_v26, 0.0  ;;  %v6344_v36 = vsel %vm1532_vm3, %v6292_v4, 0.0  ;;  %v12699_v26 = vsub.f32 %v12377_v49, %v12506_v43  ;;  %v14050_v4 = vld [vmem:[#allocation21_spill] sm:$0xff] }
 0x932   : > { %v6337_v28 = vadd.f32 %v6336_v59, %v6335_v44  ;;  %8256 = vmatmul.mubr.msk.bf16.gmra.mrb[72].mxu1 %vm1468_vm2, %v7272_v50  ;;  %v7248_v44 = vld [vmem:[%s8883_s22 + $0xbe] sm:$0xff]  ;;  %v14047_v59 = vld [vmem:[#allocation12_spill] sm:$0xff]  ;;  %v6261_v40 = vmul.f32 %v12683_v3, %v14049_v61 }
 0x933   : > { %8259 = vmatprep.mubr.msk.bf16.mxu1 %vm1468_vm2, %v7273_v41  ;;  %v14048_v41 = vld [vmem:[#allocation2_spill] sm:$0xff]  ;;  %v7274_v18 = vpack.c.bf16 %v7248_v44, %v7247_v33  ;;  %v14051_v33 = vld [vmem:[#allocation5_spill] sm:$0xff] }
 0x934   : > { %v6339_v0 = vadd.f32 %v6338_v46, %v6337_v28  ;;  %v6259_v28 = vmul.f32 %v12665_v63, %v14047_v59  ;;  %v6293_v46 = vmul.f32 %v6257_v47, %v6257_v47  ;;  %v7275_v47 = vpack.c.bf16 %v7250_v21, %v7249_v11 }
 0x935   : > { %v6262_v21 = vmul.f32 %v12692_v29, %v14051_v33  ;;  %v7254_v33 = vld [vmem:[%s8883_s22 + $0xee] sm:$0xff] }
 0x936   : > { %v6341_v5 = vadd.f32 %v6340_v31, %v6339_v0  ;;  %v6260_v0 = vmul.f32 %v12672_v25, %v14048_v41  ;;  %v6294_v31 = vmul.f32 %v6258_v51, %v6258_v51  ;;  %v6295_v2 = vmul.f32 %v6259_v28, %v6259_v28  ;;  %v7251_v28 = vld [vmem:[%s8883_s22 + $0xd6] sm:$0xff] }
 0x937   : > { %v6298_v61 = vmul.f32 %v6262_v21, %v6262_v21 }
 0x938   : > { %v6343_v50 = vadd.f32 %v6342_v10, %v6341_v5  ;;  %v6346_v5 = vsel %vm1532_vm3, %v6293_v46, 0.0  ;;  %v12706_v10 = vsub.f32 %v14050_v4, %v12506_v43  ;;  %v6296_v44 = vmul.f32 %v6260_v0, %v6260_v0  ;;  %v14052_v46 = vld [vmem:[#allocation64_spill] sm:$0xff]  ;;  %v7253_v0 = vld [vmem:[%s8883_s22 + $0xe6] sm:$0xff] }
 0x939   : > { %v6348_v49 = vsel %vm1532_vm3, %v6294_v31, 0.0  ;;  %v6297_v4 = vmul.f32 %v6261_v40, %v6261_v40  ;;  %v6350_v41 = vsel %vm1532_vm3, %v6295_v2, 0.0  ;;  %v14054_v31 = vld [vmem:[#allocation27_spill] sm:$0xff]  ;;  %v7277_v40 = vpack.c.bf16 %v7254_v33, %v7253_v0  ;;  %v14056_v2 = vld [vmem:[#allocation25_spill] sm:$0xff] }
 0x93a   : > { %v6345_v59 = vadd.f32 %v6344_v36, %v6343_v50  ;;  %8260 = vmatmul.mubr.msk.bf16.gmra.mrb[76].mxu1 %vm1468_vm2, %v7274_v18  ;;  %v7252_v50 = vld [vmem:[%s8883_s22 + $0xde] sm:$0xff]  ;;  %v12726_v18 = vsub.f32 %v14054_v31, %v12506_v43  ;;  %v12733_v13 = vsub.f32 %v14056_v2, %v12506_v43  ;;  %v6356_v0 = vsel %vm1532_vm3, %v6298_v61, 0.0  ;;  %v14064_v2 = vld [vmem:[#allocation24_spill] sm:$0xff] }
 0x93b   : > { %8263 = vmatprep.mubr.msk.bf16.mxu1 %vm1468_vm2, %v7275_v47  ;;  %v14053_v36 = vld [vmem:[#allocation66_spill] sm:$0xff]  ;;  %v7276_v38 = vpack.c.bf16 %v7252_v50, %v7251_v28  ;;  %v14061_v28 = vld [vmem:[#allocation28_spill] sm:$0xff] }
 0x93c   : > { %v6347_v51 = vadd.f32 %v6346_v5, %v6345_v59  ;;  %v12717_v59 = vsub.f32 %v14052_v46, %v12506_v43  ;;  %v6263_v5 = vmul.f32 %v12699_v26, %v14053_v36  ;;  %v14055_v47 = vld [vmem:[#allocation46_spill] sm:$0xff]  ;;  %v6352_v46 = vsel %vm1532_vm3, %v6296_v44, 0.0  ;;  %14057 = vst [vmem:[#allocation38_spill] sm:$0xff] %v12733_v13 }
 0x93d   : > { %v14059_v44 = vld [vmem:[#allocation30_spill] sm:$0xff]  ;;  %v6266_v33 = vmul.f32 %v12726_v18, %v14061_v28  ;;  %v7258_v28 = vld [vmem:[%s8883_s22 + $0x10e] sm:$0xff] }
 0x93e   : > { %v6349_v11 = vadd.f32 %v6348_v49, %v6347_v51  ;;  %v6264_v49 = vmul.f32 %v12706_v10, %v14055_v47  ;;  %v6265_v31 = vmul.f32 %v12717_v59, %v14058_v60  ;;  %v6299_v24 = vmul.f32 %v6263_v5, %v6263_v5  ;;  %v7255_v5 = vld [vmem:[%s8883_s22 + $0xf6] sm:$0xff]  ;;  %v14065_v61 = vld [vmem:[#allocation62_spill] sm:$0xff] }
 0x93f   : > { %v6302_v60 = vmul.f32 %v6266_v33, %v6266_v33 }
 0x940   : > { %v6351_v51 = vadd.f32 %v6350_v41, %v6349_v11  ;;  %v6354_v41 = vsel %vm1532_vm3, %v6297_v4, 0.0  ;;  %v12740_v11 = vsub.f32 %v14059_v44, %v12506_v43  ;;  %v6300_v50 = vmul.f32 %v6264_v49, %v6264_v49  ;;  %v14062_v4 = vld [vmem:[#allocation26_spill] sm:$0xff] }
 0x941   : > { %v6301_v44 = vmul.f32 %v6265_v31, %v6265_v31  ;;  %v6358_v47 = vsel %vm1532_vm3, %v6299_v24, 0.0  ;;  %v7257_v49 = vld [vmem:[%s8883_s22 + $0x106] sm:$0xff]  ;;  %v14068_v24 = vld [vmem:[#allocation65_spill] sm:$0xff] }
 0x942   : > { %v6353_v36 = vadd.f32 %v6352_v46, %v6351_v51  ;;  %14060 = vst [vmem:[#allocation20_spill] sm:$0xff] %v12740_v11  ;;  %8264 = vmatmul.mubr.msk.bf16.gmra.mrb[80].mxu1 %vm1468_vm2, %v7276_v38  ;;  %v7256_v46 = vld [vmem:[%s8883_s22 + $0xfe] sm:$0xff]  ;;  %v12760_v38 = vsub.f32 %v14065_v61, %v12506_v43  ;;  %v7279_v31 = vpack.c.bf16 %v7258_v28, %v7257_v49  ;;  %v6364_v49 = vsel %vm1532_vm3, %v6302_v60, 0.0 }
 0x943   : > { %8267 = vmatprep.mubr.msk.bf16.mxu1 %vm1468_vm2, %v7277_v40  ;;  %v14067_v40 = vld [vmem:[#allocation15_spill] sm:$0xff]  ;;  %v7278_v42 = vpack.c.bf16 %v7256_v46, %v7255_v5 }
 0x944   : > { %v6355_v21 = vadd.f32 %v6354_v41, %v6353_v36  ;;  %v12751_v36 = vsub.f32 %v14062_v4, %v12506_v43  ;;  %v6267_v41 = vmul.f32 %v12733_v13, %v14064_v2  ;;  %14066 = vst [vmem:[#allocation40_spill] sm:$0xff] %v12760_v38  ;;  %v6360_v4 = vsel %vm1532_vm3, %v6300_v50, 0.0  ;;  %v14071_v50 = vld [vmem:[#allocation31_spill] sm:$0xff] }
 0x945   : > { %v12767_v13 = vsub.f32 %v14068_v24, %v12506_v43  ;;  %v14073_v5 = vld [vmem:[#allocation11_spill] sm:$0xff]  ;;  %v14076_v24 = vld [vmem:[#allocation17_spill] sm:$0xff] }
 0x946   : > { %v6357_v51 = vadd.f32 %v6356_v0, %v6355_v21  ;;  %14063 = vst [vmem:[#allocation37_spill] sm:$0xff] %v12751_v36  ;;  %v6268_v0 = vmul.f32 %v12740_v11, %v14067_v40  ;;  %v6269_v61 = vmul.f32 %v12751_v36, %v14070_v8  ;;  %v6303_v15 = vmul.f32 %v6267_v41, %v6267_v41  ;;  %v7259_v41 = vld [vmem:[%s8883_s22 + $0x116] sm:$0xff] }
 0x947   : > { %14069 = vst [vmem:[#allocation13_spill] sm:$0xff] %v12767_v13  ;;  %v6270_v28 = vmul.f32 %v12760_v38, %v14073_v5  ;;  %v7262_v5 = vld [vmem:[%s8883_s22 + $0x12e] sm:$0xff] }
 0x948   : > { %v6359_v21 = vadd.f32 %v6358_v47, %v6357_v51  ;;  %v6362_v47 = vsel %vm1532_vm3, %v6301_v44, 0.0  ;;  %v12774_v51 = vsub.f32 %v14071_v50, %v12506_v43  ;;  %v6304_v46 = vmul.f32 %v6268_v0, %v6268_v0  ;;  %v14074_v44 = vld [vmem:[#allocation33_spill] sm:$0xff]  ;;  %v7261_v0 = vld [vmem:[%s8883_s22 + $0x126] sm:$0xff] }
 0x949   : > { %v6305_v50 = vmul.f32 %v6269_v61, %v6269_v61  ;;  %v6366_v40 = vsel %vm1532_vm3, %v6303_v15, 0.0  ;;  %v7281_v61 = vpack.c.bf16 %v7262_v5, %v7261_v0  ;;  %v7264_v5 = vld [vmem:[%s8883_s22 + $0x13e] sm:$0xff] }
 0x94a   : > { %v6361_v2 = vadd.f32 %v6360_v4, %v6359_v21  ;;  %14072 = vst [vmem:[#allocation14_spill] sm:$0xff] %v12774_v51  ;;  %8268 = vmatmul.mubr.msk.bf16.gmra.mrb[84].mxu1 %vm1468_vm2, %v7278_v42  ;;  %v7260_v4 = vld [vmem:[%s8883_s22 + $0x11e] sm:$0xff]  ;;  %v12794_v42 = vsub.f32 %v12467_v27, %v12506_v43 }
 0x94b   : > { %8271 = vmatprep.mubr.msk.bf16.mxu1 %vm1468_vm2, %v7279_v31  ;;  %v14078_v31 = vld [vmem:[#allocation61_spill] sm:$0xff]  ;;  %v7280_v8 = vpack.c.bf16 %v7260_v4, %v7259_v41  ;;  %v6370_v38 = vsel %vm1532_vm3, %v6305_v50, 0.0 }
 0x94c   : > { %v6363_v33 = vadd.f32 %v6362_v47, %v6361_v2  ;;  %v12785_v2 = vsub.f32 %v14074_v44, %v12506_v43  ;;  %v6271_v47 = vmul.f32 %v12767_v13, %v14076_v24  ;;  %14077 = vst [vmem:[#allocation41_spill] sm:$0xff] %v12794_v42  ;;  %v6368_v44 = vsel %vm1532_vm3, %v6304_v46, 0.0  ;;  %v14079_v13 = vld [vmem:[#allocation34_spill] sm:$0xff]  ;;  %v7263_v46 = vld [vmem:[%s8883_s22 + $0x136] sm:$0xff] }
 0x94d   : > { %v6274_v43 = vmul.f32 %v12794_v42, %v12469_v62 }
 0x94e   : > { %v6365_v21 = vadd.f32 %v6364_v49, %v6363_v33  ;;  %14075 = vst [vmem:[#allocation10_spill] sm:$0xff] %v12785_v2  ;;  %v6272_v33 = vmul.f32 %v12774_v51, %v14078_v31  ;;  %v6306_v49 = vmul.f32 %v6270_v28, %v6270_v28  ;;  %v6273_v15 = vmul.f32 %v12785_v2, %v14079_v13 }
 0x94f   : > { %v6307_v11 = vmul.f32 %v6271_v47, %v6271_v47  ;;  %v6310_v0 = vmul.f32 %v6274_v43, %v6274_v43 }
 0x950   : > { %v6367_v60 = vadd.f32 %v6366_v40, %v6365_v21  ;;  %v6308_v40 = vmul.f32 %v6272_v33, %v6272_v33  ;;  %v6372_v21 = vsel %vm1532_vm3, %v6306_v49, 0.0  ;;  %v6309_v41 = vmul.f32 %v6273_v15, %v6273_v15 }
 0x951   : > { %v6374_v4 = vsel %vm1532_vm3, %v6307_v11, 0.0  ;;  %v6380_v49 = vsel %vm1532_vm3, %v6310_v0, 0.0 }
 0x952   : > { %v6369_v24 = vadd.f32 %v6368_v44, %v6367_v60  ;;  %8272 = vmatmul.mubr.msk.bf16.gmra.mrb[88].mxu1 %vm1468_vm2, %v7280_v8  ;;  %v6378_v60 = vsel %vm1532_vm3, %v6309_v41, 0.0 }
 0x953   : > { %8275 = vmatprep.mubr.msk.bf16.mxu1 %vm1468_vm2, %v7281_v61 }
 0x954   : > { %v6371_v27 = vadd.f32 %v6370_v38, %v6369_v24  ;;  %v6376_v38 = vsel %vm1532_vm3, %v6308_v40, 0.0  ;;  %v7282_v24 = vpack.c.bf16 %v7264_v5, %v7263_v46 }
 0x956   : > { %v6373_v28 = vadd.f32 %v6372_v21, %v6371_v27 }
 0x958   : > { %v6375_v47 = vadd.f32 %v6374_v4, %v6373_v28 }
 0x95a   : > { %v6377_v50 = vadd.f32 %v6376_v38, %v6375_v47  ;;  %8276 = vmatmul.mubr.msk.bf16.gmra.mrb[92].mxu1 %vm1468_vm2, %v7282_v24 }
 0x95c   : > { %v6379_v33 = vadd.f32 %v6378_v60, %v6377_v50 }
 0x95e   : > { %v6381_v8 = vadd.f32 %v6380_v49, %v6379_v33 }
 0x960   : > { %v6382_v44 = vrot.slane %v6381_v8, 4 }
 0x962   : > { %v6383_v61 = vadd.f32 %v6382_v44, %v6381_v8 }
 0x964   : > { %v6384_v27 = vrot.slane %v6383_v61, 2 }
 0x966   : > { %v6385_v15 = vadd.f32 %v6384_v27, %v6383_v61 }
 0x968   : > { %v6386_v21 = vrot.slane %v6385_v15, 1 }
 0x96a   : > { %v6387_v11 = vadd.f32 %v6386_v21, %v6385_v15 }
 0x96c   : > { %v6389_v43 = vsel %vm1532_vm3, %v6387_v11, 0 }
 0x96d   : > { %v6458_v28 = vand.u32 4294901760, %v6389_v43 }
 0x96f   : > { %v6459_v40 = vsub.f32 %v6389_v43, %v6458_v28 }
 0x971   : > { %v6460_v46 = vand.u32 4294901760, %v6459_v40 }
 0x973   : > { %v6461_v5 = vsub.f32 %v6459_v40, %v6460_v46 }
 0x975   : > { %v6462_v4 = vand.u32 4294901760, %v6461_v5 }
 0x977   : > { %8204 = vmatmul.mubr.f32.vlgmr.msra.gmra.mrb[102].mxu0 %v6462_v4 }
 0x978   : > { %8338 = vmatpush3.bf16.msra.mxu0 %v14035_v53  ;;  %8210 = vmatprep.mubr.msk.f32.mxu0 %vm8774_vm1, %v13972_v39 }
 0x979   : > { %8339 = vmatprep.subr.bf16.mxu0 %v13964_v23 }
 0x97f   : > { %8211 = vmatmul.mubr.f32.vlgmr.msra.gmra.mrb[102].mxu0 %v6458_v28 }
 0x980   : > { %8341 = vmatpush3.bf16.msra.mxu0 %v14036_v55  ;;  %8217 = vmatprep.mubr.msk.f32.mxu0 %vm8774_vm1, %v13972_v39 }
 0x981   : > { %8342 = vmatprep.subr.bf16.mxu0 %v13964_v23 }
 0x987   : > { %8218 = vmatmul.mubr.f32.vlgmr.msra.gmra.mrb[102].mxu0 %v6459_v40 }
 0x988   : > { %8344 = vmatpush3.bf16.msra.mxu0 %v13962_v34  ;;  %8224 = vmatprep.mubr.msk.f32.mxu0 %vm8774_vm1, %v13972_v39 }
 0x989   : > { %8345 = vmatprep.subr.bf16.mxu0 %v13964_v23 }
 0x98f   : > { %8225 = vmatmul.mubr.f32.vlgmr.msra.gmra.mrb[102].mxu0 %v6460_v46 }
 0x990   : > { %8347 = vmatpush3.bf16.msra.mxu0 %v14037_v9  ;;  %8231 = vmatprep.mubr.msk.f32.mxu0 %vm8774_vm1, %v13972_v39 }
 0x991   : > { %8348 = vmatprep.subr.bf16.mxu0 %v13964_v23 }
 0x997   : > { %8232 = vmatmul.mubr.f32.vlgmr.msra.gmra.mrb[102].mxu0 %v6458_v28 }
 0x998   : > { %8350 = vmatpush3.bf16.msra.mxu0 %v13962_v34  ;;  %8238 = vmatprep.mubr.msk.f32.mxu0 %vm8774_vm1, %v13972_v39 }
 0x99f   : > { %8239 = vmatmul.mubr.f32.vlgmr.msra.gmra.mrb[102].mxu0 %v6458_v28 }
 0x9ed   : > { %v8245_v53 = vpop.f32.mrb[60].mxu1 }
 0x9ee   : > { %v7382_v55 = vpop.f32.mrb[61].mxu1 }
 0x9ef   : > { %v8246_v41 = vpop.f32.mrb[62].mxu1 }
 0x9f0   : > { %v7385_v47 = vpop.f32.mrb[63].mxu1 }
 0x9f5   : > { %v8249_v0 = vpop.f32.mrb[64].mxu1 }
 0x9f6   : > { %v7398_v38 = vpop.f32.mrb[65].mxu1 }
 0x9f7   : > { %v8250_v24 = vpop.f32.mrb[66].mxu1 }
 0x9f8   : > { %v7401_v9 = vpop.f32.mrb[67].mxu1 }
 0x9fd   : > { %v8253_v50 = vpop.f32.mrb[68].mxu1 }
 0x9fe   : > { %v7414_v60 = vpop.f32.mrb[69].mxu1 }
 0x9ff   : > { %v8254_v33 = vpop.f32.mrb[70].mxu1 }
 0xa00   : > { %v7417_v49 = vpop.f32.mrb[71].mxu1 }
 0xa05   : > { %v8257_v23 = vpop.f32.mrb[72].mxu1 }
 0xa06   : > { %v7430_v8 = vpop.f32.mrb[73].mxu1 }
 0xa07   : > { %v8258_v44 = vpop.f32.mrb[74].mxu1 }
 0xa08   : > { %v7433_v34 = vpop.f32.mrb[75].mxu1 }
 0xa0d   : > { %v8261_v61 = vpop.f32.mrb[76].mxu1 }
 0xa0e   : > { %v7446_v27 = vpop.f32.mrb[77].mxu1 }
 0xa0f   : > { %v8262_v39 = vpop.f32.mrb[78].mxu1 }
 0xa10   : > { %v7449_v15 = vpop.f32.mrb[79].mxu1 }
 0xa15   : > { %v8265_v21 = vpop.f32.mrb[80].mxu1 }
 0xa16   : > { %v7462_v11 = vpop.f32.mrb[81].mxu1 }
 0xa17   : > { %v8266_v43 = vpop.f32.mrb[82].mxu1 }
 0xa18   : > { %v7465_v28 = vpop.f32.mrb[83].mxu1 }
 0xa1d   : > { %v8269_v40 = vpop.f32.mrb[84].mxu1 }
 0xa1e   : > { %v7478_v46 = vpop.f32.mrb[85].mxu1 }
 0xa1f   : > { %v12834_v5 = vpop.f32.mrb[86].mxu1 }
 0xa20   : > { %14080 = vst [vmem:[#allocation43_spill] sm:$0xff] %v12834_v5  ;;  %v12836_v4 = vpop.f32.mrb[87].mxu1 }
 0xa21   : > { %14081 = vst [vmem:[#allocation7_spill] sm:$0xff] %v12836_v4 }
 0xa25   : > { %v12838_v31 = vpop.f32.mrb[88].mxu1 }
 0xa26   : > { %14082 = vst [vmem:[#allocation8_spill] sm:$0xff] %v12838_v31  ;;  %v12840_v62 = vpop.f32.mrb[89].mxu1 }
 0xa27   : > { %14083 = vst [vmem:[#allocation16_spill] sm:$0xff] %v12840_v62  ;;  %v12842_v13 = vpop.f32.mrb[90].mxu1  ;;  %v12857_v62 = vld [vmem:[%s13462_s13] ss:$0 sm:$0xff] }
 0xa28   : > { %14084 = vst [vmem:[#allocation18_spill] sm:$0xff] %v12842_v13  ;;  %v12844_v51 = vpop.f32.mrb[91].mxu1  ;;  %14090 = vst [vmem:[#allocation27_spill] sm:$0xff] %v12857_v62 }
 0xa29   : > { %14085 = vst [vmem:[#allocation23_spill] sm:$0xff] %v12844_v51  ;;  %v12860_v51 = vadd.f32 %v8245_v53, %v12857_v62  ;;  %v12881_v53 = vadd.f32 %v12857_v62, %v7401_v9  ;;  %v12902_v9 = vadd.f32 %v8258_v44, %v12857_v62  ;;  %v12923_v44 = vadd.f32 %v8265_v21, %v12857_v62 }
 0xa2b   : > { %14096 = vst [vmem:[#allocation31_spill] sm:$0xff] %v12923_v44 }
 0xa2d   : > { %v12846_v42 = vpop.f32.mrb[92].mxu1 }
 0xa2e   : > { %14086 = vst [vmem:[#allocation60_spill] sm:$0xff] %v12846_v42  ;;  %v12848_v2 = vpop.f32.mrb[93].mxu1  ;;  %v12863_v42 = vadd.f32 %v12857_v62, %v7382_v55  ;;  %v12884_v55 = vadd.f32 %v8253_v50, %v12857_v62 }
 0xa2f   : > { %14087 = vst [vmem:[#allocation4_spill] sm:$0xff] %v12848_v2  ;;  %v12850_v36 = vpop.f32.mrb[94].mxu1  ;;  %v14104_v2 = vld [vmem:[#allocation36_spill] sm:$0xff] }
 0xa30   : > { %14088 = vst [vmem:[#allocation21_spill] sm:$0xff] %v12850_v36  ;;  %v12852_v17 = vpop.f32.mrb[95].mxu1  ;;  %v12866_v36 = vadd.f32 %v8246_v41, %v12857_v62  ;;  %v12887_v41 = vadd.f32 %v12857_v62, %v7414_v60  ;;  %v12908_v60 = vadd.f32 %v8261_v61, %v12857_v62  ;;  %v12929_v61 = vadd.f32 %v8266_v43, %v12857_v62  ;;  %v14102_v43 = vld [vmem:[#allocation35_spill] sm:$0xff] }
 0xa31   : > { %14089 = vst [vmem:[#allocation64_spill] sm:$0xff] %v12852_v17  ;;  %v12869_v17 = vadd.f32 %v12857_v62, %v7385_v47  ;;  %v12890_v47 = vadd.f32 %v8254_v33, %v12857_v62  ;;  %v12911_v33 = vadd.f32 %v12857_v62, %v7446_v27  ;;  %v12932_v27 = vadd.f32 %v12857_v62, %v7465_v28 }
 0xa32   : > { %14092 = vst [vmem:[#allocation30_spill] sm:$0xff] %v12908_v60  ;;  %14098 = vst [vmem:[#allocation67_spill] sm:$0xff] %v12929_v61 }
 0xa33   : > { %14093 = vst [vmem:[#allocation26_spill] sm:$0xff] %v12911_v33  ;;  %14099 = vst [vmem:[#allocation68_spill] sm:$0xff] %v12932_v27 }
 0xa72   : > { %v6846_v56 = vpop.f32.mrb[102].mxu0 }
 0xa73   : > { %v6850_v5 = vmul.f32 0.001953125, %v6846_v56  ;;  %v8240_v12 = vpop.f32.mrb[103].mxu0  ;;  %v12875_v56 = vadd.f32 %v12857_v62, %v7398_v38  ;;  %v12896_v38 = vadd.f32 %v8257_v23, %v12857_v62 }
 0xa74   : > { %v12872_v12 = vadd.f32 %v8249_v0, %v12857_v62  ;;  %v12893_v0 = vadd.f32 %v12857_v62, %v7417_v49  ;;  %v12914_v49 = vadd.f32 %v8262_v39, %v12857_v62  ;;  %v12935_v39 = vadd.f32 %v8269_v40, %v12857_v62 }
 0xa75   : > { %v6851_v4 = vadd.f32 1e-05, %v6850_v5  ;;  %v12878_v5 = vadd.f32 %v8250_v24, %v12857_v62  ;;  %v12899_v24 = vadd.f32 %v12857_v62, %v7430_v8  ;;  %v12920_v8 = vadd.f32 %v12857_v62, %v7449_v15  ;;  %v12943_v15 = vld [vmem:[%s13458_s9] ss:$0 sm:$0xff] }
 0xa76   : > { %14094 = vst [vmem:[#allocation62_spill] sm:$0xff] %v12914_v49  ;;  %14100 = vst [vmem:[#allocation69_spill] sm:$0xff] %v12935_v39 }
 0xa77   : > { %8617 = vrsqrt.f32 %v6851_v4  ;;  %v12905_v4 = vadd.f32 %v12857_v62, %v7433_v34  ;;  %14095 = vst [vmem:[#allocation65_spill] sm:$0xff] %v12920_v8  ;;  %v12926_v34 = vadd.f32 %v12857_v62, %v7462_v11 }
 0xa79   : > { %14091 = vst [vmem:[#allocation25_spill] sm:$0xff] %v12905_v4  ;;  %14097 = vst [vmem:[#allocation33_spill] sm:$0xff] %v12926_v34 }
 0xa81   : > { %v8618_v50 = vpop.eup %8617 }
 0xa82   : > { %v12917_v23 = vrot.slane %v8618_v50, %v14038_v48  ;;  %v12938_v48 = vadd.f32 %v12857_v62, %v7478_v46  ;;  %v14103_v50 = vld [vmem:[#allocation19_spill] sm:$0xff] }
 0xa84   : > { %14101 = vst [vmem:[#allocation70_spill] sm:$0xff] %v12938_v48  ;;  %v6857_v21 = vmul.f32 %v12917_v23, %v12510_v14  ;;  %v6858_v11 = vmul.f32 %v12917_v23, %v12514_v20  ;;  %v6859_v28 = vmul.f32 %v12917_v23, %v14102_v43  ;;  %v6860_v40 = vmul.f32 %v12917_v23, %v14103_v50 }
 0xa85   : > { %v6861_v46 = vmul.f32 %v12917_v23, %v14104_v2  ;;  %v6862_v13 = vmul.f32 %v12917_v23, %v12536_v37  ;;  %v6863_v31 = vmul.f32 %v12917_v23, %v12542_v22  ;;  %v6864_v14 = vmul.f32 %v12917_v23, %v12556_v1  ;;  %v12972_v37 = vld [vmem:[%s13459_s10] ss:$0 sm:$0xff] }
 0xa86   : > { %v6865_v20 = vmul.f32 %v12917_v23, %v12562_v52  ;;  %v6866_v43 = vmul.f32 %v12917_v23, %v12570_v16  ;;  %v6867_v50 = vmul.f32 %v12917_v23, %v12581_v19  ;;  %v6868_v2 = vmul.f32 %v12917_v23, %v12590_v6 }
 0xa87   : > { %v6871_v1 = vmul.f32 %v12917_v23, %v12615_v45  ;;  %v6899_v22 = vmul.f32 %v12943_v15, %v6857_v21  ;;  %v6900_v52 = vmul.f32 %v12943_v15, %v6858_v11  ;;  %v6901_v16 = vmul.f32 %v12943_v15, %v6859_v28 }
 0xa88   : > { %v6902_v62 = vmul.f32 %v12943_v15, %v6860_v40  ;;  %v6903_v19 = vmul.f32 %v12943_v15, %v6861_v46  ;;  %v6904_v6 = vmul.f32 %v12943_v15, %v6862_v13  ;;  %v6905_v48 = vmul.f32 %v12943_v15, %v6863_v31 }
 0xa89   : > { %v6906_v39 = vmul.f32 %v12943_v15, %v6864_v14  ;;  %v6907_v27 = vmul.f32 %v12943_v15, %v6865_v20  ;;  %v6908_v45 = vmul.f32 %v12943_v15, %v6866_v43  ;;  %v6909_v21 = vmul.f32 %v12943_v15, %v6867_v50 }
 0xa8a   : > { %v6910_v11 = vmul.f32 %v12943_v15, %v6868_v2  ;;  %v6913_v28 = vmul.f32 %v12943_v15, %v6871_v1  ;;  %v12990_v40 = vadd.f32 %v12972_v37, %v6899_v22  ;;  %v12993_v46 = vadd.f32 %v12972_v37, %v6900_v52 }
 0xa8b   : > { %v12996_v13 = vadd.f32 %v12972_v37, %v6901_v16  ;;  %v12999_v31 = vadd.f32 %v12972_v37, %v6902_v62  ;;  %v13002_v14 = vadd.f32 %v12972_v37, %v6903_v19  ;;  %v13005_v20 = vadd.f32 %v12972_v37, %v6904_v6 }
 0xa8c   : > { %v13008_v43 = vadd.f32 %v12972_v37, %v6905_v48  ;;  %v13011_v50 = vadd.f32 %v12972_v37, %v6906_v39  ;;  %v13014_v2 = vadd.f32 %v12972_v37, %v6907_v27  ;;  %v13017_v1 = vadd.f32 %v12972_v37, %v6908_v45 }
 0xa8d   : > { %v13020_v62 = vadd.f32 %v12972_v37, %v6909_v21  ;;  %v13023_v22 = vadd.f32 %v12972_v37, %v6910_v11  ;;  %v13026_v52 = vadd.f32 %v12972_v37, %v6913_v28  ;;  %v7805_v48 = vmul.f32 -1.442695, %v12990_v40 }
 0xa8e   : > { %v7806_v39 = vmul.f32 -1.442695, %v12993_v46  ;;  %v7807_v16 = vmul.f32 -1.442695, %v12996_v13  ;;  %v7808_v27 = vmul.f32 -1.442695, %v12999_v31  ;;  %v6869_v19 = vmul.f32 %v12917_v23, %v12597_v7 }
 0xa8f   : > { %8619 = vpow2.f32 %v7805_v48  ;;  %v7809_v6 = vmul.f32 -1.442695, %v13002_v14  ;;  %v7810_v45 = vmul.f32 -1.442695, %v13005_v20  ;;  %v7811_v21 = vmul.f32 -1.442695, %v13008_v43 }
 0xa90   : > { %8621 = vpow2.f32 %v7806_v39  ;;  %v7812_v11 = vmul.f32 -1.442695, %v13011_v50  ;;  %v7813_v28 = vmul.f32 -1.442695, %v13014_v2  ;;  %v7814_v61 = vmul.f32 -1.442695, %v13017_v1 }
 0xa91   : > { %8623 = vpow2.f32 %v7807_v16  ;;  %v7815_v34 = vmul.f32 -1.442695, %v13020_v62  ;;  %v7816_v44 = vmul.f32 -1.442695, %v13023_v22  ;;  %v7819_v7 = vmul.f32 -1.442695, %v13026_v52 }
 0xa92   : > { %8625 = vpow2.f32 %v7808_v27  ;;  %v6911_v48 = vmul.f32 %v12943_v15, %v6869_v19  ;;  %v6872_v8 = vmul.f32 %v12917_v23, %v12624_v32  ;;  %v6870_v39 = vmul.f32 %v12917_v23, %v12604_v58 }
 0xa93   : > { %8627 = vpow2.f32 %v7809_v6  ;;  %v6875_v49 = vmul.f32 %v12917_v23, %v12649_v30  ;;  %v6873_v16 = vmul.f32 %v12917_v23, %v12631_v57  ;;  %v6876_v33 = vmul.f32 %v12917_v23, %v12658_v54 }
 0xa94   : > { %8629 = vpow2.f32 %v7810_v45  ;;  %v13055_v27 = vadd.f32 %v12972_v37, %v6911_v48  ;;  %v6914_v19 = vmul.f32 %v12943_v15, %v6872_v8  ;;  %v6912_v32 = vmul.f32 %v12943_v15, %v6870_v39 }
 0xa95   : > { %8631 = vpow2.f32 %v7811_v21  ;;  %v6917_v58 = vmul.f32 %v12943_v15, %v6875_v49  ;;  %v6915_v6 = vmul.f32 %v12943_v15, %v6873_v16  ;;  %v6918_v30 = vmul.f32 %v12943_v15, %v6876_v33 }
 0xa96   : > { %8633 = vpow2.f32 %v7812_v11  ;;  %v13063_v57 = vmul.f32 -1.442695, %v13055_v27  ;;  %v13066_v54 = vadd.f32 %v12972_v37, %v6914_v19  ;;  %v13069_v45 = vadd.f32 %v12972_v37, %v6912_v32 }
 0xa97   : > { %8635 = vpow2.f32 %v7813_v28  ;;  %v13072_v8 = vadd.f32 %v12972_v37, %v6917_v58  ;;  %v13075_v49 = vadd.f32 %v12972_v37, %v6915_v6  ;;  %v13078_v21 = vadd.f32 %v12972_v37, %v6918_v30 }
 0xa98   : > { %8637 = vpow2.f32 %v7814_v61  ;;  %v13081_v33 = vmul.f32 -1.442695, %v13066_v54  ;;  %v13084_v11 = vmul.f32 -1.442695, %v13069_v45  ;;  %v6874_v48 = vmul.f32 %v12917_v23, %v12638_v35 }
 0xa99   : > { %14105 = vst [vmem:[#allocation35_spill] sm:$0xff] %v13075_v49  ;;  %14106 = vst [vmem:[#allocation19_spill] sm:$0xff] %v13078_v21  ;;  %v8620_v28 = vpop.eup %8619  ;;  %8639 = vpow2.f32 %v7815_v34  ;;  %v13089_v39 = vmul.f32 -1.442695, %v13072_v8  ;;  %v13092_v16 = vmul.f32 -1.442695, %v13075_v49  ;;  %v6879_v6 = vmul.f32 %v12917_v23, %v12683_v3 }
 0xa9a   : > { %v13095_v19 = vmul.f32 -1.442695, %v13078_v21  ;;  %v8622_v61 = vpop.eup %8621  ;;  %8641 = vpow2.f32 %v7816_v44  ;;  %v7085_v32 = vadd.f32 1.0, %v8620_v28  ;;  %v6916_v58 = vmul.f32 %v12943_v15, %v6874_v48 }
 0xa9b   : > { %v8624_v35 = vpop.eup %8623  ;;  %8643 = vpow2.f32 %v7819_v7  ;;  %v7086_v34 = vadd.f32 1.0, %v8622_v61  ;;  %v6877_v30 = vmul.f32 %v12917_v23, %v12665_v63  ;;  %v6880_v60 = vmul.f32 %v12917_v23, %v12692_v29 }
 0xa9c   : > { %v8626_v49 = vpop.eup %8625  ;;  %v7087_v21 = vadd.f32 1.0, %v8624_v35  ;;  %8645 = vrcp.f32 %v7085_v32  ;;  %v13105_v44 = vadd.f32 %v12972_v37, %v6916_v58  ;;  %v6921_v48 = vmul.f32 %v12943_v15, %v6879_v6 }
 0xa9d   : > { %v8628_v28 = vpop.eup %8627  ;;  %v7088_v4 = vadd.f32 1.0, %v8626_v49  ;;  %8647 = vrcp.f32 %v7086_v34  ;;  %v6919_v3 = vmul.f32 %v12943_v15, %v6877_v30  ;;  %v6922_v7 = vmul.f32 %v12943_v15, %v6880_v60 }
 0xa9e   : > { %14107 = vst [vmem:[#allocation36_spill] sm:$0xff] %v13105_v44  ;;  %v8630_v61 = vpop.eup %8629  ;;  %v7089_v63 = vadd.f32 1.0, %v8628_v28  ;;  %8649 = vrcp.f32 %v7087_v21  ;;  %v13111_v29 = vmul.f32 -1.442695, %v13105_v44  ;;  %v13114_v32 = vadd.f32 %v12972_v37, %v6921_v48 }
 0xa9f   : > { %v8632_v58 = vpop.eup %8631  ;;  %v7090_v35 = vadd.f32 1.0, %v8630_v61  ;;  %8651 = vrcp.f32 %v7088_v4  ;;  %v13117_v6 = vadd.f32 %v12972_v37, %v6919_v3  ;;  %v13120_v49 = vadd.f32 %v12972_v37, %v6922_v7 }
 0xaa0   : > { %14108 = vst [vmem:[#allocation71_spill] sm:$0xff] %v13114_v32  ;;  %v8634_v34 = vpop.eup %8633  ;;  %v7091_v60 = vadd.f32 1.0, %v8632_v58  ;;  %8653 = vrcp.f32 %v7089_v63  ;;  %v13123_v21 = vmul.f32 -1.442695, %v13114_v32  ;;  %v6878_v30 = vmul.f32 %v12917_v23, %v12672_v25 }
 0xaa1   : > { %14109 = vst [vmem:[#allocation72_spill] sm:$0xff] %v13117_v6  ;;  %14110 = vst [vmem:[#allocation73_spill] sm:$0xff] %v13120_v49  ;;  %v8636_v48 = vpop.eup %8635  ;;  %v7092_v28 = vadd.f32 1.0, %v8634_v34  ;;  %8655 = vrcp.f32 %v7090_v35  ;;  %v13128_v4 = vmul.f32 -1.442695, %v13117_v6  ;;  %v6883_v58 = vmul.f32 %v12917_v23, %v12717_v59 }
 0xaa2   : > { %v13131_v3 = vmul.f32 -1.442695, %v13120_v49  ;;  %v8638_v7 = vpop.eup %8637  ;;  %v7093_v61 = vadd.f32 1.0, %v8636_v48  ;;  %8657 = vrcp.f32 %v7091_v60  ;;  %v6920_v63 = vmul.f32 %v12943_v15, %v6878_v30 }
 0xaa3   : > { %v8640_v32 = vpop.eup %8639  ;;  %v7094_v25 = vadd.f32 1.0, %v8638_v7  ;;  %8659 = vrcp.f32 %v7092_v28  ;;  %v6881_v35 = vmul.f32 %v12917_v23, %v12699_v26  ;;  %v6884_v34 = vmul.f32 %v12917_v23, %v12726_v18 }
 0xaa4   : > { %v8642_v49 = vpop.eup %8641  ;;  %v7095_v6 = vadd.f32 1.0, %v8640_v32  ;;  %8661 = vrcp.f32 %v7093_v61  ;;  %v13141_v60 = vadd.f32 %v12972_v37, %v6920_v63  ;;  %v6925_v30 = vmul.f32 %v12943_v15, %v6883_v58 }
 0xaa5   : > { %v8644_v48 = vpop.eup %8643  ;;  %v7096_v59 = vadd.f32 1.0, %v8642_v49  ;;  %8663 = vrcp.f32 %v7094_v25  ;;  %v6923_v7 = vmul.f32 %v12943_v15, %v6881_v35  ;;  %v6926_v28 = vmul.f32 %v12943_v15, %v6884_v34 }
 0xaa6   : > { %v8646_v44 = vpop.eup %8645  ;;  %v7099_v26 = vadd.f32 1.0, %v8644_v48  ;;  %8665 = vrcp.f32 %v7095_v6  ;;  %v13148_v18 = vmul.f32 -1.442695, %v13141_v60  ;;  %v13151_v32 = vadd.f32 %v12972_v37, %v6925_v30 }
 0xaa7   : > { %v8648_v61 = vpop.eup %8647  ;;  %8667 = vrcp.f32 %v7096_v59  ;;  %v7193_v63 = vmul.f32 %v8646_v44, %v12990_v40  ;;  %v13155_v49 = vadd.f32 %v12972_v37, %v6923_v7  ;;  %v13158_v58 = vadd.f32 %v12972_v37, %v6926_v28  ;;  %v14111_v28 = vld [vmem:[#allocation44_spill] sm:$0xff] }
 0xaa8   : > { %v8650_v25 = vpop.eup %8649  ;;  %8669 = vrcp.f32 %v7099_v26  ;;  %v7194_v6 = vmul.f32 %v8648_v61, %v12993_v46  ;;  %v13162_v35 = vmul.f32 -1.442695, %v13151_v32  ;;  %v13166_v34 = vmul.f32 %v12917_v23, %v12706_v10 }
 0xaa9   : > { %v8652_v30 = vpop.eup %8651  ;;  %v7195_v40 = vmul.f32 %v8650_v25, %v12996_v13  ;;  %v7525_v44 = vadd.f32 %v12863_v42, %v7193_v63  ;;  %8671 = vpow2.f32 %v13063_v57  ;;  %v13172_v48 = vmul.f32 -1.442695, %v13155_v49 }
 0xaaa   : > { %v8654_v59 = vpop.eup %8653  ;;  %v7196_v46 = vmul.f32 %v8652_v30, %v12999_v31  ;;  %v7526_v10 = vadd.f32 %v12869_v17, %v7194_v6  ;;  %8673 = vpow2.f32 %v13081_v33  ;;  %v13183_v42 = vmul.f32 -1.442695, %v13158_v58  ;;  %v14112_v33 = vld [vmem:[#allocation47_spill] sm:$0xff]  ;;  %v14113_v6 = vld [vmem:[#allocation48_spill] sm:$0xff] }
 0xaab   : > { %v8656_v13 = vpop.eup %8655  ;;  %v7197_v57 = vmul.f32 %v8654_v59, %v13002_v14  ;;  %v7527_v7 = vadd.f32 %v12860_v51, %v7195_v40  ;;  %v7561_v26 = vmul.f32 %v7525_v44, %v14111_v28  ;;  %8675 = vpow2.f32 %v13084_v11  ;;  %v14114_v40 = vld [vmem:[#allocation51_spill] sm:$0xff]  ;;  %v14115_v59 = vld [vmem:[#allocation52_spill] sm:$0xff]  ;;  %v14118_v28 = vld [vmem:[#allocation42_spill] sm:$0xff] }
 0xaac   : > { %v8658_v61 = vpop.eup %8657  ;;  %v7198_v31 = vmul.f32 %v8656_v13, %v13005_v20  ;;  %v7528_v17 = vadd.f32 %v12866_v36, %v7196_v46  ;;  %v7562_v63 = vmul.f32 %v7526_v10, %v14112_v33  ;;  %8677 = vpow2.f32 %v13089_v39  ;;  %v14116_v10 = vld [vmem:[#allocation55_spill] sm:$0xff]  ;;  %v14121_v33 = vld [vmem:[#allocation56_spill] sm:$0xff] }
 0xaad   : > { %v8660_v25 = vpop.eup %8659  ;;  %v7199_v14 = vmul.f32 %v8658_v61, %v13008_v43  ;;  %v7529_v51 = vadd.f32 %v12875_v56, %v7197_v57  ;;  %v7563_v30 = vmul.f32 %v7527_v7, %v14113_v6  ;;  %7597 = vst.msk [vmem:[%s13177_s27] sm:$0xff] %vm1532_vm3, %v7561_v26  ;;  %8679 = vpow2.f32 %v13092_v16  ;;  %v14117_v57 = vld [vmem:[#allocation39_spill] sm:$0xff]  ;;  %v14119_v61 = vld [vmem:[#allocation45_spill] sm:$0xff] }
 0xaae   : > { %v8662_v11 = vpop.eup %8661  ;;  %v7200_v36 = vmul.f32 %v8660_v25, %v13011_v50  ;;  %v7530_v20 = vadd.f32 %v12881_v53, %v7198_v31  ;;  %v7564_v39 = vmul.f32 %v7528_v17, %v14114_v40  ;;  %7598 = vst.msk [vmem:[%s13177_s27 + $0x8] sm:$0xff] %vm1532_vm3, %v7562_v63  ;;  %8681 = vpow2.f32 %v13095_v19  ;;  %v14120_v31 = vld [vmem:[#allocation53_spill] sm:$0xff]  ;;  %v14122_v25 = vld [vmem:[#allocation58_spill] sm:$0xff] }
 0xaaf   : > { %v8664_v43 = vpop.eup %8663  ;;  %v7201_v56 = vmul.f32 %v8662_v11, %v13014_v2  ;;  %v7531_v44 = vadd.f32 %v12872_v12, %v7199_v14  ;;  %v7565_v16 = vmul.f32 %v7529_v51, %v14115_v59  ;;  %7599 = vst.msk [vmem:[%s13177_s27 + $0x10] sm:$0xff] %vm1532_vm3, %v7563_v30  ;;  %8683 = vpow2.f32 %v13111_v29  ;;  %v14123_v6 = vld [vmem:[#allocation57_spill] sm:$0xff] }
 0xab0   : > { %v8666_v50 = vpop.eup %8665  ;;  %v7202_v53 = vmul.f32 %v8664_v43, %v13017_v1  ;;  %v7532_v46 = vadd.f32 %v12878_v5, %v7200_v36  ;;  %v7566_v19 = vmul.f32 %v7530_v20, %v14116_v10  ;;  %7600 = vst.msk [vmem:[%s13177_s27 + $0x18] sm:$0xff] %vm1532_vm3, %v7564_v39  ;;  %8685 = vpow2.f32 %v13123_v21  ;;  %v14124_v36 = vld [vmem:[#allocation37_spill] sm:$0xff]  ;;  %v14125_v43 = vld [vmem:[#allocation38_spill] sm:$0xff] }
 0xab1   : > { %v8668_v2 = vpop.eup %8667  ;;  %v7203_v12 = vmul.f32 %v8666_v50, %v13020_v62  ;;  %v7533_v13 = vadd.f32 %v12887_v41, %v7201_v56  ;;  %v7567_v29 = vmul.f32 %v7531_v44, %v14117_v57  ;;  %7601 = vst.msk [vmem:[%s13177_s27 + $0x20] sm:$0xff] %vm1532_vm3, %v7565_v16  ;;  %8687 = vpow2.f32 %v13128_v4  ;;  %v14126_v16 = vld [vmem:[#allocation40_spill] sm:$0xff] }
 0xab2   : > { %v8670_v5 = vpop.eup %8669  ;;  %v7204_v1 = vmul.f32 %v8668_v2, %v13023_v22  ;;  %v7534_v7 = vadd.f32 %v12893_v0, %v7202_v53  ;;  %v7568_v21 = vmul.f32 %v7532_v46, %v14118_v28  ;;  %7602 = vst.msk [vmem:[%s13177_s27 + $0x28] sm:$0xff] %vm1532_vm3, %v7566_v19  ;;  %8689 = vpow2.f32 %v13131_v3 }
 0xab3   : > { %v8672_v41 = vpop.eup %8671  ;;  %v7207_v62 = vmul.f32 %v8670_v5, %v13026_v52  ;;  %v7535_v26 = vadd.f32 %v12884_v55, %v7203_v12  ;;  %v7569_v4 = vmul.f32 %v7533_v13, %v14119_v61  ;;  %7603 = vst.msk [vmem:[%s13177_s27 + $0x30] sm:$0xff] %vm1532_vm3, %v7567_v29  ;;  %8691 = vpow2.f32 %v13148_v18 }
 0xab4   : > { %v8674_v0 = vpop.eup %8673  ;;  %v7536_v22 = vadd.f32 %v12890_v47, %v7204_v1  ;;  %v7570_v17 = vmul.f32 %v7534_v7, %v14120_v31  ;;  %7604 = vst.msk [vmem:[%s13177_s27 + $0x38] sm:$0xff] %vm1532_vm3, %v7568_v21  ;;  %v7097_v3 = vadd.f32 1.0, %v8672_v41  ;;  %8693 = vpow2.f32 %v13162_v35  ;;  %v14127_v7 = vld [vmem:[#allocation20_spill] sm:$0xff] }
 0xab5   : > { %v8676_v52 = vpop.eup %8675  ;;  %v7539_v55 = vadd.f32 %v12896_v38, %v7207_v62  ;;  %v7571_v63 = vmul.f32 %v7535_v26, %v14121_v33  ;;  %7605 = vst.msk [vmem:[%s13177_s27 + $0x40] sm:$0xff] %vm1532_vm3, %v7569_v4  ;;  %v7100_v18 = vadd.f32 1.0, %v8674_v0  ;;  %8695 = vpow2.f32 %v13172_v48 }
 0xab6   : > { %v8678_v47 = vpop.eup %8677  ;;  %v7572_v14 = vmul.f32 %v7536_v22, %v14122_v25  ;;  %7606 = vst.msk [vmem:[%s13177_s27 + $0x48] sm:$0xff] %vm1532_vm3, %v7570_v17  ;;  %8697 = vrcp.f32 %v7097_v3  ;;  %v7098_v51 = vadd.f32 1.0, %v8676_v52  ;;  %v6924_v35 = vmul.f32 %v12943_v15, %v13166_v34  ;;  %v14128_v52 = vld [vmem:[#allocation10_spill] sm:$0xff] }
 0xab7   : > { %v8680_v38 = vpop.eup %8679  ;;  %v7575_v30 = vmul.f32 %v7539_v55, %v14123_v6  ;;  %7607 = vst.msk [vmem:[%s13177_s27 + $0x50] sm:$0xff] %vm1532_vm3, %v7571_v63  ;;  %8699 = vrcp.f32 %v7100_v18  ;;  %v7103_v11 = vadd.f32 1.0, %v8678_v47  ;;  %v6887_v48 = vmul.f32 %v12917_v23, %v14124_v36  ;;  %v14129_v47 = vld [vmem:[#allocation13_spill] sm:$0xff] }
 0xab8   : > { %v8682_v20 = vpop.eup %8681  ;;  %7608 = vst.msk [vmem:[%s13177_s27 + $0x58] sm:$0xff] %vm1532_vm3, %v7572_v14  ;;  %8701 = vrcp.f32 %v7098_v51  ;;  %v7101_v40 = vadd.f32 1.0, %v8680_v38  ;;  %v13258_v39 = vadd.f32 %v12972_v37, %v6924_v35  ;;  %v6885_v34 = vmul.f32 %v12917_v23, %v14125_v43  ;;  %v14130_v38 = vld [vmem:[#allocation41_spill] sm:$0xff] }
 0xab9   : > { %v8684_v56 = vpop.eup %8683  ;;  %7611 = vst.msk [vmem:[%s13177_s27 + $0x70] sm:$0xff] %vm1532_vm3, %v7575_v30  ;;  %8703 = vrcp.f32 %v7103_v11  ;;  %v7104_v44 = vadd.f32 1.0, %v8682_v20  ;;  %v6929_v59 = vmul.f32 %v12943_v15, %v6887_v48  ;;  %v6888_v50 = vmul.f32 %v12917_v23, %v14126_v16  ;;  %v14131_v16 = vld [vmem:[#allocation50_spill] sm:$0xff] }
 0xaba   : > { %v8686_v53 = vpop.eup %8685  ;;  %8705 = vrcp.f32 %v7101_v40  ;;  %v7102_v46 = vadd.f32 1.0, %v8684_v56  ;;  %v7830_v10 = vmul.f32 -1.442695, %v13258_v39  ;;  %v6927_v19 = vmul.f32 %v12943_v15, %v6885_v34 }
 0xabb   : > { %v8688_v2 = vpop.eup %8687  ;;  %8707 = vrcp.f32 %v7104_v44  ;;  %v7107_v12 = vadd.f32 1.0, %v8686_v53  ;;  %v13270_v13 = vadd.f32 %v12972_v37, %v6929_v59  ;;  %v6930_v57 = vmul.f32 %v12943_v15, %v6888_v50  ;;  %v14132_v50 = vld [vmem:[#allocation25_spill] sm:$0xff] }
 0xabc   : > { %v8690_v29 = vpop.eup %8689  ;;  %8709 = vrcp.f32 %v7102_v46  ;;  %v7105_v5 = vadd.f32 1.0, %v8688_v2  ;;  %v13274_v1 = vadd.f32 %v12972_v37, %v6927_v19  ;;  %v6886_v28 = vmul.f32 %v12917_v23, %v14127_v7  ;;  %v14134_v19 = vld [vmem:[#allocation54_spill] sm:$0xff] }
 0xabd   : > { %v8692_v21 = vpop.eup %8691  ;;  %8711 = vrcp.f32 %v7107_v12  ;;  %v7108_v41 = vadd.f32 1.0, %v8690_v29  ;;  %v7835_v62 = vmul.f32 -1.442695, %v13270_v13  ;;  %v13280_v26 = vadd.f32 %v12972_v37, %v6930_v57  ;;  %v14135_v12 = vld [vmem:[#allocation30_spill] sm:$0xff]  ;;  %v14136_v57 = vld [vmem:[#allocation19_spill] sm:$0xff] }
 0xabe   : > { %v8694_v61 = vpop.eup %8693  ;;  %8713 = vrcp.f32 %v7105_v5  ;;  %v7106_v4 = vadd.f32 1.0, %v8692_v21  ;;  %v7833_v0 = vmul.f32 -1.442695, %v13274_v1  ;;  %v6928_v22 = vmul.f32 %v12943_v15, %v6886_v28  ;;  %v14137_v29 = vld [vmem:[#allocation59_spill] sm:$0xff]  ;;  %v14138_v7 = vld [vmem:[#allocation26_spill] sm:$0xff]  ;;  %v14139_v21 = vld [vmem:[#allocation36_spill] sm:$0xff] }
 0xabf   : > { %v8696_v31 = vpop.eup %8695  ;;  %8715 = vrcp.f32 %v7108_v41  ;;  %v7111_v17 = vadd.f32 1.0, %v8694_v61  ;;  %v7836_v3 = vmul.f32 -1.442695, %v13280_v26  ;;  %v6891_v55 = vmul.f32 %v12917_v23, %v14128_v52  ;;  %v14140_v61 = vld [vmem:[#allocation3_spill] sm:$0xff] }
 0xac0   : > { %v8698_v33 = vpop.eup %8697  ;;  %8717 = vrcp.f32 %v7106_v4  ;;  %v7109_v63 = vadd.f32 1.0, %v8696_v31  ;;  %v13288_v18 = vadd.f32 %v12972_v37, %v6928_v22  ;;  %v6889_v25 = vmul.f32 %v12917_v23, %v14129_v47  ;;  %v14141_v22 = vld [vmem:[#allocation62_spill] sm:$0xff] }
 0xac1   : > { %v8700_v14 = vpop.eup %8699  ;;  %v7205_v51 = vmul.f32 %v8698_v33, %v13055_v27  ;;  %8719 = vrcp.f32 %v7111_v17  ;;  %v6933_v35 = vmul.f32 %v12943_v15, %v6891_v55  ;;  %v13296_v6 = vmul.f32 %v12917_v23, %v14130_v38  ;;  %v14142_v17 = vld [vmem:[#allocation71_spill] sm:$0xff]  ;;  %v14143_v55 = vld [vmem:[#allocation6_spill] sm:$0xff] }
 0xac2   : > { %v8702_v30 = vpop.eup %8701  ;;  %v7208_v11 = vmul.f32 %v8700_v14, %v13066_v54  ;;  %8721 = vrcp.f32 %v7109_v63  ;;  %v7834_v36 = vmul.f32 -1.442695, %v13288_v18  ;;  %v6931_v48 = vmul.f32 %v12943_v15, %v6889_v25  ;;  %v14144_v63 = vld [vmem:[#allocation65_spill] sm:$0xff]  ;;  %v14145_v25 = vld [vmem:[#allocation72_spill] sm:$0xff] }
 0xac3   : > { %v8704_v20 = vpop.eup %8703  ;;  %v7537_v40 = vadd.f32 %v12899_v24, %v7205_v51  ;;  %v7206_v27 = vmul.f32 %v8702_v30, %v13069_v45  ;;  %8723 = vpow2.f32 %v13183_v42  ;;  %v13305_v43 = vadd.f32 %v12972_v37, %v6933_v35  ;;  %v14133_v42 = vld [vmem:[#allocation35_spill] sm:$0xff]  ;;  %v14146_v35 = vld [vmem:[#allocation9_spill] sm:$0xff] }
 0xac4   : > { %v8706_v34 = vpop.eup %8705  ;;  %v7540_v56 = vadd.f32 %v12902_v9, %v7208_v11  ;;  %v7211_v54 = vmul.f32 %v8704_v20, %v13072_v8  ;;  %8725 = vpow2.f32 %v7830_v10  ;;  %v13310_v44 = vadd.f32 %v12972_v37, %v6931_v48  ;;  %v14147_v30 = vld [vmem:[#allocation31_spill] sm:$0xff] }
 0xac5   : > { %v8708_v59 = vpop.eup %8707  ;;  %v7573_v24 = vmul.f32 %v7537_v40, %v14131_v16  ;;  %v7538_v45 = vadd.f32 %v14132_v50, %v7206_v27  ;;  %v7209_v53 = vmul.f32 %v8706_v34, %v14133_v42  ;;  %8727 = vpow2.f32 %v7835_v62  ;;  %v14149_v27 = vld [vmem:[#allocation63_spill] sm:$0xff] }
 0xac6   : > { %v8710_v46 = vpop.eup %8709  ;;  %v7576_v2 = vmul.f32 %v7540_v56, %v14134_v19  ;;  %v7543_v9 = vadd.f32 %v14135_v12, %v7211_v54  ;;  %v7212_v8 = vmul.f32 %v8708_v59, %v14136_v57  ;;  %8729 = vpow2.f32 %v7833_v0  ;;  %v14150_v56 = vld [vmem:[#allocation33_spill] sm:$0xff]  ;;  %v14153_v19 = vld [vmem:[#allocation12_spill] sm:$0xff] }
 0xac7   : > { %v8712_v10 = vpop.eup %8711  ;;  %7609 = vst.msk [vmem:[%s13177_s27 + $0x60] sm:$0xff] %vm1532_vm3, %v7573_v24  ;;  %v7574_v5 = vmul.f32 %v7538_v45, %v14137_v29  ;;  %v7541_v28 = vadd.f32 %v14138_v7, %v7209_v53  ;;  %v7210_v41 = vmul.f32 %v8710_v46, %v14139_v21  ;;  %8731 = vpow2.f32 %v7836_v3  ;;  %v14151_v24 = vld [vmem:[#allocation49_spill] sm:$0xff]  ;;  %v14152_v45 = vld [vmem:[#allocation67_spill] sm:$0xff]  ;;  %v14154_v12 = vld [vmem:[#allocation68_spill] sm:$0xff] }
 0xac8   : > { %v8714_v62 = vpop.eup %8713  ;;  %7612 = vst.msk [vmem:[%s13177_s27 + $0x78] sm:$0xff] %vm1532_vm3, %v7576_v2  ;;  %v7579_v4 = vmul.f32 %v7543_v9, %v14140_v61  ;;  %v7544_v31 = vadd.f32 %v14141_v22, %v7212_v8  ;;  %v7215_v0 = vmul.f32 %v8712_v10, %v14142_v17  ;;  %8733 = vpow2.f32 %v7834_v36  ;;  %v14148_v36 = vld [vmem:[#allocation73_spill] sm:$0xff]  ;;  %v14159_v61 = vld [vmem:[#allocation70_spill] sm:$0xff] }
 0xac9   : > { %v8716_v52 = vpop.eup %8715  ;;  %7610 = vst.msk [vmem:[%s13177_s27 + $0x68] sm:$0xff] %vm1532_vm3, %v7574_v5  ;;  %v7577_v33 = vmul.f32 %v7541_v28, %v14143_v55  ;;  %v7542_v47 = vadd.f32 %v14144_v63, %v7210_v41  ;;  %v7213_v3 = vmul.f32 %v8714_v62, %v14145_v25  ;;  %v7839_v14 = vmul.f32 -1.442695, %v13305_v43  ;;  %v14155_v10 = vld [vmem:[#allocation5_spill] sm:$0xff]  ;;  %v14157_v28 = vld [vmem:[#allocation14_spill] sm:$0xff] }
 0xaca   : > { %v8718_v51 = vpop.eup %8717  ;;  %7615 = vst.msk [vmem:[%s13177_s27 + $0x90] sm:$0xff] %vm1532_vm3, %v7579_v4  ;;  %v7580_v38 = vmul.f32 %v7544_v31, %v14146_v35  ;;  %v7547_v11 = vadd.f32 %v14147_v30, %v7215_v0  ;;  %v7216_v48 = vmul.f32 %v8716_v52, %v14148_v36  ;;  %v7837_v20 = vmul.f32 -1.442695, %v13310_v44  ;;  %v14158_v62 = vld [vmem:[#allocation2_spill] sm:$0xff] }
 0xacb   : > { %v8720_v40 = vpop.eup %8719  ;;  %7613 = vst.msk [vmem:[%s13177_s27 + $0x80] sm:$0xff] %vm1532_vm3, %v7577_v33  ;;  %v7578_v34 = vmul.f32 %v7542_v47, %v14149_v27  ;;  %v7545_v54 = vadd.f32 %v14150_v56, %v7213_v3  ;;  %v7214_v59 = vmul.f32 %v8718_v51, %v13141_v60  ;;  %8735 = vpow2.f32 %v7839_v14  ;;  %v14160_v17 = vld [vmem:[#allocation22_spill] sm:$0xff]  ;;  %v14163_v27 = vld [vmem:[#allocation43_spill] sm:$0xff] }
 0xacc   : > { %v8722_v16 = vpop.eup %8721  ;;  %7616 = vst.msk [vmem:[%s13177_s27 + $0x98] sm:$0xff] %vm1532_vm3, %v7580_v38  ;;  %v7583_v50 = vmul.f32 %v7547_v11, %v14151_v24  ;;  %v7548_v42 = vadd.f32 %v14152_v45, %v7216_v48  ;;  %v7219_v53 = vmul.f32 %v8720_v40, %v13151_v32  ;;  %8737 = vpow2.f32 %v7837_v20  ;;  %v14156_v32 = vld [vmem:[#allocation69_spill] sm:$0xff]  ;;  %v14161_v33 = vld [vmem:[#allocation66_spill] sm:$0xff]  ;;  %v14162_v40 = vld [vmem:[#allocation27_spill] sm:$0xff] }
 0xacd   : > { %v8724_v46 = vpop.eup %8723  ;;  %7614 = vst.msk [vmem:[%s13177_s27 + $0x88] sm:$0xff] %vm1532_vm3, %v7578_v34  ;;  %v7581_v2 = vmul.f32 %v7545_v54, %v14153_v19  ;;  %v7546_v9 = vadd.f32 %v14154_v12, %v7214_v59  ;;  %v7217_v60 = vmul.f32 %v8722_v16, %v13155_v49  ;;  %v6934_v57 = vmul.f32 %v12943_v15, %v13296_v6  ;;  %v14164_v59 = vld [vmem:[#allocation7_spill] sm:$0xff] }
 0xace   : > { %v8726_v8 = vpop.eup %8725  ;;  %7619 = vst.msk [vmem:[%s13177_s27 + $0xb0] sm:$0xff] %vm1532_vm3, %v7583_v50  ;;  %v7584_v29 = vmul.f32 %v7548_v42, %v14155_v10  ;;  %v7551_v5 = vadd.f32 %v14156_v32, %v7219_v53  ;;  %v7112_v7 = vadd.f32 1.0, %v8724_v46  ;;  %v6890_v21 = vmul.f32 %v12917_v23, %v14157_v28  ;;  %v14165_v42 = vld [vmem:[#allocation8_spill] sm:$0xff]  ;;  %v14169_v32 = vld [vmem:[#allocation46_spill] sm:$0xff]  ;;  %v14170_v28 = vld [vmem:[#allocation23_spill] sm:$0xff] }
 0xacf   : > { %v8728_v41 = vpop.eup %8727  ;;  %7617 = vst.msk [vmem:[%s13177_s27 + $0xa0] sm:$0xff] %vm1532_vm3, %v7581_v2  ;;  %v7582_v49 = vmul.f32 %v7546_v9, %v14158_v62  ;;  %v7549_v6 = vadd.f32 %v14159_v61, %v7217_v60  ;;  %v7110_v4 = vadd.f32 1.0, %v8726_v8  ;;  %v13368_v22 = vadd.f32 %v12972_v37, %v6934_v57  ;;  %v14166_v2 = vld [vmem:[#allocation16_spill] sm:$0xff]  ;;  %v14171_v62 = vld [vmem:[#allocation29_spill] sm:$0xff] }
 0xad0   : > { %v8730_v31 = vpop.eup %8729  ;;  %7620 = vst.msk [vmem:[%s13177_s27 + $0xb8] sm:$0xff] %vm1532_vm3, %v7584_v29  ;;  %v7587_v0 = vmul.f32 %v7551_v5, %v14160_v17  ;;  %8739 = vrcp.f32 %v7112_v7  ;;  %v7115_v23 = vadd.f32 1.0, %v8728_v41  ;;  %v6932_v52 = vmul.f32 %v12943_v15, %v6890_v21 }
 0xad1   : > { %v8732_v55 = vpop.eup %8731  ;;  %7618 = vst.msk [vmem:[%s13177_s27 + $0xa8] sm:$0xff] %vm1532_vm3, %v7582_v49  ;;  %v7585_v63 = vmul.f32 %v7549_v6, %v14161_v33  ;;  %8741 = vrcp.f32 %v7110_v4  ;;  %v7113_v47 = vadd.f32 1.0, %v8730_v31  ;;  %v7840_v14 = vmul.f32 -1.442695, %v13368_v22  ;;  %v14172_v4 = vld [vmem:[#allocation24_spill] sm:$0xff] }
 0xad2   : > { %v8734_v25 = vpop.eup %8733  ;;  %7623 = vst.msk [vmem:[%s13177_s27 + $0xd0] sm:$0xff] %vm1532_vm3, %v7587_v0  ;;  %8743 = vrcp.f32 %v7115_v23  ;;  %v7116_v3 = vadd.f32 1.0, %v8732_v55  ;;  %v13381_v51 = vadd.f32 %v12972_v37, %v6932_v52  ;;  %v7490_v34 = vadd.f32 %v14163_v27, %v14162_v40  ;;  %v14173_v23 = vld [vmem:[#allocation11_spill] sm:$0xff]  ;;  %v14174_v33 = vld [vmem:[#allocation60_spill] sm:$0xff] }
 0xad3   : > { %7621 = vst.msk [vmem:[%s13177_s27 + $0xc0] sm:$0xff] %vm1532_vm3, %v7585_v63  ;;  %8745 = vrcp.f32 %v7113_v47  ;;  %v7114_v15 = vadd.f32 1.0, %v8734_v25  ;;  %v7482_v16 = vadd.f32 %v14162_v40, %v14164_v59  ;;  %v7503_v53 = vadd.f32 %v14165_v42, %v14162_v40  ;;  %v14175_v47 = vld [vmem:[#allocation15_spill] sm:$0xff] }
 0xad4   : > { %8747 = vrcp.f32 %v7116_v3  ;;  %v7838_v35 = vmul.f32 -1.442695, %v13381_v51  ;;  %v7495_v12 = vadd.f32 %v14162_v40, %v14166_v2  ;;  %v7498_v21 = vadd.f32 %v14162_v40, %v14170_v28 }
 0xad5   : > { %v8736_v38 = vpop.eup %8735  ;;  %8749 = vrcp.f32 %v7114_v15  ;;  %v7519_v63 = vadd.f32 %v14174_v33, %v14162_v40 }
 0xad6   : > { %v8738_v30 = vpop.eup %8737  ;;  %v7119_v11 = vadd.f32 1.0, %v8736_v38  ;;  %8751 = vpow2.f32 %v7840_v14  ;;  %v14176_v14 = vld [vmem:[#allocation4_spill] sm:$0xff]  ;;  %v14177_v38 = vld [vmem:[#allocation34_spill] sm:$0xff] }
 0xad7   : > { %v7117_v36 = vadd.f32 1.0, %v8738_v30  ;;  %8753 = vpow2.f32 %v7838_v35  ;;  %v7511_v15 = vadd.f32 %v14162_v40, %v14176_v14 }
 0xad8   : > { %8755 = vrcp.f32 %v7119_v11  ;;  %v14178_v11 = vld [vmem:[#allocation17_spill] sm:$0xff] }
 0xad9   : > { %8757 = vrcp.f32 %v7117_v36 }
 0xada   : > { %v8740_v48 = vpop.eup %8739 }
 0xadb   : > { %v8742_v20 = vpop.eup %8741  ;;  %v7220_v37 = vmul.f32 %v8740_v48, %v13158_v58 }
 0xadc   : > { %v8744_v56 = vpop.eup %8743  ;;  %v7218_v54 = vmul.f32 %v8742_v20, %v13258_v39  ;;  %v14167_v39 = vld [vmem:[#allocation28_spill] sm:$0xff] }
 0xadd   : > { %v8746_v24 = vpop.eup %8745  ;;  %v7552_v50 = vadd.f32 %v7490_v34, %v7220_v37  ;;  %v7223_v45 = vmul.f32 %v8744_v56, %v13270_v13  ;;  %v14168_v13 = vld [vmem:[#allocation18_spill] sm:$0xff]  ;;  %v14179_v37 = vld [vmem:[#allocation21_spill] sm:$0xff]  ;;  %v14180_v56 = vld [vmem:[#allocation64_spill] sm:$0xff] }
 0xade   : > { %v8748_v46 = vpop.eup %8747  ;;  %v7550_v19 = vadd.f32 %v7482_v16, %v7218_v54  ;;  %v7221_v58 = vmul.f32 %v8746_v24, %v13274_v1  ;;  %v7506_v10 = vadd.f32 %v14168_v13, %v14162_v40  ;;  %v7522_v27 = vadd.f32 %v14179_v37, %v14162_v40  ;;  %v14181_v24 = vld [vmem:[#allocation32_spill] sm:$0xff] }
 0xadf   : > { %v8750_v9 = vpop.eup %8749  ;;  %v7588_v60 = vmul.f32 %v7552_v50, %v14167_v39  ;;  %v7555_v57 = vadd.f32 %v7503_v53, %v7223_v45  ;;  %v7224_v8 = vmul.f32 %v8748_v46, %v13280_v26  ;;  %v7514_v54 = vadd.f32 %v14162_v40, %v14180_v56  ;;  %v14182_v45 = vld [vmem:[#allocation61_spill] sm:$0xff] }
 0xae0   : > { %v8752_v29 = vpop.eup %8751  ;;  %v7586_v5 = vmul.f32 %v7550_v19, %v14169_v32  ;;  %v7553_v7 = vadd.f32 %v7495_v12, %v7221_v58  ;;  %v7222_v1 = vmul.f32 %v8750_v9, %v13288_v18 }
 0xae1   : > { %v8754_v41 = vpop.eup %8753  ;;  %7624 = vst.msk [vmem:[%s13177_s27 + $0xd8] sm:$0xff] %vm1532_vm3, %v7588_v60  ;;  %v7591_v49 = vmul.f32 %v7555_v57, %v14171_v62  ;;  %v7556_v26 = vadd.f32 %v7506_v10, %v7224_v8  ;;  %v7120_v61 = vadd.f32 1.0, %v8752_v29 }
 0xae2   : > { %v8756_v6 = vpop.eup %8755  ;;  %7622 = vst.msk [vmem:[%s13177_s27 + $0xc8] sm:$0xff] %vm1532_vm3, %v7586_v5  ;;  %v7589_v31 = vmul.f32 %v7553_v7, %v14172_v4  ;;  %v7554_v17 = vadd.f32 %v7498_v21, %v7222_v1  ;;  %v7118_v18 = vadd.f32 1.0, %v8754_v41 }
 0xae3   : > { %v8758_v0 = vpop.eup %8757  ;;  %7627 = vst.msk [vmem:[%s13177_s27 + $0xf0] sm:$0xff] %vm1532_vm3, %v7591_v49  ;;  %v7592_v52 = vmul.f32 %v7556_v26, %v14173_v23  ;;  %v7227_v55 = vmul.f32 %v8756_v6, %v13305_v43  ;;  %8759 = vrcp.f32 %v7120_v61 }
 0xae4   : > { %7625 = vst.msk [vmem:[%s13177_s27 + $0xe0] sm:$0xff] %vm1532_vm3, %v7589_v31  ;;  %v7590_v25 = vmul.f32 %v7554_v17, %v14175_v47  ;;  %v7225_v3 = vmul.f32 %v8758_v0, %v13310_v44  ;;  %8761 = vrcp.f32 %v7118_v18 }
 0xae5   : > { %7628 = vst.msk [vmem:[%s13177_s27 + $0xf8] sm:$0xff] %vm1532_vm3, %v7592_v52  ;;  %v7559_v35 = vadd.f32 %v7519_v63, %v7227_v55 }
 0xae6   : > { %7626 = vst.msk [vmem:[%s13177_s27 + $0xe8] sm:$0xff] %vm1532_vm3, %v7590_v25  ;;  %v7557_v43 = vadd.f32 %v7511_v15, %v7225_v3 }
 0xae7   : > { %v7595_v30 = vmul.f32 %v7559_v35, %v14177_v38 }
 0xae8   : > { %v7593_v36 = vmul.f32 %v7557_v43, %v14178_v11 }
 0xae9   : > { %7631 = vst.msk [vmem:[%s13177_s27 + $0x110] sm:$0xff] %vm1532_vm3, %v7595_v30 }
 0xaea   : > { %7629 = vst.msk [vmem:[%s13177_s27 + $0x100] sm:$0xff] %vm1532_vm3, %v7593_v36 }
 0xaed   : > { %v8760_v44 = vpop.eup %8759 }
 0xaee   : > { %v8762_v48 = vpop.eup %8761  ;;  %v7228_v20 = vmul.f32 %v8760_v44, %v13368_v22 }
 0xaef   : > { %v7226_v34 = vmul.f32 %v8762_v48, %v13381_v51 }
 0xaf0   : > { %v7560_v59 = vadd.f32 %v7522_v27, %v7228_v20 }
 0xaf1   : > { %v7558_v16 = vadd.f32 %v7514_v54, %v7226_v34 }
 0xaf2   : > { %v7596_v50 = vmul.f32 %v7560_v59, %v14181_v24 }
 0xaf3   : > { %v7594_v42 = vmul.f32 %v7558_v16, %v14182_v45 }
 0xaf4   : > { %7632 = vst.msk [vmem:[%s13177_s27 + $0x118] sm:$0xff] %vm1532_vm3, %v7596_v50 }
 0xaf5   : > { %7630 = vst.msk [vmem:[%s13177_s27 + $0x108] sm:$0xff] %vm1532_vm3, %v7594_v42 }
 0xaf6 PF: > { %s24_s29 = sadd.s32 1, %s8769_s29  }
 0xaf7   : > { %p21_p4 = scmp.ge.s32.totalorder %s24_s29, 4  }
 0xaf9   :  { %23 = sbr.rel (!%p21_p4) target bundleno = 1 (0x1), region = 109 }

</bundles_post_ra>
